<compile_context>
chip_gen: v7x
topology: tpu7x:2x2x1
jax: 0.10.0
libtpu: 0.0.40
codegen_flags: <defaults>
</compile_context>

<pallas_src>
import jax
import jax.numpy as jnp
from jax.experimental import pallas as pl
from jax.experimental.pallas import tpu as pltpu


# ----------------------------- Pallas kernel --------------------------------

def _fast_recip(x):
    # EUP approximate reciprocal + one Newton-Raphson step (~fp32 accurate);
    # keeps all divides off the VALU while staying well inside the 1e-2 check.
    r = pl.reciprocal(x, approx=True)
    return r * (2.0 - x * r)


def _attn_plain_net_kernel(x_ref, y_ref, att1_ref, att2_ref,
                           w1_ref, b1_ref, g1_ref, be1_ref,
                           w2_ref, b2_ref, g2_ref, be2_ref,
                           wf_ref, bf_ref,
                           out_ref):
    eps = 1e-5
    B, _, F = x_ref.shape
    H0 = w1_ref.shape[0]
    H1 = w2_ref.shape[0]
    ncp = wf_ref.shape[2]

    # ---- nf.normalize (p=2, dim=channel).  C == 1, so the norm is |value|. ----
    xr = x_ref[...][:, 0, :]                                        # (B, F)
    xv = xr * _fast_recip(jnp.maximum(jnp.abs(xr), 1e-12))
    yr = y_ref[...]                                                 # (B, N, F)
    y = yr * _fast_recip(jnp.maximum(jnp.abs(yr), 1e-12))

    # ---- attention softmax over neighbors ----
    # einsum('ci,nkl->n', att1(x), att2(y)) == sum(att1*x) * sum_{k,l}(att2*y[n])
    s1 = jnp.sum(xv * att1_ref[...], axis=1, keepdims=True)         # (B, 1)
    s2 = jnp.sum(y * att2_ref[...][None], axis=2)                   # (B, N)
    logits = s1 * s2
    m = jnp.max(logits, axis=1, keepdims=True)
    e = jnp.exp(logits - m)
    w = e * _fast_recip(jnp.sum(e, axis=1, keepdims=True))          # (B, N)

    # ---- feature adjacency (C == 1 => rank-1 symmetric outer product, VPU) ----
    yw = jnp.sum(y * w[:, :, None], axis=1)                         # (B, F)
    s = xv[:, :, None] * yw[:, None, :] + yw[:, :, None] * xv[:, None, :]   # (B,F,F)
    # sgnroot: sign(s)*sqrt(|s|) == s * rsqrt(|s| + tiny); tiny guards 0*inf.
    sg = s * jax.lax.rsqrt(jnp.abs(s) + 1e-30)
    denom = jnp.sum(jnp.abs(sg), axis=1, keepdims=True) + 1e-7      # (B, 1, F)
    adj = sg * _fast_recip(denom)
    adj = jnp.where(jnp.isnan(adj), 0.0, adj)                       # torch NaN scrub

    def bn_softsign(z, g_ref, be_ref):
        # Training-mode BatchNorm1d over (batch, length) per channel + Softsign.
        # Mean-of-means is exact because every (b, f) slice has equal length.
        mean = jnp.mean(jnp.mean(z, axis=2, keepdims=True), axis=0, keepdims=True)
        var = jnp.mean(jnp.mean((z - mean) ** 2, axis=2, keepdims=True),
                       axis=0, keepdims=True)
        zn = (z - mean) * jax.lax.rsqrt(var + eps) * g_ref[...][None] + be_ref[...][None]
        return zn * _fast_recip(1.0 + jnp.abs(zn))

    # ---- FeatBrd1d #1 (in_channels == 1): x @ fadj then 1x1 conv, all VPU ----
    t1 = jnp.sum(xv[:, :, None] * adj, axis=1)                      # (B, F)
    z1 = w1_ref[...][None] * t1[:, None, :] + b1_ref[...][None]     # (B, H0, F)
    a1 = bn_softsign(z1, g1_ref, be1_ref)

    # ---- FeatBrd1d #2: broadcast-multiply + sublane reductions (F, H0 << MXU) ----
    t2 = jnp.sum(a1[:, :, :, None] * adj[:, None, :, :], axis=2)    # (B, H0, F)
    z2 = (jnp.sum(w2_ref[...][None, :, :, None] * t2[:, None, :, :], axis=2)
          + b2_ref[...][None])                                      # (B, H1, F)
    a2 = bn_softsign(z2, g2_ref, be2_ref)

    # ---- classifier: Flatten + Linear as an accumulating sum of lane-dense
    #      (B,F)@(F,128) matmuls -- no flat scratch, no masked stores. ----
    acc = jnp.zeros((B, ncp), jnp.float32)
    for h in range(H1):                       # static unroll, accumulation in vregs
        acc = acc + jnp.dot(a2[:, h, :], wf_ref[h],
                            preferred_element_type=jnp.float32)
    out_ref[...] = acc + bf_ref[...]


# ------------------------------- wrapper -------------------------------------

def _full_spec(shape):
    n = len(shape)
    return pl.BlockSpec(shape, lambda *_: (0,) * n)


def _round_up(v, m):
    return ((v + m - 1) // m) * m


def attn_plain_net_forward(x, neighbor, params, num_class):
    B, C, F = x.shape
    assert C == 1, "AttnPlainNet fixes feat1 in_channels == 1"
    N = neighbor.shape[1]
    H1 = params["conv2_w"].shape[0]

    # Neighbors packed so the trailing two dims (N*C, F) are sublane/lane dense.
    y2 = neighbor.reshape(B, N * C, F)

    # Lane-dense classifier: pad the class dim to a multiple of 128 so the single
    # output store is unmasked; sliced back to num_class afterwards.
    ncp = _round_up(num_class, 128)
    wf = jnp.pad(params["fc_w"], ((0, 0), (0, 0), (0, ncp - num_class)))  # (H1,F,NCp)
    bf = jnp.pad(params["fc_b"], ((0, 0), (0, ncp - num_class)))          # (1, NCp)

    args = (x, y2,
            params["att1_w"], params["att2_w"],
            params["conv1_w"], params["conv1_b"], params["bn1_g"], params["bn1_b"],
            params["conv2_w"], params["conv2_b"], params["bn2_g"], params["bn2_b"],
            wf, bf)
    out = pl.pallas_call(
        _attn_plain_net_kernel,
        out_shape=jax.ShapeDtypeStruct((B, ncp), jnp.float32),
        grid=(1,),
        in_specs=[_full_spec(a.shape) for a in args],
        out_specs=_full_spec((B, ncp)),
        compiler_params=pltpu.CompilerParams(
            dimension_semantics=("arbitrary",),
            vmem_limit_bytes=32 * 1024 * 1024),
    )(*args)
    return out[:, :num_class]


# ------------------------------ parameters -----------------------------------

def init_params(key, feat_len, num_class, C=1, hidden=(10, 10)):
    H0, H1 = hidden
    ks = jax.random.split(key, 8)

    def u(k, shape, fan_in):
        bound = 1.0 / float(fan_in) ** 0.5
        return jax.random.uniform(k, shape, jnp.float32, -bound, bound)

    return dict(
        att1_w=u(ks[0], (1, feat_len), feat_len),            # Linear(F, 1, bias=False)
        att2_w=u(ks[1], (1, feat_len), feat_len),
        conv1_w=u(ks[2], (H0, C), C),                        # Conv1d(C, H0, 1) weight
        conv1_b=u(ks[3], (H0, 1), C),
        bn1_g=jnp.ones((H0, 1), jnp.float32),
        bn1_b=jnp.zeros((H0, 1), jnp.float32),
        conv2_w=u(ks[4], (H1, H0), H0),                      # Conv1d(H0, H1, 1) weight
        conv2_b=u(ks[5], (H1, 1), H0),
        bn2_g=jnp.ones((H1, 1), jnp.float32),
        bn2_b=jnp.zeros((H1, 1), jnp.float32),
        # Linear(F*H1, NC) weight stored as (H1, F, NC) matching the flatten order
        # of (B, H1, F) -> (B, H1*F).
        fc_w=u(ks[6], (H1, feat_len, num_class), H1 * feat_len),
        fc_b=u(ks[7], (1, num_class), H1 * feat_len),
    )


# ------------------------- pure-JAX reference check --------------------------

def l2_normalize(x, axis):
    # torch.nn.functional.normalize(p=2, dim=axis, eps=1e-12)
    n = jnp.sqrt(jnp.sum(x * x, axis=axis, keepdims=True))
    return x / jnp.maximum(n, 1e-12)


def reference_forward(x, neighbor, params):
    B = x.shape[0]
    xn = l2_normalize(x, axis=1)
    yn = l2_normalize(neighbor, axis=2)
    att1, att2 = params["att1_w"][0], params["att2_w"][0]
    fadjs = []
    for i in range(B):
        s1 = jnp.sum(xn[i] * att1)
        s2 = jnp.sum(yn[i] * att2, axis=(1, 2))
        w = jax.nn.softmax(s1 * s2, axis=0)
        fa = jnp.einsum("ca,ncb,n->ab", xn[i], yn[i], w)
        fa = fa + fa.T
        fa = jnp.sign(fa) * jnp.sqrt(jnp.abs(fa))
        fa = fa / (jnp.sum(jnp.abs(fa), axis=0, keepdims=True) + 1e-7)
        fa = jnp.where(jnp.isnan(fa), 0.0, fa)
        fadjs.append(fa)
    fadj = jnp.stack(fadjs)

    def layer(h, w, b, g, be):
        t = jnp.einsum("bcf,bfg->bcg", h, fadj)
        z = jnp.einsum("oc,bcf->bof", w, t) + b[None]
        mean = jnp.mean(z, axis=(0, 2), keepdims=True)
        var = jnp.mean((z - mean) ** 2, axis=(0, 2), keepdims=True)
        z = (z - mean) / jnp.sqrt(var + 1e-5) * g[None] + be[None]
        return z / (1.0 + jnp.abs(z))

    a1 = layer(xn, params["conv1_w"], params["conv1_b"], params["bn1_g"], params["bn1_b"])
    a2 = layer(a1, params["conv2_w"], params["conv2_b"], params["bn2_g"], params["bn2_b"])
    return jnp.einsum("bhf,hfn->bn", a2, params["fc_w"]) + params["fc_b"]


# ---------------------------------- main --------------------------------------

if __name__ == "__main__":
    key = jax.random.PRNGKey(0)
    B, C, F, N = 8, 1, 16, 4          # batch, in_channels, feat_len, neighbors/sample
    hidden = (10, 10)
    num_class = 4

    kx, kn, kp = jax.random.split(key, 3)
    x = jax.random.normal(kx, (B, C, F), jnp.float32)
    neighbor = jax.random.normal(kn, (B, N, C, F), jnp.float32)
    params = init_params(kp, F, num_class, C=C, hidden=hidden)

    out = attn_plain_net_forward(x, neighbor, params, num_class)
    out = jax.block_until_ready(out)

    ref = reference_forward(x, neighbor, params)
    assert out.shape == (B, num_class)
    assert bool(jnp.all(jnp.isfinite(out)))
    assert bool(jnp.allclose(out, ref, rtol=1e-2, atol=1e-2)), (out, ref)
    print("KERNEL_OK")
</pallas_src>

<mosaic_0001>
module attributes {stable_mosaic.version = 11 : i64} {
  func.func @_attn_plain_net_kernel(%arg0: i32, %arg1: memref<8x1x16xf32, #tpu.memory_space<vmem>>, %arg2: memref<8x4x16xf32, #tpu.memory_space<vmem>>, %arg3: memref<1x16xf32, #tpu.memory_space<vmem>>, %arg4: memref<1x16xf32, #tpu.memory_space<vmem>>, %arg5: memref<10x1xf32, #tpu.memory_space<vmem>>, %arg6: memref<10x1xf32, #tpu.memory_space<vmem>>, %arg7: memref<10x1xf32, #tpu.memory_space<vmem>>, %arg8: memref<10x1xf32, #tpu.memory_space<vmem>>, %arg9: memref<10x10xf32, #tpu.memory_space<vmem>>, %arg10: memref<10x1xf32, #tpu.memory_space<vmem>>, %arg11: memref<10x1xf32, #tpu.memory_space<vmem>>, %arg12: memref<10x1xf32, #tpu.memory_space<vmem>>, %arg13: memref<10x16x128xf32, #tpu.memory_space<vmem>>, %arg14: memref<1x128xf32, #tpu.memory_space<vmem>>, %arg15: memref<8x128xf32, #tpu.memory_space<vmem>>) attributes {dimension_semantics = [#tpu.dimension_semantics<arbitrary>], iteration_bounds = array<i64: 1>, scalar_prefetch = 0 : i64, scratch_operands = 0 : i64, tpu.core_type = #tpu.core_type<tc>, window_params = [{pipeline_mode = #tpu.pipeline_mode<synchronous>, transform_indices = @transform_0, window_bounds = array<i64: 8, 1, 16>}, {pipeline_mode = #tpu.pipeline_mode<synchronous>, transform_indices = @transform_1, window_bounds = array<i64: 8, 4, 16>}, {pipeline_mode = #tpu.pipeline_mode<synchronous>, transform_indices = @transform_2, window_bounds = array<i64: 1, 16>}, {pipeline_mode = #tpu.pipeline_mode<synchronous>, transform_indices = @transform_3, window_bounds = array<i64: 1, 16>}, {pipeline_mode = #tpu.pipeline_mode<synchronous>, transform_indices = @transform_4, window_bounds = array<i64: 10, 1>}, {pipeline_mode = #tpu.pipeline_mode<synchronous>, transform_indices = @transform_5, window_bounds = array<i64: 10, 1>}, {pipeline_mode = #tpu.pipeline_mode<synchronous>, transform_indices = @transform_6, window_bounds = array<i64: 10, 1>}, {pipeline_mode = #tpu.pipeline_mode<synchronous>, transform_indices = @transform_7, window_bounds = array<i64: 10, 1>}, {pipeline_mode = #tpu.pipeline_mode<synchronous>, transform_indices = @transform_8, window_bounds = array<i64: 10, 10>}, {pipeline_mode = #tpu.pipeline_mode<synchronous>, transform_indices = @transform_9, window_bounds = array<i64: 10, 1>}, {pipeline_mode = #tpu.pipeline_mode<synchronous>, transform_indices = @transform_10, window_bounds = array<i64: 10, 1>}, {pipeline_mode = #tpu.pipeline_mode<synchronous>, transform_indices = @transform_11, window_bounds = array<i64: 10, 1>}, {pipeline_mode = #tpu.pipeline_mode<synchronous>, transform_indices = @transform_12, window_bounds = array<i64: 10, 16, 128>}, {pipeline_mode = #tpu.pipeline_mode<synchronous>, transform_indices = @transform_13, window_bounds = array<i64: 1, 128>}, {pipeline_mode = #tpu.pipeline_mode<synchronous>, transform_indices = @transform_14, window_bounds = array<i64: 8, 128>}]} {
    %c0 = arith.constant 0 : index
    %c0_0 = arith.constant 0 : index
    %c0_1 = arith.constant 0 : index
    %0 = vector.load %arg1[%c0, %c0_0, %c0_1] : memref<8x1x16xf32, #tpu.memory_space<vmem>>, vector<8x1x16xf32>
    %1 = vector.shape_cast %0 : vector<8x1x16xf32> to vector<8x16xf32>
    %2 = math.absf %1 : vector<8x16xf32>
    %cst = arith.constant 9.99999996E-13 : f32
    %3 = vector.broadcast %cst : f32 to vector<8x16xf32>
    %4 = arith.maximumf %2, %3 : vector<8x16xf32>
    %5 = tpu.reciprocal %4 {approx = true} : vector<8x16xf32> -> vector<8x16xf32>
    %6 = arith.mulf %4, %5 : vector<8x16xf32>
    %cst_2 = arith.constant 2.000000e+00 : f32
    %7 = vector.broadcast %cst_2 : f32 to vector<8x16xf32>
    %8 = arith.subf %7, %6 : vector<8x16xf32>
    %9 = arith.mulf %5, %8 : vector<8x16xf32>
    %10 = arith.mulf %1, %9 : vector<8x16xf32>
    %c0_3 = arith.constant 0 : index
    %c0_4 = arith.constant 0 : index
    %c0_5 = arith.constant 0 : index
    %11 = vector.load %arg2[%c0_3, %c0_4, %c0_5] : memref<8x4x16xf32, #tpu.memory_space<vmem>>, vector<8x4x16xf32>
    %12 = math.absf %11 : vector<8x4x16xf32>
    %cst_6 = arith.constant 9.99999996E-13 : f32
    %13 = vector.broadcast %cst_6 : f32 to vector<8x4x16xf32>
    %14 = arith.maximumf %12, %13 : vector<8x4x16xf32>
    %15 = tpu.reciprocal %14 {approx = true} : vector<8x4x16xf32> -> vector<8x4x16xf32>
    %16 = arith.mulf %14, %15 : vector<8x4x16xf32>
    %cst_7 = arith.constant 2.000000e+00 : f32
    %17 = vector.broadcast %cst_7 : f32 to vector<8x4x16xf32>
    %18 = arith.subf %17, %16 : vector<8x4x16xf32>
    %19 = arith.mulf %15, %18 : vector<8x4x16xf32>
    %20 = arith.mulf %11, %19 : vector<8x4x16xf32>
    %c0_8 = arith.constant 0 : index
    %c0_9 = arith.constant 0 : index
    %21 = vector.load %arg3[%c0_8, %c0_9] : memref<1x16xf32, #tpu.memory_space<vmem>>, vector<1x16xf32>
    %22 = vector.broadcast %21 : vector<1x16xf32> to vector<8x16xf32>
    %23 = arith.mulf %10, %22 : vector<8x16xf32>
    %cst_10 = arith.constant dense<0.000000e+00> : vector<8xf32>
    %24 = vector.multi_reduction <add>, %23, %cst_10 [1] : vector<8x16xf32> to vector<8xf32>
    %25 = vector.shape_cast %24 : vector<8xf32> to vector<8x1xf32>
    %c0_11 = arith.constant 0 : index
    %c0_12 = arith.constant 0 : index
    %26 = vector.load %arg4[%c0_11, %c0_12] : memref<1x16xf32, #tpu.memory_space<vmem>>, vector<1x16xf32>
    %27 = vector.shape_cast %26 : vector<1x16xf32> to vector<1x1x16xf32>
    %28 = vector.broadcast %27 : vector<1x1x16xf32> to vector<8x4x16xf32>
    %29 = arith.mulf %20, %28 : vector<8x4x16xf32>
    %cst_13 = arith.constant dense<0.000000e+00> : vector<8x4xf32>
    %30 = vector.multi_reduction <add>, %29, %cst_13 [2] : vector<8x4x16xf32> to vector<8x4xf32>
    %31 = vector.broadcast %25 : vector<8x1xf32> to vector<8x4xf32>
    %32 = arith.mulf %31, %30 : vector<8x4xf32>
    %cst_14 = arith.constant dense<0xFF800000> : vector<8xf32>
    %33 = vector.multi_reduction <maximumf>, %32, %cst_14 [1] : vector<8x4xf32> to vector<8xf32>
    %34 = vector.shape_cast %33 : vector<8xf32> to vector<8x1xf32>
    %35 = vector.broadcast %34 : vector<8x1xf32> to vector<8x4xf32>
    %36 = arith.subf %32, %35 : vector<8x4xf32>
    %37 = math.exp %36 : vector<8x4xf32>
    %cst_15 = arith.constant dense<0.000000e+00> : vector<8xf32>
    %38 = vector.multi_reduction <add>, %37, %cst_15 [1] : vector<8x4xf32> to vector<8xf32>
    %39 = vector.shape_cast %38 : vector<8xf32> to vector<8x1xf32>
    %40 = tpu.reciprocal %39 {approx = true} : vector<8x1xf32> -> vector<8x1xf32>
    %41 = arith.mulf %39, %40 : vector<8x1xf32>
    %cst_16 = arith.constant 2.000000e+00 : f32
    %42 = vector.broadcast %cst_16 : f32 to vector<8x1xf32>
    %43 = arith.subf %42, %41 : vector<8x1xf32>
    %44 = arith.mulf %40, %43 : vector<8x1xf32>
    %45 = vector.broadcast %44 : vector<8x1xf32> to vector<8x4xf32>
    %46 = arith.mulf %37, %45 : vector<8x4xf32>
    %47 = vector.shape_cast %46 : vector<8x4xf32> to vector<8x4x1xf32>
    %48 = vector.broadcast %47 : vector<8x4x1xf32> to vector<8x4x16xf32>
    %49 = arith.mulf %20, %48 : vector<8x4x16xf32>
    %cst_17 = arith.constant dense<0.000000e+00> : vector<8x16xf32>
    %50 = vector.multi_reduction <add>, %49, %cst_17 [1] : vector<8x4x16xf32> to vector<8x16xf32>
    %51 = vector.shape_cast %10 : vector<8x16xf32> to vector<8x16x1xf32>
    %52 = vector.shape_cast %50 : vector<8x16xf32> to vector<8x1x16xf32>
    %53 = vector.broadcast %51 : vector<8x16x1xf32> to vector<8x16x16xf32>
    %54 = vector.broadcast %52 : vector<8x1x16xf32> to vector<8x16x16xf32>
    %55 = arith.mulf %53, %54 : vector<8x16x16xf32>
    %56 = vector.shape_cast %50 : vector<8x16xf32> to vector<8x16x1xf32>
    %57 = vector.shape_cast %10 : vector<8x16xf32> to vector<8x1x16xf32>
    %58 = vector.broadcast %56 : vector<8x16x1xf32> to vector<8x16x16xf32>
    %59 = vector.broadcast %57 : vector<8x1x16xf32> to vector<8x16x16xf32>
    %60 = arith.mulf %58, %59 : vector<8x16x16xf32>
    %61 = arith.addf %55, %60 : vector<8x16x16xf32>
    %62 = math.absf %61 : vector<8x16x16xf32>
    %cst_18 = arith.constant 1.000000e-30 : f32
    %63 = vector.broadcast %cst_18 : f32 to vector<8x16x16xf32>
    %64 = arith.addf %62, %63 : vector<8x16x16xf32>
    %65 = math.rsqrt %64 : vector<8x16x16xf32>
    %66 = arith.mulf %61, %65 : vector<8x16x16xf32>
    %67 = math.absf %66 : vector<8x16x16xf32>
    %cst_19 = arith.constant dense<0.000000e+00> : vector<8x16xf32>
    %68 = vector.multi_reduction <add>, %67, %cst_19 [1] : vector<8x16x16xf32> to vector<8x16xf32>
    %69 = vector.shape_cast %68 : vector<8x16xf32> to vector<8x1x16xf32>
    %cst_20 = arith.constant 1.000000e-07 : f32
    %70 = vector.broadcast %cst_20 : f32 to vector<8x1x16xf32>
    %71 = arith.addf %69, %70 : vector<8x1x16xf32>
    %72 = tpu.reciprocal %71 {approx = true} : vector<8x1x16xf32> -> vector<8x1x16xf32>
    %73 = arith.mulf %71, %72 : vector<8x1x16xf32>
    %cst_21 = arith.constant 2.000000e+00 : f32
    %74 = vector.broadcast %cst_21 : f32 to vector<8x1x16xf32>
    %75 = arith.subf %74, %73 : vector<8x1x16xf32>
    %76 = arith.mulf %72, %75 : vector<8x1x16xf32>
    %77 = vector.broadcast %76 : vector<8x1x16xf32> to vector<8x16x16xf32>
    %78 = arith.mulf %66, %77 : vector<8x16x16xf32>
    %79 = arith.cmpf one, %78, %78 : vector<8x16x16xf32>
    %cst_22 = arith.constant 0.000000e+00 : f32
    %80 = vector.broadcast %cst_22 : f32 to vector<8x16x16xf32>
    %81 = arith.select %79, %80, %78 : vector<8x16x16xi1>, vector<8x16x16xf32>
    %82 = vector.shape_cast %10 : vector<8x16xf32> to vector<8x16x1xf32>
    %83 = vector.broadcast %82 : vector<8x16x1xf32> to vector<8x16x16xf32>
    %84 = arith.mulf %83, %81 : vector<8x16x16xf32>
    %cst_23 = arith.constant dense<0.000000e+00> : vector<8x16xf32>
    %85 = vector.multi_reduction <add>, %84, %cst_23 [1] : vector<8x16x16xf32> to vector<8x16xf32>
    %c0_24 = arith.constant 0 : index
    %c0_25 = arith.constant 0 : index
    %86 = vector.load %arg5[%c0_24, %c0_25] : memref<10x1xf32, #tpu.memory_space<vmem>>, vector<10x1xf32>
    %87 = vector.shape_cast %86 : vector<10x1xf32> to vector<1x10x1xf32>
    %88 = vector.shape_cast %85 : vector<8x16xf32> to vector<8x1x16xf32>
    %89 = vector.broadcast %87 : vector<1x10x1xf32> to vector<8x10x16xf32>
    %90 = vector.broadcast %88 : vector<8x1x16xf32> to vector<8x10x16xf32>
    %91 = arith.mulf %89, %90 : vector<8x10x16xf32>
    %c0_26 = arith.constant 0 : index
    %c0_27 = arith.constant 0 : index
    %92 = vector.load %arg6[%c0_26, %c0_27] : memref<10x1xf32, #tpu.memory_space<vmem>>, vector<10x1xf32>
    %93 = vector.shape_cast %92 : vector<10x1xf32> to vector<1x10x1xf32>
    %94 = vector.broadcast %93 : vector<1x10x1xf32> to vector<8x10x16xf32>
    %95 = arith.addf %91, %94 : vector<8x10x16xf32>
    %cst_28 = arith.constant dense<0.000000e+00> : vector<8x10xf32>
    %96 = vector.multi_reduction <add>, %95, %cst_28 [2] : vector<8x10x16xf32> to vector<8x10xf32>
    %97 = vector.shape_cast %96 : vector<8x10xf32> to vector<8x10x1xf32>
    %cst_29 = arith.constant 1.600000e+01 : f32
    %98 = vector.broadcast %cst_29 : f32 to vector<8x10x1xf32>
    %99 = arith.divf %97, %98 : vector<8x10x1xf32>
    %cst_30 = arith.constant dense<0.000000e+00> : vector<10x1xf32>
    %100 = vector.multi_reduction <add>, %99, %cst_30 [0] : vector<8x10x1xf32> to vector<10x1xf32>
    %101 = vector.shape_cast %100 : vector<10x1xf32> to vector<1x10x1xf32>
    %cst_31 = arith.constant 8.000000e+00 : f32
    %102 = vector.broadcast %cst_31 : f32 to vector<1x10x1xf32>
    %103 = arith.divf %101, %102 : vector<1x10x1xf32>
    %104 = vector.broadcast %103 : vector<1x10x1xf32> to vector<8x10x16xf32>
    %105 = arith.subf %95, %104 : vector<8x10x16xf32>
    %106 = arith.mulf %105, %105 : vector<8x10x16xf32>
    %cst_32 = arith.constant dense<0.000000e+00> : vector<8x10xf32>
    %107 = vector.multi_reduction <add>, %106, %cst_32 [2] : vector<8x10x16xf32> to vector<8x10xf32>
    %108 = vector.shape_cast %107 : vector<8x10xf32> to vector<8x10x1xf32>
    %cst_33 = arith.constant 1.600000e+01 : f32
    %109 = vector.broadcast %cst_33 : f32 to vector<8x10x1xf32>
    %110 = arith.divf %108, %109 : vector<8x10x1xf32>
    %cst_34 = arith.constant dense<0.000000e+00> : vector<10x1xf32>
    %111 = vector.multi_reduction <add>, %110, %cst_34 [0] : vector<8x10x1xf32> to vector<10x1xf32>
    %112 = vector.shape_cast %111 : vector<10x1xf32> to vector<1x10x1xf32>
    %cst_35 = arith.constant 8.000000e+00 : f32
    %113 = vector.broadcast %cst_35 : f32 to vector<1x10x1xf32>
    %114 = arith.divf %112, %113 : vector<1x10x1xf32>
    %115 = vector.broadcast %103 : vector<1x10x1xf32> to vector<8x10x16xf32>
    %116 = arith.subf %95, %115 : vector<8x10x16xf32>
    %cst_36 = arith.constant 9.99999974E-6 : f32
    %117 = vector.broadcast %cst_36 : f32 to vector<1x10x1xf32>
    %118 = arith.addf %114, %117 : vector<1x10x1xf32>
    %119 = math.rsqrt %118 : vector<1x10x1xf32>
    %120 = vector.broadcast %119 : vector<1x10x1xf32> to vector<8x10x16xf32>
    %121 = arith.mulf %116, %120 : vector<8x10x16xf32>
    %c0_37 = arith.constant 0 : index
    %c0_38 = arith.constant 0 : index
    %122 = vector.load %arg7[%c0_37, %c0_38] : memref<10x1xf32, #tpu.memory_space<vmem>>, vector<10x1xf32>
    %123 = vector.shape_cast %122 : vector<10x1xf32> to vector<1x10x1xf32>
    %124 = vector.broadcast %123 : vector<1x10x1xf32> to vector<8x10x16xf32>
    %125 = arith.mulf %121, %124 : vector<8x10x16xf32>
    %c0_39 = arith.constant 0 : index
    %c0_40 = arith.constant 0 : index
    %126 = vector.load %arg8[%c0_39, %c0_40] : memref<10x1xf32, #tpu.memory_space<vmem>>, vector<10x1xf32>
    %127 = vector.shape_cast %126 : vector<10x1xf32> to vector<1x10x1xf32>
    %128 = vector.broadcast %127 : vector<1x10x1xf32> to vector<8x10x16xf32>
    %129 = arith.addf %125, %128 : vector<8x10x16xf32>
    %130 = math.absf %129 : vector<8x10x16xf32>
    %cst_41 = arith.constant 1.000000e+00 : f32
    %131 = vector.broadcast %cst_41 : f32 to vector<8x10x16xf32>
    %132 = arith.addf %131, %130 : vector<8x10x16xf32>
    %133 = tpu.reciprocal %132 {approx = true} : vector<8x10x16xf32> -> vector<8x10x16xf32>
    %134 = arith.mulf %132, %133 : vector<8x10x16xf32>
    %cst_42 = arith.constant 2.000000e+00 : f32
    %135 = vector.broadcast %cst_42 : f32 to vector<8x10x16xf32>
    %136 = arith.subf %135, %134 : vector<8x10x16xf32>
    %137 = arith.mulf %133, %136 : vector<8x10x16xf32>
    %138 = arith.mulf %129, %137 : vector<8x10x16xf32>
    %139 = vector.shape_cast %138 : vector<8x10x16xf32> to vector<8x10x16x1xf32>
    %140 = vector.shape_cast %81 : vector<8x16x16xf32> to vector<8x1x16x16xf32>
    %141 = vector.broadcast %139 : vector<8x10x16x1xf32> to vector<8x10x16x16xf32>
    %142 = vector.broadcast %140 : vector<8x1x16x16xf32> to vector<8x10x16x16xf32>
    %143 = arith.mulf %141, %142 : vector<8x10x16x16xf32>
    %cst_43 = arith.constant dense<0.000000e+00> : vector<8x10x16xf32>
    %144 = vector.multi_reduction <add>, %143, %cst_43 [2] : vector<8x10x16x16xf32> to vector<8x10x16xf32>
    %c0_44 = arith.constant 0 : index
    %c0_45 = arith.constant 0 : index
    %145 = vector.load %arg9[%c0_44, %c0_45] : memref<10x10xf32, #tpu.memory_space<vmem>>, vector<10x10xf32>
    %146 = vector.shape_cast %145 : vector<10x10xf32> to vector<1x10x10x1xf32>
    %147 = vector.shape_cast %144 : vector<8x10x16xf32> to vector<8x1x10x16xf32>
    %148 = vector.broadcast %146 : vector<1x10x10x1xf32> to vector<8x10x10x16xf32>
    %149 = vector.broadcast %147 : vector<8x1x10x16xf32> to vector<8x10x10x16xf32>
    %150 = arith.mulf %148, %149 : vector<8x10x10x16xf32>
    %cst_46 = arith.constant dense<0.000000e+00> : vector<8x10x16xf32>
    %151 = vector.multi_reduction <add>, %150, %cst_46 [2] : vector<8x10x10x16xf32> to vector<8x10x16xf32>
    %c0_47 = arith.constant 0 : index
    %c0_48 = arith.constant 0 : index
    %152 = vector.load %arg10[%c0_47, %c0_48] : memref<10x1xf32, #tpu.memory_space<vmem>>, vector<10x1xf32>
    %153 = vector.shape_cast %152 : vector<10x1xf32> to vector<1x10x1xf32>
    %154 = vector.broadcast %153 : vector<1x10x1xf32> to vector<8x10x16xf32>
    %155 = arith.addf %151, %154 : vector<8x10x16xf32>
    %cst_49 = arith.constant dense<0.000000e+00> : vector<8x10xf32>
    %156 = vector.multi_reduction <add>, %155, %cst_49 [2] : vector<8x10x16xf32> to vector<8x10xf32>
    %157 = vector.shape_cast %156 : vector<8x10xf32> to vector<8x10x1xf32>
    %cst_50 = arith.constant 1.600000e+01 : f32
    %158 = vector.broadcast %cst_50 : f32 to vector<8x10x1xf32>
    %159 = arith.divf %157, %158 : vector<8x10x1xf32>
    %cst_51 = arith.constant dense<0.000000e+00> : vector<10x1xf32>
    %160 = vector.multi_reduction <add>, %159, %cst_51 [0] : vector<8x10x1xf32> to vector<10x1xf32>
    %161 = vector.shape_cast %160 : vector<10x1xf32> to vector<1x10x1xf32>
    %cst_52 = arith.constant 8.000000e+00 : f32
    %162 = vector.broadcast %cst_52 : f32 to vector<1x10x1xf32>
    %163 = arith.divf %161, %162 : vector<1x10x1xf32>
    %164 = vector.broadcast %163 : vector<1x10x1xf32> to vector<8x10x16xf32>
    %165 = arith.subf %155, %164 : vector<8x10x16xf32>
    %166 = arith.mulf %165, %165 : vector<8x10x16xf32>
    %cst_53 = arith.constant dense<0.000000e+00> : vector<8x10xf32>
    %167 = vector.multi_reduction <add>, %166, %cst_53 [2] : vector<8x10x16xf32> to vector<8x10xf32>
    %168 = vector.shape_cast %167 : vector<8x10xf32> to vector<8x10x1xf32>
    %cst_54 = arith.constant 1.600000e+01 : f32
    %169 = vector.broadcast %cst_54 : f32 to vector<8x10x1xf32>
    %170 = arith.divf %168, %169 : vector<8x10x1xf32>
    %cst_55 = arith.constant dense<0.000000e+00> : vector<10x1xf32>
    %171 = vector.multi_reduction <add>, %170, %cst_55 [0] : vector<8x10x1xf32> to vector<10x1xf32>
    %172 = vector.shape_cast %171 : vector<10x1xf32> to vector<1x10x1xf32>
    %cst_56 = arith.constant 8.000000e+00 : f32
    %173 = vector.broadcast %cst_56 : f32 to vector<1x10x1xf32>
    %174 = arith.divf %172, %173 : vector<1x10x1xf32>
    %175 = vector.broadcast %163 : vector<1x10x1xf32> to vector<8x10x16xf32>
    %176 = arith.subf %155, %175 : vector<8x10x16xf32>
    %cst_57 = arith.constant 9.99999974E-6 : f32
    %177 = vector.broadcast %cst_57 : f32 to vector<1x10x1xf32>
    %178 = arith.addf %174, %177 : vector<1x10x1xf32>
    %179 = math.rsqrt %178 : vector<1x10x1xf32>
    %180 = vector.broadcast %179 : vector<1x10x1xf32> to vector<8x10x16xf32>
    %181 = arith.mulf %176, %180 : vector<8x10x16xf32>
    %c0_58 = arith.constant 0 : index
    %c0_59 = arith.constant 0 : index
    %182 = vector.load %arg11[%c0_58, %c0_59] : memref<10x1xf32, #tpu.memory_space<vmem>>, vector<10x1xf32>
    %183 = vector.shape_cast %182 : vector<10x1xf32> to vector<1x10x1xf32>
    %184 = vector.broadcast %183 : vector<1x10x1xf32> to vector<8x10x16xf32>
    %185 = arith.mulf %181, %184 : vector<8x10x16xf32>
    %c0_60 = arith.constant 0 : index
    %c0_61 = arith.constant 0 : index
    %186 = vector.load %arg12[%c0_60, %c0_61] : memref<10x1xf32, #tpu.memory_space<vmem>>, vector<10x1xf32>
    %187 = vector.shape_cast %186 : vector<10x1xf32> to vector<1x10x1xf32>
    %188 = vector.broadcast %187 : vector<1x10x1xf32> to vector<8x10x16xf32>
    %189 = arith.addf %185, %188 : vector<8x10x16xf32>
    %190 = math.absf %189 : vector<8x10x16xf32>
    %cst_62 = arith.constant 1.000000e+00 : f32
    %191 = vector.broadcast %cst_62 : f32 to vector<8x10x16xf32>
    %192 = arith.addf %191, %190 : vector<8x10x16xf32>
    %193 = tpu.reciprocal %192 {approx = true} : vector<8x10x16xf32> -> vector<8x10x16xf32>
    %194 = arith.mulf %192, %193 : vector<8x10x16xf32>
    %cst_63 = arith.constant 2.000000e+00 : f32
    %195 = vector.broadcast %cst_63 : f32 to vector<8x10x16xf32>
    %196 = arith.subf %195, %194 : vector<8x10x16xf32>
    %197 = arith.mulf %193, %196 : vector<8x10x16xf32>
    %198 = arith.mulf %189, %197 : vector<8x10x16xf32>
    %cst_64 = arith.constant 0.000000e+00 : f32
    %199 = vector.broadcast %cst_64 : f32 to vector<8x128xf32>
    %200 = vector.extract_strided_slice %198 {offsets = [0, 0, 0], sizes = [8, 1, 16], strides = [1, 1, 1]} : vector<8x10x16xf32> to vector<8x1x16xf32>
    %201 = vector.shape_cast %200 : vector<8x1x16xf32> to vector<8x16xf32>
    %c0_65 = arith.constant 0 : index
    %c0_66 = arith.constant 0 : index
    %c0_67 = arith.constant 0 : index
    %202 = vector.load %arg13[%c0_65, %c0_66, %c0_67] : memref<10x16x128xf32, #tpu.memory_space<vmem>>, vector<1x16x128xf32>
    %203 = vector.shape_cast %202 : vector<1x16x128xf32> to vector<16x128xf32>
    %cst_68 = arith.constant dense<0.000000e+00> : vector<8x128xf32>
    %204 = tpu.matmul %201, %203, %cst_68 {dimension_numbers = #tpu.dot_dimension_numbers<[1], [0], [0], [1], [0, 0, 1, 1], [], []>} : vector<8x16xf32>, vector<16x128xf32>, vector<8x128xf32> -> vector<8x128xf32>
    %205 = arith.addf %199, %204 : vector<8x128xf32>
    %206 = vector.extract_strided_slice %198 {offsets = [0, 1, 0], sizes = [8, 1, 16], strides = [1, 1, 1]} : vector<8x10x16xf32> to vector<8x1x16xf32>
    %207 = vector.shape_cast %206 : vector<8x1x16xf32> to vector<8x16xf32>
    %c1 = arith.constant 1 : index
    %c0_69 = arith.constant 0 : index
    %c0_70 = arith.constant 0 : index
    %208 = vector.load %arg13[%c1, %c0_69, %c0_70] : memref<10x16x128xf32, #tpu.memory_space<vmem>>, vector<1x16x128xf32>
    %209 = vector.shape_cast %208 : vector<1x16x128xf32> to vector<16x128xf32>
    %cst_71 = arith.constant dense<0.000000e+00> : vector<8x128xf32>
    %210 = tpu.matmul %207, %209, %cst_71 {dimension_numbers = #tpu.dot_dimension_numbers<[1], [0], [0], [1], [0, 0, 1, 1], [], []>} : vector<8x16xf32>, vector<16x128xf32>, vector<8x128xf32> -> vector<8x128xf32>
    %211 = arith.addf %205, %210 : vector<8x128xf32>
    %212 = vector.extract_strided_slice %198 {offsets = [0, 2, 0], sizes = [8, 1, 16], strides = [1, 1, 1]} : vector<8x10x16xf32> to vector<8x1x16xf32>
    %213 = vector.shape_cast %212 : vector<8x1x16xf32> to vector<8x16xf32>
    %c2 = arith.constant 2 : index
    %c0_72 = arith.constant 0 : index
    %c0_73 = arith.constant 0 : index
    %214 = vector.load %arg13[%c2, %c0_72, %c0_73] : memref<10x16x128xf32, #tpu.memory_space<vmem>>, vector<1x16x128xf32>
    %215 = vector.shape_cast %214 : vector<1x16x128xf32> to vector<16x128xf32>
    %cst_74 = arith.constant dense<0.000000e+00> : vector<8x128xf32>
    %216 = tpu.matmul %213, %215, %cst_74 {dimension_numbers = #tpu.dot_dimension_numbers<[1], [0], [0], [1], [0, 0, 1, 1], [], []>} : vector<8x16xf32>, vector<16x128xf32>, vector<8x128xf32> -> vector<8x128xf32>
    %217 = arith.addf %211, %216 : vector<8x128xf32>
    %218 = vector.extract_strided_slice %198 {offsets = [0, 3, 0], sizes = [8, 1, 16], strides = [1, 1, 1]} : vector<8x10x16xf32> to vector<8x1x16xf32>
    %219 = vector.shape_cast %218 : vector<8x1x16xf32> to vector<8x16xf32>
    %c3 = arith.constant 3 : index
    %c0_75 = arith.constant 0 : index
    %c0_76 = arith.constant 0 : index
    %220 = vector.load %arg13[%c3, %c0_75, %c0_76] : memref<10x16x128xf32, #tpu.memory_space<vmem>>, vector<1x16x128xf32>
    %221 = vector.shape_cast %220 : vector<1x16x128xf32> to vector<16x128xf32>
    %cst_77 = arith.constant dense<0.000000e+00> : vector<8x128xf32>
    %222 = tpu.matmul %219, %221, %cst_77 {dimension_numbers = #tpu.dot_dimension_numbers<[1], [0], [0], [1], [0, 0, 1, 1], [], []>} : vector<8x16xf32>, vector<16x128xf32>, vector<8x128xf32> -> vector<8x128xf32>
    %223 = arith.addf %217, %222 : vector<8x128xf32>
    %224 = vector.extract_strided_slice %198 {offsets = [0, 4, 0], sizes = [8, 1, 16], strides = [1, 1, 1]} : vector<8x10x16xf32> to vector<8x1x16xf32>
    %225 = vector.shape_cast %224 : vector<8x1x16xf32> to vector<8x16xf32>
    %c4 = arith.constant 4 : index
    %c0_78 = arith.constant 0 : index
    %c0_79 = arith.constant 0 : index
    %226 = vector.load %arg13[%c4, %c0_78, %c0_79] : memref<10x16x128xf32, #tpu.memory_space<vmem>>, vector<1x16x128xf32>
    %227 = vector.shape_cast %226 : vector<1x16x128xf32> to vector<16x128xf32>
    %cst_80 = arith.constant dense<0.000000e+00> : vector<8x128xf32>
    %228 = tpu.matmul %225, %227, %cst_80 {dimension_numbers = #tpu.dot_dimension_numbers<[1], [0], [0], [1], [0, 0, 1, 1], [], []>} : vector<8x16xf32>, vector<16x128xf32>, vector<8x128xf32> -> vector<8x128xf32>
    %229 = arith.addf %223, %228 : vector<8x128xf32>
    %230 = vector.extract_strided_slice %198 {offsets = [0, 5, 0], sizes = [8, 1, 16], strides = [1, 1, 1]} : vector<8x10x16xf32> to vector<8x1x16xf32>
    %231 = vector.shape_cast %230 : vector<8x1x16xf32> to vector<8x16xf32>
    %c5 = arith.constant 5 : index
    %c0_81 = arith.constant 0 : index
    %c0_82 = arith.constant 0 : index
    %232 = vector.load %arg13[%c5, %c0_81, %c0_82] : memref<10x16x128xf32, #tpu.memory_space<vmem>>, vector<1x16x128xf32>
    %233 = vector.shape_cast %232 : vector<1x16x128xf32> to vector<16x128xf32>
    %cst_83 = arith.constant dense<0.000000e+00> : vector<8x128xf32>
    %234 = tpu.matmul %231, %233, %cst_83 {dimension_numbers = #tpu.dot_dimension_numbers<[1], [0], [0], [1], [0, 0, 1, 1], [], []>} : vector<8x16xf32>, vector<16x128xf32>, vector<8x128xf32> -> vector<8x128xf32>
    %235 = arith.addf %229, %234 : vector<8x128xf32>
    %236 = vector.extract_strided_slice %198 {offsets = [0, 6, 0], sizes = [8, 1, 16], strides = [1, 1, 1]} : vector<8x10x16xf32> to vector<8x1x16xf32>
    %237 = vector.shape_cast %236 : vector<8x1x16xf32> to vector<8x16xf32>
    %c6 = arith.constant 6 : index
    %c0_84 = arith.constant 0 : index
    %c0_85 = arith.constant 0 : index
    %238 = vector.load %arg13[%c6, %c0_84, %c0_85] : memref<10x16x128xf32, #tpu.memory_space<vmem>>, vector<1x16x128xf32>
    %239 = vector.shape_cast %238 : vector<1x16x128xf32> to vector<16x128xf32>
    %cst_86 = arith.constant dense<0.000000e+00> : vector<8x128xf32>
    %240 = tpu.matmul %237, %239, %cst_86 {dimension_numbers = #tpu.dot_dimension_numbers<[1], [0], [0], [1], [0, 0, 1, 1], [], []>} : vector<8x16xf32>, vector<16x128xf32>, vector<8x128xf32> -> vector<8x128xf32>
    %241 = arith.addf %235, %240 : vector<8x128xf32>
    %242 = vector.extract_strided_slice %198 {offsets = [0, 7, 0], sizes = [8, 1, 16], strides = [1, 1, 1]} : vector<8x10x16xf32> to vector<8x1x16xf32>
    %243 = vector.shape_cast %242 : vector<8x1x16xf32> to vector<8x16xf32>
    %c7 = arith.constant 7 : index
    %c0_87 = arith.constant 0 : index
    %c0_88 = arith.constant 0 : index
    %244 = vector.load %arg13[%c7, %c0_87, %c0_88] : memref<10x16x128xf32, #tpu.memory_space<vmem>>, vector<1x16x128xf32>
    %245 = vector.shape_cast %244 : vector<1x16x128xf32> to vector<16x128xf32>
    %cst_89 = arith.constant dense<0.000000e+00> : vector<8x128xf32>
    %246 = tpu.matmul %243, %245, %cst_89 {dimension_numbers = #tpu.dot_dimension_numbers<[1], [0], [0], [1], [0, 0, 1, 1], [], []>} : vector<8x16xf32>, vector<16x128xf32>, vector<8x128xf32> -> vector<8x128xf32>
    %247 = arith.addf %241, %246 : vector<8x128xf32>
    %248 = vector.extract_strided_slice %198 {offsets = [0, 8, 0], sizes = [8, 1, 16], strides = [1, 1, 1]} : vector<8x10x16xf32> to vector<8x1x16xf32>
    %249 = vector.shape_cast %248 : vector<8x1x16xf32> to vector<8x16xf32>
    %c8 = arith.constant 8 : index
    %c0_90 = arith.constant 0 : index
    %c0_91 = arith.constant 0 : index
    %250 = vector.load %arg13[%c8, %c0_90, %c0_91] : memref<10x16x128xf32, #tpu.memory_space<vmem>>, vector<1x16x128xf32>
    %251 = vector.shape_cast %250 : vector<1x16x128xf32> to vector<16x128xf32>
    %cst_92 = arith.constant dense<0.000000e+00> : vector<8x128xf32>
    %252 = tpu.matmul %249, %251, %cst_92 {dimension_numbers = #tpu.dot_dimension_numbers<[1], [0], [0], [1], [0, 0, 1, 1], [], []>} : vector<8x16xf32>, vector<16x128xf32>, vector<8x128xf32> -> vector<8x128xf32>
    %253 = arith.addf %247, %252 : vector<8x128xf32>
    %254 = vector.extract_strided_slice %198 {offsets = [0, 9, 0], sizes = [8, 1, 16], strides = [1, 1, 1]} : vector<8x10x16xf32> to vector<8x1x16xf32>
    %255 = vector.shape_cast %254 : vector<8x1x16xf32> to vector<8x16xf32>
    %c9 = arith.constant 9 : index
    %c0_93 = arith.constant 0 : index
    %c0_94 = arith.constant 0 : index
    %256 = vector.load %arg13[%c9, %c0_93, %c0_94] : memref<10x16x128xf32, #tpu.memory_space<vmem>>, vector<1x16x128xf32>
    %257 = vector.shape_cast %256 : vector<1x16x128xf32> to vector<16x128xf32>
    %cst_95 = arith.constant dense<0.000000e+00> : vector<8x128xf32>
    %258 = tpu.matmul %255, %257, %cst_95 {dimension_numbers = #tpu.dot_dimension_numbers<[1], [0], [0], [1], [0, 0, 1, 1], [], []>} : vector<8x16xf32>, vector<16x128xf32>, vector<8x128xf32> -> vector<8x128xf32>
    %259 = arith.addf %253, %258 : vector<8x128xf32>
    %c0_96 = arith.constant 0 : index
    %c0_97 = arith.constant 0 : index
    %260 = vector.load %arg14[%c0_96, %c0_97] : memref<1x128xf32, #tpu.memory_space<vmem>>, vector<1x128xf32>
    %261 = vector.broadcast %260 : vector<1x128xf32> to vector<8x128xf32>
    %262 = arith.addf %259, %261 : vector<8x128xf32>
    %c0_98 = arith.constant 0 : index
    %c0_99 = arith.constant 0 : index
    %263 = vector.load %arg15[%c0_98, %c0_99] : memref<8x128xf32, #tpu.memory_space<vmem>>, vector<8x128xf32>
    tpu.vector_store %arg15[%c0_98, %c0_99], %262 {strides = array<i32>} : memref<8x128xf32, #tpu.memory_space<vmem>>, vector<8x128xf32>,
    return
  }
  func.func @transform_0(%arg0: i32) -> (i32, i32, i32) {
    %c0_i32 = arith.constant 0 : i32
    %c0_i32_0 = arith.constant 0 : i32
    %c0_i32_1 = arith.constant 0 : i32
    %c0_i32_2 = arith.constant 0 : i32
    return %c0_i32, %c0_i32_0, %c0_i32_1 : i32, i32, i32
  }
  func.func @transform_1(%arg0: i32) -> (i32, i32, i32) {
    %c0_i32 = arith.constant 0 : i32
    %c0_i32_0 = arith.constant 0 : i32
    %c0_i32_1 = arith.constant 0 : i32
    %c0_i32_2 = arith.constant 0 : i32
    return %c0_i32, %c0_i32_0, %c0_i32_1 : i32, i32, i32
  }
  func.func @transform_2(%arg0: i32) -> (i32, i32) {
    %c0_i32 = arith.constant 0 : i32
    %c0_i32_0 = arith.constant 0 : i32
    %c0_i32_1 = arith.constant 0 : i32
    return %c0_i32, %c0_i32_0 : i32, i32
  }
  func.func @transform_3(%arg0: i32) -> (i32, i32) {
    %c0_i32 = arith.constant 0 : i32
    %c0_i32_0 = arith.constant 0 : i32
    %c0_i32_1 = arith.constant 0 : i32
    return %c0_i32, %c0_i32_0 : i32, i32
  }
  func.func @transform_4(%arg0: i32) -> (i32, i32) {
    %c0_i32 = arith.constant 0 : i32
    %c0_i32_0 = arith.constant 0 : i32
    %c0_i32_1 = arith.constant 0 : i32
    return %c0_i32, %c0_i32_0 : i32, i32
  }
  func.func @transform_5(%arg0: i32) -> (i32, i32) {
    %c0_i32 = arith.constant 0 : i32
    %c0_i32_0 = arith.constant 0 : i32
    %c0_i32_1 = arith.constant 0 : i32
    return %c0_i32, %c0_i32_0 : i32, i32
  }
  func.func @transform_6(%arg0: i32) -> (i32, i32) {
    %c0_i32 = arith.constant 0 : i32
    %c0_i32_0 = arith.constant 0 : i32
    %c0_i32_1 = arith.constant 0 : i32
    return %c0_i32, %c0_i32_0 : i32, i32
  }
  func.func @transform_7(%arg0: i32) -> (i32, i32) {
    %c0_i32 = arith.constant 0 : i32
    %c0_i32_0 = arith.constant 0 : i32
    %c0_i32_1 = arith.constant 0 : i32
    return %c0_i32, %c0_i32_0 : i32, i32
  }
  func.func @transform_8(%arg0: i32) -> (i32, i32) {
    %c0_i32 = arith.constant 0 : i32
    %c0_i32_0 = arith.constant 0 : i32
    %c0_i32_1 = arith.constant 0 : i32
    return %c0_i32, %c0_i32_0 : i32, i32
  }
  func.func @transform_9(%arg0: i32) -> (i32, i32) {
    %c0_i32 = arith.constant 0 : i32
    %c0_i32_0 = arith.constant 0 : i32
    %c0_i32_1 = arith.constant 0 : i32
    return %c0_i32, %c0_i32_0 : i32, i32
  }
  func.func @transform_10(%arg0: i32) -> (i32, i32) {
    %c0_i32 = arith.constant 0 : i32
    %c0_i32_0 = arith.constant 0 : i32
    %c0_i32_1 = arith.constant 0 : i32
    return %c0_i32, %c0_i32_0 : i32, i32
  }
  func.func @transform_11(%arg0: i32) -> (i32, i32) {
    %c0_i32 = arith.constant 0 : i32
    %c0_i32_0 = arith.constant 0 : i32
    %c0_i32_1 = arith.constant 0 : i32
    return %c0_i32, %c0_i32_0 : i32, i32
  }
  func.func @transform_12(%arg0: i32) -> (i32, i32, i32) {
    %c0_i32 = arith.constant 0 : i32
    %c0_i32_0 = arith.constant 0 : i32
    %c0_i32_1 = arith.constant 0 : i32
    %c0_i32_2 = arith.constant 0 : i32
    return %c0_i32, %c0_i32_0, %c0_i32_1 : i32, i32, i32
  }
  func.func @transform_13(%arg0: i32) -> (i32, i32) {
    %c0_i32 = arith.constant 0 : i32
    %c0_i32_0 = arith.constant 0 : i32
    %c0_i32_1 = arith.constant 0 : i32
    return %c0_i32, %c0_i32_0 : i32, i32
  }
  func.func @transform_14(%arg0: i32) -> (i32, i32) {
    %c0_i32 = arith.constant 0 : i32
    %c0_i32_0 = arith.constant 0 : i32
    %c0_i32_1 = arith.constant 0 : i32
    return %c0_i32, %c0_i32_0 : i32, i32
  }
}

</mosaic_0001>

<bundles_post_ra>
// kernel: tpu_custom_call.1
= control target key start
LH: loop header
LB: loop body
LE: loop exit
PB: predicated region body
PF: predicated region fallthrough
CT: control target
= control target key end

     0   :  { %19 = vsyncpa [#allocation3], 0  ;;  %s13152_s0 = inlined_call_operand.hbm [shape: f32[8,1,16], index: 0, kind: input, shape index: {}]   ;;  %s13153_s1 = inlined_call_operand.hbm [shape: f32[8,4,16], index: 1, kind: input, shape index: {}]   ;;  %s13154_s2 = inlined_call_operand.vmem [shape: f32[1,16], index: 2, kind: input, shape index: {}]   ;;  %s13155_s3 = inlined_call_operand.vmem [shape: f32[1,16], index: 3, kind: input, shape index: {}]   ;;  %s13156_s4 = inlined_call_operand.vmem [shape: f32[10,1], index: 4, kind: input, shape index: {}]   ;;  %s13157_s5 = inlined_call_operand.vmem [shape: f32[10,1], index: 5, kind: input, shape index: {}]   ;;  %s13158_s6 = inlined_call_operand.vmem [shape: f32[10,1], index: 6, kind: input, shape index: {}]   ;;  %s13159_s7 = inlined_call_operand.vmem [shape: f32[10,1], index: 7, kind: input, shape index: {}]   ;;  %s13160_s8 = inlined_call_operand.hbm [shape: f32[10,10], index: 8, kind: input, shape index: {}]   ;;  %s13161_s9 = inlined_call_operand.vmem [shape: f32[10,1], index: 9, kind: input, shape index: {}]   ;;  %s13162_s10 = inlined_call_operand.vmem [shape: f32[10,1], index: 10, kind: input, shape index: {}]   ;;  %s13163_s11 = inlined_call_operand.vmem [shape: f32[10,1], index: 11, kind: input, shape index: {}]   ;;  %s13164_s12 = inlined_call_operand.vmem [shape: f32[10,16,128], index: 12, kind: input, shape index: {}]   ;;  %s13165_s13 = inlined_call_operand.vmem [shape: f32[1,128], index: 13, kind: input, shape index: {}]   ;;  %s13166_s14 = inlined_call_operand.hbm [shape: f32[8,128], index: 14, kind: output, shape index: {}]  }
   0x1   :  { %20 = vsyncpa [#allocation6], 0 }
   0x2   :  { %21 = vsyncpa [#allocation4], 0  ;;  %s7870_s29 = smov [#allocation5]   ;;  %s7776_s17 = scalar_lea.hbm %s13153_s1, 512 }
   0x3   :  { %s39_s30 = sshll.u32 %s7870_s29, 4  ;;  %p7777_p0 = scmp.ne.s32.totalorder %s13153_s1, %s7776_s17  ;;  %s40_s30 = int_to_ptr.vmem [resolvable:$true] %s39_s30 }
   0x4   :  { %p7780_p1 = scmp.lt.u32.totalorder %s7776_s17, %s13153_s1 }
   0x6   :  { %p7782_p2 = pnand %p7780_p1, %p7777_p0 }
   0x8   :  { %7785 = shalt.err (!%p7782_p2)
}
   0x9   :  { %s7786_s22 = scalar_lea.vmem %s40_s30, 512  ;;  %p7791_p4 = scmp.lt.s32.totalorder %s40_s30, %s40_s30 }
   0xa   :  { %p7787_p3 = scmp.ne.s32.totalorder %s40_s30, %s7786_s22  ;;  %p7792_p5 = scmp.lt.s32.totalorder %s7786_s22, %s7786_s22 }
   0xc   :  { %p7793_p6 = por %p7792_p5, %p7791_p4 }
   0xe   :  { %p7794_p7 = pnand %p7793_p6, %p7787_p3 }
  0x10   :  { %7797 = shalt.err (!%p7794_p7)
}
  0x11   :  { %s7871_s23 = smov 64   ;;  %s7872_s24 = smov 4  }
  0x12   :  { %45 = dma.hbm_to_vmem [thread:$0]  %s13153_s1, 512, %s40_s30, [#allocation6], %s7871_s23, %s7871_s23, %s7872_s24  }
  0x13   :  { %s7873_s27 = smov [#allocation2]   ;;  %s7798_s16 = scalar_lea.hbm %s13152_s0, 128 }
  0x14   :  { %s27_s28 = sshll.u32 %s7873_s27, 4  ;;  %p7799_p8 = scmp.ne.s32.totalorder %s13152_s0, %s7798_s16  ;;  %s28_s28 = int_to_ptr.vmem [resolvable:$true] %s27_s28 }
  0x15   :  { %p7802_p9 = scmp.lt.u32.totalorder %s7798_s16, %s13152_s0 }
  0x17   :  { %p7804_p10 = pnand %p7802_p9, %p7799_p8 }
  0x19   :  { %7807 = shalt.err (!%p7804_p10)
}
  0x1a   :  { %s7808_s21 = scalar_lea.vmem %s28_s28, 128  ;;  %p7813_p12 = scmp.lt.s32.totalorder %s28_s28, %s28_s28 }
  0x1b   :  { %p7809_p11 = scmp.ne.s32.totalorder %s28_s28, %s7808_s21  ;;  %p7814_p13 = scmp.lt.s32.totalorder %s7808_s21, %s7808_s21 }
  0x1d   :  { %p7815_p0 = por %p7814_p13, %p7813_p12 }
  0x1f   :  { %p7816_p1 = pnand %p7815_p0, %p7809_p11 }
  0x21   :  { %7819 = shalt.err (!%p7816_p1)
}
  0x22   :  { %s7874_s1 = smov 16   ;;  %s7875_s30 = smov 1  }
  0x23   :  { %33 = dma.hbm_to_vmem [thread:$0]  %s13152_s0, 128, %s28_s28, [#allocation3], %s7874_s1, %s7874_s1, %s7875_s30  }
  0x24   :  { %s7876_s24 = smov [#allocation7]   ;;  %s7820_s29 = scalar_lea.hbm %s13160_s8, 256 }
  0x25   :  { %s63_s25 = sshll.u32 %s7876_s24, 4  ;;  %p7821_p2 = scmp.ne.s32.totalorder %s13160_s8, %s7820_s29  ;;  %s64_s25 = int_to_ptr.vmem [resolvable:$true] %s63_s25 }
  0x26   :  { %p7824_p3 = scmp.lt.u32.totalorder %s7820_s29, %s13160_s8 }
  0x28   :  { %p7826_p4 = pnand %p7824_p3, %p7821_p2 }
  0x2a   :  { %7829 = shalt.err (!%p7826_p4)
}
  0x2b   :  { %s7830_s19 = scalar_lea.vmem %s64_s25, 256  ;;  %p7835_p6 = scmp.lt.s32.totalorder %s64_s25, %s64_s25 }
  0x2c   :  { %p7831_p5 = scmp.ne.s32.totalorder %s64_s25, %s7830_s19  ;;  %p7836_p7 = scmp.lt.s32.totalorder %s7830_s19, %s7830_s19 }
  0x2e   :  { %p7837_p8 = por %p7836_p7, %p7835_p6 }
  0x30   :  { %p7838_p9 = pnand %p7837_p8, %p7831_p5 }
  0x32   :  { %7841 = shalt.err (!%p7838_p9)
}
  0x33   :  { %s7877_s0 = smov 128   ;;  %s7878_s28 = smov 8  }
  0x34   :  { %69 = dma.hbm_to_vmem [thread:$0]  %s13160_s8, 256, %s64_s25, [#allocation6], %s7877_s0, %s7877_s0, %s7878_s28  }
  0x35   :  { %7864 = dma.done.wait [#allocation3], 128  }
  0x36   :  { %7865 = vsyncadd [#allocation3], 4294967168 }
  0x37   :  { %7866 = dma.done.wait [#allocation6], 768  }
  0x38   :  { %7867 = vsyncadd [#allocation6], 4294966528  ;;  %v227_v0 = vlaneseq  ;;  %v7996_v1 = vld [vmem:[#allocation5] sm:$0xf]  ;;  %v7998_v2 = vld [vmem:[#allocation5 + $0x8] sm:$0xf] }
  0x39   :  { %v161_v4 = vand.u32 2147483647, %v7996_v1  ;;  %v163_v5 = vand.u32 2147483647, %v7998_v2  ;;  %v8005_v6 = vld [vmem:[#allocation5 + $0x4] sm:$0xf] }
  0x3a   :  { %v8001_v3 = vshrl.u32 %v227_v0, 7  ;;  %v162_v7 = vand.u32 2147483647, %v8005_v6  ;;  %v8008_v8 = vld [vmem:[#allocation5 + $0xc] sm:$0xf]  ;;  %vm365_vm0 = vcmask 125952  }
  0x3b   :  { %v8010_v9 = vld [vmem:[#allocation5 + $0x10] sm:$0xf]  ;;  %v169_v10 = vmax.f32 %v161_v4, 1e-12  ;;  %v171_v11 = vmax.f32 %v163_v5, 1e-12 }
  0x3c   :  { %v164_v12 = vand.u32 2147483647, %v8008_v8  ;;  %v170_v13 = vmax.f32 %v162_v7, 1e-12  ;;  %v165_v14 = vand.u32 2147483647, %v8010_v9 }
  0x3d   :  { %v8014_v15 = vld [vmem:[#allocation5 + $0x14] sm:$0xf]  ;;  %7491 = vrcp.f32 %v169_v10  ;;  %v8017_v18 = vld [vmem:[#allocation5 + $0x18] sm:$0xf]  ;;  %v8022_v21 = vld [vmem:[#allocation5 + $0x1c] sm:$0xf] }
  0x3e   :  { %v172_v16 = vmax.f32 %v164_v12, 1e-12  ;;  %v166_v17 = vand.u32 2147483647, %v8014_v15  ;;  %7493 = vrcp.f32 %v171_v11  ;;  %v8019_v19 = vmax.f32 %v165_v14, 1e-12 }
  0x3f   :  { %v167_v20 = vand.u32 2147483647, %v8017_v18  ;;  %v7879_v22 = vmov 1966171168   ;;  %7495 = vrcp.f32 %v170_v13  ;;  %v168_v25 = vand.u32 2147483647, %v8022_v21 }
  0x40   :  { %v225_v23 = vunpack.c.l.s4 %v7879_v22  ;;  %v8024_v24 = vmax.f32 %v166_v17, 1e-12  ;;  %v8027_v26 = vld [vmem:[#allocation2] sm:$0x1]  ;;  %7497 = vrcp.f32 %v172_v16  ;;  %v8031_v28 = vld [vmem:[#allocation2 + $0x1] sm:$0x1] }
  0x41   :  { %v8029_v27 = vmax.f32 %v167_v20, 1e-12  ;;  %v8033_v29 = vld [vmem:[#allocation2 + $0x2] sm:$0x1]  ;;  %7499 = vrcp.f32 %v8019_v19  ;;  %v8036_v30 = vmax.f32 %v168_v25, 1e-12 }
  0x42   :  { %v8038_v31 = vld [vmem:[#allocation2 + $0x3] sm:$0x1]  ;;  %v8040_v32 = vld [vmem:[#allocation2 + $0x4] sm:$0x1]  ;;  %7501 = vrcp.f32 %v8024_v24  ;;  %v8043_v33 = vld [vmem:[#allocation2 + $0x5] sm:$0x1]  ;;  %v226_v36 = vunpack.c.0.s8 %v225_v23 }
  0x43   :  { %v8045_v34 = vld [vmem:[#allocation2 + $0x6] sm:$0x1]  ;;  %v8047_v35 = vld [vmem:[#allocation2 + $0x7] sm:$0x1]  ;;  %7503 = vrcp.f32 %v8029_v27  ;;  %v97_v37 = vand.u32 2147483647, %v8027_v26 }
  0x44   :  { %v98_v38 = vand.u32 2147483647, %v8031_v28  ;;  %v99_v39 = vand.u32 2147483647, %v8033_v29  ;;  %7505 = vrcp.f32 %v8036_v30  ;;  %v100_v40 = vand.u32 2147483647, %v8038_v31 }
  0x45   :  { %v101_v41 = vand.u32 2147483647, %v8040_v32  ;;  %v102_v42 = vand.u32 2147483647, %v8043_v33  ;;  %v103_v43 = vand.u32 2147483647, %v8045_v34  ;;  %v8071_v51 = vsub.s32 %v226_v36, %v8001_v3 }
  0x46   :  { %v104_v44 = vand.u32 2147483647, %v8047_v35  ;;  %v8059_v45 = vmax.f32 %v97_v37, 1e-12  ;;  %v8061_v46 = vmax.f32 %v98_v38, 1e-12 }
  0x47   :  { %v8063_v47 = vmax.f32 %v99_v39, 1e-12  ;;  %v8065_v48 = vmax.f32 %v100_v40, 1e-12  ;;  %v7492_v49 = vpop.eup %7491  ;;  %v8067_v50 = vmax.f32 %v101_v41, 1e-12 }
  0x48   :  { %7507 = vrcp.f32 %v8059_v45  ;;  %v7494_v52 = vpop.eup %7493  ;;  %v185_v53 = vmul.f32 %v7492_v49, %v169_v10  ;;  %v8073_v54 = vmax.f32 %v102_v42, 1e-12  ;;  %v8079_v55 = vld [vmem:[%s13154_s2] ss:$0 sm:$0xff]  ;;  %v8081_v58 = vmax.f32 %v103_v43, 1e-12 }
  0x49   :  { %7509 = vrcp.f32 %v8061_v46  ;;  %v7496_v56 = vpop.eup %7495  ;;  %v187_v57 = vmul.f32 %v7494_v52, %v171_v11  ;;  %v8083_v59 = vmax.f32 %v104_v44, 1e-12  ;;  %v223_v63 = vcombine.high %v8079_v55, %v8079_v55  ;;  %v7314_v20 = vld [vmem:[%s13155_s3] ss:$0 sm:$0xff] }
  0x4a   :  { %7511 = vrcp.f32 %v8063_v47  ;;  %v7498_v60 = vpop.eup %7497  ;;  %v193_v61 = vsub.f32 2.0, %v185_v53  ;;  %v186_v62 = vmul.f32 %v7496_v56, %v170_v13  ;;  %v8092_v10 = vrot.slane %v8079_v55, %v8071_v51 }
  0x4b   :  { %7513 = vrcp.f32 %v8065_v48  ;;  %v7500_v4 = vpop.eup %7499  ;;  %v195_v5 = vsub.f32 2.0, %v187_v57  ;;  %v188_v7 = vmul.f32 %v7498_v60, %v172_v16  ;;  %vm346_vm1 = vcmask 130048  }
  0x4c   :  { %7515 = vrcp.f32 %v8067_v50  ;;  %v7502_v11 = vpop.eup %7501  ;;  %v201_v12 = vmul.f32 %v7492_v49, %v193_v61  ;;  %v194_v14 = vsub.f32 2.0, %v186_v62  ;;  %v189_v17 = vmul.f32 %v7500_v4, %v8019_v19 }
  0x4d   :  { %7517 = vrcp.f32 %v8073_v54  ;;  %v7504_v13 = vpop.eup %7503  ;;  %v203_v22 = vmul.f32 %v7494_v52, %v195_v5  ;;  %v196_v16 = vsub.f32 2.0, %v188_v7  ;;  %v190_v23 = vmul.f32 %v7502_v11, %v8024_v24 }
  0x4e   :  { %7519 = vrcp.f32 %v8081_v58  ;;  %v7506_v25 = vpop.eup %7505  ;;  %v8102_v36 = vmul.f32 %v201_v12, %v7996_v1  ;;  %v202_v37 = vmul.f32 %v7496_v56, %v194_v14  ;;  %v197_v38 = vsub.f32 2.0, %v189_v17 }
  0x4f   :  { %v191_v19 = vmul.f32 %v7504_v13, %v8029_v27  ;;  %v8106_v39 = vmul.f32 %v203_v22, %v7998_v2  ;;  %v204_v40 = vmul.f32 %v7498_v60, %v196_v16  ;;  %v198_v41 = vsub.f32 2.0, %v190_v23 }
  0x50   :  { %v192_v42 = vmul.f32 %v7506_v25, %v8036_v30  ;;  %v357_v43 = vmul.f32 %v7314_v20, %v8102_v36  ;;  %v8111_v24 = vmul.f32 %v202_v37, %v8005_v6  ;;  %v205_v44 = vmul.f32 %v7500_v4, %v197_v38 }
  0x51   :  { %v199_v49 = vsub.f32 2.0, %v191_v19  ;;  %v359_v52 = vmul.f32 %v7314_v20, %v8106_v39  ;;  %v8115_v53 = vmul.f32 %v204_v40, %v8008_v8  ;;  %v206_v27 = vmul.f32 %v7502_v11, %v198_v41 }
  0x52   :  { %v7508_v1 = vpop.eup %7507  ;;  %v200_v2 = vsub.f32 2.0, %v192_v42  ;;  %v366_v56 = vsel %vm365_vm0, %v357_v43, 0.0  ;;  %v358_v30 = vmul.f32 %v7314_v20, %v8111_v24  ;;  %v8120_v57 = vmul.f32 %v205_v44, %v8010_v9 }
  0x53   :  { %v7510_v55 = vpop.eup %7509  ;;  %v207_v6 = vmul.f32 %v7504_v13, %v199_v49  ;;  %367 = vadd.xlane.f32.xlu0 %v366_v56  ;;  %v372_v61 = vsel %vm365_vm0, %v359_v52, 0.0  ;;  %v360_v62 = vmul.f32 %v7314_v20, %v8115_v53  ;;  %v8125_v8 = vmul.f32 %v206_v27, %v8014_v15 }
  0x54   :  { %v7512_v60 = vpop.eup %7511  ;;  %v208_v4 = vmul.f32 %v7506_v25, %v200_v2  ;;  %373 = vadd.xlane.f32.xlu1 %v372_v61  ;;  %v369_v7 = vsel %vm365_vm0, %v358_v30, 0.0  ;;  %v361_v11 = vmul.f32 %v7314_v20, %v8120_v57  ;;  %7521 = vrcp.f32 %v8083_v59 }
  0x55   :  { %v7514_v5 = vpop.eup %7513  ;;  %v8130_v9 = vmul.f32 %v207_v6, %v8017_v18  ;;  %v375_v14 = vsel %vm365_vm0, %v360_v62, 0.0  ;;  %v362_v17 = vmul.f32 %v7314_v20, %v8125_v8  ;;  %v121_v13 = vmul.f32 %v7508_v1, %v8059_v45 }
  0x56   :  { %v7516_v12 = vpop.eup %7515  ;;  %v8136_v15 = vmul.f32 %v208_v4, %v8022_v21  ;;  %v122_v23 = vmul.f32 %v7510_v55, %v8061_v46  ;;  %v123_v18 = vmul.f32 %v7512_v60, %v8063_v47  ;;  %v237_v25 = vrot.slane %v223_v63, %v8071_v51 }
  0x57   :  { %v7518_v22 = vpop.eup %7517  ;;  %v363_v16 = vmul.f32 %v7314_v20, %v8130_v9  ;;  %370 = vadd.xlane.f32.xlu0 %v369_v7  ;;  %v378_v38 = vsel %vm365_vm0, %v361_v11, 0.0  ;;  %v381_v19 = vsel %vm365_vm0, %v362_v17, 0.0  ;;  %v124_v21 = vmul.f32 %v7514_v5, %v8065_v48 }
  0x58   :  { %v7520_v37 = vpop.eup %7519  ;;  %v125_v40 = vmul.f32 %v7516_v12, %v8067_v50  ;;  %376 = vadd.xlane.f32.xlu1 %v375_v14  ;;  %v364_v45 = vmul.f32 %v7314_v20, %v8136_v15  ;;  %v126_v41 = vmul.f32 %v7518_v22, %v8073_v54  ;;  %v129_v47 = vsub.f32 2.0, %v121_v13 }
  0x59   :  { %v127_v46 = vmul.f32 %v7520_v37, %v8081_v58  ;;  %v384_v63 = vsel %vm365_vm0, %v363_v16, 0.0  ;;  %v130_v42 = vsub.f32 2.0, %v122_v23  ;;  %v131_v43 = vsub.f32 2.0, %v123_v18 }
  0x5a   :  { %v132_v44 = vsub.f32 2.0, %v124_v21  ;;  %v133_v49 = vsub.f32 2.0, %v125_v40  ;;  %v134_v52 = vsub.f32 2.0, %v126_v41  ;;  %v137_v2 = vmul.f32 %v7508_v1, %v129_v47 }
  0x5b   :  { %v135_v27 = vsub.f32 2.0, %v127_v46  ;;  %379 = vadd.xlane.f32.xlu0 %v378_v38  ;;  %v138_v48 = vmul.f32 %v7510_v55, %v130_v42  ;;  %v139_v50 = vmul.f32 %v7512_v60, %v131_v43  ;;  %v238_v20 = vcombine.high %v8092_v10, %v8092_v10 }
  0x5c   :  { %v140_v56 = vmul.f32 %v7514_v5, %v132_v44  ;;  %382 = vadd.xlane.f32.xlu1 %v381_v19  ;;  %v387_v54 = vsel %vm365_vm0, %v364_v45, 0.0  ;;  %v141_v58 = vmul.f32 %v7516_v12, %v133_v49  ;;  %v142_v30 = vmul.f32 %v7518_v22, %v134_v52 }
  0x5d   :  { %v145_v6 = vmul.f32 %v137_v2, %v8027_v26  ;;  %v143_v61 = vmul.f32 %v7520_v37, %v135_v27  ;;  %v146_v62 = vmul.f32 %v138_v48, %v8031_v28  ;;  %v147_v4 = vmul.f32 %v139_v50, %v8033_v29 }
  0x5e   :  { %v239_v1 = vcombine.high %v237_v25, %v237_v25  ;;  %v7522_v7 = vpop.eup %7521  ;;  %v8158_v55 = vmul.f32 %v140_v56, %v8038_v31  ;;  %v8161_v60 = vmul.f32 %v141_v58, %v8040_v32  ;;  %v8164_v5 = vmul.f32 %v142_v30, %v8043_v33 }
  0x5f   :  { %v246_v11 = vrot.slane %v8092_v10, %v8071_v51  ;;  %385 = vadd.xlane.f32.xlu0 %v384_v63  ;;  %v128_v26 = vmul.f32 %v7522_v7, %v8083_v59  ;;  %v253_v28 = vrot.slane %v237_v25, %v8071_v51  ;;  %v260_v29 = vrot.slane %v238_v20, %v8071_v51 }
  0x60   :  { %v267_v12 = vrot.slane %v239_v1, %v8071_v51  ;;  %388 = vadd.xlane.f32.xlu1 %v387_v54  ;;  %v8173_v17 = vmul.f32 %v143_v61, %v8045_v34  ;;  %v8191_v27 = vsub.s32 0, %v8001_v3  ;;  %v399_v56 = vand.u32 127, %v227_v0 }
  0x61   :  { %v268_v31 = vcombine.high %v246_v11, %v246_v11  ;;  %v280_v14 = vmul.f32 %v246_v11, %v145_v6  ;;  %v136_v32 = vsub.f32 2.0, %v128_v26  ;;  %v269_v33 = vcombine.high %v253_v28, %v253_v28 }
  0x62   :  { %v270_v13 = vcombine.high %v260_v29, %v260_v29  ;;  %v281_v22 = vmul.f32 %v260_v29, %v146_v62  ;;  %v284_v16 = vmul.f32 %v253_v28, %v8161_v60  ;;  %v285_v59 = vmul.f32 %v267_v12, %v8164_v5  ;;  %13445 = vst [vmem:[#allocation12_spill] sm:$0xff] %v8191_v27 }
  0x63   :  { %v282_v10 = vmul.f32 %v268_v31, %v147_v4  ;;  %v144_v23 = vmul.f32 %v7522_v7, %v136_v32  ;;  %v271_v18 = vcombine.high %v267_v12, %v267_v12  ;;  %v286_v19 = vmul.f32 %v269_v33, %v8173_v17 }
  0x64   :  { %v283_v25 = vmul.f32 %v270_v13, %v8158_v55  ;;  %v296_v37 = vcombine.low %v280_v14, %v281_v22  ;;  %v298_v21 = vcombine.low %v284_v16, %v285_v59  ;;  %v8194_v2 = vrot.slane %v145_v6, %v8191_v27 }
  0x65   :  { %v8179_v38 = vmul.f32 %v144_v23, %v8047_v35  ;;  %v8198_v48 = vrot.slane %v146_v62, %v8191_v27  ;;  %v402_v58 = vsub.s32 %v399_v56, %v8001_v3  ;;  %vm432_vm2 = vcmask 1041409  }
  0x66   :  { %v297_v34 = vcombine.low %v282_v10, %v283_v25  ;;  %v306_v40 = vrot.slane %v296_v37, %v8071_v51  ;;  %v320_v47 = vrot.slane %v298_v21, %v8071_v51  ;;  %vm434_vm3 = vcmask 1042434   ;;  %v1440_v21 = vld [vmem:[%s13158_s6 + $0x8] sm:$0x3] }
  0x67   :  { %v287_v45 = vmul.f32 %v271_v18, %v8179_v38  ;;  %vm436_vm4 = vcmask 1043459   ;;  %vm438_vm5 = vcmask 1044484   ;;  %vm440_vm6 = vcmask 1045509  }
  0x68   :  { %v313_v41 = vrot.slane %v297_v34, %v8071_v51  ;;  %vm442_vm7 = vcmask 1046534   ;;  %vm444_vm8 = vcmask 1047559   ;;  %vm448_vm9 = vcmask 31744   ;;  %v1151_v34 = vld [vmem:[%s13156_s4] sm:$0xff] }
  0x69   :  { %v299_v46 = vcombine.low %v286_v19, %v287_v45  ;;  %v8220_v18 = vrot.slane %v8158_v55, %v8191_v27  ;;  %v8225_v25 = vrot.slane %v8161_v60, %v8191_v27  ;;  %v7880_v37 = vmov 0  }
  0x6a   :  { %v328_v63 = vcombine.low %v306_v40, %v313_v41  ;;  %7490 = vset.pattern.permute.xlu0 %v7880_v37  ;;  %7489 = vset.pattern.permute.xlu1 %v7880_v37  ;;  %v8230_v19 = vrot.slane %v8164_v5, %v8191_v27  ;;  %v8235_v55 = vrot.slane %v8173_v17, %v8191_v27  ;;  %v1152_v5 = vld [vmem:[%s13156_s4 + $0x8] sm:$0x3] }
  0x6b   :  { %v327_v42 = vrot.slane %v299_v46, %v8071_v51  ;;  %v8240_v60 = vrot.slane %v8179_v38, %v8191_v27  ;;  %v1180_v17 = vld [vmem:[%s13157_s5 + $0x8] sm:$0x3]  ;;  %v1467_v38 = vld [vmem:[%s13159_s7] sm:$0xff] }
  0x6c   :  { %v336_v35 = vrot.slane %v328_v63, %v8071_v51  ;;  %v1468_v40 = vld [vmem:[%s13159_s7 + $0x8] sm:$0x3]  ;;  %s7884_s7 = smov [#allocation8]  }
  0x6d   :  { %v329_v43 = vcombine.low %v320_v47, %v327_v42  ;;  %v8263_v42 = vsub.s32 1, %v8001_v3  ;;  %s7303_s19 = sshll.u32 %s7884_s7, 4  ;;  %s7304_s19 = int_to_ptr.vmem [resolvable:$true] %s7303_s19 }
  0x6e   :  { %s7842_s0 = scalar_lea.vmem %s7304_s19, 128  ;;  %p7847_p11 = scmp.lt.s32.totalorder %s7304_s19, %s7304_s19 }
  0x6f   :  { %v343_v44 = vrot.slane %v329_v43, %v8071_v51  ;;  %v8202_v51 = vrot.slane %v147_v4, %v8191_v27  ;;  %13446 = vst [vmem:[#allocation13_spill] sm:$0xff] %v8263_v42  ;;  %v3367_v43 = vld [vmem:[#allocation7] sm:$0xff]  ;;  %p7843_p10 = scmp.ne.s32.totalorder %s7304_s19, %s7842_s0  ;;  %p7848_p12 = scmp.lt.s32.totalorder %s7842_s0, %s7842_s0 }
  0x71   :  { %v344_v49 = vcombine.low %v336_v35, %v343_v44  ;;  %v3383_v35 = vrot.slane %v3367_v43, %v8263_v42  ;;  %v8267_v44 = vsub.s32 2, %v8001_v3  ;;  %p7849_p13 = por %p7848_p12, %p7847_p11 }
  0x73   :  { %v347_v52 = vsel %vm346_vm1, %v344_v49, 0.0  ;;  %13447 = vst [vmem:[#allocation14_spill] sm:$0xff] %v8267_v44  ;;  %v3394_v49 = vrot.slane %v3367_v43, %v8267_v44  ;;  %p7850_p0 = pnand %p7849_p13, %p7843_p10 }
  0x74   :  { %348 = vadd.xlane.f32.xlu0 %v347_v52  ;;  %v3372_v52 = vrot.slane %v3367_v43, %v8191_v27 }
  0x8a   :  { %592 = vbcast.lane.b32.xlu0 %v8194_v2, 264 }
  0x8e   :  { %603 = vbcast.lane.b32.xlu0 %v8198_v48, 264 }
  0x92   :  { %614 = vbcast.lane.b32.xlu0 %v8202_v51, 264 }
  0xe0   :  { %v368_v50 = vpop.xlane.xlu0 %367 }
  0xe1   :  { %v374_v20 = vpop.xlane.xlu1 %373  ;;  %v403_v61 = vrot.slane %v368_v50, %v402_v58  ;;  %v8273_v50 = vsub.s32 3, %v8001_v3 }
  0xe2   :  { %v411_v7 = vrot.slane %v374_v20, %v402_v58  ;;  %v8278_v20 = vsub.s32 4, %v8001_v3 }
  0xe3   :  { %13448 = vst [vmem:[#allocation15_spill] sm:$0xff] %v8273_v50  ;;  %v3405_v56 = vrot.slane %v3367_v43, %v8273_v50 }
  0xe4   :  { %v371_v54 = vpop.xlane.xlu0 %370  ;;  %13449 = vst [vmem:[#allocation16_spill] sm:$0xff] %v8278_v20 }
  0xe5   :  { %v407_v30 = vrot.slane %v371_v54, %v402_v58  ;;  %v377_v6 = vpop.xlane.xlu1 %376  ;;  %v3416_v54 = vrot.slane %v3367_v43, %v8278_v20 }
  0xe6   :  { %v415_v4 = vrot.slane %v377_v6, %v402_v58 }
  0xe7   :  { %v433_v62 = vsel %vm432_vm2, %v407_v30, %v403_v61  ;;  %v1439_v30 = vld [vmem:[%s13158_s6] sm:$0xff] }
  0xe8   :  { %v380_v1 = vpop.xlane.xlu0 %379  ;;  %v435_v11 = vsel %vm434_vm3, %v411_v7, %v433_v62 }
  0xe9   :  { %v383_v26 = vpop.xlane.xlu1 %382  ;;  %v419_v28 = vrot.slane %v380_v1, %v402_v58  ;;  %v437_v0 = vsel %vm436_vm4, %v415_v4, %v435_v11 }
  0xea   :  { %v423_v12 = vrot.slane %v383_v26, %v402_v58 }
  0xeb   :  { %v439_v31 = vsel %vm438_vm5, %v419_v28, %v437_v0 }
  0xec   :  { %v386_v29 = vpop.xlane.xlu0 %385  ;;  %v441_v33 = vsel %vm440_vm6, %v423_v12, %v439_v31  ;;  %v8299_v12 = vsub.s32 5, %v8001_v3 }
  0xed   :  { %v427_v14 = vrot.slane %v386_v29, %v402_v58  ;;  %v389_v32 = vpop.xlane.xlu1 %388 }
  0xee   :  { %v431_v13 = vrot.slane %v389_v32, %v402_v58  ;;  %v1179_v58 = vld [vmem:[%s13157_s5] sm:$0xff]  ;;  %13450 = vst [vmem:[#allocation17_spill] sm:$0xff] %v8299_v12  ;;  %v8304_v32 = vsub.s32 7, %v8001_v3 }
  0xef   :  { %v443_v22 = vsel %vm442_vm7, %v427_v14, %v441_v33 }
  0xf0   :  { %v445_v10 = vsel %vm444_vm8, %v431_v13, %v443_v22  ;;  %13451 = vst [vmem:[#allocation18_spill] sm:$0xff] %v8304_v32 }
 0x101   :  { %v349_v16 = vpop.xlane.xlu0 %348 }
 0x102   :  { %v447_v59 = vmul.f32 %v445_v10, %v349_v16 }
 0x104   :  { %v449_v23 = vsel %vm448_vm9, %v447_v59, -inf }
 0x105   :  { %450 = vmax.xlane.f32.xlu1 %v449_v23  ;;  %v8290_v6 = vpop.permute.xlu0 %592 }
 0x109   :  { %v8292_v61 = vpop.permute.xlu0 %603 }
 0x10d   :  { %v8294_v62 = vpop.permute.xlu0 %614 }
 0x116   :  { %588 = vbcast.lane.b32.xlu1 %v8194_v2, 256 }
 0x11a   :  { %599 = vbcast.lane.b32.xlu1 %v8198_v48, 256 }
 0x11e   :  { %610 = vbcast.lane.b32.xlu1 %v8202_v51, 256 }
 0x122   :  { %621 = vbcast.lane.b32.xlu1 %v8220_v18, 256 }
 0x126   :  { %632 = vbcast.lane.b32.xlu1 %v8225_v25, 256 }
 0x12a   :  { %643 = vbcast.lane.b32.xlu1 %v8230_v19, 256 }
 0x12e   :  { %654 = vbcast.lane.b32.xlu1 %v8235_v55, 256 }
 0x132   :  { %665 = vbcast.lane.b32.xlu1 %v8240_v60, 256 }
 0x136   :  { %1155 = vperm.xlu1 %7489, %v1151_v34  }
 0x13a   :  { %1160 = vperm.xlu1 %7489, %v1152_v5  }
 0x13e   :  { %1188 = vperm.xlu1 %7489, %v1180_v17  }
 0x142   :  { %1471 = vperm.xlu1 %7489, %v1467_v38  }
 0x146   :  { %1448 = vperm.xlu1 %7489, %v1440_v21  }
 0x14a   :  { %1476 = vperm.xlu1 %7489, %v1468_v40  }
 0x14e   :  { %3389 = vbcast.lane.b32.xlu1 %v3383_v35, 264 }
 0x152   :  { %3400 = vbcast.lane.b32.xlu1 %v3394_v49, 264 }
 0x156   :  { %3378 = vbcast.lane.b32.xlu1 %v3372_v52, 264 }
 0x15a   :  { %3411 = vbcast.lane.b32.xlu1 %v3405_v56, 264 }
 0x15e   :  { %3422 = vbcast.lane.b32.xlu1 %v3416_v54, 264 }
 0x192   :  { %v451_v45 = vpop.xlane.xlu1 %450 }
 0x193   :  { %v452_v41 = vsub.f32 %v447_v59, %v451_v45  ;;  %v8314_v59 = vsub.s32 6, %v8001_v3 }
 0x195   :  { %v453_v46 = vmul.f32 1.442695, %v452_v41  ;;  %13452 = vst [vmem:[#allocation19_spill] sm:$0xff] %v8314_v59 }
 0x196   :  { %v8306_v33 = vpop.permute.xlu1 %588 }
 0x197   :  { %7523 = vpow2.f32 %v453_v46 }
 0x19a   :  { %v8310_v10 = vpop.permute.xlu1 %599 }
 0x19e   :  { %v8317_v37 = vpop.permute.xlu1 %610 }
 0x1a1   :  { %v7524_v47 = vpop.eup %7523 }
 0x1a2   :  { %v455_v63 = vsel %vm448_vm9, %v7524_v47, 0.0  ;;  %v8319_v34 = vpop.permute.xlu1 %621 }
 0x1a3   :  { %456 = vadd.xlane.f32.xlu0 %v455_v63 }
 0x1a6   :  { %v8321_v5 = vpop.permute.xlu1 %632 }
 0x1aa   :  { %v8323_v17 = vpop.permute.xlu1 %643 }
 0x1ae   :  { %v8325_v38 = vpop.permute.xlu1 %654 }
 0x1b2   :  { %v8327_v21 = vpop.permute.xlu1 %665 }
 0x1b6   :  { %v8331_v3 = vpop.permute.xlu1 %1155 }
 0x1b9   :  { %625 = vbcast.lane.b32.xlu0 %v8220_v18, 264 }
 0x1ba   :  { %v8335_v41 = vpop.permute.xlu1 %1160 }
 0x1bd   :  { %636 = vbcast.lane.b32.xlu0 %v8225_v25, 264 }
 0x1c1   :  { %647 = vbcast.lane.b32.xlu0 %v8230_v19, 264 }
 0x1c5   :  { %658 = vbcast.lane.b32.xlu0 %v8235_v55, 264 }
 0x1c9   :  { %669 = vbcast.lane.b32.xlu0 %v8240_v60, 264 }
 0x1cd   :  { %1183 = vperm.xlu0 %7490, %v1179_v58  }
 0x1d1   :  { %1443 = vperm.xlu0 %7490, %v1439_v30  }
 0x1d5   :  { %3385 = vbcast.lane.b32.xlu0 %v3383_v35, 256 }
 0x1d9   :  { %3396 = vbcast.lane.b32.xlu0 %v3394_v49, 256 }
 0x1dd   :  { %3374 = vbcast.lane.b32.xlu0 %v3372_v52, 256 }
 0x1e1   :  { %3407 = vbcast.lane.b32.xlu0 %v3405_v56, 256 }
 0x1e5   :  { %3418 = vbcast.lane.b32.xlu0 %v3416_v54, 256 }
 0x230   :  { %v457_v1 = vpop.xlane.xlu0 %456 }
 0x231   :  { %7525 = vrcp.f32 %v457_v1 }
 0x234   :  { %v8329_v40 = vpop.permute.xlu0 %625 }
 0x238   :  { %v8333_v45 = vpop.permute.xlu0 %636 }
 0x23b   :  { %v7526_v7 = vpop.eup %7525 }
 0x23c   :  { %v459_v4 = vmul.f32 %v7526_v7, %v457_v1  ;;  %v8337_v46 = vpop.permute.xlu0 %647 }
 0x23e   :  { %v460_v11 = vsub.f32 2.0, %v459_v4 }
 0x240   :  { %v461_v26 = vmul.f32 %v7526_v7, %v460_v11  ;;  %v8341_v63 = vpop.permute.xlu0 %658 }
 0x242   :  { %v462_v28 = vmul.f32 %v7524_v47, %v461_v26  ;;  %v8339_v47 = vpop.permute.xlu1 %1188 }
 0x244   :  { %v473_v0 = vrot.slane %v462_v28, %v8263_v42  ;;  %v466_v29 = vrot.slane %v462_v28, %v8191_v27  ;;  %v501_v31 = vrot.slane %v462_v28, %v8299_v12  ;;  %v480_v14 = vrot.slane %v462_v28, %v8267_v44  ;;  %v8345_v35 = vpop.permute.xlu0 %669 }
 0x245   :  { %v515_v13 = vrot.slane %v462_v28, %v8304_v32  ;;  %v487_v22 = vrot.slane %v462_v28, %v8273_v50  ;;  %v494_v16 = vrot.slane %v462_v28, %v8278_v20  ;;  %v508_v23 = vrot.slane %v462_v28, %v8314_v59 }
 0x246   :  { %475 = vbcast.lane.b32.xlu0 %v473_v0, 256  ;;  %468 = vbcast.lane.b32.xlu1 %v466_v29, 256  ;;  %v8343_v43 = vpop.permute.xlu1 %1471 }
 0x247   :  { %13453 = vst [vmem:[#allocation20_spill] sm:$0xff] %v8343_v43 }
 0x24a   :  { %503 = vbcast.lane.b32.xlu0 %v501_v31, 256  ;;  %482 = vbcast.lane.b32.xlu1 %v480_v14, 256  ;;  %v8349_v52 = vpop.permute.xlu1 %1448 }
 0x24b   :  { %13454 = vst [vmem:[#allocation21_spill] sm:$0xff] %v8349_v52 }
 0x24c   :  { %v8347_v49 = vpop.permute.xlu0 %1183 }
 0x24e   :  { %517 = vbcast.lane.b32.xlu0 %v515_v13, 256  ;;  %489 = vbcast.lane.b32.xlu1 %v487_v22, 256  ;;  %v8353_v54 = vpop.permute.xlu1 %1476 }
 0x24f   :  { %13455 = vst [vmem:[#allocation22_spill] sm:$0xff] %v8353_v54 }
 0x250   :  { %v8351_v56 = vpop.permute.xlu0 %1443 }
 0x252   :  { %496 = vbcast.lane.b32.xlu1 %v494_v16, 256  ;;  %v8355_v58 = vpop.permute.xlu1 %3389 }
 0x253   :  { %13456 = vst [vmem:[#allocation23_spill] sm:$0xff] %v8355_v58 }
 0x254   :  { %v8357_v30 = vpop.permute.xlu0 %3385 }
 0x255   :  { %13457 = vst [vmem:[#allocation24_spill] sm:$0xff] %v8357_v30 }
 0x256   :  { %510 = vbcast.lane.b32.xlu1 %v508_v23, 256  ;;  %v8359_v1 = vpop.permute.xlu1 %3400 }
 0x257   :  { %13458 = vst [vmem:[#allocation25_spill] sm:$0xff] %v8359_v1 }
 0x258   :  { %v8361_v7 = vpop.permute.xlu0 %3396 }
 0x259   :  { %13459 = vst [vmem:[#allocation26_spill] sm:$0xff] %v8361_v7 }
 0x25a   :  { %v8363_v4 = vpop.permute.xlu1 %3378 }
 0x25b   :  { %13460 = vst [vmem:[#allocation27_spill] sm:$0xff] %v8363_v4 }
 0x25c   :  { %v8365_v11 = vpop.permute.xlu0 %3374 }
 0x25d   :  { %13461 = vst [vmem:[#allocation28_spill] sm:$0xff] %v8365_v11 }
 0x25e   :  { %v8367_v26 = vpop.permute.xlu1 %3411 }
 0x25f   :  { %13462 = vst [vmem:[#allocation29_spill] sm:$0xff] %v8367_v26 }
 0x260   :  { %v8369_v28 = vpop.permute.xlu0 %3407 }
 0x261   :  { %13463 = vst [vmem:[#allocation30_spill] sm:$0xff] %v8369_v28 }
 0x262   :  { %v8371_v0 = vpop.permute.xlu1 %3422 }
 0x263   :  { %13464 = vst [vmem:[#allocation31_spill] sm:$0xff] %v8371_v0 }
 0x264   :  { %v8373_v29 = vpop.permute.xlu0 %3418 }
 0x265   :  { %13465 = vst [vmem:[#allocation32_spill] sm:$0xff] %v8373_v29 }
 0x2b8   :  { %v469_v31 = vpop.permute.xlu1 %468  ;;  %v476_v14 = vpop.permute.xlu0 %475 }
 0x2b9   :  { %v519_v13 = vmul.f32 %v469_v31, %v8102_v36  ;;  %v520_v22 = vmul.f32 %v476_v14, %v8111_v24 }
 0x2bb   :  { %v527_v16 = vsel %vm365_vm0, %v519_v13, 0.0  ;;  %v534_v23 = vsel %vm365_vm0, %v520_v22, 0.0 }
 0x2bc   :  { %v528_v1 = vrot.slane %v527_v16, 4  ;;  %v535_v58 = vrot.slane %v534_v23, 4  ;;  %v483_v4 = vpop.permute.xlu1 %482  ;;  %v504_v26 = vpop.permute.xlu0 %503 }
 0x2bd   :  { %v521_v28 = vmul.f32 %v483_v4, %v8106_v39  ;;  %v524_v29 = vmul.f32 %v504_v26, %v8125_v8 }
 0x2be   :  { %v529_v7 = vadd.f32 %v528_v1, %v527_v16  ;;  %v536_v0 = vadd.f32 %v535_v58, %v534_v23 }
 0x2bf   :  { %v541_v30 = vsel %vm365_vm0, %v521_v28, 0.0  ;;  %v562_v52 = vsel %vm365_vm0, %v524_v29, 0.0 }
 0x2c0   :  { %v530_v11 = vrot.slane %v529_v7, 2  ;;  %v537_v36 = vrot.slane %v536_v0, 2  ;;  %v542_v31 = vrot.slane %v541_v30, 4  ;;  %v490_v24 = vpop.permute.xlu1 %489  ;;  %v518_v39 = vpop.permute.xlu0 %517  ;;  %v563_v8 = vrot.slane %v562_v52, 4 }
 0x2c1   :  { %v522_v14 = vmul.f32 %v490_v24, %v8115_v53  ;;  %v526_v59 = vmul.f32 %v518_v39, %v8136_v15 }
 0x2c2   :  { %v531_v13 = vadd.f32 %v530_v11, %v529_v7  ;;  %v538_v22 = vadd.f32 %v537_v36, %v536_v0  ;;  %v543_v54 = vadd.f32 %v542_v31, %v541_v30  ;;  %v564_v29 = vadd.f32 %v563_v8, %v562_v52 }
 0x2c3   :  { %v548_v32 = vsel %vm365_vm0, %v522_v14, 0.0  ;;  %v576_v14 = vsel %vm365_vm0, %v526_v59, 0.0 }
 0x2c4   :  { %v532_v1 = vrot.slane %v531_v13, 1  ;;  %v544_v58 = vrot.slane %v543_v54, 2  ;;  %v497_v4 = vpop.permute.xlu1 %496  ;;  %v549_v26 = vrot.slane %v548_v32, 4  ;;  %v539_v16 = vrot.slane %v538_v22, 1 }
 0x2c5   :  { %v523_v28 = vmul.f32 %v497_v4, %v8120_v57  ;;  %v565_v39 = vrot.slane %v564_v29, 2 }
 0x2c6   :  { %v545_v23 = vadd.f32 %v544_v58, %v543_v54  ;;  %v533_v53 = vadd.f32 %v532_v1, %v531_v13  ;;  %v550_v7 = vadd.f32 %v549_v26, %v548_v32  ;;  %v540_v4 = vadd.f32 %v539_v16, %v538_v22 }
 0x2c7   :  { %v555_v30 = vsel %vm365_vm0, %v523_v28, 0.0  ;;  %v577_v1 = vrot.slane %v576_v14, 4 }
 0x2c8   :  { %v556_v11 = vrot.slane %v555_v30, 4  ;;  %692 = vbcast.lane.b32.xlu0 %v533_v53, 264  ;;  %688 = vbcast.lane.b32.xlu1 %v533_v53, 256  ;;  %v511_v0 = vpop.permute.xlu1 %510  ;;  %v551_v36 = vrot.slane %v550_v7, 2  ;;  %v546_v24 = vrot.slane %v545_v23, 1 }
 0x2c9   :  { %v525_v31 = vmul.f32 %v511_v0, %v8130_v9  ;;  %v566_v9 = vadd.f32 %v565_v39, %v564_v29  ;;  %v578_v28 = vadd.f32 %v577_v1, %v576_v14 }
 0x2ca   :  { %v557_v57 = vadd.f32 %v556_v11, %v555_v30  ;;  %v552_v54 = vadd.f32 %v551_v36, %v550_v7  ;;  %v547_v8 = vadd.f32 %v546_v24, %v545_v23 }
 0x2cb   :  { %v569_v15 = vsel %vm365_vm0, %v525_v31, 0.0  ;;  %v567_v16 = vrot.slane %v566_v9, 1  ;;  %v579_v7 = vrot.slane %v578_v28, 2 }
 0x2cc   :  { %v558_v13 = vrot.slane %v557_v57, 2  ;;  %v570_v32 = vrot.slane %v569_v15, 4  ;;  %699 = vbcast.lane.b32.xlu0 %v540_v4, 264  ;;  %695 = vbcast.lane.b32.xlu1 %v540_v4, 256  ;;  %v553_v58 = vrot.slane %v552_v54, 1 }
 0x2cd   :  { %v580_v36 = vadd.f32 %v579_v7, %v578_v28  ;;  %v8395_v31 = vadd.f32 %v567_v16, %v566_v9  ;;  %v674_v9 = vmul.f32 %v8292_v61, %v540_v4 }
 0x2ce   :  { %v559_v26 = vadd.f32 %v558_v13, %v557_v57  ;;  %v571_v52 = vadd.f32 %v570_v32, %v569_v15  ;;  %v554_v22 = vadd.f32 %v553_v58, %v552_v54  ;;  %v671_v15 = vmul.f32 %v8306_v33, %v533_v53 }
 0x2cf   :  { %v581_v29 = vrot.slane %v580_v36, 1  ;;  %v672_v32 = vmul.f32 %v8290_v6, %v533_v53 }
 0x2d0   :  { %706 = vbcast.lane.b32.xlu0 %v547_v8, 264  ;;  %702 = vbcast.lane.b32.xlu1 %v547_v8, 256  ;;  %v560_v59 = vrot.slane %v559_v26, 1  ;;  %v572_v30 = vrot.slane %v571_v52, 2 }
 0x2d1   :  { %v8403_v14 = vadd.f32 %v581_v29, %v580_v36 }
 0x2d2   :  { %v573_v11 = vadd.f32 %v572_v30, %v571_v52  ;;  %v8391_v0 = vadd.f32 %v560_v59, %v559_v26  ;;  %v673_v52 = vmul.f32 %v8310_v10, %v540_v4 }
 0x2d4   :  { %713 = vbcast.lane.b32.xlu0 %v554_v22, 264  ;;  %709 = vbcast.lane.b32.xlu1 %v554_v22, 256  ;;  %v574_v23 = vrot.slane %v573_v11, 1 }
 0x2d6   :  { %v8399_v24 = vadd.f32 %v574_v23, %v573_v11  ;;  %v675_v23 = vmul.f32 %v8317_v37, %v547_v8 }
 0x2d8   :  { %720 = vbcast.lane.b32.xlu0 %v8391_v0, 264  ;;  %716 = vbcast.lane.b32.xlu1 %v8391_v0, 256 }
 0x2dc   :  { %727 = vbcast.lane.b32.xlu0 %v8395_v31, 264  ;;  %723 = vbcast.lane.b32.xlu1 %v8395_v31, 256 }
 0x2e0   :  { %734 = vbcast.lane.b32.xlu0 %v8399_v24, 264  ;;  %730 = vbcast.lane.b32.xlu1 %v8399_v24, 256 }
 0x2e4   :  { %741 = vbcast.lane.b32.xlu0 %v8403_v14, 264  ;;  %737 = vbcast.lane.b32.xlu1 %v8403_v14, 256 }
 0x33a   :  { %v689_v57 = vpop.permute.xlu1 %688  ;;  %v693_v54 = vpop.permute.xlu0 %692 }
 0x33b   :  { %v791_v13 = vmul.f32 %v689_v57, %v8194_v2  ;;  %v792_v39 = vmul.f32 %v693_v54, %v8194_v2 }
 0x33d   :  { %v807_v1 = vadd.f32 %v791_v13, %v671_v15  ;;  %v8411_v58 = vadd.f32 %v792_v39, %v672_v32 }
 0x33e   :  { %v696_v26 = vpop.permute.xlu1 %695  ;;  %v700_v28 = vpop.permute.xlu0 %699 }
 0x33f   :  { %v823_v59 = vand.u32 2147483647, %v807_v1  ;;  %v824_v30 = vand.u32 2147483647, %v8411_v58  ;;  %v793_v16 = vmul.f32 %v696_v26, %v8198_v48  ;;  %v794_v7 = vmul.f32 %v700_v28, %v8198_v48 }
 0x340   :  { %v676_v48 = vmul.f32 %v8294_v62, %v547_v8 }
 0x341   :  { %v839_v11 = vadd.f32 1e-30, %v823_v59  ;;  %v840_v53 = vadd.f32 1e-30, %v824_v30  ;;  %v8418_v36 = vadd.f32 %v793_v16, %v673_v52  ;;  %v8420_v2 = vadd.f32 %v794_v7, %v674_v9 }
 0x342   :  { %v703_v29 = vpop.permute.xlu1 %702  ;;  %v707_v57 = vpop.permute.xlu0 %706  ;;  %v677_v9 = vmul.f32 %v8319_v34, %v554_v22  ;;  %v678_v59 = vmul.f32 %v8329_v40, %v554_v22  ;;  %v679_v22 = vmul.f32 %v8321_v5, %v8391_v0 }
 0x343   :  { %7527 = vrsqrt.f32 %v839_v11  ;;  %v825_v4 = vand.u32 2147483647, %v8418_v36  ;;  %v826_v54 = vand.u32 2147483647, %v8420_v2  ;;  %v795_v15 = vmul.f32 %v703_v29, %v8202_v51 }
 0x344   :  { %7529 = vrsqrt.f32 %v840_v53  ;;  %v796_v13 = vmul.f32 %v707_v57, %v8202_v51 }
 0x345   :  { %v841_v32 = vadd.f32 1e-30, %v825_v4  ;;  %v842_v39 = vadd.f32 1e-30, %v826_v54  ;;  %v8428_v26 = vadd.f32 %v795_v15, %v675_v23  ;;  %v681_v54 = vmul.f32 %v8323_v17, %v8395_v31 }
 0x346   :  { %v8430_v52 = vadd.f32 %v796_v13, %v676_v48  ;;  %v710_v28 = vpop.permute.xlu1 %709  ;;  %v714_v30 = vpop.permute.xlu0 %713  ;;  %v680_v13 = vmul.f32 %v8333_v45, %v8391_v0 }
 0x347   :  { %7531 = vrsqrt.f32 %v841_v32  ;;  %v827_v16 = vand.u32 2147483647, %v8428_v26  ;;  %v797_v7 = vmul.f32 %v710_v28, %v8220_v18  ;;  %v798_v8 = vmul.f32 %v714_v30, %v8220_v18 }
 0x348   :  { %7533 = vrsqrt.f32 %v842_v39  ;;  %v828_v51 = vand.u32 2147483647, %v8430_v52  ;;  %v682_v39 = vmul.f32 %v8337_v46, %v8395_v31  ;;  %v8468_v31 = vmul.f32 %v8345_v35, %v8403_v14 }
 0x349   :  { %v843_v11 = vadd.f32 1e-30, %v827_v16  ;;  %v8438_v53 = vadd.f32 %v797_v7, %v677_v9  ;;  %v8440_v23 = vadd.f32 %v798_v8, %v678_v59  ;;  %v8458_v16 = vmul.f32 %v8327_v21, %v8403_v14 }
 0x34a   :  { %v844_v29 = vadd.f32 1e-30, %v828_v51  ;;  %v717_v57 = vpop.permute.xlu1 %716  ;;  %v721_v4 = vpop.permute.xlu0 %720 }
 0x34b   :  { %7535 = vrsqrt.f32 %v843_v11  ;;  %v829_v18 = vand.u32 2147483647, %v8438_v53  ;;  %v830_v15 = vand.u32 2147483647, %v8440_v23  ;;  %v799_v48 = vmul.f32 %v717_v57, %v8225_v25 }
 0x34c   :  { %7537 = vrsqrt.f32 %v844_v29  ;;  %v800_v32 = vmul.f32 %v721_v4, %v8225_v25  ;;  %v683_v25 = vmul.f32 %v8325_v38, %v8399_v24 }
 0x34d   :  { %v7528_v9 = vpop.eup %7527  ;;  %v845_v28 = vadd.f32 1e-30, %v829_v18  ;;  %v846_v59 = vadd.f32 1e-30, %v830_v15  ;;  %v8454_v30 = vadd.f32 %v799_v48, %v679_v22 }
 0x34e   :  { %v7530_v7 = vpop.eup %7529  ;;  %v8460_v8 = vmul.f32 %v7528_v9, %v807_v1  ;;  %v8462_v51 = vadd.f32 %v800_v32, %v680_v13  ;;  %v724_v0 = vpop.permute.xlu1 %723 }
 0x34f   :  { %v728_v11 = vpop.permute.xlu0 %727  ;;  %v8471_v29 = vmul.f32 %v7530_v7, %v8411_v58  ;;  %7539 = vrsqrt.f32 %v845_v28  ;;  %v831_v22 = vand.u32 2147483647, %v8454_v30  ;;  %v801_v1 = vmul.f32 %v724_v0, %v8230_v19 }
 0x350   :  { %v887_v57 = vand.u32 2147483647, %v8460_v8  ;;  %7541 = vrsqrt.f32 %v846_v59  ;;  %v832_v4 = vand.u32 2147483647, %v8462_v51  ;;  %v802_v18 = vmul.f32 %v728_v11, %v8230_v19 }
 0x351   :  { %v7532_v15 = vpop.eup %7531  ;;  %v888_v48 = vand.u32 2147483647, %v8471_v29  ;;  %v847_v14 = vadd.f32 1e-30, %v831_v22  ;;  %v8479_v13 = vadd.f32 %v801_v1, %v681_v54  ;;  %v684_v58 = vmul.f32 %v8341_v63, %v8399_v24 }
 0x352   :  { %v7534_v32 = vpop.eup %7533  ;;  %v903_v9 = vsel %vm346_vm1, %v887_v57, 0.0  ;;  %v8485_v28 = vmul.f32 %v7532_v15, %v8418_v36  ;;  %v848_v59 = vadd.f32 1e-30, %v832_v4  ;;  %v8487_v7 = vadd.f32 %v802_v18, %v682_v39  ;;  %v731_v0 = vpop.permute.xlu1 %730 }
 0x353   :  { %v735_v19 = vpop.permute.xlu0 %734  ;;  %v904_v11 = vsel %vm346_vm1, %v888_v48, 0.0  ;;  %v8491_v22 = vmul.f32 %v7534_v32, %v8420_v2  ;;  %7543 = vrsqrt.f32 %v847_v14  ;;  %v833_v54 = vand.u32 2147483647, %v8479_v13 }
 0x354   :  { %v905_v24 = vadd.f32 %v904_v11, %v903_v9  ;;  %v889_v1 = vand.u32 2147483647, %v8485_v28  ;;  %7545 = vrsqrt.f32 %v848_v59  ;;  %v834_v36 = vand.u32 2147483647, %v8487_v7 }
 0x355   :  { %v7536_v57 = vpop.eup %7535  ;;  %v890_v39 = vand.u32 2147483647, %v8491_v22  ;;  %v849_v4 = vadd.f32 1e-30, %v833_v54  ;;  %v803_v18 = vmul.f32 %v731_v0, %v8235_v55  ;;  %v804_v15 = vmul.f32 %v735_v19, %v8235_v55 }
 0x356   :  { %v7538_v48 = vpop.eup %7537  ;;  %v906_v2 = vrot.slane %v905_v24, 4  ;;  %v912_v14 = vsel %vm346_vm1, %v889_v1, 0.0  ;;  %v8501_v32 = vmul.f32 %v7536_v57, %v8428_v26  ;;  %v850_v9 = vadd.f32 1e-30, %v834_v36  ;;  %v738_v11 = vpop.permute.xlu1 %737 }
 0x357   :  { %v913_v59 = vsel %vm346_vm1, %v890_v39, 0.0  ;;  %v8505_v12 = vmul.f32 %v7538_v48, %v8430_v52  ;;  %7547 = vrsqrt.f32 %v849_v4  ;;  %v8507_v54 = vadd.f32 %v803_v18, %v683_v25  ;;  %v742_v44 = vpop.permute.xlu0 %741 }
 0x358   :  { %v907_v0 = vadd.f32 %v906_v2, %v905_v24  ;;  %v914_v20 = vadd.f32 %v913_v59, %v912_v14  ;;  %v891_v55 = vand.u32 2147483647, %v8501_v32  ;;  %7549 = vrsqrt.f32 %v850_v9 }
 0x359   :  { %v7540_v19 = vpop.eup %7539  ;;  %v892_v1 = vand.u32 2147483647, %v8505_v12  ;;  %v835_v26 = vand.u32 2147483647, %v8507_v54  ;;  %v8512_v36 = vadd.f32 %v804_v15, %v684_v58  ;;  %v805_v57 = vmul.f32 %v738_v11, %v8240_v60 }
 0x35a   :  { %v7542_v39 = vpop.eup %7541  ;;  %v908_v52 = vrot.slane %v907_v0, 2  ;;  %v915_v48 = vrot.slane %v914_v20, 4  ;;  %v921_v25 = vsel %vm346_vm1, %v891_v55, 0.0  ;;  %v8517_v24 = vmul.f32 %v7540_v19, %v8438_v53 }
 0x35b   :  { %v922_v4 = vsel %vm346_vm1, %v892_v1, 0.0  ;;  %v8521_v18 = vmul.f32 %v7542_v39, %v8440_v23  ;;  %v851_v2 = vadd.f32 1e-30, %v835_v26  ;;  %v836_v14 = vand.u32 2147483647, %v8512_v36 }
 0x35c   :  { %v909_v58 = vadd.f32 %v908_v52, %v907_v0  ;;  %v916_v15 = vadd.f32 %v915_v48, %v914_v20  ;;  %v923_v9 = vadd.f32 %v922_v4, %v921_v25  ;;  %v893_v11 = vand.u32 2147483647, %v8517_v24 }
 0x35d   :  { %v7544_v59 = vpop.eup %7543  ;;  %v894_v50 = vand.u32 2147483647, %v8521_v18  ;;  %7551 = vrsqrt.f32 %v851_v2  ;;  %v852_v55 = vadd.f32 1e-30, %v836_v14  ;;  %v8527_v53 = vadd.f32 %v805_v57, %v8458_v16 }
 0x35e   :  { %v7546_v19 = vpop.eup %7545  ;;  %v910_v1 = vrot.slane %v909_v58, 1  ;;  %v917_v23 = vrot.slane %v916_v15, 2  ;;  %v924_v39 = vrot.slane %v923_v9, 4  ;;  %v930_v26 = vsel %vm346_vm1, %v893_v11, 0.0 }
 0x35f   :  { %v931_v20 = vsel %vm346_vm1, %v894_v50, 0.0  ;;  %v8532_v0 = vmul.f32 %v7544_v59, %v8454_v30  ;;  %v8535_v52 = vmul.f32 %v7546_v19, %v8462_v51  ;;  %7553 = vrsqrt.f32 %v852_v55 }
 0x360   :  { %v911_v48 = vadd.f32 %v910_v1, %v909_v58  ;;  %v918_v25 = vadd.f32 %v917_v23, %v916_v15  ;;  %v925_v16 = vadd.f32 %v924_v39, %v923_v9  ;;  %v932_v57 = vadd.f32 %v931_v20, %v930_v26 }
 0x361   :  { %v7548_v4 = vpop.eup %7547  ;;  %v895_v2 = vand.u32 2147483647, %v8532_v0  ;;  %v896_v14 = vand.u32 2147483647, %v8535_v52  ;;  %v837_v11 = vand.u32 2147483647, %v8527_v53  ;;  %v806_v50 = vmul.f32 %v742_v44, %v8240_v60 }
 0x362   :  { %v7550_v42 = vpop.eup %7549  ;;  %v975_v30 = vadd.f32 1e-07, %v911_v48  ;;  %v919_v59 = vrot.slane %v918_v25, 1  ;;  %v926_v27 = vrot.slane %v925_v16, 2  ;;  %v933_v51 = vrot.slane %v932_v57, 4 }
 0x363   :  { %v939_v55 = vsel %vm346_vm1, %v895_v2, 0.0  ;;  %v940_v58 = vsel %vm346_vm1, %v896_v14, 0.0  ;;  %v8544_v15 = vmul.f32 %v7548_v4, %v8479_v13  ;;  %v8547_v9 = vmul.f32 %v7550_v42, %v8487_v7 }
 0x364   :  { %7555 = vrcp.f32 %v975_v30  ;;  %v920_v19 = vadd.f32 %v919_v59, %v918_v25  ;;  %v927_v1 = vadd.f32 %v926_v27, %v925_v16  ;;  %v934_v23 = vadd.f32 %v933_v51, %v932_v57 }
 0x365   :  { %v941_v60 = vadd.f32 %v940_v58, %v939_v55  ;;  %v897_v44 = vand.u32 2147483647, %v8544_v15  ;;  %v898_v39 = vand.u32 2147483647, %v8547_v9  ;;  %v853_v26 = vadd.f32 1e-30, %v837_v11 }
 0x366   :  { %v976_v20 = vadd.f32 1e-07, %v920_v19  ;;  %v928_v48 = vrot.slane %v927_v1, 1  ;;  %v935_v2 = vrot.slane %v934_v23, 2  ;;  %v8552_v14 = vadd.f32 %v806_v50, %v8468_v31 }
 0x367   :  { %v7552_v13 = vpop.eup %7551  ;;  %v942_v4 = vrot.slane %v941_v60, 4  ;;  %v948_v42 = vsel %vm346_vm1, %v897_v44, 0.0  ;;  %v949_v7 = vsel %vm346_vm1, %v898_v39, 0.0  ;;  %7557 = vrsqrt.f32 %v853_v26 }
 0x368   :  { %7559 = vrcp.f32 %v976_v20  ;;  %v929_v27 = vadd.f32 %v928_v48, %v927_v1  ;;  %v936_v25 = vadd.f32 %v935_v2, %v934_v23  ;;  %v950_v16 = vadd.f32 %v949_v7, %v948_v42 }
 0x369   :  { %v7554_v57 = vpop.eup %7553  ;;  %v943_v59 = vadd.f32 %v942_v4, %v941_v60  ;;  %v8557_v11 = vmul.f32 %v7552_v13, %v8507_v54  ;;  %v838_v51 = vand.u32 2147483647, %v8552_v14 }
 0x36a   :  { %v977_v31 = vadd.f32 1e-07, %v929_v27  ;;  %v937_v50 = vrot.slane %v936_v25, 1  ;;  %v951_v55 = vrot.slane %v950_v16, 4  ;;  %v8561_v58 = vmul.f32 %v7554_v57, %v8512_v36 }
 0x36b   :  { %v944_v19 = vrot.slane %v943_v59, 2  ;;  %v899_v44 = vand.u32 2147483647, %v8557_v11  ;;  %v854_v39 = vadd.f32 1e-30, %v838_v51 }
 0x36c   :  { %7561 = vrcp.f32 %v977_v31  ;;  %v938_v1 = vadd.f32 %v937_v50, %v936_v25  ;;  %v952_v23 = vadd.f32 %v951_v55, %v950_v16  ;;  %v900_v60 = vand.u32 2147483647, %v8561_v58 }
 0x36d   :  { %v945_v26 = vadd.f32 %v944_v19, %v943_v59  ;;  %v957_v54 = vsel %vm346_vm1, %v899_v44, 0.0  ;;  %7563 = vrsqrt.f32 %v854_v39 }
 0x36e   :  { %v7556_v48 = vpop.eup %7555  ;;  %v978_v2 = vadd.f32 1e-07, %v938_v1  ;;  %v953_v13 = vrot.slane %v952_v23, 2  ;;  %v958_v4 = vsel %vm346_vm1, %v900_v60, 0.0 }
 0x36f   :  { %v991_v36 = vmul.f32 %v7556_v48, %v975_v30  ;;  %v946_v42 = vrot.slane %v945_v26, 1  ;;  %v959_v7 = vadd.f32 %v958_v4, %v957_v54 }
 0x370   :  { %7565 = vrcp.f32 %v978_v2  ;;  %v954_v27 = vadd.f32 %v953_v13, %v952_v23 }
 0x371   :  { %v7558_v57 = vpop.eup %7557  ;;  %v999_v51 = vsub.f32 2.0, %v991_v36  ;;  %v947_v25 = vadd.f32 %v946_v42, %v945_v26  ;;  %v960_v16 = vrot.slane %v959_v7, 4 }
 0x372   :  { %v7560_v50 = vpop.eup %7559  ;;  %v955_v55 = vrot.slane %v954_v27, 1  ;;  %v8568_v59 = vmul.f32 %v7558_v57, %v8527_v53 }
 0x373   :  { %v1007_v19 = vmul.f32 %v7556_v48, %v999_v51  ;;  %v992_v44 = vmul.f32 %v7560_v50, %v976_v20  ;;  %v979_v39 = vadd.f32 1e-07, %v947_v25  ;;  %v961_v1 = vadd.f32 %v960_v16, %v959_v7 }
 0x374   :  { %v956_v43 = vadd.f32 %v955_v55, %v954_v27  ;;  %v901_v4 = vand.u32 2147483647, %v8568_v59 }
 0x375   :  { %v1015_v30 = vmul.f32 %v1007_v19, %v8460_v8  ;;  %v1016_v60 = vmul.f32 %v1007_v19, %v8471_v29  ;;  %v1000_v54 = vsub.f32 2.0, %v992_v44  ;;  %7567 = vrcp.f32 %v979_v39 }
 0x376   :  { %v7562_v23 = vpop.eup %7561  ;;  %v980_v13 = vadd.f32 1e-07, %v956_v43  ;;  %v962_v26 = vrot.slane %v961_v1, 2  ;;  %v966_v25 = vsel %vm346_vm1, %v901_v4, 0.0 }
 0x377   :  { %v7564_v36 = vpop.eup %7563  ;;  %vm1031_vm10 = vcmp.ne.f32.partialorder %v1015_v30, %v1015_v30  ;;  %vm1032_vm11 = vcmp.ne.f32.partialorder %v1016_v60, %v1016_v60  ;;  %v1008_v53 = vmul.f32 %v7560_v50, %v1000_v54  ;;  %v993_v48 = vmul.f32 %v7562_v23, %v977_v31 }
 0x378   :  { %v8573_v20 = vsel %vm1031_vm10, 0.0, %v1015_v30  ;;  %v8575_v42 = vsel %vm1032_vm11, 0.0, %v1016_v60  ;;  %7569 = vrcp.f32 %v980_v13  ;;  %v963_v8 = vadd.f32 %v962_v26, %v961_v1 }
 0x379   :  { %13466 = vst [vmem:[#allocation33_spill] sm:$0xff] %v8573_v20  ;;  %13467 = vst [vmem:[#allocation34_spill] sm:$0xff] %v8575_v42  ;;  %v1017_v29 = vmul.f32 %v1008_v53, %v8485_v28  ;;  %v1018_v7 = vmul.f32 %v1008_v53, %v8491_v22  ;;  %v1001_v27 = vsub.f32 2.0, %v993_v48  ;;  %v8580_v43 = vmul.f32 %v7564_v36, %v8552_v14 }
 0x37a   :  { %v7566_v57 = vpop.eup %7565  ;;  %v964_v51 = vrot.slane %v963_v8, 1  ;;  %v1063_v31 = vmul.f32 %v8573_v20, %v8306_v33  ;;  %v1064_v16 = vmul.f32 %v8575_v42, %v8290_v6 }
 0x37b   :  { %vm1033_vm12 = vcmp.ne.f32.partialorder %v1017_v29, %v1017_v29  ;;  %vm1034_vm13 = vcmp.ne.f32.partialorder %v1018_v7, %v1018_v7  ;;  %v1009_v50 = vmul.f32 %v7562_v23, %v1001_v27  ;;  %v994_v28 = vmul.f32 %v7566_v57, %v978_v2 }
 0x37c   :  { %v8587_v55 = vsel %vm1033_vm12, 0.0, %v1017_v29  ;;  %v8589_v22 = vsel %vm1034_vm13, 0.0, %v1018_v7  ;;  %v965_v14 = vadd.f32 %v964_v51, %v963_v8  ;;  %v902_v19 = vand.u32 2147483647, %v8580_v43 }
 0x37d   :  { %13468 = vst [vmem:[#allocation35_spill] sm:$0xff] %v8587_v55  ;;  %13469 = vst [vmem:[#allocation36_spill] sm:$0xff] %v8589_v22  ;;  %v1019_v44 = vmul.f32 %v1009_v50, %v8501_v32  ;;  %v1020_v1 = vmul.f32 %v1009_v50, %v8505_v12  ;;  %v1002_v30 = vsub.f32 2.0, %v994_v28  ;;  %v1079_v33 = vsel %vm346_vm1, %v1063_v31, 0.0 }
 0x37e   :  { %v981_v60 = vadd.f32 1e-07, %v965_v14  ;;  %v967_v6 = vsel %vm346_vm1, %v902_v19, 0.0  ;;  %v1080_v54 = vsel %vm346_vm1, %v1064_v16, 0.0  ;;  %v1065_v2 = vmul.f32 %v8587_v55, %v8310_v10 }
 0x37f   :  { %v7568_v23 = vpop.eup %7567  ;;  %vm1035_vm14 = vcmp.ne.f32.partialorder %v1019_v44, %v1019_v44  ;;  %vm1036_vm15 = vcmp.ne.f32.partialorder %v1020_v1, %v1020_v1  ;;  %v1010_v26 = vmul.f32 %v7566_v57, %v1002_v30  ;;  %v968_v4 = vadd.f32 %v967_v6, %v966_v25 }
 0x380   :  { %v8599_v36 = vsel %vm1035_vm14, 0.0, %v1019_v44  ;;  %v995_v32 = vmul.f32 %v7568_v23, %v979_v39  ;;  %7571 = vrcp.f32 %v981_v60  ;;  %v1081_v8 = vadd.f32 %v1080_v54, %v1079_v33 }
 0x381   :  { %13470 = vst [vmem:[#allocation37_spill] sm:$0xff] %v8599_v36  ;;  %v1021_v12 = vmul.f32 %v1010_v26, %v8517_v24  ;;  %v1022_v53 = vmul.f32 %v1010_v26, %v8521_v18  ;;  %v969_v48 = vrot.slane %v968_v4, 4  ;;  %v8603_v7 = vsel %vm1036_vm15, 0.0, %v1020_v1 }
 0x382   :  { %v7570_v29 = vpop.eup %7569  ;;  %13471 = vst [vmem:[#allocation38_spill] sm:$0xff] %v8603_v7  ;;  %v1003_v27 = vsub.f32 2.0, %v995_v32  ;;  %v1066_v10 = vmul.f32 %v8589_v22, %v8292_v61  ;;  %v1088_v25 = vsel %vm346_vm1, %v1065_v2, 0.0  ;;  %v1067_v39 = vmul.f32 %v8599_v36, %v8317_v37 }
 0x383   :  { %v996_v51 = vmul.f32 %v7570_v29, %v980_v13  ;;  %v970_v57 = vadd.f32 %v969_v48, %v968_v4  ;;  %vm1037_vm0 = vcmp.ne.f32.partialorder %v1021_v12, %v1021_v12  ;;  %vm1038_vm9 = vcmp.ne.f32.partialorder %v1022_v53, %v1022_v53 }
 0x384   :  { %v1011_v24 = vmul.f32 %v7568_v23, %v1003_v27  ;;  %v1082_v18 = vrot.slane %v1081_v8, 4  ;;  %v1089_v50 = vsel %vm346_vm1, %v1066_v10, 0.0  ;;  %v1068_v28 = vmul.f32 %v8603_v7, %v8294_v62 }
 0x385   :  { %v1004_v31 = vsub.f32 2.0, %v996_v51  ;;  %v971_v16 = vrot.slane %v970_v57, 2  ;;  %v1090_v19 = vadd.f32 %v1089_v50, %v1088_v25  ;;  %v1097_v37 = vsel %vm346_vm1, %v1067_v39, 0.0 }
 0x386   :  { %v1023_v61 = vmul.f32 %v1011_v24, %v8532_v0  ;;  %v1024_v13 = vmul.f32 %v1011_v24, %v8535_v52  ;;  %v1083_v14 = vadd.f32 %v1082_v18, %v1081_v8  ;;  %v1098_v30 = vsel %vm346_vm1, %v1068_v28, 0.0 }
 0x387   :  { %v1012_v44 = vmul.f32 %v7570_v29, %v1004_v31  ;;  %v972_v1 = vadd.f32 %v971_v16, %v970_v57  ;;  %v8618_v33 = vsel %vm1037_vm0, 0.0, %v1021_v12  ;;  %v1091_v54 = vrot.slane %v1090_v19, 4 }
 0x388   :  { %13472 = vst [vmem:[#allocation39_spill] sm:$0xff] %v8618_v33  ;;  %vm1039_vm10 = vcmp.ne.f32.partialorder %v1023_v61, %v1023_v61  ;;  %v1084_v6 = vrot.slane %v1083_v14, 2  ;;  %v8621_v62 = vsel %vm1038_vm9, 0.0, %v1022_v53  ;;  %vm1040_vm11 = vcmp.ne.f32.partialorder %v1024_v13, %v1024_v13 }
 0x389   :  { %13473 = vst [vmem:[#allocation40_spill] sm:$0xff] %v8621_v62  ;;  %v1025_v0 = vmul.f32 %v1012_v44, %v8544_v15  ;;  %v1026_v52 = vmul.f32 %v1012_v44, %v8547_v9  ;;  %v973_v23 = vrot.slane %v972_v1, 1  ;;  %v1092_v4 = vadd.f32 %v1091_v54, %v1090_v19 }
 0x38a   :  { %v7572_v2 = vpop.eup %7571  ;;  %v1085_v26 = vadd.f32 %v1084_v6, %v1083_v14  ;;  %v1099_v32 = vadd.f32 %v1098_v30, %v1097_v37  ;;  %v8625_v48 = vsel %vm1039_vm10, 0.0, %v1023_v61  ;;  %v1069_v8 = vmul.f32 %v8618_v33, %v8319_v34 }
 0x38b   :  { %13474 = vst [vmem:[#allocation41_spill] sm:$0xff] %v8625_v48  ;;  %v997_v12 = vmul.f32 %v7572_v2, %v981_v60  ;;  %v8629_v29 = vsel %vm1040_vm11, 0.0, %v1024_v13  ;;  %vm1041_vm12 = vcmp.ne.f32.partialorder %v1025_v0, %v1025_v0  ;;  %v974_v53 = vadd.f32 %v973_v23, %v972_v1 }
 0x38c   :  { %13475 = vst [vmem:[#allocation42_spill] sm:$0xff] %v8629_v29  ;;  %v1086_v27 = vrot.slane %v1085_v26, 1  ;;  %v1093_v15 = vrot.slane %v1092_v4, 2  ;;  %v1100_v51 = vrot.slane %v1099_v32, 4  ;;  %v1070_v9 = vmul.f32 %v8621_v62, %v8329_v40 }
 0x38d   :  { %v1005_v10 = vsub.f32 2.0, %v997_v12  ;;  %vm1042_vm13 = vcmp.ne.f32.partialorder %v1026_v52, %v1026_v52  ;;  %v982_v57 = vadd.f32 1e-07, %v974_v53  ;;  %v1106_v39 = vsel %vm346_vm1, %v1069_v8, 0.0 }
 0x38e   :  { %v1087_v25 = vadd.f32 %v1086_v27, %v1085_v26  ;;  %v1094_v24 = vadd.f32 %v1093_v15, %v1092_v4  ;;  %v1101_v18 = vadd.f32 %v1100_v51, %v1099_v32  ;;  %v1107_v34 = vsel %vm346_vm1, %v1070_v9, 0.0 }
 0x38f   :  { %v1013_v60 = vmul.f32 %v7572_v2, %v1005_v10  ;;  %v8635_v31 = vsel %vm1041_vm12, 0.0, %v1025_v0  ;;  %7573 = vrcp.f32 %v982_v57  ;;  %v1108_v50 = vadd.f32 %v1107_v34, %v1106_v39 }
 0x390   :  { %13476 = vst [vmem:[#allocation43_spill] sm:$0xff] %v8635_v31  ;;  %v1163_v16 = vmul.f32 %v8331_v3, %v1087_v25  ;;  %v1095_v61 = vrot.slane %v1094_v24, 1  ;;  %v1102_v13 = vrot.slane %v1101_v18, 2  ;;  %v1071_v44 = vmul.f32 %v8625_v48, %v8321_v5 }
 0x391   :  { %v1027_v28 = vmul.f32 %v1013_v60, %v8557_v11  ;;  %v1028_v40 = vmul.f32 %v1013_v60, %v8561_v58  ;;  %v1109_v19 = vrot.slane %v1108_v50, 4  ;;  %v1072_v1 = vmul.f32 %v8629_v29, %v8333_v45 }
 0x392   :  { %v8641_v14 = vadd.f32 %v8347_v49, %v1163_v16  ;;  %v8648_v37 = vsel %vm1042_vm13, 0.0, %v1026_v52  ;;  %v1096_v30 = vadd.f32 %v1095_v61, %v1094_v24  ;;  %v1103_v11 = vadd.f32 %v1102_v13, %v1101_v18 }
 0x393   :  { %13477 = vst [vmem:[#allocation44_spill] sm:$0xff] %v8648_v37  ;;  %vm1043_vm14 = vcmp.ne.f32.partialorder %v1027_v28, %v1027_v28  ;;  %vm1044_vm15 = vcmp.ne.f32.partialorder %v1028_v40, %v1028_v40  ;;  %v1164_v6 = vmul.f32 %v8335_v41, %v1087_v25  ;;  %v1110_v2 = vadd.f32 %v1109_v19, %v1108_v50 }
 0x394   :  { %v1207_v58 = vsel %vm346_vm1, %v8641_v14, 0.0  ;;  %v8653_v54 = vsel %vm1043_vm14, 0.0, %v1027_v28  ;;  %v1165_v5 = vmul.f32 %v8331_v3, %v1096_v30  ;;  %v1104_v0 = vrot.slane %v1103_v11, 1 }
 0x395   :  { %13478 = vst [vmem:[#allocation45_spill] sm:$0xff] %v8653_v54  ;;  %1208 = vadd.xlane.f32.xlu0 %v1207_v58  ;;  %v1115_v45 = vsel %vm346_vm1, %v1071_v44, 0.0  ;;  %v1116_v52 = vsel %vm346_vm1, %v1072_v1, 0.0  ;;  %v1073_v23 = vmul.f32 %v8635_v31, %v8323_v17  ;;  %v1074_v26 = vmul.f32 %v8648_v37, %v8337_v46 }
 0x396   :  { %v8662_v4 = vsel %vm1044_vm15, 0.0, %v1028_v40  ;;  %v8665_v32 = vadd.f32 %v8347_v49, %v1165_v5  ;;  %v1105_v12 = vadd.f32 %v1104_v0, %v1103_v11  ;;  %v1111_v8 = vrot.slane %v1110_v2, 2 }
 0x397   :  { %13479 = vst [vmem:[#allocation46_spill] sm:$0xff] %v8662_v4  ;;  %v1117_v53 = vadd.f32 %v1116_v52, %v1115_v45  ;;  %v1124_v27 = vsel %vm346_vm1, %v1073_v23, 0.0  ;;  %v1125_v10 = vsel %vm346_vm1, %v1074_v26, 0.0  ;;  %v1075_v15 = vmul.f32 %v8653_v54, %v8325_v38 }
 0x398   :  { %v1214_v17 = vsel %vm346_vm1, %v8665_v32, 0.0  ;;  %v1167_v46 = vmul.f32 %v8331_v3, %v1105_v12  ;;  %v1112_v51 = vadd.f32 %v1111_v8, %v1110_v2  ;;  %v1166_v25 = vmul.f32 %v8335_v41, %v1096_v30 }
 0x399   :  { %v7574_v9 = vpop.eup %7573  ;;  %1215 = vadd.xlane.f32.xlu1 %v1214_v17  ;;  %v1118_v39 = vrot.slane %v1117_v53, 4  ;;  %v1126_v60 = vadd.f32 %v1125_v10, %v1124_v27  ;;  %v1076_v24 = vmul.f32 %v8662_v4, %v8341_v63  ;;  %v1133_v16 = vsel %vm346_vm1, %v1075_v15, 0.0 }
 0x39a   :  { %v998_v18 = vmul.f32 %v7574_v9, %v982_v57  ;;  %v8678_v34 = vadd.f32 %v8347_v49, %v1167_v46  ;;  %v1113_v38 = vrot.slane %v1112_v51, 1  ;;  %v8682_v50 = vadd.f32 %v8339_v47, %v1164_v6 }
 0x39b   :  { %v1119_v28 = vadd.f32 %v1118_v39, %v1117_v53  ;;  %v1127_v40 = vrot.slane %v1126_v60, 4  ;;  %v1134_v61 = vsel %vm346_vm1, %v1076_v24, 0.0  ;;  %vm1210_vm0 = vcmask 123904  }
 0x39c   :  { %v1006_v13 = vsub.f32 2.0, %v998_v18  ;;  %v1220_v19 = vsel %vm346_vm1, %v8678_v34, 0.0  ;;  %v1114_v44 = vadd.f32 %v1113_v38, %v1112_v51  ;;  %v1135_v63 = vadd.f32 %v1134_v61, %v1133_v16 }
 0x39d   :  { %1221 = vadd.xlane.f32.xlu0 %v1220_v19  ;;  %v8688_v57 = vadd.f32 %v8339_v47, %v1166_v25  ;;  %v1120_v1 = vrot.slane %v1119_v28, 2  ;;  %v1128_v30 = vadd.f32 %v1127_v40, %v1126_v60  ;;  %v1168_v6 = vmul.f32 %v8335_v41, %v1105_v12 }
 0x39e   :  { %v1014_v11 = vmul.f32 %v7574_v9, %v1006_v13  ;;  %v1169_v58 = vmul.f32 %v8331_v3, %v1114_v44  ;;  %v1136_v5 = vrot.slane %v1135_v63, 4  ;;  %v1211_v23 = vsel %vm1210_vm0, %v8682_v50, 0.0 }
 0x39f   :  { %v1121_v0 = vadd.f32 %v1120_v1, %v1119_v28  ;;  %v1129_v2 = vrot.slane %v1128_v30, 2  ;;  %v1217_v8 = vsel %vm1210_vm0, %v8688_v57, 0.0  ;;  %v1170_v51 = vmul.f32 %v8335_v41, %v1114_v44 }
 0x3a0   :  { %v1029_v45 = vmul.f32 %v1014_v11, %v8568_v59  ;;  %v1030_v52 = vmul.f32 %v1014_v11, %v8580_v43  ;;  %v8697_v26 = vadd.f32 %v8347_v49, %v1169_v58  ;;  %v1137_v12 = vadd.f32 %v1136_v5, %v1135_v63 }
 0x3a1   :  { %1212 = vadd.xlane.f32.xlu0 %v1211_v23  ;;  %v1122_v53 = vrot.slane %v1121_v0, 1  ;;  %v1130_v27 = vadd.f32 %v1129_v2, %v1128_v30  ;;  %v8704_v43 = vadd.f32 %v8339_v47, %v1168_v6  ;;  %vm1280_vm11 = vcmask 1041408  }
 0x3a2   :  { %vm1045_vm9 = vcmp.ne.f32.partialorder %v1029_v45, %v1029_v45  ;;  %vm1046_vm10 = vcmp.ne.f32.partialorder %v1030_v52, %v1030_v52  ;;  %v1226_v59 = vsel %vm346_vm1, %v8697_v26, 0.0  ;;  %v1138_v9 = vrot.slane %v1137_v12, 2 }
 0x3a3   :  { %v8706_v10 = vsel %vm1045_vm9, 0.0, %v1029_v45  ;;  %v8708_v15 = vsel %vm1046_vm10, 0.0, %v1030_v52  ;;  %1227 = vadd.xlane.f32.xlu1 %v1226_v59  ;;  %v1123_v17 = vadd.f32 %v1122_v53, %v1121_v0  ;;  %v1131_v46 = vrot.slane %v1130_v27, 1 }
 0x3a4   :  { %13480 = vst [vmem:[#allocation47_spill] sm:$0xff] %v8706_v10  ;;  %13481 = vst [vmem:[#allocation48_spill] sm:$0xff] %v8708_v15  ;;  %v1077_v25 = vmul.f32 %v8706_v10, %v8327_v21  ;;  %v1078_v39 = vmul.f32 %v8708_v15, %v8345_v35  ;;  %v1139_v18 = vadd.f32 %v1138_v9, %v1137_v12  ;;  %v1223_v21 = vsel %vm1210_vm0, %v8704_v43, 0.0 }
 0x3a5   :  { %1218 = vadd.xlane.f32.xlu0 %v1217_v8  ;;  %v1171_v60 = vmul.f32 %v8331_v3, %v1123_v17  ;;  %v1132_v24 = vadd.f32 %v1131_v46, %v1130_v27  ;;  %v8725_v35 = vadd.f32 %v8339_v47, %v1170_v51  ;;  %v1172_v19 = vmul.f32 %v8335_v41, %v1123_v17 }
 0x3a6   :  { %v1142_v38 = vsel %vm346_vm1, %v1077_v25, 0.0  ;;  %v1143_v16 = vsel %vm346_vm1, %v1078_v39, 0.0  ;;  %v1140_v13 = vrot.slane %v1139_v18, 1  ;;  %vm7882_vm12 = vmmov 0  }
 0x3a7   :  { %v8719_v28 = vadd.f32 %v8347_v49, %v1171_v60  ;;  %v1173_v40 = vmul.f32 %v8331_v3, %v1132_v24  ;;  %v1144_v61 = vadd.f32 %v1143_v16, %v1142_v38  ;;  %v1229_v6 = vsel %vm1210_vm0, %v8725_v35, 0.0 }
 0x3a8   :  { %v1141_v30 = vadd.f32 %v1140_v13, %v1139_v18  ;;  %v8739_v0 = vadd.f32 %v8339_v47, %v1172_v19  ;;  %v1174_v2 = vmul.f32 %v8335_v41, %v1132_v24 }
 0x3a9   :  { %v1232_v44 = vsel %vm346_vm1, %v8719_v28, 0.0  ;;  %1224 = vadd.xlane.f32.xlu0 %v1223_v21  ;;  %v8731_v63 = vadd.f32 %v8347_v49, %v1173_v40  ;;  %v1145_v1 = vrot.slane %v1144_v61, 4 }
 0x3aa   :  { %1233 = vadd.xlane.f32.xlu1 %v1232_v44  ;;  %v1175_v5 = vmul.f32 %v8331_v3, %v1141_v30  ;;  %v1235_v53 = vsel %vm1210_vm0, %v8739_v0, 0.0  ;;  %v8750_v27 = vadd.f32 %v8339_v47, %v1174_v2  ;;  %v1176_v12 = vmul.f32 %v8335_v41, %v1141_v30 }
 0x3ab   :  { %v1238_v11 = vsel %vm346_vm1, %v8731_v63, 0.0  ;;  %v1146_v58 = vadd.f32 %v1145_v1, %v1144_v61 }
 0x3ac   :  { %v8743_v52 = vadd.f32 %v8347_v49, %v1175_v5  ;;  %v1241_v46 = vsel %vm1210_vm0, %v8750_v27, 0.0  ;;  %v8756_v51 = vadd.f32 %v8339_v47, %v1176_v12 }
 0x3ad   :  { %1230 = vadd.xlane.f32.xlu0 %v1229_v6  ;;  %v1147_v45 = vrot.slane %v1146_v58, 2 }
 0x3ae   :  { %1239 = vadd.xlane.f32.xlu1 %v1238_v11  ;;  %v1244_v8 = vsel %vm346_vm1, %v8743_v52, 0.0  ;;  %v1247_v60 = vsel %vm1210_vm0, %v8756_v51, 0.0 }
 0x3af   :  { %v1148_v23 = vadd.f32 %v1147_v45, %v1146_v58 }
 0x3b1   :  { %1236 = vadd.xlane.f32.xlu0 %v1235_v53  ;;  %v1149_v59 = vrot.slane %v1148_v23, 1 }
 0x3b2   :  { %1245 = vadd.xlane.f32.xlu1 %v1244_v8 }
 0x3b3   :  { %v1150_v17 = vadd.f32 %v1149_v59, %v1148_v23 }
 0x3b5   :  { %v1177_v9 = vmul.f32 %v8331_v3, %v1150_v17  ;;  %1242 = vadd.xlane.f32.xlu0 %v1241_v46  ;;  %v1178_v25 = vmul.f32 %v8335_v41, %v1150_v17 }
 0x3b7   :  { %v8761_v39 = vadd.f32 %v8347_v49, %v1177_v9  ;;  %v8768_v18 = vadd.f32 %v8339_v47, %v1178_v25 }
 0x3b9   :  { %v1250_v24 = vsel %vm346_vm1, %v8761_v39, 0.0  ;;  %1248 = vadd.xlane.f32.xlu0 %v1247_v60  ;;  %v1253_v3 = vsel %vm1210_vm0, %v8768_v18, 0.0 }
 0x3ba   :  { %1251 = vadd.xlane.f32.xlu1 %v1250_v24 }
 0x3be   :  { %1254 = vadd.xlane.f32.xlu1 %v1253_v3 }
 0x422   :  { %v1209_v38 = vpop.xlane.xlu0 %1208 }
 0x423   :  { %v1257_v30 = vmul.f32 0.0625, %v1209_v38 }
 0x426   :  { %v1216_v16 = vpop.xlane.xlu1 %1215 }
 0x427   :  { %v1259_v19 = vmul.f32 0.0625, %v1216_v16 }
 0x429   :  { %v1273_v5 = vadd.f32 %v1259_v19, %v1257_v30 }
 0x42a   :  { %v1222_v41 = vpop.xlane.xlu0 %1221 }
 0x42b   :  { %v1261_v47 = vmul.f32 0.0625, %v1222_v41 }
 0x42d   :  { %v1274_v53 = vadd.f32 %v1273_v5, %v1261_v47 }
 0x42e   :  { %v1213_v49 = vpop.xlane.xlu0 %1212 }
 0x42f   :  { %v1258_v58 = vmul.f32 0.0625, %v1213_v49 }
 0x430   :  { %v1228_v40 = vpop.xlane.xlu1 %1227 }
 0x431   :  { %v1263_v2 = vmul.f32 0.0625, %v1228_v40  ;;  %v1281_v12 = vsel %vm1280_vm11, %v1258_v58, 0.0 }
 0x432   :  { %v1219_v61 = vpop.xlane.xlu0 %1218 }
 0x433   :  { %v1260_v44 = vmul.f32 0.0625, %v1219_v61  ;;  %v1275_v60 = vadd.f32 %v1274_v53, %v1263_v2 }
 0x435   :  { %v1282_v45 = vsel %vm1280_vm11, %v1260_v44, 0.0 }
 0x436   :  { %v1225_v21 = vpop.xlane.xlu0 %1224  ;;  %v1283_v9 = vadd.f32 %v1282_v45, %v1281_v12 }
 0x437   :  { %v1234_v13 = vpop.xlane.xlu1 %1233  ;;  %v1262_v6 = vmul.f32 0.0625, %v1225_v21 }
 0x438   :  { %v1265_v59 = vmul.f32 0.0625, %v1234_v13 }
 0x439   :  { %v1284_v17 = vsel %vm1280_vm11, %v1262_v6, 0.0 }
 0x43a   :  { %v1231_v1 = vpop.xlane.xlu0 %1230  ;;  %v1285_v41 = vadd.f32 %v1284_v17, %v1283_v9  ;;  %v1276_v49 = vadd.f32 %v1275_v60, %v1265_v59 }
 0x43b   :  { %v1240_v11 = vpop.xlane.xlu1 %1239  ;;  %v1264_v23 = vmul.f32 0.0625, %v1231_v1 }
 0x43c   :  { %v1267_v24 = vmul.f32 0.0625, %v1240_v11 }
 0x43d   :  { %v1286_v3 = vsel %vm1280_vm11, %v1264_v23, 0.0 }
 0x43e   :  { %v1237_v8 = vpop.xlane.xlu0 %1236  ;;  %v1287_v21 = vadd.f32 %v1286_v3, %v1285_v41  ;;  %v1277_v19 = vadd.f32 %v1276_v49, %v1267_v24 }
 0x43f   :  { %v1266_v46 = vmul.f32 0.0625, %v1237_v8  ;;  %v1246_v25 = vpop.xlane.xlu1 %1245 }
 0x440   :  { %v1269_v40 = vmul.f32 0.0625, %v1246_v25 }
 0x441   :  { %v1288_v61 = vsel %vm1280_vm11, %v1266_v46, 0.0 }
 0x442   :  { %v1243_v38 = vpop.xlane.xlu0 %1242  ;;  %v1289_v30 = vadd.f32 %v1288_v61, %v1287_v21  ;;  %v1278_v58 = vadd.f32 %v1277_v19, %v1269_v40 }
 0x443   :  { %v1268_v16 = vmul.f32 0.0625, %v1243_v38 }
 0x445   :  { %v1290_v13 = vsel %vm1280_vm11, %v1268_v16, 0.0 }
 0x446   :  { %v1249_v44 = vpop.xlane.xlu0 %1248  ;;  %v1291_v11 = vadd.f32 %v1290_v13, %v1289_v30 }
 0x447   :  { %v1252_v1 = vpop.xlane.xlu1 %1251  ;;  %v1270_v47 = vmul.f32 0.0625, %v1249_v44 }
 0x448   :  { %v1271_v6 = vmul.f32 0.0625, %v1252_v1 }
 0x449   :  { %v1292_v5 = vsel %vm1280_vm11, %v1270_v47, 0.0 }
 0x44a   :  { %v1279_v2 = vadd.f32 %v1278_v58, %v1271_v6  ;;  %v1293_v23 = vadd.f32 %v1292_v5, %v1291_v11 }
 0x44b   :  { %v1255_v45 = vpop.xlane.xlu1 %1254 }
 0x44c   :  { %v1297_v8 = vmul.f32 0.125, %v1279_v2  ;;  %v1272_v53 = vmul.f32 0.0625, %v1255_v45 }
 0x44e   :  { %v1294_v12 = vsel %vm1280_vm11, %v1272_v53, 0.0  ;;  %v8781_v59 = vsub.f32 %v8665_v32, %v1297_v8  ;;  %v8784_v17 = vsub.f32 %v8641_v14, %v1297_v8  ;;  %v8787_v46 = vsub.f32 %v8697_v26, %v1297_v8 }
 0x44f   :  { %v1295_v9 = vadd.f32 %v1294_v12, %v1293_v23  ;;  %v8790_v25 = vsub.f32 %v8678_v34, %v1297_v8  ;;  %v8797_v32 = vsub.f32 %v8719_v28, %v1297_v8  ;;  %v8811_v28 = vsub.f32 %v8731_v63, %v1297_v8 }
 0x450   :  { %v1317_v60 = vmul.f32 %v8781_v59, %v8781_v59  ;;  %v1315_v24 = vmul.f32 %v8784_v17, %v8784_v17  ;;  %v1321_v26 = vmul.f32 %v8787_v46, %v8787_v46  ;;  %v8824_v63 = vsub.f32 %v8743_v52, %v1297_v8 }
 0x451   :  { %v1298_v3 = vmul.f32 0.125, %v1295_v9  ;;  %v1319_v34 = vmul.f32 %v8790_v25, %v8790_v25  ;;  %v1323_v61 = vmul.f32 %v8797_v32, %v8797_v32  ;;  %v1325_v19 = vmul.f32 %v8811_v28, %v8811_v28 }
 0x452   :  { %v1337_v14 = vsel %vm346_vm1, %v1317_v60, 0.0  ;;  %v1331_v38 = vsel %vm346_vm1, %v1315_v24, 0.0  ;;  %v1349_v49 = vsel %vm346_vm1, %v1321_v26, 0.0  ;;  %v1327_v30 = vmul.f32 %v8824_v63, %v8824_v63 }
 0x453   :  { %1338 = vadd.xlane.f32.xlu1 %v1337_v14  ;;  %1332 = vadd.xlane.f32.xlu0 %v1331_v38  ;;  %v8806_v41 = vsub.f32 %v8688_v57, %v1298_v3  ;;  %v1343_v40 = vsel %vm346_vm1, %v1319_v34, 0.0  ;;  %v8818_v21 = vsub.f32 %v8704_v43, %v1298_v3  ;;  %v1355_v13 = vsel %vm346_vm1, %v1323_v61, 0.0 }
 0x454   :  { %v8830_v1 = vsub.f32 %v8725_v35, %v1298_v3  ;;  %v1361_v43 = vsel %vm346_vm1, %v1325_v19, 0.0  ;;  %v8839_v58 = vsub.f32 %v8761_v39, %v1297_v8  ;;  %v8842_v6 = vsub.f32 %v8739_v0, %v1298_v3 }
 0x455   :  { %v1318_v16 = vmul.f32 %v8806_v41, %v8806_v41  ;;  %v1320_v44 = vmul.f32 %v8818_v21, %v8818_v21  ;;  %v1367_v35 = vsel %vm346_vm1, %v1327_v30, 0.0  ;;  %v8846_v11 = vsub.f32 %v8682_v50, %v1298_v3 }
 0x456   :  { %v1322_v52 = vmul.f32 %v8830_v1, %v8830_v1  ;;  %v1329_v2 = vmul.f32 %v8839_v58, %v8839_v58  ;;  %v1324_v45 = vmul.f32 %v8842_v6, %v8842_v6  ;;  %v8854_v39 = vsub.f32 %v8750_v27, %v1298_v3 }
 0x457   :  { %1350 = vadd.xlane.f32.xlu1 %v1349_v49  ;;  %1344 = vadd.xlane.f32.xlu0 %v1343_v40  ;;  %v1340_v57 = vsel %vm1210_vm0, %v1318_v16, 0.0  ;;  %v1346_v47 = vsel %vm1210_vm0, %v1320_v44, 0.0  ;;  %v1316_v0 = vmul.f32 %v8846_v11, %v8846_v11  ;;  %v8859_v23 = vsub.f32 %v8756_v51, %v1298_v3 }
 0x458   :  { %v1352_v5 = vsel %vm1210_vm0, %v1322_v52, 0.0  ;;  %v1373_v50 = vsel %vm346_vm1, %v1329_v2, 0.0  ;;  %v1358_v8 = vsel %vm1210_vm0, %v1324_v45, 0.0  ;;  %v1326_v53 = vmul.f32 %v8854_v39, %v8854_v39 }
 0x459   :  { %v8866_v12 = vsub.f32 %v8768_v18, %v1298_v3  ;;  %v1334_v27 = vsel %vm1210_vm0, %v1316_v0, 0.0  ;;  %v1328_v51 = vmul.f32 %v8859_v23, %v8859_v23 }
 0x45a   :  { %v1364_v9 = vsel %vm1210_vm0, %v1326_v53, 0.0 }
 0x45b   :  { %1356 = vadd.xlane.f32.xlu0 %v1355_v13  ;;  %1341 = vadd.xlane.f32.xlu1 %v1340_v57  ;;  %v1330_v60 = vmul.f32 %v8866_v12, %v8866_v12  ;;  %v1370_v24 = vsel %vm1210_vm0, %v1328_v51, 0.0 }
 0x45d   :  { %v1376_v14 = vsel %vm1210_vm0, %v1330_v60, 0.0 }
 0x45f   :  { %1362 = vadd.xlane.f32.xlu0 %v1361_v43  ;;  %1347 = vadd.xlane.f32.xlu1 %v1346_v47 }
 0x463   :  { %1368 = vadd.xlane.f32.xlu0 %v1367_v35  ;;  %1353 = vadd.xlane.f32.xlu1 %v1352_v5 }
 0x467   :  { %1374 = vadd.xlane.f32.xlu0 %v1373_v50  ;;  %1359 = vadd.xlane.f32.xlu1 %v1358_v8 }
 0x46b   :  { %1335 = vadd.xlane.f32.xlu0 %v1334_v27  ;;  %1365 = vadd.xlane.f32.xlu1 %v1364_v9 }
 0x46f   :  { %1371 = vadd.xlane.f32.xlu0 %v1370_v24  ;;  %1377 = vadd.xlane.f32.xlu1 %v1376_v14  ;;  %v13482_v14 = vld [vmem:[#allocation20_spill] sm:$0xff] }
 0x4e0   :  { %v1339_v18 = vpop.xlane.xlu1 %1338  ;;  %v1333_v3 = vpop.xlane.xlu0 %1332 }
 0x4e1   :  { %v1381_v38 = vmul.f32 0.0625, %v1339_v18  ;;  %v1379_v26 = vmul.f32 0.0625, %v1333_v3 }
 0x4e3   :  { %v1395_v49 = vadd.f32 %v1381_v38, %v1379_v26 }
 0x4e4   :  { %v1345_v34 = vpop.xlane.xlu0 %1344  ;;  %v1351_v40 = vpop.xlane.xlu1 %1350 }
 0x4e5   :  { %v1383_v16 = vmul.f32 0.0625, %v1345_v34  ;;  %v1385_v19 = vmul.f32 0.0625, %v1351_v40 }
 0x4e7   :  { %v1396_v57 = vadd.f32 %v1395_v49, %v1383_v16 }
 0x4e8   :  { %v1357_v61 = vpop.xlane.xlu0 %1356 }
 0x4e9   :  { %v1397_v44 = vadd.f32 %v1396_v57, %v1385_v19  ;;  %v1387_v43 = vmul.f32 0.0625, %v1357_v61 }
 0x4eb   :  { %v1398_v52 = vadd.f32 %v1397_v44, %v1387_v43 }
 0x4ec   :  { %v1363_v13 = vpop.xlane.xlu0 %1362 }
 0x4ed   :  { %v1389_v30 = vmul.f32 0.0625, %v1363_v13 }
 0x4ef   :  { %v1399_v5 = vadd.f32 %v1398_v52, %v1389_v30 }
 0x4f0   :  { %v1369_v47 = vpop.xlane.xlu0 %1368 }
 0x4f1   :  { %v1391_v35 = vmul.f32 0.0625, %v1369_v47 }
 0x4f3   :  { %v1400_v45 = vadd.f32 %v1399_v5, %v1391_v35  ;;  %v13483_v35 = vld [vmem:[#allocation12_spill] sm:$0xff] }
 0x4f4   :  { %v1375_v2 = vpop.xlane.xlu0 %1374 }
 0x4f5   :  { %v1393_v0 = vmul.f32 0.0625, %v1375_v2 }
 0x4f7   :  { %v1401_v50 = vadd.f32 %v1400_v45, %v1393_v0 }
 0x4f9   :  { %v1417_v8 = vmul.f32 0.125, %v1401_v50 }
 0x4fb   :  { %v1419_v53 = vadd.f32 1e-05, %v1417_v8 }
 0x4fd   :  { %7575 = vrsqrt.f32 %v1419_v53 }
 0x507   :  { %v8876_v27 = vpop.eup %7575 }
 0x508   :  { %v1423_v9 = vmul.f32 %v8876_v27, %v8784_v17  ;;  %v1425_v51 = vmul.f32 %v8876_v27, %v8781_v59  ;;  %v1427_v17 = vmul.f32 %v8876_v27, %v8790_v25  ;;  %v13484_v25 = vld [vmem:[#allocation13_spill] sm:$0xff] }
 0x50a   :  { %v1451_v60 = vmul.f32 %v8351_v56, %v1423_v9  ;;  %v1453_v24 = vmul.f32 %v8351_v56, %v1425_v51  ;;  %v1455_v49 = vmul.f32 %v8351_v56, %v1427_v17  ;;  %v1429_v9 = vmul.f32 %v8876_v27, %v8787_v46  ;;  %v13485_v51 = vld [vmem:[#allocation14_spill] sm:$0xff] }
 0x50c   :  { %v1479_v18 = vadd.f32 %v13482_v14, %v1451_v60  ;;  %v1481_v3 = vadd.f32 %v13482_v14, %v1453_v24  ;;  %v1483_v40 = vadd.f32 %v13482_v14, %v1455_v49 }
 0x50e   :  { %v1495_v38 = vand.u32 2147483647, %v1479_v18  ;;  %v1497_v26 = vand.u32 2147483647, %v1481_v3  ;;  %v1499_v44 = vand.u32 2147483647, %v1483_v40 }
 0x510   :  { %v1511_v34 = vadd.f32 1.0, %v1495_v38  ;;  %v1513_v16 = vadd.f32 1.0, %v1497_v26  ;;  %v1515_v52 = vadd.f32 1.0, %v1499_v44 }
 0x512   :  { %7577 = vrcp.f32 %v1511_v34 }
 0x513   :  { %7579 = vrcp.f32 %v1513_v16 }
 0x514   :  { %7581 = vrcp.f32 %v1515_v52 }
 0x51c   :  { %v7578_v59 = vpop.eup %7577 }
 0x51d   :  { %v7580_v61 = vpop.eup %7579  ;;  %v1543_v57 = vmul.f32 %v7578_v59, %v1511_v34  ;;  %v13486_v34 = vld [vmem:[#allocation15_spill] sm:$0xff] }
 0x51e   :  { %v1545_v19 = vmul.f32 %v7580_v61, %v1513_v16  ;;  %v7582_v53 = vpop.eup %7581 }
 0x51f   :  { %v1559_v13 = vsub.f32 2.0, %v1543_v57  ;;  %v1547_v24 = vmul.f32 %v7582_v53, %v1515_v52 }
 0x520   :  { %v1561_v30 = vsub.f32 2.0, %v1545_v19 }
 0x521   :  { %v1575_v43 = vmul.f32 %v7578_v59, %v1559_v13  ;;  %v1563_v38 = vsub.f32 2.0, %v1547_v24  ;;  %v13487_v13 = vld [vmem:[#allocation16_spill] sm:$0xff] }
 0x522   :  { %v1577_v2 = vmul.f32 %v7580_v61, %v1561_v30 }
 0x523   :  { %v8890_v47 = vmul.f32 %v1575_v43, %v1479_v18  ;;  %v1457_v18 = vmul.f32 %v8351_v56, %v1429_v9  ;;  %v1579_v46 = vmul.f32 %v7582_v53, %v1563_v38  ;;  %v1342_v9 = vpop.xlane.xlu1 %1341  ;;  %v1336_v38 = vpop.xlane.xlu0 %1335 }
 0x524   :  { %v8896_v0 = vmul.f32 %v1577_v2, %v1481_v3 }
 0x525   :  { %v1610_v5 = vrot.slane %v8890_v47, %v13483_v35  ;;  %v1621_v45 = vrot.slane %v8890_v47, %v13484_v25  ;;  %v1632_v60 = vrot.slane %v8890_v47, %v13485_v51  ;;  %v1485_v26 = vadd.f32 %v13482_v14, %v1457_v18 }
 0x526   :  { %v1720_v50 = vrot.slane %v8896_v0, %v13483_v35  ;;  %v1731_v8 = vrot.slane %v8896_v0, %v13484_v25  ;;  %v1742_v3 = vrot.slane %v8896_v0, %v13485_v51  ;;  %v1643_v16 = vrot.slane %v8890_v47, %v13486_v34 }
 0x527   :  { %1616 = vbcast.lane.b32.xlu1 %v1610_v5, 264  ;;  %1612 = vbcast.lane.b32.xlu0 %v1610_v5, 256  ;;  %v1501_v17 = vand.u32 2147483647, %v1485_v26  ;;  %v1753_v49 = vrot.slane %v8896_v0, %v13486_v34  ;;  %v8914_v59 = vmul.f32 %v1579_v46, %v1483_v40  ;;  %v1654_v44 = vrot.slane %v8890_v47, %v13487_v13  ;;  %v13488_v5 = vld [vmem:[#allocation17_spill] sm:$0xff] }
 0x528   :  { %v1764_v40 = vrot.slane %v8896_v0, %v13487_v13  ;;  %v1665_v2 = vrot.slane %v8890_v47, %v13488_v5  ;;  %v1380_v46 = vmul.f32 0.0625, %v1336_v38 }
 0x529   :  { %v1517_v61 = vadd.f32 1.0, %v1501_v17  ;;  %v1830_v57 = vrot.slane %v8914_v59, %v13483_v35  ;;  %v1841_v19 = vrot.slane %v8914_v59, %v13484_v25  ;;  %v1852_v30 = vrot.slane %v8914_v59, %v13485_v51 }
 0x52a   :  { %v1863_v24 = vrot.slane %v8914_v59, %v13486_v34 }
 0x52b   :  { %1627 = vbcast.lane.b32.xlu1 %v1621_v45, 264  ;;  %1623 = vbcast.lane.b32.xlu0 %v1621_v45, 256  ;;  %7583 = vrcp.f32 %v1517_v61 }
 0x52f   :  { %1726 = vbcast.lane.b32.xlu1 %v1720_v50, 264  ;;  %1722 = vbcast.lane.b32.xlu0 %v1720_v50, 256  ;;  %v1431_v50 = vmul.f32 %v8876_v27, %v8797_v32 }
 0x533   :  { %1737 = vbcast.lane.b32.xlu1 %v1731_v8, 264  ;;  %1733 = vbcast.lane.b32.xlu0 %v1731_v8, 256  ;;  %v1775_v8 = vrot.slane %v8896_v0, %v13488_v5 }
 0x535   :  { %v7584_v43 = vpop.eup %7583 }
 0x536   :  { %v1549_v52 = vmul.f32 %v7584_v43, %v1517_v61 }
 0x537   :  { %1638 = vbcast.lane.b32.xlu1 %v1632_v60, 264  ;;  %1634 = vbcast.lane.b32.xlu0 %v1632_v60, 256  ;;  %v1459_v60 = vmul.f32 %v8351_v56, %v1431_v50 }
 0x538   :  { %v1565_v45 = vsub.f32 2.0, %v1549_v52 }
 0x539   :  { %v8938_v32 = vadd.f32 %v13482_v14, %v1459_v60 }
 0x53a   :  { %v1581_v53 = vmul.f32 %v7584_v43, %v1565_v45  ;;  %v13489_v43 = vld [vmem:[#allocation19_spill] sm:$0xff] }
 0x53b   :  { %1748 = vbcast.lane.b32.xlu1 %v1742_v3, 264  ;;  %1744 = vbcast.lane.b32.xlu0 %v1742_v3, 256  ;;  %v1348_v3 = vpop.xlane.xlu1 %1347  ;;  %v1503_v17 = vand.u32 2147483647, %v8938_v32 }
 0x53c   :  { %v8935_v18 = vmul.f32 %v1581_v53, %v1485_v26 }
 0x53e   :  { %v1951_v26 = vrot.slane %v8935_v18, %v13484_v25 }
 0x53f   :  { %1649 = vbcast.lane.b32.xlu1 %v1643_v16, 264  ;;  %1645 = vbcast.lane.b32.xlu0 %v1643_v16, 256  ;;  %v1940_v16 = vrot.slane %v8935_v18, %v13483_v35  ;;  %v1354_v61 = vpop.xlane.xlu1 %1353 }
 0x540   :  { %v1386_v50 = vmul.f32 0.0625, %v1354_v61  ;;  %v1372_v61 = vpop.xlane.xlu0 %1371 }
 0x543   :  { %1759 = vbcast.lane.b32.xlu1 %v1753_v49, 264  ;;  %1755 = vbcast.lane.b32.xlu0 %v1753_v49, 256  ;;  %v1382_v49 = vmul.f32 0.0625, %v1342_v9  ;;  %v1407_v9 = vsel %vm1280_vm11, %v1386_v50, 0.0 }
 0x547   :  { %1836 = vbcast.lane.b32.xlu1 %v1830_v57, 264  ;;  %1832 = vbcast.lane.b32.xlu0 %v1830_v57, 256  ;;  %v1402_v57 = vsel %vm1280_vm11, %v1380_v46, 0.0 }
 0x54b   :  { %1847 = vbcast.lane.b32.xlu1 %v1841_v19, 264  ;;  %1843 = vbcast.lane.b32.xlu0 %v1841_v19, 256  ;;  %v1519_v19 = vadd.f32 1.0, %v1503_v17  ;;  %v1962_v17 = vrot.slane %v8935_v18, %v13485_v51 }
 0x54d   :  { %7585 = vrcp.f32 %v1519_v19 }
 0x54f   :  { %1660 = vbcast.lane.b32.xlu1 %v1654_v44, 264  ;;  %1656 = vbcast.lane.b32.xlu0 %v1654_v44, 256  ;;  %v1403_v44 = vsel %vm1280_vm11, %v1382_v49, 0.0 }
 0x550   :  { %v1404_v52 = vadd.f32 %v1403_v44, %v1402_v57  ;;  %v1433_v57 = vmul.f32 %v8876_v27, %v8811_v28 }
 0x553   :  { %1770 = vbcast.lane.b32.xlu1 %v1764_v40, 264  ;;  %1766 = vbcast.lane.b32.xlu0 %v1764_v40, 256  ;;  %v1384_v40 = vmul.f32 0.0625, %v1348_v3 }
 0x555   :  { %v1405_v45 = vsel %vm1280_vm11, %v1384_v40, 0.0  ;;  %v1392_v40 = vmul.f32 0.0625, %v1372_v61 }
 0x556   :  { %v1406_v53 = vadd.f32 %v1405_v45, %v1404_v52 }
 0x557   :  { %1858 = vbcast.lane.b32.xlu1 %v1852_v30, 264  ;;  %1854 = vbcast.lane.b32.xlu0 %v1852_v30, 256  ;;  %v1676_v30 = vrot.slane %v8890_v47, %v13489_v43  ;;  %v7586_v49 = vpop.eup %7585 }
 0x558   :  { %v1408_v38 = vadd.f32 %v1407_v9, %v1406_v53  ;;  %v1413_v53 = vsel %vm1280_vm11, %v1392_v40, 0.0 }
 0x55b   :  { %1671 = vbcast.lane.b32.xlu1 %v1665_v2, 264  ;;  %1667 = vbcast.lane.b32.xlu0 %v1665_v2, 256  ;;  %v1360_v2 = vpop.xlane.xlu1 %1359 }
 0x55c   :  { %v1388_v60 = vmul.f32 0.0625, %v1360_v2  ;;  %v1551_v2 = vmul.f32 %v7586_v49, %v1519_v19  ;;  %v1885_v19 = vrot.slane %v8914_v59, %v13488_v5 }
 0x55e   :  { %v1567_v28 = vsub.f32 2.0, %v1551_v2  ;;  %v1896_v2 = vrot.slane %v8914_v59, %v13489_v43 }
 0x55f   :  { %1781 = vbcast.lane.b32.xlu1 %v1775_v8, 264  ;;  %1777 = vbcast.lane.b32.xlu0 %v1775_v8, 256  ;;  %v1786_v8 = vrot.slane %v8896_v0, %v13489_v43  ;;  %v1366_v3 = vpop.xlane.xlu1 %1365 }
 0x560   :  { %v1390_v46 = vmul.f32 0.0625, %v1366_v3 }
 0x562   :  { %v1411_v44 = vsel %vm1280_vm11, %v1390_v46, 0.0 }
 0x563   :  { %1869 = vbcast.lane.b32.xlu1 %v1863_v24, 264  ;;  %1865 = vbcast.lane.b32.xlu0 %v1863_v24, 256  ;;  %v1874_v24 = vrot.slane %v8914_v59, %v13487_v13  ;;  %v1378_v50 = vpop.xlane.xlu1 %1377 }
 0x564   :  { %v1394_v9 = vmul.f32 0.0625, %v1378_v50 }
 0x567   :  { %1946 = vbcast.lane.b32.xlu1 %v1940_v16, 264  ;;  %1942 = vbcast.lane.b32.xlu0 %v1940_v16, 256  ;;  %v1409_v16 = vsel %vm1280_vm11, %v1388_v60, 0.0 }
 0x56b   :  { %1957 = vbcast.lane.b32.xlu1 %v1951_v26, 264  ;;  %1953 = vbcast.lane.b32.xlu0 %v1951_v26, 256  ;;  %v1410_v26 = vadd.f32 %v1409_v16, %v1408_v38  ;;  %v1583_v38 = vmul.f32 %v7586_v49, %v1567_v28  ;;  %v1435_v49 = vmul.f32 %v8876_v27, %v8824_v63 }
 0x56d   :  { %v1412_v45 = vadd.f32 %v1411_v44, %v1410_v26 }
 0x56f   :  { %1682 = vbcast.lane.b32.xlu1 %v1676_v30, 264  ;;  %1678 = vbcast.lane.b32.xlu0 %v1676_v30, 256  ;;  %v13490_v30 = vld [vmem:[#allocation18_spill] sm:$0xff] }
 0x570   :  { %v1687_v52 = vrot.slane %v8890_v47, %v13490_v30  ;;  %v1797_v60 = vrot.slane %v8896_v0, %v13490_v30  ;;  %v1415_v47 = vsel %vm1280_vm11, %v1394_v9, 0.0  ;;  %v1973_v0 = vrot.slane %v8935_v18, %v13486_v34 }
 0x573   :  { %1792 = vbcast.lane.b32.xlu1 %v1786_v8, 264  ;;  %1788 = vbcast.lane.b32.xlu0 %v1786_v8, 256  ;;  %v1461_v8 = vmul.f32 %v8351_v56, %v1433_v57 }
 0x575   :  { %v8968_v3 = vadd.f32 %v13482_v14, %v1461_v8 }
 0x577   :  { %1880 = vbcast.lane.b32.xlu1 %v1874_v24, 264  ;;  %1876 = vbcast.lane.b32.xlu0 %v1874_v24, 256  ;;  %v1414_v24 = vadd.f32 %v1413_v53, %v1412_v45  ;;  %v1505_v46 = vand.u32 2147483647, %v8968_v3 }
 0x579   :  { %v1416_v16 = vadd.f32 %v1415_v47, %v1414_v24  ;;  %v1521_v61 = vadd.f32 1.0, %v1505_v46 }
 0x57b   :  { %1968 = vbcast.lane.b32.xlu1 %v1962_v17, 264  ;;  %1964 = vbcast.lane.b32.xlu0 %v1962_v17, 256  ;;  %v8977_v17 = vmul.f32 %v1583_v38, %v8938_v32  ;;  %v1418_v26 = vmul.f32 0.125, %v1416_v16  ;;  %7587 = vrcp.f32 %v1521_v61  ;;  %v1437_v32 = vmul.f32 %v8876_v27, %v8839_v58 }
 0x57c   :  { %v1984_v58 = vrot.slane %v8935_v18, %v13487_v13 }
 0x57d   :  { %v2050_v57 = vrot.slane %v8977_v17, %v13483_v35  ;;  %v1420_v44 = vadd.f32 1e-05, %v1418_v26  ;;  %v2061_v40 = vrot.slane %v8977_v17, %v13484_v25  ;;  %v1465_v45 = vmul.f32 %v8351_v56, %v1437_v32 }
 0x57e   :  { %v2072_v24 = vrot.slane %v8977_v17, %v13485_v51  ;;  %v1907_v26 = vrot.slane %v8914_v59, %v13490_v30 }
 0x57f   :  { %1693 = vbcast.lane.b32.xlu1 %v1687_v52, 264  ;;  %1689 = vbcast.lane.b32.xlu0 %v1687_v52, 256  ;;  %7589 = vrsqrt.f32 %v1420_v44  ;;  %v1463_v52 = vmul.f32 %v8351_v56, %v1435_v49  ;;  %v9001_v53 = vadd.f32 %v13482_v14, %v1465_v45  ;;  %v13491_v44 = vld [vmem:[#allocation21_spill] sm:$0xff]  ;;  %v13492_v45 = vld [vmem:[#allocation22_spill] sm:$0xff] }
 0x581   :  { %v8992_v63 = vadd.f32 %v13482_v14, %v1463_v52  ;;  %v1995_v52 = vrot.slane %v8935_v18, %v13488_v5 }
 0x583   :  { %1803 = vbcast.lane.b32.xlu1 %v1797_v60, 264  ;;  %1799 = vbcast.lane.b32.xlu0 %v1797_v60, 256  ;;  %v1507_v56 = vand.u32 2147483647, %v8992_v63 }
 0x585   :  { %v7588_v27 = vpop.eup %7587  ;;  %v1523_v14 = vadd.f32 1.0, %v1507_v56 }
 0x586   :  { %v1553_v47 = vmul.f32 %v7588_v27, %v1521_v61 }
 0x587   :  { %1891 = vbcast.lane.b32.xlu1 %v1885_v19, 264  ;;  %1887 = vbcast.lane.b32.xlu0 %v1885_v19, 256  ;;  %v1509_v19 = vand.u32 2147483647, %v9001_v53  ;;  %7591 = vrcp.f32 %v1523_v14 }
 0x589   :  { %v9004_v9 = vpop.eup %7589  ;;  %v1525_v61 = vadd.f32 1.0, %v1509_v19 }
 0x58a   :  { %v1424_v38 = vmul.f32 %v9004_v9, %v8846_v11  ;;  %v1426_v16 = vmul.f32 %v9004_v9, %v8806_v41  ;;  %v1428_v11 = vmul.f32 %v9004_v9, %v8818_v21 }
 0x58b   :  { %1979 = vbcast.lane.b32.xlu1 %v1973_v0, 264  ;;  %1975 = vbcast.lane.b32.xlu0 %v1973_v0, 256  ;;  %7593 = vrcp.f32 %v1525_v61 }
 0x58c   :  { %v1452_v49 = vmul.f32 %v13491_v44, %v1424_v38  ;;  %v1456_v21 = vmul.f32 %v13491_v44, %v1428_v11  ;;  %v1432_v38 = vmul.f32 %v9004_v9, %v8842_v6 }
 0x58e   :  { %v1460_v6 = vmul.f32 %v13491_v44, %v1432_v38 }
 0x58f   :  { %2056 = vbcast.lane.b32.xlu1 %v2050_v57, 264  ;;  %2052 = vbcast.lane.b32.xlu0 %v2050_v57, 256  ;;  %v1569_v57 = vsub.f32 2.0, %v1553_v47 }
 0x591   :  { %v1585_v59 = vmul.f32 %v7588_v27, %v1569_v57  ;;  %v2083_v27 = vrot.slane %v8977_v17, %v13486_v34  ;;  %v9057_v57 = vadd.f32 %v13492_v45, %v1456_v21 }
 0x593   :  { %2067 = vbcast.lane.b32.xlu1 %v2061_v40, 264  ;;  %2063 = vbcast.lane.b32.xlu0 %v2061_v40, 256  ;;  %v1454_v40 = vmul.f32 %v13491_v44, %v1426_v16  ;;  %v1500_v15 = vand.u32 2147483647, %v9057_v57 }
 0x595   :  { %v9039_v56 = vadd.f32 %v13492_v45, %v1454_v40  ;;  %v9091_v31 = vadd.f32 1.0, %v1500_v15 }
 0x597   :  { %1902 = vbcast.lane.b32.xlu1 %v1896_v2, 264  ;;  %1898 = vbcast.lane.b32.xlu0 %v1896_v2, 256  ;;  %v1430_v2 = vmul.f32 %v9004_v9, %v8830_v1  ;;  %v9049_v1 = vmul.f32 %v1585_v59, %v8968_v3 }
 0x599   :  { %v8994_v50 = vpop.permute.xlu1 %1616  ;;  %v8996_v8 = vpop.permute.xlu0 %1612  ;;  %v1458_v19 = vmul.f32 %v13491_v44, %v1430_v2  ;;  %v2160_v3 = vrot.slane %v9049_v1, %v13483_v35  ;;  %v1434_v2 = vmul.f32 %v9004_v9, %v8854_v39  ;;  %v1436_v39 = vmul.f32 %v9004_v9, %v8859_v23 }
 0x59b   :  { %1990 = vbcast.lane.b32.xlu1 %v1984_v58, 264  ;;  %1986 = vbcast.lane.b32.xlu0 %v1984_v58, 256  ;;  %v9036_v58 = vadd.f32 %v13492_v45, %v1452_v49  ;;  %v7592_v49 = vpop.eup %7591 }
 0x59c   :  { %v7594_v21 = vpop.eup %7593 }
 0x59d   :  { %v9006_v60 = vpop.permute.xlu1 %1627  ;;  %v9008_v28 = vpop.permute.xlu0 %1623  ;;  %v1496_v16 = vand.u32 2147483647, %v9036_v58 }
 0x59f   :  { %2078 = vbcast.lane.b32.xlu1 %v2072_v24, 264  ;;  %2074 = vbcast.lane.b32.xlu0 %v2072_v24, 256  ;;  %v9069_v59 = vadd.f32 1.0, %v1496_v16  ;;  %v9084_v16 = vadd.f32 %v13492_v45, %v1460_v6  ;;  %v2006_v6 = vrot.slane %v8935_v18, %v13489_v43 }
 0x5a1   :  { %v9017_v46 = vpop.permute.xlu1 %1726  ;;  %v9019_v0 = vpop.permute.xlu0 %1722  ;;  %7595 = vrcp.f32 %v9069_v59 }
 0x5a3   :  { %1913 = vbcast.lane.b32.xlu1 %v1907_v26, 264  ;;  %1909 = vbcast.lane.b32.xlu0 %v1907_v26, 256  ;;  %v1498_v26 = vand.u32 2147483647, %v9039_v56 }
 0x5a5   :  { %v9027_v41 = vpop.permute.xlu1 %1737  ;;  %v9029_v32 = vpop.permute.xlu0 %1733  ;;  %v9073_v10 = vadd.f32 1.0, %v1498_v26  ;;  %v1462_v26 = vmul.f32 %v13491_v44, %v1434_v2 }
 0x5a7   :  { %2001 = vbcast.lane.b32.xlu1 %v1995_v52, 264  ;;  %1997 = vbcast.lane.b32.xlu0 %v1995_v52, 256  ;;  %v9066_v52 = vadd.f32 %v13492_v45, %v1458_v19  ;;  %v2171_v19 = vrot.slane %v9049_v1, %v13484_v25  ;;  %7597 = vrcp.f32 %v9073_v10 }
 0x5a8   :  { %7599 = vrcp.f32 %v9091_v31 }
 0x5a9   :  { %v9042_v24 = vpop.permute.xlu1 %1638  ;;  %v9044_v47 = vpop.permute.xlu0 %1634  ;;  %v1502_v38 = vand.u32 2147483647, %v9066_v52 }
 0x5ab   :  { %2089 = vbcast.lane.b32.xlu1 %v2083_v27, 264  ;;  %2085 = vbcast.lane.b32.xlu0 %v2083_v27, 256  ;;  %v1555_v27 = vmul.f32 %v7592_v49, %v1523_v14  ;;  %v1557_v14 = vmul.f32 %v7594_v21, %v1525_v61  ;;  %v9099_v23 = vadd.f32 1.0, %v1502_v38  ;;  %v1504_v61 = vand.u32 2147483647, %v9084_v16 }
 0x5ac   :  { %v2094_v38 = vrot.slane %v8977_v17, %v13487_v13 }
 0x5ad   :  { %v9059_v40 = vpop.permute.xlu1 %1748  ;;  %v9061_v11 = vpop.permute.xlu0 %1744  ;;  %v1573_v2 = vsub.f32 2.0, %v1557_v14  ;;  %7601 = vrcp.f32 %v9099_v23  ;;  %v9114_v62 = vadd.f32 1.0, %v1504_v61 }
 0x5af   :  { %2166 = vbcast.lane.b32.xlu1 %v2160_v3, 264  ;;  %2162 = vbcast.lane.b32.xlu0 %v2160_v3, 256  ;;  %v1571_v3 = vsub.f32 2.0, %v1555_v27  ;;  %v9104_v27 = vadd.f32 %v13492_v45, %v1462_v26  ;;  %7603 = vrcp.f32 %v9114_v62 }
 0x5b1   :  { %v9076_v54 = vpop.permute.xlu1 %1649  ;;  %v9078_v4 = vpop.permute.xlu0 %1645  ;;  %v1587_v15 = vmul.f32 %v7592_v49, %v1571_v3  ;;  %v1589_v49 = vmul.f32 %v7594_v21, %v1573_v2  ;;  %v1506_v26 = vand.u32 2147483647, %v9104_v27  ;;  %v2017_v3 = vrot.slane %v8935_v18, %v13490_v30 }
 0x5b2   :  { %v9141_v18 = vrot.slane %v9049_v1, %v13486_v34  ;;  %v9149_v2 = vrot.slane %v9049_v1, %v13487_v13 }
 0x5b3   :  { %2177 = vbcast.lane.b32.xlu1 %v2171_v19, 264  ;;  %2173 = vbcast.lane.b32.xlu0 %v2171_v19, 256  ;;  %v1464_v19 = vmul.f32 %v13491_v44, %v1436_v39  ;;  %v1438_v39 = vmul.f32 %v9004_v9, %v8866_v12  ;;  %v2182_v12 = vrot.slane %v9049_v1, %v13485_v51 }
 0x5b4   :  { %v2105_v9 = vrot.slane %v8977_v17, %v13488_v5 }
 0x5b5   :  { %v9093_v37 = vpop.permute.xlu1 %1759  ;;  %v9095_v48 = vpop.permute.xlu0 %1755  ;;  %v9119_v14 = vadd.f32 %v13492_v45, %v1464_v19  ;;  %v1466_v21 = vmul.f32 %v13491_v44, %v1438_v39  ;;  %v9154_v44 = vrot.slane %v8977_v17, %v13490_v30  ;;  %v1605_v39 = vmul.f32 %v1589_v49, %v9001_v53 }
 0x5b6   :  { %v9181_v53 = vrot.slane %v9049_v1, %v13489_v43 }
 0x5b7   :  { %2012 = vbcast.lane.b32.xlu1 %v2006_v6, 264  ;;  %2008 = vbcast.lane.b32.xlu0 %v2006_v6, 256  ;;  %13495 = vst [vmem:[#allocation13_spill] sm:$0xff] %v9119_v14  ;;  %v1603_v6 = vmul.f32 %v1587_v15, %v8992_v63  ;;  %v9145_v63 = vrot.slane %v8977_v17, %v13489_v43  ;;  %v1508_v15 = vand.u32 2147483647, %v9119_v14  ;;  %13498 = vst [vmem:[#allocation16_spill] sm:$0xff] %v9154_v44 }
 0x5b8   :  { %13504 = vst [vmem:[#allocation52_spill] sm:$0xff] %v9181_v53 }
 0x5b9   :  { %v9107_v29 = vpop.permute.xlu1 %1836  ;;  %v9109_v33 = vpop.permute.xlu0 %1832  ;;  %v9173_v17 = vrot.slane %v1603_v6, %v13486_v34  ;;  %v9200_v53 = vrot.slane %v1603_v6, %v13488_v5 }
 0x5ba   :  { %13493 = vst [vmem:[#allocation20_spill] sm:$0xff] %v9107_v29  ;;  %13494 = vst [vmem:[#allocation12_spill] sm:$0xff] %v9109_v33  ;;  %v9125_v33 = vpop.eup %7595  ;;  %v9167_v29 = vrot.slane %v1603_v6, %v13484_v25 }
 0x5bb   :  { %2100 = vbcast.lane.b32.xlu1 %v2094_v38, 264  ;;  %2096 = vbcast.lane.b32.xlu0 %v2094_v38, 256  ;;  %v9137_v19 = vpop.eup %7597  ;;  %v9158_v38 = vrot.slane %v9049_v1, %v13488_v5  ;;  %13501 = vst [vmem:[#allocation49_spill] sm:$0xff] %v9173_v17  ;;  %v1544_v49 = vmul.f32 %v9125_v33, %v9069_v59  ;;  %13508 = vst [vmem:[#allocation56_spill] sm:$0xff] %v9200_v53 }
 0x5bc   :  { %v9193_v17 = vrot.slane %v1603_v6, %v13487_v13  ;;  %v9223_v53 = vrot.slane %v1605_v39, %v13486_v34 }
 0x5bd   :  { %v9127_v61 = vpop.permute.xlu1 %1847  ;;  %v9129_v36 = vpop.permute.xlu0 %1843  ;;  %13499 = vst [vmem:[#allocation21_spill] sm:$0xff] %v9158_v38  ;;  %v9188_v38 = vadd.f32 %v13492_v45, %v1466_v21  ;;  %v9210_v45 = vrot.slane %v1603_v6, %v13489_v43  ;;  %v9213_v21 = vrot.slane %v1603_v6, %v13490_v30 }
 0x5be   :  { %13496 = vst [vmem:[#allocation14_spill] sm:$0xff] %v9127_v61  ;;  %13497 = vst [vmem:[#allocation15_spill] sm:$0xff] %v9129_v36  ;;  %v9161_v36 = vadd.f32 1.0, %v1506_v26  ;;  %v9164_v61 = vrot.slane %v1603_v6, %v13483_v35  ;;  %v1546_v26 = vmul.f32 %v9137_v19, %v9073_v10  ;;  %v9207_v10 = vrot.slane %v1605_v39, %v13483_v35 }
 0x5bf   :  { %2188 = vbcast.lane.b32.xlu1 %v2182_v12, 264  ;;  %2184 = vbcast.lane.b32.xlu0 %v2182_v12, 256  ;;  %v9170_v12 = vrot.slane %v1603_v6, %v13485_v51  ;;  %13505 = vst [vmem:[#allocation53_spill] sm:$0xff] %v9188_v38  ;;  %13506 = vst [vmem:[#allocation54_spill] sm:$0xff] %v9193_v17  ;;  %v9233_v6 = vrot.slane %v1605_v39, %v13488_v5 }
 0x5c0   :  { %13509 = vst [vmem:[#allocation57_spill] sm:$0xff] %v9207_v10  ;;  %13510 = vst [vmem:[#allocation58_spill] sm:$0xff] %v9210_v45  ;;  %7605 = vrcp.f32 %v9161_v36  ;;  %v1562_v17 = vsub.f32 2.0, %v1546_v26  ;;  %v2487_v5 = vmul.f32 %v8996_v8, %v8573_v20  ;;  %v2489_v26 = vmul.f32 %v9008_v28, %v8573_v20 }
 0x5c1   :  { %13500 = vst [vmem:[#allocation22_spill] sm:$0xff] %v9170_v12  ;;  %v9175_v44 = vpop.permute.xlu1 %1660  ;;  %v9177_v14 = vpop.permute.xlu0 %1656  ;;  %13511 = vst [vmem:[#allocation59_spill] sm:$0xff] %v9213_v21  ;;  %v1560_v21 = vsub.f32 2.0, %v1544_v49  ;;  %v2490_v49 = vmul.f32 %v9006_v60, %v8575_v42  ;;  %v2509_v8 = vmul.f32 %v9029_v32, %v8587_v55  ;;  %v9264_v28 = vrot.slane %v1605_v39, %v13489_v43 }
 0x5c2   :  { %13502 = vst [vmem:[#allocation50_spill] sm:$0xff] %v9175_v44  ;;  %13503 = vst [vmem:[#allocation51_spill] sm:$0xff] %v9177_v14  ;;  %v9190_v12 = vpop.eup %7599  ;;  %v9197_v14 = vrot.slane %v9049_v1, %v13490_v30  ;;  %v9202_v44 = vadd.f32 1.0, %v1508_v15  ;;  %v9217_v1 = vrot.slane %v1605_v39, %v13484_v25  ;;  %v9220_v15 = vrot.slane %v1605_v39, %v13485_v51 }
 0x5c3   :  { %v9204_v59 = vpop.eup %7601  ;;  %2023 = vbcast.lane.b32.xlu1 %v2017_v3, 264  ;;  %2019 = vbcast.lane.b32.xlu0 %v2017_v3, 256  ;;  %13514 = vst [vmem:[#allocation62_spill] sm:$0xff] %v9223_v53  ;;  %v9226_v3 = vrot.slane %v1605_v39, %v13487_v13  ;;  %13516 = vst [vmem:[#allocation64_spill] sm:$0xff] %v9233_v6  ;;  %v2488_v51 = vmul.f32 %v8994_v50, %v8575_v42  ;;  %v2657_v43 = vsel %vm346_vm1, %v2490_v49, 0.0 }
 0x5c4   :  { %13507 = vst [vmem:[#allocation55_spill] sm:$0xff] %v9197_v14  ;;  %13512 = vst [vmem:[#allocation60_spill] sm:$0xff] %v9217_v1  ;;  %v1510_v1 = vand.u32 2147483647, %v9188_v38  ;;  %v1548_v34 = vmul.f32 %v9190_v12, %v9091_v31  ;;  %v1550_v13 = vmul.f32 %v9204_v59, %v9099_v23  ;;  %7607 = vrcp.f32 %v9202_v44 }
 0x5c5   :  { %13513 = vst [vmem:[#allocation61_spill] sm:$0xff] %v9220_v15  ;;  %13515 = vst [vmem:[#allocation63_spill] sm:$0xff] %v9226_v3  ;;  %v9228_v14 = vpop.permute.xlu1 %1770  ;;  %v9230_v45 = vpop.permute.xlu0 %1766  ;;  %v2508_v31 = vmul.f32 %v9017_v46, %v8589_v22  ;;  %v2507_v50 = vmul.f32 %v9019_v0, %v8587_v55  ;;  %v2510_v23 = vmul.f32 %v9027_v41, %v8589_v22  ;;  %v2648_v10 = vsel %vm346_vm1, %v2488_v51, 0.0 }
 0x5c6   :  { %v9243_v3 = vpop.eup %7603  ;;  %v1576_v46 = vmul.f32 %v9125_v33, %v1560_v21  ;;  %v9270_v53 = vadd.f32 1.0, %v1510_v1  ;;  %v1578_v0 = vmul.f32 %v9137_v19, %v1562_v17  ;;  %v1564_v41 = vsub.f32 2.0, %v1548_v34 }
 0x5c7   :  { %2111 = vbcast.lane.b32.xlu1 %v2105_v9, 264  ;;  %2107 = vbcast.lane.b32.xlu0 %v2105_v9, 256  ;;  %v9267_v9 = vrot.slane %v1605_v39, %v13490_v30  ;;  %v1566_v15 = vsub.f32 2.0, %v1550_v13  ;;  %v1552_v32 = vmul.f32 %v9243_v3, %v9114_v62  ;;  %v2647_v38 = vsel %vm346_vm1, %v2487_v5, 0.0 }
 0x5c8   :  { %v2656_v39 = vsel %vm346_vm1, %v2489_v26, 0.0  ;;  %v2738_v33 = vsel %vm346_vm1, %v2508_v31, 0.0  ;;  %v2737_v19 = vsel %vm346_vm1, %v2507_v50, 0.0  ;;  %v2747_v17 = vsel %vm346_vm1, %v2510_v23, 0.0 }
 0x5c9   :  { %v9259_v6 = vpop.permute.xlu1 %1858  ;;  %v9261_v60 = vpop.permute.xlu0 %1854  ;;  %v2746_v62 = vsel %vm346_vm1, %v2509_v8, 0.0  ;;  %v2492_v5 = vmul.f32 %v9042_v24, %v8575_v42  ;;  %v2491_v1 = vmul.f32 %v9044_v47, %v8573_v20  ;;  %v2512_v51 = vmul.f32 %v9059_v40, %v8589_v22 }
 0x5ca   :  { %v9285_v21 = vpop.eup %7605  ;;  %v1592_v49 = vmul.f32 %v1576_v46, %v9036_v58  ;;  %v1594_v26 = vmul.f32 %v1578_v0, %v9039_v56  ;;  %v1580_v31 = vmul.f32 %v9190_v12, %v1564_v41  ;;  %7609 = vrcp.f32 %v9270_v53 }
 0x5cb   :  { %2199 = vbcast.lane.b32.xlu1 %v9141_v18, 264  ;;  %2195 = vbcast.lane.b32.xlu0 %v9141_v18, 256  ;;  %v2511_v18 = vmul.f32 %v9061_v11, %v8587_v55  ;;  %v2649_v24 = vadd.f32 %v2648_v10, %v2647_v38  ;;  %v2658_v47 = vadd.f32 %v2657_v43, %v2656_v39  ;;  %v1568_v8 = vsub.f32 2.0, %v1552_v32 }
 0x5cc   :  { %v1582_v40 = vmul.f32 %v9204_v59, %v1566_v15  ;;  %v2739_v50 = vadd.f32 %v2738_v33, %v2737_v19  ;;  %v2748_v23 = vadd.f32 %v2747_v17, %v2746_v62  ;;  %v1554_v58 = vmul.f32 %v9285_v21, %v9161_v36 }
 0x5cd   :  { %v9295_v34 = vpop.permute.xlu1 %1671  ;;  %v9297_v13 = vpop.permute.xlu0 %1667  ;;  %v2666_v56 = vsel %vm346_vm1, %v2492_v5, 0.0  ;;  %v2665_v12 = vsel %vm346_vm1, %v2491_v1, 0.0  ;;  %v2756_v38 = vsel %vm346_vm1, %v2512_v51, 0.0  ;;  %v2755_v43 = vsel %vm346_vm1, %v2511_v18, 0.0 }
 0x5ce   :  { %v7608_v11 = vpop.eup %7607  ;;  %v2494_v59 = vmul.f32 %v9076_v54, %v8575_v42  ;;  %v2493_v15 = vmul.f32 %v9078_v4, %v8573_v20  ;;  %v9321_v36 = vrot.slane %v1592_v49, %v13483_v35  ;;  %v9324_v46 = vrot.slane %v1592_v49, %v13484_v25 }
 0x5cf   :  { %2276 = vbcast.lane.b32.xlu1 %v9164_v61, 264  ;;  %2272 = vbcast.lane.b32.xlu0 %v9164_v61, 256  ;;  %v2650_v0 = vrot.slane %v2649_v24, 4  ;;  %v2659_v41 = vrot.slane %v2658_v47, 4  ;;  %v9329_v32 = vrot.slane %v1594_v26, %v13483_v35  ;;  %v1556_v54 = vmul.f32 %v7608_v11, %v9202_v44 }
 0x5d0   :  { %v2740_v39 = vrot.slane %v2739_v50, 4  ;;  %v2749_v33 = vrot.slane %v2748_v23, 4  ;;  %v2667_v4 = vadd.f32 %v2666_v56, %v2665_v12  ;;  %v2757_v19 = vadd.f32 %v2756_v38, %v2755_v43 }
 0x5d1   :  { %v9312_v10 = vpop.permute.xlu1 %1781  ;;  %v9314_v61 = vpop.permute.xlu0 %1777  ;;  %13517 = vst [vmem:[#allocation65_spill] sm:$0xff] %v9329_v32  ;;  %v1596_v5 = vmul.f32 %v1580_v31, %v9057_v57  ;;  %v1598_v1 = vmul.f32 %v1582_v40, %v9066_v52  ;;  %v1584_v51 = vmul.f32 %v9243_v3, %v1568_v8  ;;  %v2675_v18 = vsel %vm346_vm1, %v2494_v59, 0.0 }
 0x5d2   :  { %v2674_v49 = vsel %vm346_vm1, %v2493_v15, 0.0  ;;  %v2514_v44 = vmul.f32 %v9093_v37, %v8589_v22  ;;  %v2513_v56 = vmul.f32 %v9095_v48, %v8587_v55  ;;  %v2651_v12 = vadd.f32 %v2650_v0, %v2649_v24 }
 0x5d3   :  { %2287 = vbcast.lane.b32.xlu1 %v9167_v29, 264  ;;  %2283 = vbcast.lane.b32.xlu0 %v9167_v29, 256  ;;  %v1570_v29 = vsub.f32 2.0, %v1554_v58  ;;  %v2660_v38 = vadd.f32 %v2659_v41, %v2658_v47  ;;  %v9348_v57 = vrot.slane %v1594_v26, %v13484_v25  ;;  %v1572_v52 = vsub.f32 2.0, %v1556_v54 }
 0x5d4   :  { %v7610_v3 = vpop.eup %7609  ;;  %v2741_v31 = vadd.f32 %v2740_v39, %v2739_v50  ;;  %v2750_v40 = vadd.f32 %v2749_v33, %v2748_v23  ;;  %v2668_v8 = vrot.slane %v2667_v4, 4  ;;  %v2758_v58 = vrot.slane %v2757_v19, 4 }
 0x5d5   :  { %v9332_v17 = vpop.permute.xlu1 %1869  ;;  %v9334_v62 = vpop.permute.xlu0 %1865  ;;  %13518 = vst [vmem:[#allocation66_spill] sm:$0xff] %v9348_v57  ;;  %v2676_v43 = vadd.f32 %v2675_v18, %v2674_v49  ;;  %v9355_v48 = vrot.slane %v1596_v5, %v13483_v35  ;;  %v9358_v24 = vrot.slane %v1596_v5, %v13484_v25  ;;  %v2765_v26 = vsel %vm346_vm1, %v2514_v44, 0.0  ;;  %v13536_v57 = vld [vmem:[#allocation50_spill] sm:$0xff] }
 0x5d6   :  { %v2764_v47 = vsel %vm346_vm1, %v2513_v56, 0.0  ;;  %v9364_v50 = vrot.slane %v1598_v1, %v13483_v35  ;;  %v1600_v23 = vmul.f32 %v1584_v51, %v9084_v16  ;;  %v2652_v15 = vrot.slane %v2651_v12, 2  ;;  %v13524_v56 = vld [vmem:[#allocation37_spill] sm:$0xff] }
 0x5d7   :  { %2122 = vbcast.lane.b32.xlu1 %v9145_v63, 264  ;;  %2118 = vbcast.lane.b32.xlu0 %v9145_v63, 256  ;;  %13519 = vst [vmem:[#allocation67_spill] sm:$0xff] %v9355_v48  ;;  %13520 = vst [vmem:[#allocation68_spill] sm:$0xff] %v9358_v24  ;;  %v1586_v63 = vmul.f32 %v9285_v21, %v1570_v29  ;;  %v2661_v0 = vrot.slane %v2660_v38, 2  ;;  %v1588_v41 = vmul.f32 %v7608_v11, %v1572_v52 }
 0x5d8   :  { %13521 = vst [vmem:[#allocation69_spill] sm:$0xff] %v9364_v50  ;;  %v1558_v54 = vmul.f32 %v7610_v3, %v9270_v53  ;;  %v2742_v39 = vrot.slane %v2741_v31, 2  ;;  %v2751_v21 = vrot.slane %v2750_v40, 2  ;;  %v2669_v33 = vadd.f32 %v2668_v8, %v2667_v4  ;;  %v13525_v53 = vld [vmem:[#allocation12_spill] sm:$0xff] }
 0x5d9   :  { %v9350_v37 = vpop.permute.xlu1 %1946  ;;  %v9352_v59 = vpop.permute.xlu0 %1942  ;;  %v2759_v5 = vadd.f32 %v2758_v58, %v2757_v19  ;;  %v2677_v29 = vrot.slane %v2676_v43, 4  ;;  %v2766_v18 = vadd.f32 %v2765_v26, %v2764_v47  ;;  %v9375_v16 = vrot.slane %v1598_v1, %v13484_v25  ;;  %v13528_v26 = vld [vmem:[#allocation22_spill] sm:$0xff]  ;;  %v13529_v1 = vld [vmem:[#allocation13_spill] sm:$0xff] }
 0x5da   :  { %v1602_v51 = vmul.f32 %v1586_v63, %v9104_v27  ;;  %v2527_v52 = vmul.f32 %v13525_v53, %v13524_v56  ;;  %v9383_v4 = vrot.slane %v1600_v23, %v13483_v35  ;;  %v9386_v19 = vrot.slane %v1600_v23, %v13484_v25 }
 0x5db   :  { %2210 = vbcast.lane.b32.xlu1 %v9149_v2, 264  ;;  %2206 = vbcast.lane.b32.xlu0 %v9149_v2, 256  ;;  %13522 = vst [vmem:[#allocation70_spill] sm:$0xff] %v9375_v16  ;;  %v13523_v2 = vld [vmem:[#allocation20_spill] sm:$0xff]  ;;  %v2653_v8 = vadd.f32 %v2652_v15, %v2651_v12  ;;  %v2662_v58 = vadd.f32 %v2661_v0, %v2660_v38  ;;  %v1574_v63 = vsub.f32 2.0, %v1558_v54  ;;  %v2670_v16 = vrot.slane %v2669_v33, 2 }
 0x5dc   :  { %v2528_v11 = vmul.f32 %v13523_v2, %v8603_v7  ;;  %13526 = vst [vmem:[#allocation20_spill] sm:$0xff] %v9383_v4  ;;  %13527 = vst [vmem:[#allocation12_spill] sm:$0xff] %v9386_v19  ;;  %v9391_v27 = vmul.f32 %v1588_v41, %v13529_v1  ;;  %v2743_v47 = vadd.f32 %v2742_v39, %v2741_v31  ;;  %v2760_v53 = vrot.slane %v2759_v5, 2  ;;  %v13530_v4 = vld [vmem:[#allocation14_spill] sm:$0xff]  ;;  %v13532_v31 = vld [vmem:[#allocation15_spill] sm:$0xff] }
 0x5dd   :  { %v9370_v49 = vpop.permute.xlu1 %1957  ;;  %v9372_v44 = vpop.permute.xlu0 %1953  ;;  %v2752_v2 = vadd.f32 %v2751_v21, %v2750_v40  ;;  %v2678_v50 = vadd.f32 %v2677_v29, %v2676_v43  ;;  %v2767_v24 = vrot.slane %v2766_v18, 4  ;;  %v2530_v23 = vmul.f32 %v13530_v4, %v8603_v7  ;;  %v13534_v39 = vld [vmem:[#allocation16_spill] sm:$0xff] }
 0x5de   :  { %v9400_v38 = vrot.slane %v1602_v51, %v13483_v35  ;;  %v2828_v15 = vsel %vm346_vm1, %v2528_v11, 0.0  ;;  %v2827_v0 = vsel %vm346_vm1, %v2527_v52, 0.0  ;;  %v2529_v40 = vmul.f32 %v13532_v31, %v13524_v56 }
 0x5df   :  { %2298 = vbcast.lane.b32.xlu1 %v13528_v26, 264  ;;  %2294 = vbcast.lane.b32.xlu0 %v13528_v26, 256  ;;  %v9407_v43 = vrot.slane %v1602_v51, %v13484_v25  ;;  %v2654_v41 = vrot.slane %v2653_v8, 1  ;;  %v2663_v54 = vrot.slane %v2662_v58, 1  ;;  %v9413_v21 = vrot.slane %v9391_v27, %v13483_v35 }
 0x5e0   :  { %13531 = vst [vmem:[#allocation22_spill] sm:$0xff] %v9400_v38  ;;  %v1590_v29 = vmul.f32 %v7610_v3, %v1574_v63  ;;  %v2744_v11 = vrot.slane %v2743_v47, 1  ;;  %v2753_v4 = vrot.slane %v2752_v2, 1  ;;  %v2671_v52 = vadd.f32 %v2670_v16, %v2669_v33  ;;  %v13537_v3 = vld [vmem:[#allocation51_spill] sm:$0xff]  ;;  %v13538_v16 = vld [vmem:[#allocation21_spill] sm:$0xff] }
 0x5e1   :  { %v9395_v19 = vpop.permute.xlu1 %1682  ;;  %v9397_v12 = vpop.permute.xlu0 %1678  ;;  %13533 = vst [vmem:[#allocation13_spill] sm:$0xff] %v9407_v43  ;;  %13535 = vst [vmem:[#allocation14_spill] sm:$0xff] %v9413_v21  ;;  %v2761_v26 = vadd.f32 %v2760_v53, %v2759_v5  ;;  %v2679_v1 = vrot.slane %v2678_v50, 2  ;;  %v2768_v31 = vadd.f32 %v2767_v24, %v2766_v18  ;;  %v2829_v38 = vadd.f32 %v2828_v15, %v2827_v0 }
 0x5e2   :  { %v2837_v51 = vsel %vm346_vm1, %v2530_v23, 0.0  ;;  %v2496_v32 = vmul.f32 %v13536_v57, %v8575_v42  ;;  %v2495_v63 = vmul.f32 %v13537_v3, %v8573_v20  ;;  %v2516_v33 = vmul.f32 %v9228_v14, %v8589_v22 }
 0x5e3   :  { %2133 = vbcast.lane.b32.xlu1 %v13534_v39, 264  ;;  %2129 = vbcast.lane.b32.xlu0 %v13534_v39, 256  ;;  %v2836_v39 = vsel %vm346_vm1, %v2529_v40, 0.0  ;;  %v2655_v5 = vadd.f32 %v2654_v41, %v2653_v8  ;;  %v2664_v24 = vadd.f32 %v2663_v54, %v2662_v58  ;;  %v2515_v18 = vmul.f32 %v9230_v45, %v8587_v55 }
 0x5e4   :  { %v2745_v53 = vadd.f32 %v2744_v11, %v2743_v47  ;;  %v2754_v23 = vadd.f32 %v2753_v4, %v2752_v2  ;;  %v2672_v15 = vrot.slane %v2671_v52, 1  ;;  %v2762_v0 = vrot.slane %v2761_v26, 1  ;;  %v13539_v11 = vld [vmem:[#allocation49_spill] sm:$0xff] }
 0x5e5   :  { %v9416_v43 = vpop.permute.xlu1 %1792  ;;  %v9418_v48 = vpop.permute.xlu0 %1788  ;;  %v2680_v57 = vadd.f32 %v2679_v1, %v2678_v50  ;;  %v2769_v40 = vrot.slane %v2768_v31, 2  ;;  %v2830_v21 = vrot.slane %v2829_v38, 4  ;;  %v2838_v3 = vadd.f32 %v2837_v51, %v2836_v39  ;;  %v13540_v1 = vld [vmem:[#allocation53_spill] sm:$0xff] }
 0x5e6   :  { %v2684_v8 = vsel %vm346_vm1, %v2496_v32, 0.0  ;;  %v2683_v45 = vsel %vm346_vm1, %v2495_v63, 0.0  ;;  %v2774_v58 = vsel %vm346_vm1, %v2516_v33, 0.0  ;;  %v2532_v47 = vmul.f32 %v9259_v6, %v8603_v7 }
 0x5e7   :  { %2221 = vbcast.lane.b32.xlu1 %v13538_v16, 264  ;;  %2217 = vbcast.lane.b32.xlu0 %v13538_v16, 256  ;;  %v2773_v2 = vsel %vm346_vm1, %v2515_v18, 0.0  ;;  %v2531_v50 = vmul.f32 %v9261_v60, %v13524_v56  ;;  %v2498_v41 = vmul.f32 %v9295_v34, %v8575_v42  ;;  %v2497_v54 = vmul.f32 %v9297_v13, %v8573_v20 }
 0x5e8   :  { %v3559_v32 = vsel %vm432_vm2, %v2664_v24, %v2655_v5  ;;  %v3567_v4 = vsel %vm432_vm2, %v2754_v23, %v2745_v53  ;;  %v9453_v6 = vrot.slane %v9391_v27, %v13484_v25  ;;  %v1606_v60 = vmul.f32 %v1590_v29, %v13540_v1 }
 0x5e9   :  { %v9431_v30 = vpop.permute.xlu1 %1880  ;;  %v9433_v14 = vpop.permute.xlu0 %1876  ;;  %v2673_v51 = vadd.f32 %v2672_v15, %v2671_v52  ;;  %v2763_v39 = vadd.f32 %v2762_v0, %v2761_v26  ;;  %v2681_v34 = vrot.slane %v2680_v57, 1  ;;  %v2770_v63 = vadd.f32 %v2769_v40, %v2768_v31  ;;  %v13541_v52 = vld [vmem:[#allocation57_spill] sm:$0xff] }
 0x5ea   :  { %v2831_v18 = vadd.f32 %v2830_v21, %v2829_v38  ;;  %v2839_v16 = vrot.slane %v2838_v3, 4  ;;  %v2775_v5 = vadd.f32 %v2774_v58, %v2773_v2  ;;  %v2846_v24 = vsel %vm346_vm1, %v2532_v47, 0.0 }
 0x5eb   :  { %2309 = vbcast.lane.b32.xlu1 %v13539_v11, 264  ;;  %2305 = vbcast.lane.b32.xlu0 %v13539_v11, 256  ;;  %v2685_v11 = vadd.f32 %v2684_v8, %v2683_v45  ;;  %v2845_v53 = vsel %vm346_vm1, %v2531_v50, 0.0  ;;  %v2693_v27 = vsel %vm346_vm1, %v2498_v41, 0.0  ;;  %v2692_v29 = vsel %vm346_vm1, %v2497_v54, 0.0  ;;  %v13543_v41 = vld [vmem:[#allocation60_spill] sm:$0xff] }
 0x5ec   :  { %v2518_v26 = vmul.f32 %v9312_v10, %v8589_v22  ;;  %v2517_v38 = vmul.f32 %v9314_v61, %v8587_v55  ;;  %v2534_v21 = vmul.f32 %v9332_v17, %v8603_v7  ;;  %v2533_v31 = vmul.f32 %v9334_v62, %v13524_v56 }
 0x5ed   :  { %v9456_v33 = vpop.permute.xlu1 %1968  ;;  %v9458_v13 = vpop.permute.xlu0 %1964  ;;  %v3560_v23 = vsel %vm434_vm3, %v2673_v51, %v3559_v32  ;;  %v3568_v15 = vsel %vm434_vm3, %v2763_v39, %v3567_v4  ;;  %v9481_v8 = vrot.slane %v1606_v60, %v13483_v35  ;;  %v9484_v10 = vrot.slane %v1606_v60, %v13484_v25 }
 0x5ee   :  { %v2682_v61 = vadd.f32 %v2681_v34, %v2680_v57  ;;  %v2771_v45 = vrot.slane %v2770_v63, 1  ;;  %v2832_v17 = vrot.slane %v2831_v18, 2  ;;  %v2840_v58 = vadd.f32 %v2839_v16, %v2838_v3  ;;  %v13544_v57 = vld [vmem:[#allocation40_spill] sm:$0xff]  ;;  %v13545_v3 = vld [vmem:[#allocation39_spill] sm:$0xff] }
 0x5ef   :  { %2386 = vbcast.lane.b32.xlu1 %v13541_v52, 264  ;;  %2382 = vbcast.lane.b32.xlu0 %v13541_v52, 256  ;;  %13542 = vst [vmem:[#allocation15_spill] sm:$0xff] %v9484_v10  ;;  %v2686_v47 = vrot.slane %v2685_v11, 4  ;;  %v2776_v62 = vrot.slane %v2775_v5, 4  ;;  %v2847_v2 = vadd.f32 %v2846_v24, %v2845_v53  ;;  %v2694_v50 = vadd.f32 %v2693_v27, %v2692_v29 }
 0x5f0   :  { %v2783_v54 = vsel %vm346_vm1, %v2518_v26, 0.0  ;;  %v2782_v32 = vsel %vm346_vm1, %v2517_v38, 0.0  ;;  %v2855_v4 = vsel %vm346_vm1, %v2534_v21, 0.0  ;;  %v2854_v1 = vsel %vm346_vm1, %v2533_v31, 0.0  ;;  %v13546_v38 = vld [vmem:[#allocation52_spill] sm:$0xff] }
 0x5f1   :  { %v9476_v0 = vpop.permute.xlu1 %1693  ;;  %v9478_v40 = vpop.permute.xlu0 %1689  ;;  %v2550_v60 = vmul.f32 %v9370_v49, %v13544_v57  ;;  %v2549_v51 = vmul.f32 %v9372_v44, %v13545_v3  ;;  %v2500_v39 = vmul.f32 %v9395_v19, %v8575_v42  ;;  %v2499_v34 = vmul.f32 %v9397_v12, %v8573_v20 }
 0x5f2   :  { %v9505_v53 = vsel %vm436_vm4, %v2682_v61, %v3560_v23  ;;  %v2772_v27 = vadd.f32 %v2771_v45, %v2770_v63  ;;  %v2548_v49 = vmul.f32 %v9350_v37, %v13544_v57  ;;  %v2547_v44 = vmul.f32 %v9352_v59, %v13545_v3 }
 0x5f3   :  { %2397 = vbcast.lane.b32.xlu1 %v13543_v41, 264  ;;  %2393 = vbcast.lane.b32.xlu0 %v13543_v41, 256  ;;  %v2833_v29 = vadd.f32 %v2832_v17, %v2831_v18  ;;  %v2841_v52 = vrot.slane %v2840_v58, 2  ;;  %v2687_v19 = vadd.f32 %v2686_v47, %v2685_v11  ;;  %v2777_v26 = vadd.f32 %v2776_v62, %v2775_v5 }
 0x5f4   :  { %v2848_v12 = vrot.slane %v2847_v2, 4  ;;  %v2695_v21 = vrot.slane %v2694_v50, 4  ;;  %v2784_v31 = vadd.f32 %v2783_v54, %v2782_v32  ;;  %v2856_v23 = vadd.f32 %v2855_v4, %v2854_v1  ;;  %v13547_v4 = vld [vmem:[#allocation54_spill] sm:$0xff] }
 0x5f5   :  { %v9500_v16 = vpop.permute.xlu1 %1803  ;;  %v9502_v24 = vpop.permute.xlu0 %1799  ;;  %v2927_v63 = vsel %vm346_vm1, %v2550_v60, 0.0  ;;  %v2926_v61 = vsel %vm346_vm1, %v2549_v51, 0.0  ;;  %v2702_v37 = vsel %vm346_vm1, %v2500_v39, 0.0  ;;  %v2701_v59 = vsel %vm346_vm1, %v2499_v34, 0.0 }
 0x5f6   :  { %v2918_v5 = vsel %vm346_vm1, %v2548_v49, 0.0  ;;  %v2917_v45 = vsel %vm346_vm1, %v2547_v44, 0.0  ;;  %v2520_v17 = vmul.f32 %v9416_v43, %v8589_v22  ;;  %v2519_v47 = vmul.f32 %v9418_v48, %v8587_v55 }
 0x5f7   :  { %2232 = vbcast.lane.b32.xlu1 %v13546_v38, 264  ;;  %2228 = vbcast.lane.b32.xlu0 %v13546_v38, 256  ;;  %v2834_v62 = vrot.slane %v2833_v29, 1  ;;  %v2842_v41 = vadd.f32 %v2841_v52, %v2840_v58  ;;  %v2688_v54 = vrot.slane %v2687_v19, 2  ;;  %v2778_v32 = vrot.slane %v2777_v26, 2 }
 0x5f8   :  { %v2849_v1 = vadd.f32 %v2848_v12, %v2847_v2  ;;  %v2696_v60 = vadd.f32 %v2695_v21, %v2694_v50  ;;  %v2928_v51 = vadd.f32 %v2927_v63, %v2926_v61  ;;  %v2703_v39 = vadd.f32 %v2702_v37, %v2701_v59  ;;  %v13548_v63 = vld [vmem:[#allocation61_spill] sm:$0xff] }
 0x5f9   :  { %v9517_v18 = vpop.permute.xlu1 %1891  ;;  %v9519_v11 = vpop.permute.xlu0 %1887  ;;  %v9530_v34 = vsel %vm436_vm4, %v2772_v27, %v3568_v15  ;;  %v2785_v49 = vrot.slane %v2784_v31, 4  ;;  %v2857_v43 = vrot.slane %v2856_v23, 4  ;;  %v2919_v44 = vadd.f32 %v2918_v5, %v2917_v45 }
 0x5fa   :  { %v2792_v58 = vsel %vm346_vm1, %v2520_v17, 0.0  ;;  %v2791_v52 = vsel %vm346_vm1, %v2519_v47, 0.0  ;;  %v2536_v2 = vmul.f32 %v9431_v30, %v8603_v7  ;;  %v2535_v50 = vmul.f32 %v9433_v14, %v13524_v56 }
 0x5fb   :  { %2320 = vbcast.lane.b32.xlu1 %v13547_v4, 264  ;;  %2316 = vbcast.lane.b32.xlu0 %v13547_v4, 256  ;;  %v2835_v12 = vadd.f32 %v2834_v62, %v2833_v29  ;;  %v2843_v15 = vrot.slane %v2842_v41, 1  ;;  %v2689_v27 = vadd.f32 %v2688_v54, %v2687_v19  ;;  %v2779_v21 = vadd.f32 %v2778_v32, %v2777_v26  ;;  %v13549_v32 = vld [vmem:[#allocation55_spill] sm:$0xff] }
 0x5fc   :  { %v2850_v61 = vrot.slane %v2849_v1, 2  ;;  %v2697_v37 = vrot.slane %v2696_v60, 2  ;;  %v2929_v59 = vrot.slane %v2928_v51, 4  ;;  %v2704_v5 = vrot.slane %v2703_v39, 4 }
 0x5fd   :  { %v9532_v38 = vpop.permute.xlu1 %1979  ;;  %v9534_v48 = vpop.permute.xlu0 %1975  ;;  %v2786_v45 = vadd.f32 %v2785_v49, %v2784_v31  ;;  %v2858_v17 = vadd.f32 %v2857_v43, %v2856_v23  ;;  %v2920_v47 = vrot.slane %v2919_v44, 4  ;;  %v2793_v4 = vadd.f32 %v2792_v58, %v2791_v52 }
 0x5fe   :  { %v2864_v14 = vsel %vm346_vm1, %v2536_v2, 0.0  ;;  %v2863_v29 = vsel %vm346_vm1, %v2535_v50, 0.0  ;;  %v2552_v19 = vmul.f32 %v9456_v33, %v13544_v57  ;;  %v2551_v26 = vmul.f32 %v9458_v13, %v13545_v3 }
 0x5ff   :  { %2408 = vbcast.lane.b32.xlu1 %v13548_v63, 264  ;;  %2404 = vbcast.lane.b32.xlu0 %v13548_v63, 256  ;;  %v2844_v62 = vadd.f32 %v2843_v15, %v2842_v41  ;;  %v2690_v54 = vrot.slane %v2689_v27, 1  ;;  %v2502_v31 = vmul.f32 %v9476_v0, %v8575_v42  ;;  %v2501_v23 = vmul.f32 %v9478_v40, %v8573_v20 }
 0x600   :  { %v2780_v49 = vrot.slane %v2779_v21, 1  ;;  %v2851_v43 = vadd.f32 %v2850_v61, %v2849_v1  ;;  %v2930_v58 = vadd.f32 %v2929_v59, %v2928_v51  ;;  %v2705_v52 = vadd.f32 %v2704_v5, %v2703_v39  ;;  %v13550_v39 = vld [vmem:[#allocation56_spill] sm:$0xff] }
 0x601   :  { %v9544_v30 = vpop.permute.xlu1 %2056  ;;  %v9546_v10 = vpop.permute.xlu0 %2052  ;;  %v2698_v33 = vadd.f32 %v2697_v37, %v2696_v60  ;;  %v2787_v2 = vrot.slane %v2786_v45, 2  ;;  %v2794_v50 = vrot.slane %v2793_v4, 4  ;;  %v2865_v13 = vadd.f32 %v2864_v14, %v2863_v29 }
 0x602   :  { %v2859_v0 = vrot.slane %v2858_v17, 2  ;;  %v2921_v63 = vadd.f32 %v2920_v47, %v2919_v44  ;;  %v2936_v40 = vsel %vm346_vm1, %v2552_v19, 0.0  ;;  %v2935_v20 = vsel %vm346_vm1, %v2551_v26, 0.0 }
 0x603   :  { %2243 = vbcast.lane.b32.xlu1 %v13549_v32, 264  ;;  %2239 = vbcast.lane.b32.xlu0 %v13549_v32, 256  ;;  %v2711_v32 = vsel %vm346_vm1, %v2502_v31, 0.0  ;;  %v2710_v1 = vsel %vm346_vm1, %v2501_v23, 0.0  ;;  %v2522_v60 = vmul.f32 %v9500_v16, %v8589_v22  ;;  %v2521_v51 = vmul.f32 %v9502_v24, %v8587_v55 }
 0x604   :  { %v2691_v61 = vadd.f32 %v2690_v54, %v2689_v27  ;;  %v2781_v44 = vadd.f32 %v2780_v49, %v2779_v21  ;;  %v2931_v37 = vrot.slane %v2930_v58, 2  ;;  %v2706_v59 = vrot.slane %v2705_v52, 2  ;;  %v13551_v54 = vld [vmem:[#allocation62_spill] sm:$0xff] }
 0x605   :  { %v9560_v41 = vpop.permute.xlu1 %2067  ;;  %v9562_v15 = vpop.permute.xlu0 %2063  ;;  %v2788_v5 = vadd.f32 %v2787_v2, %v2786_v45  ;;  %v2795_v47 = vadd.f32 %v2794_v50, %v2793_v4  ;;  %v2866_v14 = vrot.slane %v2865_v13, 4  ;;  %v2937_v29 = vadd.f32 %v2936_v40, %v2935_v20 }
 0x606   :  { %v3575_v16 = vsel %vm432_vm2, %v2844_v62, %v2835_v12  ;;  %v2852_v31 = vrot.slane %v2851_v43, 1  ;;  %v2922_v24 = vrot.slane %v2921_v63, 2  ;;  %v2712_v23 = vadd.f32 %v2711_v32, %v2710_v1 }
 0x607   :  { %2331 = vbcast.lane.b32.xlu1 %v13550_v39, 264  ;;  %2327 = vbcast.lane.b32.xlu0 %v13550_v39, 256  ;;  %v2699_v55 = vrot.slane %v2698_v33, 1  ;;  %v2860_v22 = vadd.f32 %v2859_v0, %v2858_v17  ;;  %v2801_v27 = vsel %vm346_vm1, %v2522_v60, 0.0  ;;  %v2800_v21 = vsel %vm346_vm1, %v2521_v51, 0.0 }
 0x608   :  { %v3562_v20 = vsel %vm438_vm5, %v2691_v61, %v9505_v53  ;;  %v3570_v45 = vsel %vm438_vm5, %v2781_v44, %v9530_v34  ;;  %v2932_v12 = vadd.f32 %v2931_v37, %v2930_v58  ;;  %v2707_v4 = vadd.f32 %v2706_v59, %v2705_v52  ;;  %v13552_v58 = vld [vmem:[#allocation58_spill] sm:$0xff] }
 0x609   :  { %v9574_v19 = vpop.permute.xlu1 %1902  ;;  %v9576_v26 = vpop.permute.xlu0 %1898  ;;  %v2789_v62 = vrot.slane %v2788_v5, 1  ;;  %v2796_v49 = vrot.slane %v2795_v47, 2  ;;  %v2867_v2 = vadd.f32 %v2866_v14, %v2865_v13  ;;  %v2938_v17 = vrot.slane %v2937_v29, 4 }
 0x60a   :  { %v2853_v40 = vadd.f32 %v2852_v31, %v2851_v43  ;;  %v2923_v32 = vadd.f32 %v2922_v24, %v2921_v63  ;;  %v2713_v1 = vrot.slane %v2712_v23, 4  ;;  %v2802_v60 = vadd.f32 %v2801_v27, %v2800_v21 }
 0x60b   :  { %2419 = vbcast.lane.b32.xlu1 %v13551_v54, 264  ;;  %2415 = vbcast.lane.b32.xlu0 %v13551_v54, 256  ;;  %v2700_v51 = vadd.f32 %v2699_v55, %v2698_v33  ;;  %v2861_v39 = vrot.slane %v2860_v22, 1  ;;  %v2538_v53 = vmul.f32 %v9517_v18, %v8603_v7  ;;  %v2537_v34 = vmul.f32 %v9519_v11, %v13524_v56  ;;  %v13553_v54 = vld [vmem:[#allocation63_spill] sm:$0xff] }
 0x60c   :  { %v2933_v52 = vrot.slane %v2932_v12, 1  ;;  %v2708_v13 = vrot.slane %v2707_v4, 1  ;;  %v2554_v43 = vmul.f32 %v9532_v38, %v13544_v57  ;;  %v2553_v63 = vmul.f32 %v9534_v48, %v13545_v3 }
 0x60d   :  { %v9587_v50 = vpop.permute.xlu1 %1990  ;;  %v9589_v0 = vpop.permute.xlu0 %1986  ;;  %v2790_v55 = vadd.f32 %v2789_v62, %v2788_v5  ;;  %v2797_v33 = vadd.f32 %v2796_v49, %v2795_v47  ;;  %v2868_v61 = vrot.slane %v2867_v2, 2  ;;  %v2939_v44 = vadd.f32 %v2938_v17, %v2937_v29 }
 0x60e   :  { %v3576_v11 = vsel %vm434_vm3, %v2853_v40, %v3575_v16  ;;  %v2924_v59 = vrot.slane %v2923_v32, 1  ;;  %v2714_v14 = vadd.f32 %v2713_v1, %v2712_v23  ;;  %v2803_v31 = vrot.slane %v2802_v60, 4 }
 0x60f   :  { %2342 = vbcast.lane.b32.xlu1 %v13552_v58, 264  ;;  %2338 = vbcast.lane.b32.xlu0 %v13552_v58, 256  ;;  %v3563_v24 = vsel %vm440_vm6, %v2700_v51, %v3562_v20  ;;  %v2862_v27 = vadd.f32 %v2861_v39, %v2860_v22  ;;  %v2873_v21 = vsel %vm346_vm1, %v2538_v53, 0.0  ;;  %v2872_v38 = vsel %vm346_vm1, %v2537_v34, 0.0  ;;  %v13555_v53 = vld [vmem:[#allocation41_spill] sm:$0xff]  ;;  %v13556_v58 = vld [vmem:[#allocation59_spill] sm:$0xff] }
 0x610   :  { %v2934_v48 = vadd.f32 %v2933_v52, %v2932_v12  ;;  %v2709_v5 = vadd.f32 %v2708_v13, %v2707_v4  ;;  %v2945_v47 = vsel %vm346_vm1, %v2554_v43, 0.0  ;;  %v2944_v29 = vsel %vm346_vm1, %v2553_v63, 0.0  ;;  %v13554_v12 = vld [vmem:[#allocation42_spill] sm:$0xff] }
 0x611   :  { %v2079_v18 = vpop.permute.xlu1 %2078  ;;  %v2075_v37 = vpop.permute.xlu0 %2074  ;;  %v9610_v16 = vsel %vm440_vm6, %v2790_v55, %v3570_v45  ;;  %v2798_v23 = vrot.slane %v2797_v33, 1  ;;  %v9612_v20 = vadd.f32 %v2868_v61, %v2867_v2  ;;  %v2940_v22 = vrot.slane %v2939_v44, 2 }
 0x612   :  { %v2925_v17 = vadd.f32 %v2924_v59, %v2923_v32  ;;  %v2715_v40 = vrot.slane %v2714_v14, 2  ;;  %v2804_v1 = vadd.f32 %v2803_v31, %v2802_v60  ;;  %v2874_v51 = vadd.f32 %v2873_v21, %v2872_v38 }
 0x613   :  { %2430 = vbcast.lane.b32.xlu1 %v13553_v54, 264  ;;  %2426 = vbcast.lane.b32.xlu0 %v13553_v54, 256  ;;  %v2946_v39 = vadd.f32 %v2945_v47, %v2944_v29  ;;  %v2568_v4 = vmul.f32 %v9544_v30, %v13554_v12  ;;  %v2567_v34 = vmul.f32 %v9546_v10, %v13555_v53  ;;  %v2870_v52 = vrot.slane %v9612_v20, 1 }
 0x614   :  { %v9621_v45 = vsel %vm436_vm4, %v2862_v27, %v3576_v11  ;;  %v9624_v2 = vsel %vm432_vm2, %v2934_v48, %v2925_v17  ;;  %v9627_v32 = vsel %vm442_vm7, %v2709_v5, %v3563_v24  ;;  %v2540_v60 = vmul.f32 %v9574_v19, %v8603_v7 }
 0x615   :  { %v1914_v62 = vpop.permute.xlu1 %1913  ;;  %v1910_v49 = vpop.permute.xlu0 %1909  ;;  %v2799_v30 = vadd.f32 %v2798_v23, %v2797_v33  ;;  %v2941_v10 = vadd.f32 %v2940_v22, %v2939_v44  ;;  %v2539_v13 = vmul.f32 %v9576_v26, %v13524_v56  ;;  %v2716_v55 = vadd.f32 %v2715_v40, %v2714_v14  ;;  %v13557_v33 = vld [vmem:[#allocation64_spill] sm:$0xff] }
 0x616   :  { %v2805_v61 = vrot.slane %v2804_v1, 2  ;;  %v2542_v11 = vmul.f32 %v1914_v62, %v8603_v7  ;;  %v2541_v59 = vmul.f32 %v1910_v49, %v13524_v56  ;;  %v2875_v31 = vrot.slane %v2874_v51, 4 }
 0x617   :  { %2353 = vbcast.lane.b32.xlu1 %v13556_v58, 264  ;;  %2349 = vbcast.lane.b32.xlu0 %v13556_v58, 256  ;;  %v2947_v24 = vrot.slane %v2946_v39, 4  ;;  %v3008_v27 = vsel %vm346_vm1, %v2568_v4, 0.0  ;;  %v3007_v19 = vsel %vm346_vm1, %v2567_v34, 0.0  ;;  %v2570_v26 = vmul.f32 %v9560_v41, %v13554_v12 }
 0x618   :  { %v2569_v44 = vmul.f32 %v9562_v15, %v13555_v53  ;;  %v2882_v14 = vsel %vm346_vm1, %v2540_v60, 0.0  ;;  %v2556_v21 = vmul.f32 %v9587_v50, %v13544_v57  ;;  %v2881_v38 = vsel %vm346_vm1, %v2539_v13, 0.0 }
 0x619   :  { %v2002_v43 = vpop.permute.xlu1 %2001  ;;  %v1998_v63 = vpop.permute.xlu0 %1997  ;;  %v2555_v54 = vmul.f32 %v9589_v0, %v13545_v3  ;;  %v2572_v48 = vmul.f32 %v2079_v18, %v13554_v12  ;;  %v2571_v5 = vmul.f32 %v2075_v37, %v13555_v53  ;;  %v2942_v41 = vrot.slane %v2941_v10, 1 }
 0x61a   :  { %v2806_v23 = vadd.f32 %v2805_v61, %v2804_v1  ;;  %v2891_v15 = vsel %vm346_vm1, %v2542_v11, 0.0  ;;  %v2890_v22 = vsel %vm346_vm1, %v2541_v59, 0.0  ;;  %v2717_v62 = vrot.slane %v2716_v55, 1  ;;  %v7775_v61 = vld [vmem:[#allocation7] sm:$0xff] }
 0x61b   :  { %2441 = vbcast.lane.b32.xlu1 %v13557_v33, 264  ;;  %2437 = vbcast.lane.b32.xlu0 %v13557_v33, 256  ;;  %v2876_v49 = vadd.f32 %v2875_v31, %v2874_v51  ;;  %v2948_v50 = vadd.f32 %v2947_v24, %v2946_v39  ;;  %v3009_v17 = vadd.f32 %v3008_v27, %v3007_v19  ;;  %v3017_v0 = vsel %vm346_vm1, %v2570_v26, 0.0  ;;  %v13558_v11 = vld [vmem:[#allocation17_spill] sm:$0xff] }
 0x61c   :  { %v3016_v18 = vsel %vm346_vm1, %v2569_v44, 0.0  ;;  %v2883_v37 = vadd.f32 %v2882_v14, %v2881_v38  ;;  %v2954_v40 = vsel %vm346_vm1, %v2556_v21, 0.0  ;;  %v2953_v1 = vsel %vm346_vm1, %v2555_v54, 0.0 }
 0x61d   :  { %v2090_v47 = vpop.permute.xlu1 %2089  ;;  %v2086_v29 = vpop.permute.xlu0 %2085  ;;  %v3026_v4 = vsel %vm346_vm1, %v2572_v48, 0.0  ;;  %v3025_v34 = vsel %vm346_vm1, %v2571_v5, 0.0  ;;  %v2892_v51 = vadd.f32 %v2891_v15, %v2890_v22  ;;  %v2558_v60 = vmul.f32 %v2002_v43, %v13544_v57 }
 0x61e   :  { %v2557_v13 = vmul.f32 %v1998_v63, %v13545_v3  ;;  %v9671_v59 = vrot.slane %v7775_v61, %v13558_v11  ;;  %v2871_v31 = vadd.f32 %v2870_v52, %v9612_v20  ;;  %v2877_v24 = vrot.slane %v2876_v49, 2 }
 0x61f   :  { %2452 = vbcast.lane.b32.xlu1 %v9264_v28, 264  ;;  %2448 = vbcast.lane.b32.xlu0 %v9264_v28, 256  ;;  %v3572_v28 = vsel %vm442_vm7, %v2799_v30, %v9610_v16  ;;  %v3010_v27 = vrot.slane %v3009_v17, 4  ;;  %v3018_v19 = vadd.f32 %v3017_v0, %v3016_v18  ;;  %v2943_v33 = vadd.f32 %v2942_v41, %v2941_v10 }
 0x620   :  { %v2884_v26 = vrot.slane %v2883_v37, 4  ;;  %v2955_v16 = vadd.f32 %v2954_v40, %v2953_v1  ;;  %v3027_v30 = vadd.f32 %v3026_v4, %v3025_v34  ;;  %v2718_v43 = vadd.f32 %v2717_v62, %v2716_v55  ;;  %v13559_v62 = vld [vmem:[#allocation19_spill] sm:$0xff] }
 0x621   :  { %v9662_v39 = vpop.permute.xlu1 %2166  ;;  %v9664_v58 = vpop.permute.xlu0 %2162  ;;  %v2807_v44 = vrot.slane %v2806_v23, 1  ;;  %v2949_v63 = vrot.slane %v2948_v50, 2  ;;  %v2893_v14 = vrot.slane %v2892_v51, 4  ;;  %v2963_v20 = vsel %vm346_vm1, %v2558_v60, 0.0 }
 0x622   :  { %v2962_v52 = vsel %vm346_vm1, %v2557_v13, 0.0  ;;  %v2574_v54 = vmul.f32 %v2090_v47, %v13554_v12  ;;  %v3578_v10 = vsel %vm438_vm5, %v2871_v31, %v9621_v45  ;;  %v2878_v48 = vadd.f32 %v2877_v24, %v2876_v49 }
 0x623   :  { %2463 = vbcast.lane.b32.xlu1 %v9267_v9, 264  ;;  %2459 = vbcast.lane.b32.xlu0 %v9267_v9, 256  ;;  %v2573_v9 = vmul.f32 %v2086_v29, %v13555_v53  ;;  %v3011_v55 = vadd.f32 %v3010_v27, %v3009_v17  ;;  %v3019_v5 = vrot.slane %v3018_v19, 4  ;;  %v2885_v41 = vadd.f32 %v2884_v26, %v2883_v37 }
 0x624   :  { %v2956_v15 = vrot.slane %v2955_v16, 4  ;;  %v3028_v22 = vrot.slane %v3027_v30, 4  ;;  %v9689_v0 = vrot.slane %v7775_v61, %v13559_v62  ;;  %v9693_v47 = vsel %vm444_vm8, %v2718_v43, %v9627_v32  ;;  %v13561_v32 = vld [vmem:[#allocation18_spill] sm:$0xff] }
 0x625   :  { %v9676_v21 = vpop.permute.xlu1 %2177  ;;  %v9678_v38 = vpop.permute.xlu0 %2173  ;;  %13560 = vst [vmem:[#allocation16_spill] sm:$0xff] %v9693_v47  ;;  %v2808_v29 = vadd.f32 %v2807_v44, %v2806_v23  ;;  %v2894_v18 = vadd.f32 %v2893_v14, %v2892_v51  ;;  %v2964_v45 = vadd.f32 %v2963_v20, %v2962_v52  ;;  %v2950_v37 = vadd.f32 %v2949_v63, %v2948_v50  ;;  %v3368_v51 = vld [vmem:[#allocation7 + $0x8] sm:$0x3]  ;;  %v13566_v52 = vld [vmem:[#allocation65_spill] sm:$0xff] }
 0x626   :  { %v3035_v40 = vsel %vm346_vm1, %v2574_v54, 0.0  ;;  %v3034_v1 = vsel %vm346_vm1, %v2573_v9, 0.0  ;;  %v2879_v4 = vrot.slane %v2878_v48, 1  ;;  %v3012_v34 = vrot.slane %v3011_v55, 2  ;;  %v13565_v44 = vld [vmem:[#allocation26_spill] sm:$0xff] }
 0x627   :  { %1704 = vbcast.lane.b32.xlu1 %v9321_v36, 264  ;;  %1700 = vbcast.lane.b32.xlu0 %v9321_v36, 256  ;;  %v3584_v36 = vsel %vm434_vm3, %v2943_v33, %v9624_v2  ;;  %v3020_v60 = vadd.f32 %v3019_v5, %v3018_v19  ;;  %v9706_v23 = vrot.slane %v7775_v61, %v13561_v32  ;;  %v2886_v13 = vrot.slane %v2885_v41, 2  ;;  %v13562_v2 = vld [vmem:[#allocation28_spill] sm:$0xff] }
 0x628   :  { %v2957_v11 = vadd.f32 %v2956_v15, %v2955_v16  ;;  %v3029_v31 = vadd.f32 %v3028_v22, %v3027_v30  ;;  %v9710_v50 = vmul.f32 %v9693_v47, %v13562_v2  ;;  %v9713_v24 = vsel %vm444_vm8, %v2808_v29, %v3572_v28  ;;  %v13564_v16 = vld [vmem:[#allocation24_spill] sm:$0xff] }
 0x629   :  { %v9695_v49 = vpop.permute.xlu1 %2012  ;;  %v9697_v17 = vpop.permute.xlu0 %2008  ;;  %13563 = vst [vmem:[#allocation50_spill] sm:$0xff] %v9713_v24  ;;  %v2895_v27 = vrot.slane %v2894_v18, 2  ;;  %v2965_v19 = vrot.slane %v2964_v45, 4  ;;  %v3036_v33 = vadd.f32 %v3035_v40, %v3034_v1  ;;  %v2951_v61 = vrot.slane %v2950_v37, 1 }
 0x62a   :  { %v9720_v43 = vrot.slane %v3368_v51, %v13484_v25  ;;  %v9724_v30 = vmul.f32 %v9693_v47, %v13564_v16  ;;  %v9728_v63 = vmul.f32 %v9693_v47, %v13565_v44  ;;  %v2880_v28 = vadd.f32 %v2879_v4, %v2878_v48  ;;  %v13568_v4 = vld [vmem:[#allocation44_spill] sm:$0xff] }
 0x62b   :  { %1715 = vbcast.lane.b32.xlu1 %v9324_v46, 264  ;;  %1711 = vbcast.lane.b32.xlu0 %v9324_v46, 256  ;;  %v3013_v14 = vadd.f32 %v3012_v34, %v3011_v55  ;;  %v3021_v20 = vrot.slane %v3020_v60, 2  ;;  %v9733_v54 = vrot.slane %v3368_v51, %v13483_v35  ;;  %v2887_v25 = vadd.f32 %v2886_v13, %v2885_v41  ;;  %v13569_v41 = vld [vmem:[#allocation43_spill] sm:$0xff]  ;;  %v13570_v13 = vld [vmem:[#allocation66_spill] sm:$0xff] }
 0x62c   :  { %v2958_v9 = vrot.slane %v2957_v11, 2  ;;  %v3030_v5 = vrot.slane %v3029_v31, 2  ;;  %v3659_v15 = vmul.f32 %v9713_v24, %v13562_v2  ;;  %v2896_v22 = vadd.f32 %v2895_v27, %v2894_v18  ;;  %v13571_v27 = vld [vmem:[#allocation30_spill] sm:$0xff] }
 0x62d   :  { %v9715_v26 = vpop.permute.xlu1 %2100  ;;  %v9717_v46 = vpop.permute.xlu0 %2096  ;;  %13567 = vst [vmem:[#allocation51_spill] sm:$0xff] %v9733_v54  ;;  %v2966_v62 = vadd.f32 %v2965_v19, %v2964_v45  ;;  %v3037_v29 = vrot.slane %v3036_v33, 4  ;;  %v3661_v55 = vmul.f32 %v9713_v24, %v13564_v16  ;;  %v2952_v1 = vadd.f32 %v2951_v61, %v2950_v37 }
 0x62e   :  { %v2588_v35 = vmul.f32 %v9662_v39, %v13568_v4  ;;  %v2587_v34 = vmul.f32 %v9664_v58, %v13569_v41  ;;  %v3663_v32 = vmul.f32 %v9713_v24, %v13565_v44  ;;  %v3579_v18 = vsel %vm440_vm6, %v2880_v28, %v3578_v10 }
 0x62f   :  { %1814 = vbcast.lane.b32.xlu1 %v13566_v52, 264  ;;  %1810 = vbcast.lane.b32.xlu0 %v13566_v52, 256  ;;  %v3014_v45 = vrot.slane %v3013_v14, 1  ;;  %v3022_v51 = vadd.f32 %v3021_v20, %v3020_v60  ;;  %v3665_v37 = vmul.f32 %v9713_v24, %v13571_v27  ;;  %v2888_v19 = vrot.slane %v2887_v25, 1  ;;  %v13572_v52 = vld [vmem:[#allocation32_spill] sm:$0xff] }
 0x630   :  { %v2959_v61 = vadd.f32 %v2958_v9, %v2957_v11  ;;  %v3031_v39 = vadd.f32 %v3030_v5, %v3029_v31  ;;  %v3667_v58 = vmul.f32 %v9713_v24, %v13572_v52  ;;  %v2897_v56 = vrot.slane %v2896_v22, 1 }
 0x631   :  { %v9737_v40 = vpop.permute.xlu1 %2188  ;;  %v9739_v48 = vpop.permute.xlu0 %2184  ;;  %v2967_v7 = vrot.slane %v2966_v62, 2  ;;  %v3038_v42 = vadd.f32 %v3037_v29, %v3036_v33  ;;  %v9761_v60 = vsel %vm346_vm1, %v3659_v15, 0.0  ;;  %v3585_v28 = vsel %vm436_vm4, %v2952_v1, %v3584_v36 }
 0x632   :  { %13573 = vst [vmem:[#allocation21_spill] sm:$0xff] %v9761_v60  ;;  %v3098_v20 = vsel %vm346_vm1, %v2588_v35, 0.0  ;;  %v3097_v11 = vsel %vm346_vm1, %v2587_v34, 0.0  ;;  %v9767_v31 = vsel %vm346_vm1, %v3661_v55, 0.0  ;;  %v3015_v9 = vadd.f32 %v3014_v45, %v3013_v14 }
 0x633   :  { %1825 = vbcast.lane.b32.xlu1 %v13570_v13, 264  ;;  %1821 = vbcast.lane.b32.xlu0 %v13570_v13, 256  ;;  %13574 = vst [vmem:[#allocation49_spill] sm:$0xff] %v9767_v31  ;;  %v3023_v5 = vrot.slane %v3022_v51, 1  ;;  %v13575_v13 = vld [vmem:[#allocation67_spill] sm:$0xff]  ;;  %v9772_v33 = vsel %vm346_vm1, %v3663_v32, 0.0  ;;  %v2889_v36 = vadd.f32 %v2888_v19, %v2887_v25  ;;  %v3645_v35 = vmul.f32 %v9693_v47, %v13571_v27 }
 0x634   :  { %13576 = vst [vmem:[#allocation53_spill] sm:$0xff] %v9772_v33  ;;  %v9775_v15 = vsel %vm346_vm1, %v3665_v37, 0.0  ;;  %v2960_v29 = vrot.slane %v2959_v61, 1  ;;  %v3032_v1 = vrot.slane %v3031_v39, 1  ;;  %v2898_v55 = vadd.f32 %v2897_v56, %v2896_v22 }
 0x635   :  { %v9756_v54 = vpop.permute.xlu1 %2023  ;;  %v9758_v10 = vpop.permute.xlu0 %2019  ;;  %13577 = vst [vmem:[#allocation57_spill] sm:$0xff] %v9775_v15  ;;  %v2968_v34 = vadd.f32 %v2967_v7, %v2966_v62  ;;  %v3039_v14 = vrot.slane %v3038_v42, 2  ;;  %v3099_v45 = vadd.f32 %v3098_v20, %v3097_v11  ;;  %v2589_v32 = vmul.f32 %v9678_v38, %v13569_v41  ;;  %v13579_v15 = vld [vmem:[#allocation68_spill] sm:$0xff] }
 0x636   :  { %v9784_v37 = vsel %vm346_vm1, %v3667_v58, 0.0  ;;  %v3647_v25 = vmul.f32 %v9693_v47, %v13572_v52  ;;  %v3024_v19 = vadd.f32 %v3023_v5, %v3022_v51  ;;  %v9792_v7 = vsel %vm346_vm1, %v9710_v50, 0.0 }
 0x637   :  { %1924 = vbcast.lane.b32.xlu1 %v13575_v13, 264  ;;  %1920 = vbcast.lane.b32.xlu0 %v13575_v13, 256  ;;  %v2590_v13 = vmul.f32 %v9676_v21, %v13568_v4  ;;  %13578 = vst [vmem:[#allocation60_spill] sm:$0xff] %v9784_v37  ;;  %v9796_v56 = vsel %vm346_vm1, %v9724_v30, 0.0  ;;  %v9800_v21 = vsel %vm346_vm1, %v9728_v63, 0.0  ;;  %v3580_v38 = vsel %vm442_vm7, %v2889_v36, %v3579_v18 }
 0x638   :  { %13580 = vst [vmem:[#allocation40_spill] sm:$0xff] %v9800_v21  ;;  %v2961_v22 = vadd.f32 %v2960_v29, %v2959_v61  ;;  %v3033_v62 = vadd.f32 %v3032_v1, %v3031_v39  ;;  %v9804_v51 = vsel %vm346_vm1, %v3645_v35, 0.0  ;;  %v9807_v58 = vsel %vm444_vm8, %v2898_v55, %v3580_v38  ;;  %v13583_v29 = vld [vmem:[#allocation69_spill] sm:$0xff] }
 0x639   :  { %v2112_v24 = vpop.permute.xlu1 %2111  ;;  %v2108_v31 = vpop.permute.xlu0 %2107  ;;  %13581 = vst [vmem:[#allocation39_spill] sm:$0xff] %v9804_v51  ;;  %13582 = vst [vmem:[#allocation52_spill] sm:$0xff] %v9807_v58  ;;  %v2969_v50 = vrot.slane %v2968_v34, 1  ;;  %v3040_v20 = vadd.f32 %v3039_v14, %v3038_v42  ;;  %v3100_v11 = vrot.slane %v3099_v45, 4  ;;  %v3106_v63 = vsel %vm346_vm1, %v2589_v32, 0.0 }
 0x63a   :  { %v2560_v18 = vmul.f32 %v9695_v49, %v13544_v57  ;;  %v2559_v61 = vmul.f32 %v9697_v17, %v13545_v3  ;;  %v3591_v39 = vsel %vm432_vm2, %v3024_v19, %v3015_v9  ;;  %v2576_v36 = vmul.f32 %v9715_v26, %v13554_v12 }
 0x63b   :  { %1935 = vbcast.lane.b32.xlu1 %v13579_v15, 264  ;;  %1931 = vbcast.lane.b32.xlu0 %v13579_v15, 256  ;;  %v3107_v15 = vsel %vm346_vm1, %v2590_v13, 0.0  ;;  %v2575_v42 = vmul.f32 %v9717_v46, %v13555_v53  ;;  %v9823_v1 = vsel %vm346_vm1, %v3647_v25, 0.0  ;;  %v3586_v49 = vsel %vm438_vm5, %v2961_v22, %v3585_v28 }
 0x63c   :  { %13584 = vst [vmem:[#allocation54_spill] sm:$0xff] %v9823_v1  ;;  %v3592_v35 = vsel %vm434_vm3, %v3033_v62, %v3591_v39  ;;  %v3679_v17 = vmul.f32 %v9807_v58, %v13562_v2  ;;  %v3681_v26 = vmul.f32 %v9807_v58, %v13564_v16  ;;  %v2970_v9 = vadd.f32 %v2969_v50, %v2968_v34  ;;  %v13585_v50 = vld [vmem:[#allocation70_spill] sm:$0xff] }
 0x63d   :  { %v2200_v5 = vpop.permute.xlu1 %2199  ;;  %v2196_v30 = vpop.permute.xlu0 %2195  ;;  %v3041_v55 = vrot.slane %v3040_v20, 1  ;;  %v3101_v46 = vadd.f32 %v3100_v11, %v3099_v45  ;;  %v3108_v14 = vadd.f32 %v3107_v15, %v3106_v63  ;;  %v2972_v19 = vsel %vm346_vm1, %v2560_v18, 0.0 }
 0x63e   :  { %v2971_v25 = vsel %vm346_vm1, %v2559_v61, 0.0  ;;  %v2592_v28 = vmul.f32 %v9737_v40, %v13568_v4  ;;  %v2591_v38 = vmul.f32 %v9739_v48, %v13569_v41  ;;  %v3044_v22 = vsel %vm346_vm1, %v2576_v36, 0.0 }
 0x63f   :  { %2034 = vbcast.lane.b32.xlu1 %v13583_v29, 264  ;;  %2030 = vbcast.lane.b32.xlu0 %v13583_v29, 256  ;;  %v3043_v62 = vsel %vm346_vm1, %v2575_v42, 0.0  ;;  %v2562_v34 = vmul.f32 %v9756_v54, %v13544_v57  ;;  %v2561_v45 = vmul.f32 %v9758_v10, %v13545_v3  ;;  %v2578_v11 = vmul.f32 %v2112_v24, %v13554_v12 }
 0x640   :  { %v2577_v40 = vmul.f32 %v2108_v31, %v13555_v53  ;;  %v3683_v48 = vmul.f32 %v9807_v58, %v13565_v44  ;;  %v9851_v15 = vmul.f32 %v9807_v58, %v13571_v27  ;;  %v9854_v54 = vsel %vm440_vm6, %v2970_v9, %v3586_v49  ;;  %v13586_v9 = vld [vmem:[#allocation20_spill] sm:$0xff] }
 0x641   :  { %v2277_v13 = vpop.permute.xlu1 %2276  ;;  %v2273_v32 = vpop.permute.xlu0 %2272  ;;  %v3042_v63 = vadd.f32 %v3041_v55, %v3040_v20  ;;  %v3102_v10 = vrot.slane %v3101_v46, 2  ;;  %v3109_v18 = vrot.slane %v3108_v14, 4  ;;  %v2973_v36 = vadd.f32 %v2972_v19, %v2971_v25 }
 0x642   :  { %v3045_v42 = vadd.f32 %v3044_v22, %v3043_v62  ;;  %v3116_v24 = vsel %vm346_vm1, %v2592_v28, 0.0  ;;  %v3115_v31 = vsel %vm346_vm1, %v2591_v38, 0.0  ;;  %v2981_v29 = vsel %vm346_vm1, %v2562_v34, 0.0 }
 0x643   :  { %2045 = vbcast.lane.b32.xlu1 %v13585_v50, 264  ;;  %2041 = vbcast.lane.b32.xlu0 %v13585_v50, 256  ;;  %v2980_v50 = vsel %vm346_vm1, %v2561_v45, 0.0  ;;  %v2594_v1 = vmul.f32 %v2200_v5, %v13568_v4  ;;  %v2593_v49 = vmul.f32 %v2196_v30, %v13569_v41  ;;  %v3053_v20 = vsel %vm346_vm1, %v2578_v11, 0.0 }
 0x644   :  { %v3052_v55 = vsel %vm346_vm1, %v2577_v40, 0.0  ;;  %v9868_v19 = vmul.f32 %v9807_v58, %v13572_v52  ;;  %v9871_v25 = vsel %vm346_vm1, %v3679_v17, 0.0  ;;  %v9873_v28 = vadd.f32 %v3102_v10, %v3101_v46  ;;  %v13590_v10 = vld [vmem:[#allocation12_spill] sm:$0xff] }
 0x645   :  { %v2288_v61 = vpop.permute.xlu1 %2287  ;;  %v2284_v39 = vpop.permute.xlu0 %2283  ;;  %13587 = vst [vmem:[#allocation61_spill] sm:$0xff] %v9871_v25  ;;  %v3110_v5 = vadd.f32 %v3109_v18, %v3108_v14  ;;  %v9876_v22 = vsel %vm346_vm1, %v3681_v26, 0.0  ;;  %v9879_v62 = vsel %vm346_vm1, %v3683_v48, 0.0  ;;  %v9882_v34 = vsel %vm436_vm4, %v3042_v63, %v3592_v35  ;;  %v13591_v26 = vld [vmem:[#allocation46_spill] sm:$0xff]  ;;  %v13592_v48 = vld [vmem:[#allocation45_spill] sm:$0xff] }
 0x646   :  { %13588 = vst [vmem:[#allocation55_spill] sm:$0xff] %v9876_v22  ;;  %13589 = vst [vmem:[#allocation56_spill] sm:$0xff] %v9879_v62  ;;  %v2974_v45 = vrot.slane %v2973_v36, 4  ;;  %v3117_v11 = vadd.f32 %v3116_v24, %v3115_v31  ;;  %v2982_v40 = vadd.f32 %v2981_v29, %v2980_v50  ;;  %v3054_v17 = vadd.f32 %v3053_v20, %v3052_v55 }
 0x647   :  { %2144 = vbcast.lane.b32.xlu1 %v13586_v9, 264  ;;  %2140 = vbcast.lane.b32.xlu0 %v13586_v9, 256  ;;  %v3046_v9 = vrot.slane %v3045_v42, 4  ;;  %v3125_v46 = vsel %vm346_vm1, %v2594_v1, 0.0  ;;  %v3124_v14 = vsel %vm346_vm1, %v2593_v49, 0.0  ;;  %v2608_v18 = vmul.f32 %v2277_v13, %v13591_v26 }
 0x648   :  { %v2607_v62 = vmul.f32 %v2273_v32, %v13592_v48  ;;  %v2610_v35 = vmul.f32 %v2288_v61, %v13591_v26  ;;  %v2609_v63 = vmul.f32 %v2284_v39, %v13592_v48  ;;  %v3111_v31 = vrot.slane %v3110_v5, 2  ;;  %v13593_v39 = vld [vmem:[#allocation22_spill] sm:$0xff] }
 0x649   :  { %v2123_v38 = vpop.permute.xlu1 %2122  ;;  %v2119_v30 = vpop.permute.xlu0 %2118  ;;  %v3118_v20 = vrot.slane %v3117_v11, 4  ;;  %v2983_v55 = vrot.slane %v2982_v40, 4  ;;  %v2975_v32 = vadd.f32 %v2974_v45, %v2973_v36  ;;  %v3047_v22 = vadd.f32 %v3046_v9, %v3045_v42 }
 0x64a   :  { %v2580_v29 = vmul.f32 %v2123_v38, %v13554_v12  ;;  %v2579_v1 = vmul.f32 %v2119_v30, %v13555_v53  ;;  %v3055_v61 = vrot.slane %v3054_v17, 4  ;;  %v3126_v25 = vadd.f32 %v3125_v46, %v3124_v14 }
 0x64b   :  { %2155 = vbcast.lane.b32.xlu1 %v13590_v10, 264  ;;  %2151 = vbcast.lane.b32.xlu0 %v13590_v10, 256  ;;  %v3188_v38 = vsel %vm346_vm1, %v2608_v18, 0.0  ;;  %v3187_v30 = vsel %vm346_vm1, %v2607_v62, 0.0  ;;  %v3197_v24 = vsel %vm346_vm1, %v2610_v35, 0.0  ;;  %v3196_v51 = vsel %vm346_vm1, %v2609_v63, 0.0 }
 0x64c   :  { %v3119_v46 = vadd.f32 %v3118_v20, %v3117_v11  ;;  %v2984_v14 = vadd.f32 %v2983_v55, %v2982_v40  ;;  %v3189_v35 = vadd.f32 %v3188_v38, %v3187_v30  ;;  %v3198_v21 = vadd.f32 %v3197_v24, %v3196_v51  ;;  %v13594_v63 = vld [vmem:[#allocation13_spill] sm:$0xff] }
 0x64d   :  { %v2211_v50 = vpop.permute.xlu1 %2210  ;;  %v2207_v49 = vpop.permute.xlu0 %2206  ;;  %v3112_v20 = vadd.f32 %v3111_v31, %v3110_v5  ;;  %v3048_v55 = vrot.slane %v3047_v22, 2 }
 0x64e   :  { %v2596_v10 = vmul.f32 %v2211_v50, %v13568_v4  ;;  %v2595_v13 = vmul.f32 %v2207_v49, %v13569_v41  ;;  %v3062_v50 = vsel %vm346_vm1, %v2580_v29, 0.0  ;;  %v3061_v49 = vsel %vm346_vm1, %v2579_v1, 0.0 }
 0x64f   :  { %2254 = vbcast.lane.b32.xlu1 %v13593_v39, 264  ;;  %2250 = vbcast.lane.b32.xlu0 %v13593_v39, 256  ;;  %v2976_v39 = vrot.slane %v2975_v32, 2  ;;  %v9913_v29 = vsel %vm346_vm1, %v9851_v15, 0.0  ;;  %v3063_v1 = vadd.f32 %v3062_v50, %v3061_v49  ;;  %v3120_v24 = vrot.slane %v3119_v46, 2 }
 0x650   :  { %v3134_v36 = vsel %vm346_vm1, %v2596_v10, 0.0  ;;  %v3133_v42 = vsel %vm346_vm1, %v2595_v13, 0.0  ;;  %13595 = vst [vmem:[#allocation62_spill] sm:$0xff] %v9913_v29  ;;  %v3056_v13 = vadd.f32 %v3055_v61, %v3054_v17  ;;  %v2985_v30 = vrot.slane %v2984_v14, 2 }
 0x651   :  { %v2299_v45 = vpop.permute.xlu1 %2298  ;;  %v2295_v9 = vpop.permute.xlu0 %2294  ;;  %v3135_v10 = vadd.f32 %v3134_v36, %v3133_v42  ;;  %v2977_v15 = vadd.f32 %v2976_v39, %v2975_v32  ;;  %v3190_v29 = vrot.slane %v3189_v35, 4  ;;  %v3199_v50 = vrot.slane %v3198_v21, 4  ;;  %v13596_v36 = vld [vmem:[#allocation14_spill] sm:$0xff] }
 0x652   :  { %v2612_v18 = vmul.f32 %v2299_v45, %v13591_v26  ;;  %v2611_v62 = vmul.f32 %v2295_v9, %v13592_v48  ;;  %v3127_v45 = vrot.slane %v3126_v25, 4  ;;  %v3064_v5 = vrot.slane %v3063_v1, 4 }
 0x653   :  { %2265 = vbcast.lane.b32.xlu1 %v13594_v63, 264  ;;  %2261 = vbcast.lane.b32.xlu0 %v13594_v63, 256  ;;  %v3136_v31 = vrot.slane %v3135_v10, 4  ;;  %v3049_v42 = vadd.f32 %v3048_v55, %v3047_v22  ;;  %v9925_v32 = vsel %vm346_vm1, %v9868_v19, 0.0  ;;  %v3121_v39 = vadd.f32 %v3120_v24, %v3119_v46 }
 0x654   :  { %v3206_v11 = vsel %vm346_vm1, %v2612_v18, 0.0  ;;  %v3205_v40 = vsel %vm346_vm1, %v2611_v62, 0.0  ;;  %v3057_v18 = vrot.slane %v3056_v13, 2  ;;  %v3128_v62 = vadd.f32 %v3127_v45, %v3126_v25  ;;  %13597 = vst [vmem:[#allocation58_spill] sm:$0xff] %v9925_v32 }
 0x655   :  { %v2134_v38 = vpop.permute.xlu1 %2133  ;;  %v2130_v51 = vpop.permute.xlu0 %2129  ;;  %v3207_v49 = vadd.f32 %v3206_v11, %v3205_v40  ;;  %v2986_v11 = vadd.f32 %v2985_v30, %v2984_v14  ;;  %v3200_v47 = vadd.f32 %v3199_v50, %v3198_v21  ;;  %v3113_v25 = vrot.slane %v3112_v20, 1 }
 0x656   :  { %v2582_v9 = vmul.f32 %v2134_v38, %v13554_v12  ;;  %v2581_v63 = vmul.f32 %v2130_v51, %v13555_v53  ;;  %v2978_v22 = vrot.slane %v2977_v15, 1  ;;  %v3065_v55 = vadd.f32 %v3064_v5, %v3063_v1 }
 0x657   :  { %2364 = vbcast.lane.b32.xlu1 %v13596_v36, 264  ;;  %2360 = vbcast.lane.b32.xlu0 %v13596_v36, 256  ;;  %v3191_v36 = vadd.f32 %v3190_v29, %v3189_v35  ;;  %v3137_v45 = vadd.f32 %v3136_v31, %v3135_v10  ;;  %v13598_v19 = vrot.slane %v9873_v28, 1  ;;  %v3050_v14 = vrot.slane %v3049_v42, 1 }
 0x658   :  { %v3071_v17 = vsel %vm346_vm1, %v2582_v9, 0.0  ;;  %v3070_v61 = vsel %vm346_vm1, %v2581_v63, 0.0  ;;  %v3208_v9 = vrot.slane %v3207_v49, 4  ;;  %v3058_v24 = vadd.f32 %v3057_v18, %v3056_v13 }
 0x659   :  { %v2222_v38 = vpop.permute.xlu1 %2221  ;;  %v2218_v58 = vpop.permute.xlu0 %2217  ;;  %v3072_v37 = vadd.f32 %v3071_v17, %v3070_v61  ;;  %v3105_v46 = vadd.f32 %v13598_v19, %v9873_v28  ;;  %v3129_v30 = vrot.slane %v3128_v62, 2  ;;  %v3122_v21 = vrot.slane %v3121_v39, 1 }
 0x65a   :  { %v2598_v40 = vmul.f32 %v2222_v38, %v13568_v4  ;;  %v2597_v51 = vmul.f32 %v2218_v58, %v13569_v41  ;;  %v2987_v29 = vrot.slane %v2986_v11, 1  ;;  %v3201_v17 = vrot.slane %v3200_v47, 2 }
 0x65b   :  { %2375 = vbcast.lane.b32.xlu1 %v9453_v6, 264  ;;  %2371 = vbcast.lane.b32.xlu0 %v9453_v6, 256  ;;  %v3192_v6 = vrot.slane %v3191_v36, 2  ;;  %v3209_v61 = vadd.f32 %v3208_v9, %v3207_v49  ;;  %v3073_v1 = vrot.slane %v3072_v37, 4  ;;  %v3114_v28 = vadd.f32 %v3113_v25, %v3112_v20  ;;  %v13599_v20 = vld [vmem:[#allocation15_spill] sm:$0xff] }
 0x65c   :  { %v3143_v63 = vsel %vm346_vm1, %v2598_v40, 0.0  ;;  %v3142_v50 = vsel %vm346_vm1, %v2597_v51, 0.0  ;;  %v2979_v10 = vadd.f32 %v2978_v22, %v2977_v15  ;;  %v3066_v13 = vrot.slane %v3065_v55, 2 }
 0x65d   :  { %v2310_v58 = vpop.permute.xlu1 %2309  ;;  %v2306_v35 = vpop.permute.xlu0 %2305  ;;  %v3138_v5 = vrot.slane %v3137_v45, 2  ;;  %v3051_v31 = vadd.f32 %v3050_v14, %v3049_v42  ;;  %v3059_v18 = vrot.slane %v3058_v24, 1  ;;  %v3130_v38 = vadd.f32 %v3129_v30, %v3128_v62 }
 0x65e   :  { %v3144_v19 = vadd.f32 %v3143_v63, %v3142_v50  ;;  %v3123_v33 = vadd.f32 %v3122_v21, %v3121_v39  ;;  %v2988_v51 = vadd.f32 %v2987_v29, %v2986_v11  ;;  %v2614_v60 = vmul.f32 %v2310_v58, %v13591_v26  ;;  %v13601_v21 = vld [vmem:[#allocation48_spill] sm:$0xff] }
 0x65f   :  { %2474 = vbcast.lane.b32.xlu1 %v9481_v8, 264  ;;  %2470 = vbcast.lane.b32.xlu0 %v9481_v8, 256  ;;  %v2613_v49 = vmul.f32 %v2306_v35, %v13592_v48  ;;  %v3193_v9 = vadd.f32 %v3192_v6, %v3191_v36  ;;  %v3202_v53 = vadd.f32 %v3201_v17, %v3200_v47  ;;  %v3210_v12 = vrot.slane %v3209_v61, 2 }
 0x660   :  { %v3074_v8 = vadd.f32 %v3073_v1, %v3072_v37  ;;  %v3599_v15 = vsel %vm432_vm2, %v3114_v28, %v3105_v46  ;;  %v3588_v42 = vsel %vm442_vm7, %v2979_v10, %v9854_v54  ;;  %v3067_v62 = vadd.f32 %v3066_v13, %v3065_v55 }
 0x661   :  { %v2387_v32 = vpop.permute.xlu1 %2386  ;;  %v2383_v40 = vpop.permute.xlu0 %2382  ;;  %v3139_v39 = vadd.f32 %v3138_v5, %v3137_v45  ;;  %v3594_v11 = vsel %vm438_vm5, %v3051_v31, %v9882_v34  ;;  %v3060_v25 = vadd.f32 %v3059_v18, %v3058_v24  ;;  %v3131_v22 = vrot.slane %v3130_v38, 1 }
 0x662   :  { %v3145_v36 = vrot.slane %v3144_v19, 4  ;;  %v3600_v37 = vsel %vm434_vm3, %v3123_v33, %v3599_v15  ;;  %v9949_v30 = vsel %vm444_vm8, %v2988_v51, %v3588_v42  ;;  %v3215_v46 = vsel %vm346_vm1, %v2614_v60, 0.0  ;;  %v13602_v33 = vld [vmem:[#allocation47_spill] sm:$0xff] }
 0x663   :  { %2485 = vbcast.lane.b32.xlu1 %v13599_v20, 264  ;;  %2481 = vbcast.lane.b32.xlu0 %v13599_v20, 256  ;;  %13600 = vst [vmem:[#allocation63_spill] sm:$0xff] %v9949_v30  ;;  %v3214_v58 = vsel %vm346_vm1, %v2613_v49, 0.0  ;;  %v3194_v54 = vrot.slane %v3193_v9, 1  ;;  %v3203_v55 = vrot.slane %v3202_v53, 1  ;;  %v3211_v45 = vadd.f32 %v3210_v12, %v3209_v61 }
 0x664   :  { %v3075_v35 = vrot.slane %v3074_v8, 2  ;;  %v3068_v34 = vrot.slane %v3067_v62, 1  ;;  %v3140_v24 = vrot.slane %v3139_v39, 1  ;;  %v3595_v50 = vsel %vm440_vm6, %v3060_v25, %v3594_v11 }
 0x665   :  { %v2398_v47 = vpop.permute.xlu1 %2397  ;;  %v2394_v14 = vpop.permute.xlu0 %2393  ;;  %v3132_v6 = vadd.f32 %v3131_v22, %v3130_v38  ;;  %v3146_v60 = vadd.f32 %v3145_v36, %v3144_v19  ;;  %v3216_v17 = vadd.f32 %v3215_v46, %v3214_v58  ;;  %v2628_v12 = vmul.f32 %v2387_v32, %v13601_v21  ;;  %v4519_v58 = vld [vmem:[%s13161_s9] sm:$0xff] }
 0x666   :  { %v2630_v29 = vmul.f32 %v2398_v47, %v13601_v21  ;;  %v2629_v63 = vmul.f32 %v2394_v14, %v13602_v33  ;;  %v2627_v61 = vmul.f32 %v2383_v40, %v13602_v33  ;;  %v3195_v13 = vadd.f32 %v3194_v54, %v3193_v9 }
 0x667   :  { %3433 = vbcast.lane.b32.xlu1 %v9671_v59, 264  ;;  %3429 = vbcast.lane.b32.xlu0 %v9671_v59, 256  ;;  %v3204_v5 = vadd.f32 %v3203_v55, %v3202_v53  ;;  %v3212_v31 = vrot.slane %v3211_v45, 1  ;;  %v3076_v18 = vadd.f32 %v3075_v35, %v3074_v8  ;;  %v3069_v38 = vadd.f32 %v3068_v34, %v3067_v62 }
 0x668   :  { %v3141_v19 = vadd.f32 %v3140_v24, %v3139_v39  ;;  %v3287_v51 = vsel %vm346_vm1, %v2630_v29, 0.0  ;;  %v3286_v32 = vsel %vm346_vm1, %v2629_v63, 0.0  ;;  %v3147_v49 = vrot.slane %v3146_v60, 2 }
 0x669   :  { %v2233_v1 = vpop.permute.xlu1 %2232  ;;  %v2229_v28 = vpop.permute.xlu0 %2228  ;;  %v3217_v40 = vrot.slane %v3216_v17, 4  ;;  %v3278_v8 = vsel %vm346_vm1, %v2628_v12, 0.0  ;;  %v3277_v42 = vsel %vm346_vm1, %v2627_v61, 0.0  ;;  %v3601_v39 = vsel %vm436_vm4, %v3132_v6, %v3600_v37 }
 0x66a   :  { %v2600_v10 = vmul.f32 %v2233_v1, %v13568_v4  ;;  %v2599_v59 = vmul.f32 %v2229_v28, %v13569_v41  ;;  %v3213_v11 = vadd.f32 %v3212_v31, %v3211_v45  ;;  %v3077_v25 = vrot.slane %v3076_v18, 1 }
 0x66b   :  { %3444 = vbcast.lane.b32.xlu1 %v9689_v0, 264  ;;  %3440 = vbcast.lane.b32.xlu0 %v9689_v0, 256  ;;  %v3288_v22 = vadd.f32 %v3287_v51, %v3286_v32  ;;  %v3607_v36 = vsel %vm432_vm2, %v3204_v5, %v3195_v13  ;;  %v3596_v37 = vsel %vm442_vm7, %v3069_v38, %v3595_v50 }
 0x66c   :  { %v3152_v20 = vsel %vm346_vm1, %v2600_v10, 0.0  ;;  %v3151_v15 = vsel %vm346_vm1, %v2599_v59, 0.0  ;;  %v9983_v54 = vsel %vm438_vm5, %v3141_v19, %v3601_v39  ;;  %v3279_v55 = vadd.f32 %v3278_v8, %v3277_v42 }
 0x66d   :  { %v2321_v9 = vpop.permute.xlu1 %2320  ;;  %v2317_v53 = vpop.permute.xlu0 %2316  ;;  %v3153_v47 = vadd.f32 %v3152_v20, %v3151_v15  ;;  %v3148_v34 = vadd.f32 %v3147_v49, %v3146_v60  ;;  %v3218_v24 = vadd.f32 %v3217_v40, %v3216_v17  ;;  %v9988_v6 = vsel %vm434_vm3, %v3213_v11, %v3607_v36  ;;  %v13604_v15 = vld [vmem:[#allocation51_spill] sm:$0xff] }
 0x66e   :  { %v2616_v0 = vmul.f32 %v2321_v9, %v13591_v26  ;;  %v2615_v62 = vmul.f32 %v2317_v53, %v13592_v48  ;;  %v3078_v1 = vadd.f32 %v3077_v25, %v3076_v18  ;;  %v3289_v28 = vrot.slane %v3288_v22, 4 }
 0x66f   :  { %3455 = vbcast.lane.b32.xlu1 %v9706_v23, 264  ;;  %3451 = vbcast.lane.b32.xlu0 %v9706_v23, 256  ;;  %v3699_v50 = vmul.f32 %v9949_v30, %v13562_v2  ;;  %v3154_v12 = vrot.slane %v3153_v47, 4  ;;  %v3701_v17 = vmul.f32 %v9949_v30, %v13564_v16  ;;  %v3280_v10 = vrot.slane %v3279_v55, 4 }
 0x670   :  { %v3224_v14 = vsel %vm346_vm1, %v2616_v0, 0.0  ;;  %v3223_v46 = vsel %vm346_vm1, %v2615_v62, 0.0  ;;  %v3703_v18 = vmul.f32 %v9949_v30, %v13565_v44  ;;  %v3149_v38 = vrot.slane %v3148_v34, 1  ;;  %v4520_v0 = vld [vmem:[%s13161_s9 + $0x8] sm:$0x3] }
 0x671   :  { %v3225_v45 = vadd.f32 %v3224_v14, %v3223_v46  ;;  %v2409_v35 = vpop.permute.xlu1 %2408  ;;  %v2405_v23 = vpop.permute.xlu0 %2404  ;;  %v3219_v19 = vrot.slane %v3218_v24, 2  ;;  %v10002_v49 = vsel %vm444_vm8, %v3078_v1, %v3596_v37  ;;  %v3290_v40 = vadd.f32 %v3289_v28, %v3288_v22 }
 0x672   :  { %v2632_v29 = vmul.f32 %v2409_v35, %v13601_v21  ;;  %v2631_v63 = vmul.f32 %v2405_v23, %v13602_v33  ;;  %13603 = vst [vmem:[#allocation59_spill] sm:$0xff] %v10002_v49  ;;  %v3705_v9 = vmul.f32 %v9949_v30, %v13571_v27  ;;  %v3155_v53 = vadd.f32 %v3154_v12, %v3153_v47 }
 0x673   :  { %3473 = vbcast.lane.b32.xlu1 %v9720_v43, 256  ;;  %4523 = vperm.xlu0 %7490, %v4519_v58   ;;  %v3226_v59 = vrot.slane %v3225_v45, 4  ;;  %v3707_v62 = vmul.f32 %v9949_v30, %v13572_v52  ;;  %v3281_v39 = vadd.f32 %v3280_v10, %v3279_v55  ;;  %v10016_v36 = vsel %vm346_vm1, %v3699_v50, 0.0 }
 0x674   :  { %v3296_v61 = vsel %vm346_vm1, %v2632_v29, 0.0  ;;  %v3295_v60 = vsel %vm346_vm1, %v2631_v63, 0.0  ;;  %13605 = vst [vmem:[#allocation64_spill] sm:$0xff] %v10016_v36  ;;  %v3150_v47 = vadd.f32 %v3149_v38, %v3148_v34  ;;  %v3220_v14 = vadd.f32 %v3219_v19, %v3218_v24  ;;  %v13639_v36 = vld [vmem:[#allocation49_spill] sm:$0xff] }
 0x675   :  { %v3297_v13 = vadd.f32 %v3296_v61, %v3295_v60  ;;  %v2244_v5 = vpop.permute.xlu1 %2243  ;;  %v2240_v31 = vpop.permute.xlu0 %2239  ;;  %v3227_v11 = vadd.f32 %v3226_v59, %v3225_v45  ;;  %v3291_v37 = vrot.slane %v3290_v40, 2  ;;  %v10022_v55 = vsel %vm346_vm1, %v3701_v17, 0.0 }
 0x676   :  { %v2602_v51 = vmul.f32 %v2244_v5, %v13568_v4  ;;  %v2601_v32 = vmul.f32 %v2240_v31, %v13569_v41  ;;  %13606 = vst [vmem:[#allocation17_spill] sm:$0xff] %v10022_v55  ;;  %v3156_v45 = vrot.slane %v3155_v53, 2  ;;  %v10027_v34 = vsel %vm346_vm1, %v3703_v18, 0.0 }
 0x677   :  { %v3298_v20 = vrot.slane %v3297_v13, 4  ;;  %3462 = vbcast.lane.b32.xlu1 %v13604_v15, 256  ;;  %3477 = vbcast.lane.b32.xlu0 %v9720_v43, 264  ;;  %13607 = vst [vmem:[#allocation19_spill] sm:$0xff] %v10027_v34  ;;  %v3282_v24 = vrot.slane %v3281_v39, 2  ;;  %v3228_v1 = vrot.slane %v3227_v11, 2  ;;  %v10031_v60 = vsel %vm440_vm6, %v3150_v47, %v9983_v54 }
 0x678   :  { %v3161_v8 = vsel %vm346_vm1, %v2602_v51, 0.0  ;;  %v3160_v42 = vsel %vm346_vm1, %v2601_v32, 0.0  ;;  %v3221_v17 = vrot.slane %v3220_v14, 1  ;;  %v10036_v18 = vsel %vm346_vm1, %v3705_v9, 0.0  ;;  %v13638_v34 = vld [vmem:[#allocation21_spill] sm:$0xff] }
 0x679   :  { %v3162_v25 = vadd.f32 %v3161_v8, %v3160_v42  ;;  %v2332_v22 = vpop.permute.xlu1 %2331  ;;  %v2328_v43 = vpop.permute.xlu0 %2327  ;;  %v3299_v35 = vadd.f32 %v3298_v20, %v3297_v13  ;;  %v3292_v13 = vadd.f32 %v3291_v37, %v3290_v40  ;;  %13608 = vst [vmem:[#allocation18_spill] sm:$0xff] %v10036_v18  ;;  %v3157_v38 = vadd.f32 %v3156_v45, %v3155_v53 }
 0x67a   :  { %v2618_v46 = vmul.f32 %v2332_v22, %v13591_v26  ;;  %v2617_v58 = vmul.f32 %v2328_v43, %v13592_v48  ;;  %v3283_v20 = vadd.f32 %v3282_v24, %v3281_v39  ;;  %v3229_v54 = vadd.f32 %v3228_v1, %v3227_v11 }
 0x67b   :  { %v3163_v23 = vrot.slane %v3162_v25, 4  ;;  %4527 = vperm.xlu1 %7489, %v4520_v0   ;;  %3466 = vbcast.lane.b32.xlu0 %v13604_v15, 264  ;;  %v3300_v5 = vrot.slane %v3299_v35, 2  ;;  %v10043_v9 = vsel %vm346_vm1, %v3707_v62, 0.0  ;;  %v3293_v53 = vrot.slane %v3292_v13, 1 }
 0x67c   :  { %v3233_v29 = vsel %vm346_vm1, %v2618_v46, 0.0  ;;  %v3232_v63 = vsel %vm346_vm1, %v2617_v58, 0.0  ;;  %13609 = vst [vmem:[#allocation65_spill] sm:$0xff] %v10043_v9  ;;  %v3158_v58 = vrot.slane %v3157_v38, 1  ;;  %v3230_v45 = vrot.slane %v3229_v54, 1 }
 0x67d   :  { %v3164_v28 = vadd.f32 %v3163_v23, %v3162_v25  ;;  %v3234_v50 = vadd.f32 %v3233_v29, %v3232_v63  ;;  %v2420_v12 = vpop.permute.xlu1 %2419  ;;  %v2416_v61 = vpop.permute.xlu0 %2415  ;;  %v3222_v25 = vadd.f32 %v3221_v17, %v3220_v14  ;;  %v3301_v43 = vadd.f32 %v3300_v5, %v3299_v35 }
 0x67e   :  { %v2634_v10 = vmul.f32 %v2420_v12, %v13601_v21  ;;  %v2633_v59 = vmul.f32 %v2416_v61, %v13602_v33  ;;  %v3284_v23 = vrot.slane %v3283_v20, 1  ;;  %v3294_v12 = vadd.f32 %v3293_v53, %v3292_v13 }
 0x67f   :  { %v3235_v31 = vrot.slane %v3234_v50, 4  ;;  %v3165_v19 = vrot.slane %v3164_v28, 2  ;;  %v3609_v62 = vsel %vm436_vm4, %v3222_v25, %v9988_v6 }
 0x680   :  { %v3305_v51 = vsel %vm346_vm1, %v2634_v10, 0.0  ;;  %v3304_v32 = vsel %vm346_vm1, %v2633_v59, 0.0  ;;  %v3159_v10 = vadd.f32 %v3158_v58, %v3157_v38 }
 0x681   :  { %v3236_v15 = vadd.f32 %v3235_v31, %v3234_v50  ;;  %v3306_v8 = vadd.f32 %v3305_v51, %v3304_v32  ;;  %v2343_v42 = vpop.permute.xlu1 %2342  ;;  %v2339_v0 = vpop.permute.xlu0 %2338  ;;  %v3166_v37 = vadd.f32 %v3165_v19, %v3164_v28  ;;  %v3302_v28 = vrot.slane %v3301_v43, 1 }
 0x682   :  { %v2620_v40 = vmul.f32 %v2343_v42, %v13591_v26  ;;  %v2619_v22 = vmul.f32 %v2339_v0, %v13592_v48  ;;  %v3285_v19 = vadd.f32 %v3284_v23, %v3283_v20  ;;  %v3231_v51 = vadd.f32 %v3230_v45, %v3229_v54 }
 0x683   :  { %v3237_v47 = vrot.slane %v3236_v15, 2  ;;  %v3307_v46 = vrot.slane %v3306_v8, 4  ;;  %v3167_v59 = vrot.slane %v3166_v37, 1  ;;  %v3303_v38 = vadd.f32 %v3302_v28, %v3301_v43 }
 0x684   :  { %v3242_v39 = vsel %vm346_vm1, %v2620_v40, 0.0  ;;  %v3241_v11 = vsel %vm346_vm1, %v2619_v22, 0.0  ;;  %v3615_v40 = vsel %vm432_vm2, %v3294_v12, %v3285_v19  ;;  %v3610_v58 = vsel %vm438_vm5, %v3231_v51, %v3609_v62 }
 0x685   :  { %v3308_v14 = vadd.f32 %v3307_v46, %v3306_v8  ;;  %v3243_v29 = vadd.f32 %v3242_v39, %v3241_v11  ;;  %v2431_v63 = vpop.permute.xlu1 %2430  ;;  %v2427_v24 = vpop.permute.xlu0 %2426  ;;  %v3238_v1 = vadd.f32 %v3237_v47, %v3236_v15  ;;  %v3604_v47 = vsel %vm442_vm7, %v3159_v10, %v10031_v60 }
 0x686   :  { %v2636_v35 = vmul.f32 %v2431_v63, %v13601_v21  ;;  %v2635_v50 = vmul.f32 %v2427_v24, %v13602_v33  ;;  %v3168_v20 = vadd.f32 %v3167_v59, %v3166_v37  ;;  %v3616_v60 = vsel %vm434_vm3, %v3303_v38, %v3615_v40 }
 0x687   :  { %v3309_v61 = vrot.slane %v3308_v14, 2  ;;  %v3244_v17 = vrot.slane %v3243_v29, 4  ;;  %v3239_v42 = vrot.slane %v3238_v1, 1  ;;  %v10081_v38 = vmul.f32 %v10002_v49, %v13564_v16 }
 0x688   :  { %v3314_v5 = vsel %vm346_vm1, %v2636_v35, 0.0  ;;  %v3313_v31 = vsel %vm346_vm1, %v2635_v50, 0.0  ;;  %v10065_v12 = vsel %vm444_vm8, %v3168_v20, %v3604_v47 }
 0x689   :  { %v3245_v32 = vadd.f32 %v3244_v17, %v3243_v29  ;;  %v3315_v8 = vadd.f32 %v3314_v5, %v3313_v31  ;;  %v2354_v6 = vpop.permute.xlu1 %2353  ;;  %v2350_v15 = vpop.permute.xlu0 %2349  ;;  %v3310_v0 = vadd.f32 %v3309_v61, %v3308_v14  ;;  %v3240_v29 = vadd.f32 %v3239_v42, %v3238_v1  ;;  %13610 = vst [vmem:[#allocation44_spill] sm:$0xff] %v10065_v12 }
 0x68a   :  { %v2622_v25 = vmul.f32 %v2354_v6, %v13591_v26  ;;  %v2621_v13 = vmul.f32 %v2350_v15, %v13592_v48  ;;  %v10071_v1 = vmul.f32 %v10002_v49, %v13562_v2 }
 0x68b   :  { %v3246_v22 = vrot.slane %v3245_v32, 2  ;;  %v3316_v53 = vrot.slane %v3315_v8, 4  ;;  %v3311_v63 = vrot.slane %v3310_v0, 1  ;;  %v3611_v19 = vsel %vm440_vm6, %v3240_v29, %v3610_v58 }
 0x68c   :  { %v3251_v54 = vsel %vm346_vm1, %v2622_v25, 0.0  ;;  %v3250_v46 = vsel %vm346_vm1, %v2621_v13, 0.0 }
 0x68d   :  { %v3247_v39 = vadd.f32 %v3246_v22, %v3245_v32  ;;  %v3317_v11 = vadd.f32 %v3316_v53, %v3315_v8  ;;  %v3252_v23 = vadd.f32 %v3251_v54, %v3250_v46  ;;  %v2442_v45 = vpop.permute.xlu1 %2441  ;;  %v2438_v14 = vpop.permute.xlu0 %2437  ;;  %v3312_v51 = vadd.f32 %v3311_v63, %v3310_v0 }
 0x68e   :  { %v2638_v43 = vmul.f32 %v2442_v45, %v13601_v21  ;;  %v2637_v24 = vmul.f32 %v2438_v14, %v13602_v33  ;;  %v10085_v0 = vmul.f32 %v10002_v49, %v13565_v44 }
 0x68f   :  { %v3248_v37 = vrot.slane %v3247_v39, 1  ;;  %v3318_v35 = vrot.slane %v3317_v11, 2  ;;  %v3253_v50 = vrot.slane %v3252_v23, 4  ;;  %v3617_v58 = vsel %vm436_vm4, %v3312_v51, %v3616_v60 }
 0x690   :  { %v3323_v62 = vsel %vm346_vm1, %v2638_v43, 0.0  ;;  %v3322_v28 = vsel %vm346_vm1, %v2637_v24, 0.0  ;;  %v3743_v60 = vmul.f32 %v10065_v12, %v13565_v44  ;;  %v3747_v51 = vmul.f32 %v10065_v12, %v13572_v52 }
 0x691   :  { %v3249_v61 = vadd.f32 %v3248_v37, %v3247_v39  ;;  %v3319_v17 = vadd.f32 %v3318_v35, %v3317_v11  ;;  %v3254_v10 = vadd.f32 %v3253_v50, %v3252_v23  ;;  %v3324_v59 = vadd.f32 %v3323_v62, %v3322_v28  ;;  %v2453_v5 = vpop.permute.xlu1 %2452  ;;  %v2449_v31 = vpop.permute.xlu0 %2448 }
 0x692   :  { %v2640_v32 = vmul.f32 %v2453_v5, %v13601_v21  ;;  %v2639_v8 = vmul.f32 %v2449_v31, %v13602_v33  ;;  %v3739_v23 = vmul.f32 %v10065_v12, %v13562_v2  ;;  %v3741_v37 = vmul.f32 %v10065_v12, %v13564_v16  ;;  %v13612_v5 = vld [vmem:[#allocation33_spill] sm:$0xff] }
 0x693   :  { %v3612_v6 = vsel %vm442_vm7, %v3249_v61, %v3611_v19  ;;  %v3320_v15 = vrot.slane %v3319_v17, 1  ;;  %v3255_v42 = vrot.slane %v3254_v10, 2  ;;  %v3325_v25 = vrot.slane %v3324_v59, 4 }
 0x694   :  { %v3332_v13 = vsel %vm346_vm1, %v2640_v32, 0.0  ;;  %v3331_v40 = vsel %vm346_vm1, %v2639_v8, 0.0  ;;  %v3745_v19 = vmul.f32 %v10065_v12, %v13571_v27 }
 0x695   :  { %v3321_v22 = vadd.f32 %v3320_v15, %v3319_v17  ;;  %v3256_v53 = vadd.f32 %v3255_v42, %v3254_v10  ;;  %v3326_v47 = vadd.f32 %v3325_v25, %v3324_v59  ;;  %v3333_v20 = vadd.f32 %v3332_v13, %v3331_v40  ;;  %v2464_v54 = vpop.permute.xlu1 %2463  ;;  %v2460_v46 = vpop.permute.xlu0 %2459  ;;  %v13611_v10 = vld [vmem:[#allocation34_spill] sm:$0xff] }
 0x696   :  { %v2642_v39 = vmul.f32 %v2464_v54, %v13601_v21  ;;  %v2641_v11 = vmul.f32 %v2460_v46, %v13602_v33  ;;  %v10111_v40 = vsel %vm346_vm1, %v3739_v23, 0.0 }
 0x697   :  { %v3618_v45 = vsel %vm438_vm5, %v3321_v22, %v3617_v58  ;;  %v3257_v14 = vrot.slane %v3256_v53, 1  ;;  %v3327_v29 = vrot.slane %v3326_v47, 2  ;;  %v3334_v63 = vrot.slane %v3333_v20, 4 }
 0x698   :  { %v3341_v43 = vsel %vm346_vm1, %v2642_v39, 0.0  ;;  %v3340_v24 = vsel %vm346_vm1, %v2641_v11, 0.0  ;;  %v10114_v22 = vsel %vm346_vm1, %v3741_v37, 0.0  ;;  %v10119_v11 = vsel %vm346_vm1, %v3743_v60, 0.0 }
 0x699   :  { %v3258_v35 = vadd.f32 %v3257_v14, %v3256_v53  ;;  %v3328_v50 = vadd.f32 %v3327_v29, %v3326_v47  ;;  %v3335_v62 = vadd.f32 %v3334_v63, %v3333_v20  ;;  %v3342_v28 = vadd.f32 %v3341_v43, %v3340_v24  ;;  %v1705_v61 = vpop.permute.xlu1 %1704  ;;  %v1701_v17 = vpop.permute.xlu0 %1700 }
 0x69a   :  { %v2504_v59 = vmul.f32 %v1705_v61, %v13611_v10  ;;  %v2503_v31 = vmul.f32 %v1701_v17, %v13612_v5  ;;  %v10122_v14 = vsel %vm346_vm1, %v3745_v19, 0.0  ;;  %v3727_v19 = vmul.f32 %v10002_v49, %v13572_v52 }
 0x69b   :  { %v10106_v32 = vsel %vm444_vm8, %v3258_v35, %v3612_v6  ;;  %v3329_v8 = vrot.slane %v3328_v50, 1  ;;  %v3336_v15 = vrot.slane %v3335_v62, 2  ;;  %v3343_v42 = vrot.slane %v3342_v28, 4 }
 0x69c   :  { %13613 = vst [vmem:[#allocation43_spill] sm:$0xff] %v10106_v32  ;;  %v2720_v25 = vsel %vm346_vm1, %v2504_v59, 0.0  ;;  %v2719_v13 = vsel %vm346_vm1, %v2503_v31, 0.0  ;;  %v10128_v35 = vsel %vm346_vm1, %v3747_v51, 0.0  ;;  %v10138_v51 = vsel %vm346_vm1, %v10071_v1, 0.0 }
 0x69d   :  { %v3330_v53 = vadd.f32 %v3329_v8, %v3328_v50  ;;  %v3337_v47 = vadd.f32 %v3336_v15, %v3335_v62  ;;  %v3344_v20 = vadd.f32 %v3343_v42, %v3342_v28  ;;  %v2721_v54 = vadd.f32 %v2720_v25, %v2719_v13  ;;  %v1716_v46 = vpop.permute.xlu1 %1715  ;;  %v1712_v6 = vpop.permute.xlu0 %1711  ;;  %13616 = vst [vmem:[#allocation66_spill] sm:$0xff] %v10138_v51 }
 0x69e   :  { %v2506_v58 = vmul.f32 %v1716_v46, %v13611_v10  ;;  %v2505_v39 = vmul.f32 %v1712_v6, %v13612_v5  ;;  %v3725_v50 = vmul.f32 %v10002_v49, %v13571_v27  ;;  %v13615_v5 = vld [vmem:[#allocation35_spill] sm:$0xff] }
 0x69f   :  { %v3619_v23 = vsel %vm440_vm6, %v3330_v53, %v3618_v45  ;;  %v3338_v29 = vrot.slane %v3337_v47, 1  ;;  %v3345_v63 = vrot.slane %v3344_v20, 2  ;;  %v2722_v43 = vrot.slane %v2721_v54, 4  ;;  %v13614_v45 = vld [vmem:[#allocation36_spill] sm:$0xff] }
 0x6a0   :  { %v2729_v24 = vsel %vm346_vm1, %v2506_v58, 0.0  ;;  %v2728_v37 = vsel %vm346_vm1, %v2505_v39, 0.0 }
 0x6a1   :  { %v3339_v60 = vadd.f32 %v3338_v29, %v3337_v47  ;;  %v3346_v62 = vadd.f32 %v3345_v63, %v3344_v20  ;;  %v2723_v28 = vadd.f32 %v2722_v43, %v2721_v54  ;;  %v2730_v61 = vadd.f32 %v2729_v24, %v2728_v37  ;;  %v1815_v17 = vpop.permute.xlu1 %1814  ;;  %v1811_v10 = vpop.permute.xlu0 %1810 }
 0x6a2   :  { %v2524_v59 = vmul.f32 %v1815_v17, %v13614_v45  ;;  %v2523_v31 = vmul.f32 %v1811_v10, %v13615_v5  ;;  %v10145_v47 = vsel %vm346_vm1, %v10081_v38, 0.0  ;;  %v10149_v20 = vsel %vm346_vm1, %v10085_v0, 0.0 }
 0x6a3   :  { %v3620_v8 = vsel %vm442_vm7, %v3339_v60, %v3619_v23  ;;  %v3347_v15 = vrot.slane %v3346_v62, 1  ;;  %v2724_v42 = vrot.slane %v2723_v28, 2  ;;  %v2731_v25 = vrot.slane %v2730_v61, 4  ;;  %13617 = vst [vmem:[#allocation67_spill] sm:$0xff] %v10145_v47  ;;  %13618 = vst [vmem:[#allocation68_spill] sm:$0xff] %v10149_v20 }
 0x6a4   :  { %v2810_v13 = vsel %vm346_vm1, %v2524_v59, 0.0  ;;  %v2809_v53 = vsel %vm346_vm1, %v2523_v31, 0.0  ;;  %v10154_v63 = vsel %vm346_vm1, %v3725_v50, 0.0  ;;  %v10157_v38 = vsel %vm346_vm1, %v3727_v19, 0.0  ;;  %v13622_v31 = vld [vmem:[#allocation38_spill] sm:$0xff] }
 0x6a5   :  { %v3348_v54 = vadd.f32 %v3347_v15, %v3346_v62  ;;  %v2725_v1 = vadd.f32 %v2724_v42, %v2723_v28  ;;  %v2732_v46 = vadd.f32 %v2731_v25, %v2730_v61  ;;  %v2811_v6 = vadd.f32 %v2810_v13, %v2809_v53  ;;  %v1826_v58 = vpop.permute.xlu1 %1825  ;;  %v1822_v39 = vpop.permute.xlu0 %1821  ;;  %13619 = vst [vmem:[#allocation69_spill] sm:$0xff] %v10154_v63 }
 0x6a6   :  { %v2526_v23 = vmul.f32 %v1826_v58, %v13614_v45  ;;  %v2525_v29 = vmul.f32 %v1822_v39, %v13615_v5  ;;  %13620 = vst [vmem:[#allocation70_spill] sm:$0xff] %v10157_v38 }
 0x6a7   :  { %v10160_v43 = vsel %vm444_vm8, %v3348_v54, %v3620_v8  ;;  %v2726_v0 = vrot.slane %v2725_v1, 1  ;;  %v2733_v24 = vrot.slane %v2732_v46, 2  ;;  %v2812_v37 = vrot.slane %v2811_v6, 4  ;;  %v13623_v8 = vld [vmem:[#allocation37_spill] sm:$0xff] }
 0x6a8   :  { %13621 = vst [vmem:[#allocation20_spill] sm:$0xff] %v10160_v43  ;;  %v2819_v60 = vsel %vm346_vm1, %v2526_v23, 0.0  ;;  %v2818_v62 = vsel %vm346_vm1, %v2525_v29, 0.0  ;;  %v3779_v28 = vmul.f32 %v10160_v43, %v13562_v2  ;;  %v3781_v50 = vmul.f32 %v10160_v43, %v13564_v16 }
 0x6a9   :  { %v2727_v61 = vadd.f32 %v2726_v0, %v2725_v1  ;;  %v2734_v17 = vadd.f32 %v2733_v24, %v2732_v46  ;;  %v2813_v10 = vadd.f32 %v2812_v37, %v2811_v6  ;;  %v2820_v45 = vadd.f32 %v2819_v60, %v2818_v62  ;;  %v1925_v59 = vpop.permute.xlu1 %1924  ;;  %v1921_v5 = vpop.permute.xlu0 %1920 }
 0x6aa   :  { %v2544_v19 = vmul.f32 %v1925_v59, %v13622_v31  ;;  %v2543_v15 = vmul.f32 %v1921_v5, %v13623_v8  ;;  %v3783_v42 = vmul.f32 %v10160_v43, %v13565_v44  ;;  %v3785_v25 = vmul.f32 %v10160_v43, %v13571_v27 }
 0x6ab   :  { %v2735_v13 = vrot.slane %v2734_v17, 1  ;;  %v2814_v53 = vrot.slane %v2813_v10, 2  ;;  %v2821_v54 = vrot.slane %v2820_v45, 4  ;;  %v10176_v1 = vmul.f32 %v10160_v43, %v13572_v52 }
 0x6ac   :  { %v2900_v46 = vsel %vm346_vm1, %v2544_v19, 0.0  ;;  %v2899_v6 = vsel %vm346_vm1, %v2543_v15, 0.0  ;;  %v10181_v58 = vsel %vm346_vm1, %v3779_v28, 0.0  ;;  %v10184_v39 = vsel %vm346_vm1, %v3781_v50, 0.0 }
 0x6ad   :  { %13624 = vst [vmem:[#allocation12_spill] sm:$0xff] %v10176_v1  ;;  %13625 = vst [vmem:[#allocation46_spill] sm:$0xff] %v10181_v58  ;;  %v2736_v23 = vadd.f32 %v2735_v13, %v2734_v17  ;;  %v2815_v29 = vadd.f32 %v2814_v53, %v2813_v10  ;;  %v2822_v0 = vadd.f32 %v2821_v54, %v2820_v45  ;;  %v1936_v37 = vpop.permute.xlu1 %1935  ;;  %v1932_v60 = vpop.permute.xlu0 %1931  ;;  %v10189_v5 = vsel %vm346_vm1, %v3783_v42, 0.0  ;;  %v13630_v13 = vld [vmem:[#allocation27_spill] sm:$0xff] }
 0x6ae   :  { %13626 = vst [vmem:[#allocation45_spill] sm:$0xff] %v10184_v39  ;;  %v2901_v24 = vadd.f32 %v2900_v46, %v2899_v6  ;;  %v2546_v62 = vmul.f32 %v1936_v37, %v13622_v31  ;;  %v2545_v59 = vmul.f32 %v1932_v60, %v13623_v8  ;;  %13627 = vst [vmem:[#allocation22_spill] sm:$0xff] %v10189_v5  ;;  %v10192_v19 = vsel %vm346_vm1, %v3785_v25, 0.0  ;;  %v13631_v8 = vld [vmem:[#allocation23_spill] sm:$0xff]  ;;  %v13632_v60 = vld [vmem:[#allocation25_spill] sm:$0xff] }
 0x6af   :  { %13628 = vst [vmem:[#allocation13_spill] sm:$0xff] %v10192_v19  ;;  %v10195_v28 = vsel %vm432_vm2, %v2736_v23, %v2727_v61  ;;  %v2816_v50 = vrot.slane %v2815_v29, 1  ;;  %v2823_v17 = vrot.slane %v2822_v0, 2 }
 0x6b0   :  { %13629 = vst [vmem:[#allocation14_spill] sm:$0xff] %v10195_v28  ;;  %v2902_v10 = vrot.slane %v2901_v24, 4  ;;  %v2909_v45 = vsel %vm346_vm1, %v2546_v62, 0.0  ;;  %v2908_v15 = vsel %vm346_vm1, %v2545_v59, 0.0  ;;  %v3640_v31 = vmul.f32 %v10195_v28, %v13630_v13  ;;  %v13633_v59 = vld [vmem:[#allocation29_spill] sm:$0xff] }
 0x6b1   :  { %v3642_v42 = vmul.f32 %v10195_v28, %v13631_v8  ;;  %v2817_v53 = vadd.f32 %v2816_v50, %v2815_v29  ;;  %v2824_v54 = vadd.f32 %v2823_v17, %v2822_v0  ;;  %v2910_v46 = vadd.f32 %v2909_v45, %v2908_v15  ;;  %v2035_v6 = vpop.permute.xlu1 %2034  ;;  %v2031_v61 = vpop.permute.xlu0 %2030  ;;  %v13634_v0 = vld [vmem:[#allocation31_spill] sm:$0xff] }
 0x6b2   :  { %v2903_v25 = vadd.f32 %v2902_v10, %v2901_v24  ;;  %v2564_v23 = vmul.f32 %v2035_v6, %v13544_v57  ;;  %v2563_v37 = vmul.f32 %v2031_v61, %v13545_v3  ;;  %v10207_v62 = vmul.f32 %v10195_v28, %v13632_v60 }
 0x6b3   :  { %v10211_v52 = vmul.f32 %v10195_v28, %v13633_v59  ;;  %v2825_v27 = vrot.slane %v2824_v54, 1  ;;  %v2911_v29 = vrot.slane %v2910_v46, 4  ;;  %v10215_v24 = vmul.f32 %v10195_v28, %v13634_v0 }
 0x6b4   :  { %v2904_v44 = vrot.slane %v2903_v25, 2  ;;  %v2990_v50 = vsel %vm346_vm1, %v2564_v23, 0.0  ;;  %v2989_v17 = vsel %vm346_vm1, %v2563_v37, 0.0  ;;  %v3800_v10 = vsel %vm1210_vm0, %v3640_v31, 0.0  ;;  %v13636_v37 = vld [vmem:[#allocation42_spill] sm:$0xff] }
 0x6b5   :  { %v3809_v45 = vsel %vm1210_vm0, %v3642_v42, 0.0  ;;  %v2826_v15 = vadd.f32 %v2825_v27, %v2824_v54  ;;  %v2912_v61 = vadd.f32 %v2911_v29, %v2910_v46  ;;  %v2991_v16 = vadd.f32 %v2990_v50, %v2989_v17  ;;  %v2046_v2 = vpop.permute.xlu1 %2045  ;;  %v2042_v38 = vpop.permute.xlu0 %2041  ;;  %v13637_v50 = vld [vmem:[#allocation41_spill] sm:$0xff] }
 0x6b6   :  { %v2905_v6 = vadd.f32 %v2904_v44, %v2903_v25  ;;  %v2566_v63 = vmul.f32 %v2046_v2, %v13544_v57  ;;  %v2565_v20 = vmul.f32 %v2042_v38, %v13545_v3  ;;  %v10224_v47 = vadd.f32 %v3800_v10, %v9792_v7 }
 0x6b7   :  { %v10227_v23 = vadd.f32 %v3809_v45, %v9796_v56  ;;  %v10230_v31 = vsel %vm432_vm2, %v2826_v15, %v2817_v53  ;;  %v2913_v27 = vrot.slane %v2912_v61, 2  ;;  %v2992_v44 = vrot.slane %v2991_v16, 4 }
 0x6b8   :  { %13635 = vst [vmem:[#allocation15_spill] sm:$0xff] %v10230_v31  ;;  %v2906_v42 = vrot.slane %v2905_v6, 1  ;;  %v2999_v54 = vsel %vm346_vm1, %v2566_v63, 0.0  ;;  %v2998_v25 = vsel %vm346_vm1, %v2565_v20, 0.0  ;;  %v3660_v57 = vmul.f32 %v10230_v31, %v13630_v13 }
 0x6b9   :  { %v3662_v3 = vmul.f32 %v10230_v31, %v13631_v8  ;;  %v2914_v7 = vadd.f32 %v2913_v27, %v2912_v61  ;;  %v2993_v56 = vadd.f32 %v2992_v44, %v2991_v16  ;;  %v3000_v38 = vadd.f32 %v2999_v54, %v2998_v25  ;;  %v2145_v46 = vpop.permute.xlu1 %2144  ;;  %v2141_v53 = vpop.permute.xlu0 %2140 }
 0x6ba   :  { %v2907_v2 = vadd.f32 %v2906_v42, %v2905_v6  ;;  %v2584_v29 = vmul.f32 %v2145_v46, %v13636_v37  ;;  %v2583_v17 = vmul.f32 %v2141_v53, %v13637_v50  ;;  %v3664_v63 = vmul.f32 %v10230_v31, %v13632_v60 }
 0x6bb   :  { %v10244_v20 = vmul.f32 %v10230_v31, %v13633_v59  ;;  %v2915_v10 = vrot.slane %v2914_v7, 1  ;;  %v2994_v45 = vrot.slane %v2993_v56, 2  ;;  %v3001_v15 = vrot.slane %v3000_v38, 4 }
 0x6bc   :  { %v10248_v16 = vmul.f32 %v10230_v31, %v13634_v0  ;;  %v3080_v6 = vsel %vm346_vm1, %v2584_v29, 0.0  ;;  %v3079_v61 = vsel %vm346_vm1, %v2583_v17, 0.0  ;;  %v3890_v42 = vsel %vm1210_vm0, %v3660_v57, 0.0 }
 0x6bd   :  { %v3899_v27 = vsel %vm1210_vm0, %v3662_v3, 0.0  ;;  %v2916_v44 = vadd.f32 %v2915_v10, %v2914_v7  ;;  %v2995_v54 = vadd.f32 %v2994_v45, %v2993_v56  ;;  %v3002_v25 = vadd.f32 %v3001_v15, %v3000_v38  ;;  %v2156_v53 = vpop.permute.xlu1 %2155  ;;  %v2152_v51 = vpop.permute.xlu0 %2151 }
 0x6be   :  { %v3081_v46 = vadd.f32 %v3080_v6, %v3079_v61  ;;  %v2586_v9 = vmul.f32 %v2156_v53, %v13636_v37  ;;  %v2585_v18 = vmul.f32 %v2152_v51, %v13637_v50  ;;  %v3891_v55 = vadd.f32 %v3890_v42, %v13638_v34 }
 0x6bf   :  { %v3900_v29 = vadd.f32 %v3899_v27, %v13639_v36  ;;  %v10259_v17 = vsel %vm432_vm2, %v2916_v44, %v2907_v2  ;;  %v2996_v57 = vrot.slane %v2995_v54, 1  ;;  %v3003_v1 = vrot.slane %v3002_v25, 2 }
 0x6c0   :  { %v3082_v3 = vrot.slane %v3081_v46, 4  ;;  %v3089_v7 = vsel %vm346_vm1, %v2586_v9, 0.0  ;;  %v3088_v56 = vsel %vm346_vm1, %v2585_v18, 0.0  ;;  %v3892_v38 = vrot.slane %v3891_v55, 4 }
 0x6c1   :  { %v3901_v10 = vrot.slane %v3900_v29, 4  ;;  %v2997_v45 = vadd.f32 %v2996_v57, %v2995_v54  ;;  %v3004_v37 = vadd.f32 %v3003_v1, %v3002_v25  ;;  %v3090_v51 = vadd.f32 %v3089_v7, %v3088_v56  ;;  %v2255_v50 = vpop.permute.xlu1 %2254  ;;  %v2251_v34 = vpop.permute.xlu0 %2250 }
 0x6c2   :  { %v3083_v15 = vadd.f32 %v3082_v3, %v3081_v46  ;;  %v2604_v36 = vmul.f32 %v2255_v50, %v13568_v4  ;;  %v2603_v2 = vmul.f32 %v2251_v34, %v13569_v41  ;;  %v3893_v6 = vadd.f32 %v3892_v38, %v3891_v55 }
 0x6c3   :  { %v3902_v61 = vadd.f32 %v3901_v10, %v3900_v29  ;;  %v3005_v42 = vrot.slane %v3004_v37, 1  ;;  %v3091_v44 = vrot.slane %v3090_v51, 4  ;;  %v3908_v9 = vsel %vm1210_vm0, %v3664_v63, 0.0 }
 0x6c4   :  { %v3084_v27 = vrot.slane %v3083_v15, 2  ;;  %v3170_v18 = vsel %vm346_vm1, %v2604_v36, 0.0  ;;  %v3169_v54 = vsel %vm346_vm1, %v2603_v2, 0.0  ;;  %v3894_v1 = vrot.slane %v3893_v6, 2 }
 0x6c5   :  { %v3903_v25 = vrot.slane %v3902_v61, 2  ;;  %v3006_v46 = vadd.f32 %v3005_v42, %v3004_v37  ;;  %v3092_v57 = vadd.f32 %v3091_v44, %v3090_v51  ;;  %v3171_v3 = vadd.f32 %v3170_v18, %v3169_v54  ;;  %v2266_v7 = vpop.permute.xlu1 %2265  ;;  %v2262_v56 = vpop.permute.xlu0 %2261 }
 0x6c6   :  { %v3085_v53 = vadd.f32 %v3084_v27, %v3083_v15  ;;  %v2606_v55 = vmul.f32 %v2266_v7, %v13568_v4  ;;  %v2605_v29 = vmul.f32 %v2262_v56, %v13569_v41  ;;  %v3895_v38 = vadd.f32 %v3894_v1, %v3893_v6  ;;  %v13641_v7 = vld [vmem:[#allocation53_spill] sm:$0xff] }
 0x6c7   :  { %v3904_v10 = vadd.f32 %v3903_v25, %v3902_v61  ;;  %v10271_v63 = vsel %vm432_vm2, %v3006_v46, %v2997_v45  ;;  %v3093_v34 = vrot.slane %v3092_v57, 2  ;;  %v3172_v36 = vrot.slane %v3171_v3, 4 }
 0x6c8   :  { %13640 = vst [vmem:[#allocation48_spill] sm:$0xff] %v10271_v63  ;;  %v3086_v50 = vrot.slane %v3085_v53, 1  ;;  %v3179_v2 = vsel %vm346_vm1, %v2606_v55, 0.0  ;;  %v3178_v37 = vsel %vm346_vm1, %v2605_v29, 0.0  ;;  %v3896_v15 = vrot.slane %v3895_v38, 1 }
 0x6c9   :  { %v3905_v51 = vrot.slane %v3904_v10, 1  ;;  %v3094_v27 = vadd.f32 %v3093_v34, %v3092_v57  ;;  %v3173_v44 = vadd.f32 %v3172_v36, %v3171_v3  ;;  %v3180_v4 = vadd.f32 %v3179_v2, %v3178_v37  ;;  %v2365_v18 = vpop.permute.xlu1 %2364  ;;  %v2361_v41 = vpop.permute.xlu0 %2360 }
 0x6ca   :  { %v3087_v42 = vadd.f32 %v3086_v50, %v3085_v53  ;;  %v2624_v6 = vmul.f32 %v2365_v18, %v13591_v26  ;;  %v2623_v45 = vmul.f32 %v2361_v41, %v13592_v48  ;;  %v10277_v61 = vadd.f32 %v3896_v15, %v3895_v38  ;;  %v13642_v15 = vld [vmem:[#allocation57_spill] sm:$0xff] }
 0x6cb   :  { %v10279_v54 = vadd.f32 %v3905_v51, %v3904_v10  ;;  %v3095_v1 = vrot.slane %v3094_v27, 1  ;;  %v3174_v25 = vrot.slane %v3173_v44, 2  ;;  %v3181_v46 = vrot.slane %v3180_v4, 4 }
 0x6cc   :  { %v3909_v56 = vadd.f32 %v3908_v9, %v13641_v7  ;;  %v3260_v53 = vsel %vm346_vm1, %v2624_v6, 0.0  ;;  %v3259_v57 = vsel %vm346_vm1, %v2623_v45, 0.0  ;;  %v3917_v3 = vsel %vm1210_vm0, %v10244_v20, 0.0 }
 0x6cd   :  { %v3926_v55 = vsel %vm1210_vm0, %v10248_v16, 0.0  ;;  %v3096_v29 = vadd.f32 %v3095_v1, %v3094_v27  ;;  %v3175_v38 = vadd.f32 %v3174_v25, %v3173_v44  ;;  %v3182_v50 = vadd.f32 %v3181_v46, %v3180_v4  ;;  %v2376_v34 = vpop.permute.xlu1 %2375  ;;  %v2372_v36 = vpop.permute.xlu0 %2371 }
 0x6ce   :  { %v3261_v10 = vadd.f32 %v3260_v53, %v3259_v57  ;;  %v2626_v2 = vmul.f32 %v2376_v34, %v13591_v26  ;;  %v2625_v9 = vmul.f32 %v2372_v36, %v13592_v48  ;;  %v3910_v37 = vrot.slane %v3909_v56, 4  ;;  %v13644_v36 = vld [vmem:[#allocation60_spill] sm:$0xff] }
 0x6cf   :  { %v3918_v51 = vadd.f32 %v3917_v3, %v13642_v15  ;;  %v10292_v18 = vsel %vm432_vm2, %v3096_v29, %v3087_v42  ;;  %v3176_v20 = vrot.slane %v3175_v38, 1  ;;  %v3183_v41 = vrot.slane %v3182_v50, 2 }
 0x6d0   :  { %13643 = vst [vmem:[#allocation47_spill] sm:$0xff] %v10292_v18  ;;  %v3262_v6 = vrot.slane %v3261_v10, 4  ;;  %v3269_v16 = vsel %vm346_vm1, %v2626_v2, 0.0  ;;  %v3268_v27 = vsel %vm346_vm1, %v2625_v9, 0.0  ;;  %v3911_v44 = vadd.f32 %v3910_v37, %v3909_v56 }
 0x6d1   :  { %v3919_v4 = vrot.slane %v3918_v51, 4  ;;  %v3177_v45 = vadd.f32 %v3176_v20, %v3175_v38  ;;  %v3184_v1 = vadd.f32 %v3183_v41, %v3182_v50  ;;  %v3270_v25 = vadd.f32 %v3269_v16, %v3268_v27  ;;  %v2475_v48 = vpop.permute.xlu1 %2474  ;;  %v2471_v46 = vpop.permute.xlu0 %2470 }
 0x6d2   :  { %v3263_v26 = vadd.f32 %v3262_v6, %v3261_v10  ;;  %v2644_v7 = vmul.f32 %v2475_v48, %v13601_v21  ;;  %v2643_v42 = vmul.f32 %v2471_v46, %v13602_v33  ;;  %v3912_v53 = vrot.slane %v3911_v44, 2 }
 0x6d3   :  { %v3920_v57 = vadd.f32 %v3919_v4, %v3918_v51  ;;  %v3185_v3 = vrot.slane %v3184_v1, 1  ;;  %v3271_v34 = vrot.slane %v3270_v25, 4  ;;  %v10299_v2 = vadd.f32 %v3926_v55, %v13644_v36 }
 0x6d4   :  { %v3264_v29 = vrot.slane %v3263_v26, 2  ;;  %v3350_v56 = vsel %vm346_vm1, %v2644_v7, 0.0  ;;  %v3349_v38 = vsel %vm346_vm1, %v2643_v42, 0.0  ;;  %v3913_v50 = vadd.f32 %v3912_v53, %v3911_v44 }
 0x6d5   :  { %v3921_v10 = vrot.slane %v3920_v57, 2  ;;  %v3186_v9 = vadd.f32 %v3185_v3, %v3184_v1  ;;  %v3272_v15 = vadd.f32 %v3271_v34, %v3270_v25  ;;  %v3351_v20 = vadd.f32 %v3350_v56, %v3349_v38  ;;  %v2486_v41 = vpop.permute.xlu1 %2485  ;;  %v2482_v6 = vpop.permute.xlu0 %2481 }
 0x6d6   :  { %v3265_v37 = vadd.f32 %v3264_v29, %v3263_v26  ;;  %v2646_v51 = vmul.f32 %v2486_v41, %v13601_v21  ;;  %v2645_v16 = vmul.f32 %v2482_v6, %v13602_v33  ;;  %v3914_v27 = vrot.slane %v3913_v50, 1 }
 0x6d7   :  { %v10305_v4 = vadd.f32 %v3921_v10, %v3920_v57  ;;  %v10308_v55 = vsel %vm432_vm2, %v3186_v9, %v3177_v45  ;;  %v3273_v46 = vrot.slane %v3272_v15, 2  ;;  %v3352_v44 = vrot.slane %v3351_v20, 4 }
 0x6d8   :  { %v3266_v48 = vrot.slane %v3265_v37, 1  ;;  %v3359_v1 = vsel %vm346_vm1, %v2646_v51, 0.0  ;;  %v3358_v26 = vsel %vm346_vm1, %v2645_v16, 0.0  ;;  %v10312_v25 = vadd.f32 %v3914_v27, %v3913_v50 }
 0x6d9   :  { %v3274_v42 = vadd.f32 %v3273_v46, %v3272_v15  ;;  %v3353_v33 = vadd.f32 %v3352_v44, %v3351_v20  ;;  %v3360_v53 = vadd.f32 %v3359_v1, %v3358_v26  ;;  %v3434_v57 = vpop.permute.xlu1 %3433  ;;  %v3430_v10 = vpop.permute.xlu0 %3429  ;;  %v13648_v46 = vld [vmem:[#allocation16_spill] sm:$0xff]  ;;  %v13649_v1 = vld [vmem:[#allocation50_spill] sm:$0xff] }
 0x6da   :  { %v3267_v21 = vadd.f32 %v3266_v48, %v3265_v37  ;;  %v3650_v3 = vmul.f32 %v10195_v28, %v3434_v57  ;;  %v3670_v45 = vmul.f32 %v10230_v31, %v3434_v57  ;;  %v3690_v29 = vmul.f32 %v10259_v17, %v3434_v57 }
 0x6db   :  { %v3710_v34 = vmul.f32 %v10271_v63, %v3434_v57  ;;  %v3275_v36 = vrot.slane %v3274_v42, 1  ;;  %v3354_v56 = vrot.slane %v3353_v33, 2  ;;  %v3361_v38 = vrot.slane %v3360_v53, 4 }
 0x6dc   :  { %v3730_v50 = vmul.f32 %v10292_v18, %v3434_v57  ;;  %v3750_v9 = vmul.f32 %v10308_v55, %v3434_v57  ;;  %v10322_v37 = vsel %vm1210_vm0, %v3650_v3, 0.0  ;;  %v10325_v15 = vsel %vm1210_vm0, %v3670_v45, 0.0 }
 0x6dd   :  { %v10328_v20 = vsel %vm1210_vm0, %v3690_v29, 0.0  ;;  %v3276_v41 = vadd.f32 %v3275_v36, %v3274_v42  ;;  %v3355_v6 = vadd.f32 %v3354_v56, %v3353_v33  ;;  %v3362_v51 = vadd.f32 %v3361_v38, %v3360_v53  ;;  %v3445_v3 = vpop.permute.xlu1 %3444  ;;  %v13651_v53 = vld [vmem:[#allocation52_spill] sm:$0xff]  ;;  %v3441_v5 = vpop.permute.xlu0 %3440 }
 0x6de   :  { %13645 = vst [vmem:[#allocation51_spill] sm:$0xff] %v10328_v20  ;;  %v10331_v16 = vsel %vm1210_vm0, %v3710_v34, 0.0  ;;  %v10334_v27 = vsel %vm1210_vm0, %v3730_v50, 0.0  ;;  %v10337_v48 = vsel %vm1210_vm0, %v3750_v9, 0.0  ;;  %v3649_v44 = vmul.f32 %v13648_v46, %v3430_v10 }
 0x6df   :  { %13646 = vst [vmem:[#allocation34_spill] sm:$0xff] %v10331_v16  ;;  %13647 = vst [vmem:[#allocation33_spill] sm:$0xff] %v10334_v27  ;;  %v3669_v26 = vmul.f32 %v13649_v1, %v3430_v10  ;;  %v10342_v45 = vsel %vm432_vm2, %v3276_v41, %v3267_v21  ;;  %v3356_v42 = vrot.slane %v3355_v6, 1  ;;  %v3363_v33 = vrot.slane %v3362_v51, 2 }
 0x6e0   :  { %13650 = vst [vmem:[#allocation36_spill] sm:$0xff] %v10342_v45  ;;  %v3689_v29 = vmul.f32 %v13651_v53, %v3430_v10  ;;  %v3770_v34 = vmul.f32 %v10342_v45, %v3434_v57  ;;  %v3709_v36 = vmul.f32 %v9949_v30, %v3430_v10  ;;  %v3729_v56 = vmul.f32 %v10002_v49, %v3430_v10 }
 0x6e1   :  { %v3749_v38 = vmul.f32 %v10065_v12, %v3430_v10  ;;  %v3357_v50 = vadd.f32 %v3356_v42, %v3355_v6  ;;  %v3364_v9 = vadd.f32 %v3363_v33, %v3362_v51  ;;  %v3769_v7 = vmul.f32 %v10106_v32, %v3430_v10 }
 0x6e2   :  { %v3789_v27 = vmul.f32 %v10160_v43, %v3430_v10  ;;  %v10352_v21 = vsel %vm1210_vm0, %v3770_v34, 0.0  ;;  %v10355_v41 = vsel %vm346_vm1, %v3649_v44, 0.0  ;;  %v3934_v16 = vsel %vm346_vm1, %v3669_v26, 0.0 }
 0x6e3   :  { %13652 = vst [vmem:[#allocation35_spill] sm:$0xff] %v10352_v21  ;;  %v10359_v19 = vsel %vm346_vm1, %v3689_v29, 0.0  ;;  %v3365_v39 = vrot.slane %v3364_v9, 1  ;;  %v10362_v6 = vsel %vm346_vm1, %v3709_v36, 0.0  ;;  %v10365_v51 = vsel %vm346_vm1, %v3729_v56, 0.0  ;;  %v3456_v29 = vpop.permute.xlu1 %3455 }
 0x6e4   :  { %13653 = vst [vmem:[#allocation38_spill] sm:$0xff] %v10359_v19  ;;  %13654 = vst [vmem:[#allocation37_spill] sm:$0xff] %v10362_v6  ;;  %v10368_v10 = vsel %vm346_vm1, %v3749_v38, 0.0  ;;  %v10371_v42 = vsel %vm346_vm1, %v3769_v7, 0.0  ;;  %v10374_v44 = vsel %vm346_vm1, %v3789_v27, 0.0  ;;  %v10377_v26 = vmul.f32 %v10195_v28, %v3445_v3 }
 0x6e5   :  { %13655 = vst [vmem:[#allocation27_spill] sm:$0xff] %v10365_v51  ;;  %13656 = vst [vmem:[#allocation23_spill] sm:$0xff] %v10371_v42  ;;  %v3672_v33 = vmul.f32 %v10230_v31, %v3445_v3  ;;  %v3366_v34 = vadd.f32 %v3365_v39, %v3364_v9  ;;  %v10381_v36 = vmul.f32 %v10259_v17, %v3445_v3 }
 0x6e6   :  { %13657 = vst [vmem:[#allocation25_spill] sm:$0xff] %v10374_v44  ;;  %v10384_v56 = vmul.f32 %v10271_v63, %v3445_v3  ;;  %v10387_v38 = vmul.f32 %v10292_v18, %v3445_v3  ;;  %v10390_v7 = vmul.f32 %v10308_v55, %v3445_v3  ;;  %v10393_v27 = vmul.f32 %v10342_v45, %v3445_v3 }
 0x6e7   :  { %13658 = vst [vmem:[#allocation29_spill] sm:$0xff] %v10381_v36  ;;  %v10396_v21 = vmul.f32 %v13648_v46, %v3441_v5  ;;  %v3671_v39 = vmul.f32 %v13649_v1, %v3441_v5  ;;  %v10400_v9 = vsel %vm432_vm2, %v3366_v34, %v3357_v50  ;;  %v10403_v42 = vmul.f32 %v13651_v53, %v3441_v5  ;;  %v3452_v34 = vpop.permute.xlu0 %3451 }
 0x6e8   :  { %13659 = vst [vmem:[#allocation31_spill] sm:$0xff] %v10384_v56  ;;  %13660 = vst [vmem:[#allocation42_spill] sm:$0xff] %v10387_v38  ;;  %v10406_v51 = vmul.f32 %v9949_v30, %v3441_v5  ;;  %v10409_v38 = vmul.f32 %v10002_v49, %v3441_v5  ;;  %v3790_v56 = vmul.f32 %v10400_v9, %v3434_v57 }
 0x6e9   :  { %13661 = vst [vmem:[#allocation41_spill] sm:$0xff] %v10393_v27  ;;  %13662 = vst [vmem:[#allocation21_spill] sm:$0xff] %v10400_v9  ;;  %v10413_v27 = vmul.f32 %v10400_v9, %v3445_v3  ;;  %v10416_v6 = vmul.f32 %v10065_v12, %v3441_v5  ;;  %v10419_v50 = vmul.f32 %v10106_v32, %v3441_v5 }
 0x6ea   :  { %13663 = vst [vmem:[#allocation49_spill] sm:$0xff] %v10403_v42  ;;  %13664 = vst [vmem:[#allocation53_spill] sm:$0xff] %v10406_v51  ;;  %v10422_v44 = vmul.f32 %v10160_v43, %v3441_v5  ;;  %v10425_v51 = vmul.f32 %v10195_v28, %v3456_v29  ;;  %v10429_v57 = vmul.f32 %v10259_v17, %v3456_v29  ;;  %v10432_v3 = vsel %vm1210_vm0, %v3790_v56, 0.0 }
 0x6eb   :  { %13665 = vst [vmem:[#allocation57_spill] sm:$0xff] %v10409_v38  ;;  %13666 = vst [vmem:[#allocation60_spill] sm:$0xff] %v10413_v27  ;;  %v3674_v38 = vmul.f32 %v10230_v31, %v3456_v29  ;;  %v10435_v27 = vmul.f32 %v10271_v63, %v3456_v29  ;;  %v10441_v5 = vmul.f32 %v10308_v55, %v3456_v29 }
 0x6ec   :  { %13667 = vst [vmem:[#allocation71_spill] sm:$0xff] %v10419_v50  ;;  %13668 = vst [vmem:[#allocation72_spill] sm:$0xff] %v10422_v44  ;;  %v10438_v50 = vmul.f32 %v10292_v18, %v3456_v29  ;;  %v3474_v44 = vpop.permute.xlu1 %3473  ;;  %v10444_v58 = vmul.f32 %v10342_v45, %v3456_v29  ;;  %v10447_v36 = vmul.f32 %v10400_v9, %v3456_v29 }
 0x6ed   :  { %13669 = vst [vmem:[#allocation73_spill] sm:$0xff] %v10429_v57  ;;  %13670 = vst [vmem:[#allocation74_spill] sm:$0xff] %v10432_v3  ;;  %v10450_v57 = vmul.f32 %v13648_v46, %v3452_v34  ;;  %v3673_v56 = vmul.f32 %v13649_v1, %v3452_v34  ;;  %v10460_v3 = vmul.f32 %v10002_v49, %v3452_v34 }
 0x6ee   :  { %13671 = vst [vmem:[#allocation75_spill] sm:$0xff] %v10435_v27  ;;  %13672 = vst [vmem:[#allocation76_spill] sm:$0xff] %v10438_v50  ;;  %v10454_v27 = vmul.f32 %v13651_v53, %v3452_v34  ;;  %v10457_v50 = vmul.f32 %v9949_v30, %v3452_v34  ;;  %v10463_v42 = vmul.f32 %v10065_v12, %v3452_v34 }
 0x6ef   :  { %13673 = vst [vmem:[#allocation77_spill] sm:$0xff] %v10444_v58  ;;  %13674 = vst [vmem:[#allocation78_spill] sm:$0xff] %v10447_v36  ;;  %v10466_v29 = vmul.f32 %v10106_v32, %v3452_v34  ;;  %v10469_v58 = vmul.f32 %v10160_v43, %v3452_v34  ;;  %v10472_v36 = vmul.f32 %v13648_v46, %v3474_v44  ;;  %v13688_v46 = vrot.slane %v10305_v4, 1 }
 0x6f0   :  { %13675 = vst [vmem:[#allocation79_spill] sm:$0xff] %v10454_v27  ;;  %13676 = vst [vmem:[#allocation80_spill] sm:$0xff] %v10457_v50  ;;  %v10475_v27 = vmul.f32 %v13649_v1, %v3474_v44  ;;  %v10478_v50 = vmul.f32 %v13651_v53, %v3474_v44  ;;  %v10484_v20 = vmul.f32 %v10002_v49, %v3474_v44  ;;  %v3943_v49 = vsel %vm346_vm1, %v3671_v39, 0.0 }
 0x6f1   :  { %13677 = vst [vmem:[#allocation81_spill] sm:$0xff] %v10460_v3  ;;  %13678 = vst [vmem:[#allocation82_spill] sm:$0xff] %v10466_v29  ;;  %v10481_v3 = vmul.f32 %v9949_v30, %v3474_v44  ;;  %v10487_v29 = vmul.f32 %v10065_v12, %v3474_v44  ;;  %v10490_v34 = vmul.f32 %v10106_v32, %v3474_v44  ;;  %v3811_v30 = vrot.slane %v10227_v23, 4  ;;  %v10529_v32 = vpop.permute.xlu1 %3462 }
 0x6f2   :  { %13679 = vst [vmem:[#allocation83_spill] sm:$0xff] %v10469_v58  ;;  %13680 = vst [vmem:[#allocation84_spill] sm:$0xff] %v10472_v36  ;;  %v10493_v36 = vmul.f32 %v10160_v43, %v3474_v44  ;;  %v3924_v53 = vadd.f32 %v13688_v46, %v10305_v4  ;;  %v3953_v44 = vsel %vm1210_vm0, %v3674_v38, 0.0  ;;  %v10506_v43 = vpop.permute.xlu0 %4523 }
 0x6f3   :  { %13681 = vst [vmem:[#allocation85_spill] sm:$0xff] %v10475_v27  ;;  %13682 = vst [vmem:[#allocation86_spill] sm:$0xff] %v10478_v50  ;;  %v3928_v50 = vrot.slane %v10299_v2, 4  ;;  %v10512_v39 = vrot.slane %v10506_v43, 1  ;;  %v10518_v38 = vrot.slane %v10506_v43, 3  ;;  %v10536_v58 = vadd.f32 %v10506_v43, %v10277_v61 }
 0x6f4   :  { %13683 = vst [vmem:[#allocation87_spill] sm:$0xff] %v10481_v3  ;;  %13684 = vst [vmem:[#allocation88_spill] sm:$0xff] %v10484_v20  ;;  %v3936_v3 = vadd.f32 %v10325_v15, %v3934_v16  ;;  %v3944_v20 = vsel %vm1210_vm0, %v3672_v33, 0.0  ;;  %v3818_v15 = vsel %vm1210_vm0, %v10207_v62, 0.0  ;;  %v10524_v62 = vrot.slane %v10506_v43, 5 }
 0x6f5   :  { %13685 = vst [vmem:[#allocation89_spill] sm:$0xff] %v10487_v29  ;;  %13686 = vst [vmem:[#allocation90_spill] sm:$0xff] %v10490_v34  ;;  %v3952_v29 = vsel %vm346_vm1, %v3673_v56, 0.0  ;;  %v3929_v12 = vadd.f32 %v3928_v50, %v10299_v2  ;;  %v3945_v34 = vadd.f32 %v3944_v20, %v3943_v49  ;;  %v10515_v49 = vrot.slane %v10506_v43, 2 }
 0x6f6   :  { %13687 = vst [vmem:[#allocation91_spill] sm:$0xff] %v10493_v36  ;;  %v3802_v36 = vrot.slane %v10224_v47, 4  ;;  %v3937_v4 = vrot.slane %v3936_v3, 4  ;;  %v3954_v46 = vadd.f32 %v3953_v44, %v3952_v29  ;;  %v10521_v50 = vrot.slane %v10506_v43, 4  ;;  %13689 = vst [vmem:[#allocation92_spill] sm:$0xff] %v10529_v32  ;;  %v3478_v27 = vpop.permute.xlu0 %3477 }
 0x6f7   :  { %v3930_v16 = vrot.slane %v3929_v12, 2  ;;  %v3946_v33 = vrot.slane %v3945_v34, 4  ;;  %v10527_v44 = vrot.slane %v10506_v43, 6  ;;  %v10557_v61 = vmul.f32 %v10342_v45, %v3478_v27 }
 0x6f8   :  { %v3938_v2 = vadd.f32 %v3937_v4, %v3936_v3  ;;  %v3955_v20 = vrot.slane %v3954_v46, 4  ;;  %v10532_v4 = vrot.slane %v10506_v43, 7 }
 0x6f9   :  { %v3931_v56 = vadd.f32 %v3930_v16, %v3929_v12  ;;  %v3947_v29 = vadd.f32 %v3946_v33, %v3945_v34  ;;  %v10539_v12 = vmul.f32 %v10195_v28, %v3478_v27  ;;  %v10542_v34 = vmul.f32 %v10230_v31, %v3478_v27  ;;  %13696 = vst [vmem:[#allocation99_spill] sm:$0xff] %v10557_v61 }
 0x6fa   :  { %v3939_v1 = vrot.slane %v3938_v2, 2  ;;  %v3956_v3 = vadd.f32 %v3955_v20, %v3954_v46  ;;  %v10545_v16 = vmul.f32 %v10259_v17, %v3478_v27  ;;  %v10548_v33 = vmul.f32 %v10271_v63, %v3478_v27 }
 0x6fb   :  { %13690 = vst [vmem:[#allocation93_spill] sm:$0xff] %v10539_v12  ;;  %13691 = vst [vmem:[#allocation94_spill] sm:$0xff] %v10542_v34  ;;  %v10551_v46 = vmul.f32 %v10292_v18, %v3478_v27  ;;  %v10554_v20 = vmul.f32 %v10308_v55, %v3478_v27  ;;  %v10560_v12 = vmul.f32 %v10400_v9, %v3478_v27  ;;  %v3932_v28 = vrot.slane %v3931_v56, 1 }
 0x6fc   :  { %13692 = vst [vmem:[#allocation95_spill] sm:$0xff] %v10545_v16  ;;  %13693 = vst [vmem:[#allocation96_spill] sm:$0xff] %v10548_v33  ;;  %v3940_v34 = vadd.f32 %v3939_v1, %v3938_v2  ;;  %v3948_v31 = vrot.slane %v3947_v29, 2  ;;  %v3957_v32 = vrot.slane %v3956_v3, 2  ;;  %v10562_v16 = vpop.permute.xlu1 %4527  ;;  %v10566_v33 = vadd.f32 %v10512_v39, %v10279_v54 }
 0x6fd   :  { %13694 = vst [vmem:[#allocation97_spill] sm:$0xff] %v10551_v46  ;;  %13695 = vst [vmem:[#allocation98_spill] sm:$0xff] %v10554_v20  ;;  %v10570_v46 = vadd.f32 %v10515_v49, %v10312_v25  ;;  %v10573_v20 = vadd.f32 %v10518_v38, %v3924_v53  ;;  %v3803_v27 = vadd.f32 %v3802_v36, %v10224_v47  ;;  %v10577_v61 = vrot.slane %v10562_v16, 1 }
 0x6fe   :  { %13697 = vst [vmem:[#allocation100_spill] sm:$0xff] %v10560_v12  ;;  %13698 = vst [vmem:[#allocation101_spill] sm:$0xff] %v10566_v33  ;;  %v3933_v1 = vadd.f32 %v3932_v28, %v3931_v56  ;;  %v3941_v2 = vrot.slane %v3940_v34, 1  ;;  %v3949_v12 = vadd.f32 %v3948_v31, %v3947_v29  ;;  %v3958_v45 = vadd.f32 %v3957_v32, %v3956_v3  ;;  %v13701_v31 = vld [vmem:[#allocation40_spill] sm:$0xff] }
 0x6ff   :  { %13699 = vst [vmem:[#allocation102_spill] sm:$0xff] %v10570_v46  ;;  %13700 = vst [vmem:[#allocation103_spill] sm:$0xff] %v10573_v20  ;;  %v4723_v18 = vrot.slane %v10566_v33, 7  ;;  %v4725_v54 = vrot.slane %v10570_v46, 6  ;;  %v4727_v63 = vrot.slane %v10573_v20, 5  ;;  %v3804_v19 = vrot.slane %v3803_v27, 2 }
 0x700   :  { %v3942_v25 = vadd.f32 %v3941_v2, %v3940_v34  ;;  %v3950_v9 = vrot.slane %v3949_v12, 1  ;;  %v10583_v53 = vadd.f32 %v10521_v50, %v3933_v1  ;;  %v3959_v47 = vrot.slane %v3958_v45, 1 }
 0x701   :  { %v4724_v36 = vsel %vm432_vm2, %v4723_v18, %v10536_v58  ;;  %v3812_v28 = vadd.f32 %v3811_v30, %v10227_v23  ;;  %v3819_v32 = vadd.f32 %v3818_v15, %v13701_v31  ;;  %v3805_v20 = vadd.f32 %v3804_v19, %v3803_v27 }
 0x702   :  { %v3951_v56 = vadd.f32 %v3950_v9, %v3949_v12  ;;  %v10590_v29 = vadd.f32 %v10524_v62, %v3942_v25  ;;  %v4726_v3 = vsel %vm434_vm3, %v4725_v54, %v4724_v36  ;;  %v4729_v34 = vrot.slane %v10583_v53, 4  ;;  %v13702_v54 = vld [vmem:[#allocation39_spill] sm:$0xff] }
 0x703   :  { %v3960_v2 = vadd.f32 %v3959_v47, %v3958_v45  ;;  %v4728_v1 = vsel %vm436_vm4, %v4727_v63, %v4726_v3  ;;  %v3813_v46 = vrot.slane %v3812_v28, 2  ;;  %v3820_v18 = vrot.slane %v3819_v32, 4 }
 0x704   :  { %v10596_v33 = vadd.f32 %v10527_v44, %v3951_v56  ;;  %v4730_v30 = vsel %vm438_vm5, %v4729_v34, %v4728_v1  ;;  %v4731_v23 = vrot.slane %v10590_v29, 3  ;;  %v3806_v15 = vrot.slane %v3805_v20, 1  ;;  %v13703_v34 = vld [vmem:[#allocation54_spill] sm:$0xff] }
 0x705   :  { %v10601_v9 = vadd.f32 %v10532_v4, %v3960_v2  ;;  %v3814_v12 = vadd.f32 %v3813_v46, %v3812_v28  ;;  %v3827_v45 = vsel %vm1210_vm0, %v10211_v52, 0.0  ;;  %v3821_v27 = vadd.f32 %v3820_v18, %v3819_v32 }
 0x706   :  { %v4732_v63 = vsel %vm440_vm6, %v4731_v23, %v4730_v30  ;;  %v4733_v19 = vrot.slane %v10596_v33, 2  ;;  %v3828_v25 = vadd.f32 %v3827_v45, %v13702_v54  ;;  %v3807_v36 = vadd.f32 %v3806_v15, %v3805_v20 }
 0x707   :  { %v4735_v47 = vrot.slane %v10601_v9, 1  ;;  %v3815_v31 = vrot.slane %v3814_v12, 1  ;;  %v3836_v56 = vsel %vm1210_vm0, %v10215_v24, 0.0  ;;  %v3822_v46 = vrot.slane %v3821_v27, 2 }
 0x708   :  { %v4734_v3 = vsel %vm442_vm7, %v4733_v19, %v4732_v63  ;;  %v3829_v28 = vrot.slane %v3828_v25, 4  ;;  %v3837_v52 = vadd.f32 %v3836_v56, %v13703_v34  ;;  %v3846_v32 = vadd.f32 %v10322_v37, %v10355_v41 }
 0x709   :  { %v4736_v2 = vsel %vm444_vm8, %v4735_v47, %v4734_v3  ;;  %v3816_v1 = vadd.f32 %v3815_v31, %v3814_v12  ;;  %v3853_v30 = vsel %vm346_vm1, %v10396_v21, 0.0  ;;  %v3823_v23 = vadd.f32 %v3822_v46, %v3821_v27 }
 0x70a   :  { %v4857_v20 = vsel %vm346_vm1, %v4736_v2, 0.0  ;;  %v3830_v18 = vadd.f32 %v3829_v28, %v3828_v25  ;;  %v3838_v24 = vrot.slane %v3837_v52, 4  ;;  %v3847_v15 = vrot.slane %v3846_v32, 4 }
 0x70b   :  { %4858 = vadd.xlane.f32.xlu1 %v4857_v20  ;;  %v3854_v45 = vsel %vm1210_vm0, %v10377_v26, 0.0  ;;  %v3862_v63 = vsel %vm346_vm1, %v10450_v57, 0.0  ;;  %v3863_v12 = vsel %vm1210_vm0, %v10425_v51, 0.0  ;;  %v3824_v37 = vrot.slane %v3823_v23, 1 }
 0x70c   :  { %v3831_v41 = vrot.slane %v3830_v18, 2  ;;  %v3839_v19 = vadd.f32 %v3838_v24, %v3837_v52  ;;  %v3855_v21 = vadd.f32 %v3854_v45, %v3853_v30  ;;  %v3848_v54 = vadd.f32 %v3847_v15, %v3846_v32 }
 0x70d   :  { %v3864_v47 = vadd.f32 %v3863_v12, %v3862_v63  ;;  %v10626_v27 = vadd.f32 %v10506_v43, %v3807_v36  ;;  %v10629_v25 = vadd.f32 %v10512_v39, %v3816_v1  ;;  %v3825_v31 = vadd.f32 %v3824_v37, %v3823_v23 }
 0x70e   :  { %v3832_v26 = vadd.f32 %v3831_v41, %v3830_v18  ;;  %v3840_v56 = vrot.slane %v3839_v19, 2  ;;  %v3856_v3 = vrot.slane %v3855_v21, 4  ;;  %v3849_v57 = vrot.slane %v3848_v54, 2 }
 0x70f   :  { %v3865_v46 = vrot.slane %v3864_v47, 4  ;;  %v4707_v51 = vrot.slane %v10629_v25, 7  ;;  %v3740_v28 = vmul.f32 %v10308_v55, %v13630_v13  ;;  %v10635_v36 = vadd.f32 %v10515_v49, %v3825_v31 }
 0x710   :  { %v3833_v34 = vrot.slane %v3832_v26, 1  ;;  %v3841_v52 = vadd.f32 %v3840_v56, %v3839_v19  ;;  %v3857_v2 = vadd.f32 %v3856_v3, %v3855_v21  ;;  %v3850_v32 = vadd.f32 %v3849_v57, %v3848_v54 }
 0x711   :  { %v3866_v1 = vadd.f32 %v3865_v46, %v3864_v47  ;;  %v4708_v30 = vsel %vm432_vm2, %v4707_v51, %v10626_v27  ;;  %v3742_v20 = vmul.f32 %v10308_v55, %v13631_v8  ;;  %v4709_v15 = vrot.slane %v10635_v36, 6 }
 0x712   :  { %v3834_v23 = vadd.f32 %v3833_v34, %v3832_v26  ;;  %v3842_v18 = vrot.slane %v3841_v52, 1  ;;  %v3858_v24 = vrot.slane %v3857_v2, 2  ;;  %v3851_v45 = vrot.slane %v3850_v32, 1 }
 0x713   :  { %v3867_v63 = vrot.slane %v3866_v1, 2  ;;  %v3744_v12 = vmul.f32 %v10308_v55, %v13632_v60  ;;  %v3746_v37 = vmul.f32 %v10308_v55, %v13633_v59  ;;  %v4710_v54 = vsel %vm434_vm3, %v4709_v15, %v4708_v30 }
 0x714   :  { %v3843_v41 = vadd.f32 %v3842_v18, %v3841_v52  ;;  %v3859_v19 = vadd.f32 %v3858_v24, %v3857_v2  ;;  %v10647_v21 = vadd.f32 %v10518_v38, %v3834_v23  ;;  %v3852_v47 = vadd.f32 %v3851_v45, %v3850_v32 }
 0x715   :  { %v3868_v31 = vadd.f32 %v3867_v63, %v3866_v1  ;;  %v3748_v26 = vmul.f32 %v10308_v55, %v13634_v0  ;;  %v4250_v56 = vsel %vm1210_vm0, %v3740_v28, 0.0  ;;  %v4259_v2 = vsel %vm1210_vm0, %v3742_v20, 0.0 }
 0x716   :  { %v3860_v3 = vrot.slane %v3859_v19, 1  ;;  %v10654_v57 = vadd.f32 %v10521_v50, %v3843_v41  ;;  %v4711_v46 = vrot.slane %v10647_v21, 5  ;;  %v4251_v51 = vadd.f32 %v4250_v56, %v10111_v40 }
 0x717   :  { %v3869_v34 = vrot.slane %v3868_v31, 1  ;;  %v10659_v52 = vadd.f32 %v10524_v62, %v3852_v47  ;;  %v4268_v32 = vsel %vm1210_vm0, %v3744_v12, 0.0  ;;  %v4260_v15 = vadd.f32 %v4259_v2, %v10114_v22 }
 0x718   :  { %v3861_v1 = vadd.f32 %v3860_v3, %v3859_v19  ;;  %v4712_v30 = vsel %vm436_vm4, %v4711_v46, %v4710_v54  ;;  %v4713_v28 = vrot.slane %v10654_v57, 4  ;;  %v4252_v23 = vrot.slane %v4251_v51, 4 }
 0x719   :  { %v3870_v18 = vadd.f32 %v3869_v34, %v3868_v31  ;;  %v4715_v24 = vrot.slane %v10659_v52, 3  ;;  %v4269_v40 = vadd.f32 %v4268_v32, %v10119_v11  ;;  %v4277_v12 = vsel %vm1210_vm0, %v3746_v37, 0.0 }
 0x71a   :  { %v10669_v45 = vadd.f32 %v10527_v44, %v3861_v1  ;;  %v4714_v20 = vsel %vm438_vm5, %v4713_v28, %v4712_v30  ;;  %v4253_v63 = vadd.f32 %v4252_v23, %v4251_v51  ;;  %v4261_v54 = vrot.slane %v4260_v15, 4 }
 0x71b   :  { %v10674_v41 = vadd.f32 %v10532_v4, %v3870_v18  ;;  %v4716_v19 = vsel %vm440_vm6, %v4715_v24, %v4714_v20  ;;  %v4270_v47 = vrot.slane %v4269_v40, 4  ;;  %v4278_v11 = vadd.f32 %v4277_v12, %v10122_v14 }
 0x71c   :  { %v4717_v31 = vrot.slane %v10669_v45, 2  ;;  %v4254_v22 = vrot.slane %v4253_v63, 2  ;;  %v4286_v56 = vsel %vm1210_vm0, %v3748_v26, 0.0  ;;  %v4262_v46 = vadd.f32 %v4261_v54, %v4260_v15 }
 0x71d   :  { %v4719_v3 = vrot.slane %v10674_v41, 1  ;;  %v4271_v51 = vadd.f32 %v4270_v47, %v4269_v40  ;;  %v4287_v37 = vadd.f32 %v4286_v56, %v10128_v35  ;;  %v4279_v32 = vrot.slane %v4278_v11, 4 }
 0x71e   :  { %v4718_v34 = vsel %vm442_vm7, %v4717_v31, %v4716_v19  ;;  %v4255_v2 = vadd.f32 %v4254_v22, %v4253_v63  ;;  %v4296_v1 = vadd.f32 %v10337_v48, %v10368_v10  ;;  %v4263_v28 = vrot.slane %v4262_v46, 2 }
 0x71f   :  { %v4720_v30 = vsel %vm444_vm8, %v4719_v3, %v4718_v34  ;;  %v4272_v23 = vrot.slane %v4271_v51, 2  ;;  %v4288_v14 = vrot.slane %v4287_v37, 4  ;;  %v4280_v24 = vadd.f32 %v4279_v32, %v4278_v11 }
 0x720   :  { %v4851_v26 = vsel %vm346_vm1, %v4720_v30, 0.0  ;;  %v4256_v18 = vrot.slane %v4255_v2, 1  ;;  %v4297_v15 = vrot.slane %v4296_v1, 4  ;;  %v4264_v40 = vadd.f32 %v4263_v28, %v4262_v46 }
 0x721   :  { %4852 = vadd.xlane.f32.xlu0 %v4851_v26  ;;  %v4273_v35 = vadd.f32 %v4272_v23, %v4271_v51  ;;  %v4289_v20 = vadd.f32 %v4288_v14, %v4287_v37  ;;  %v4303_v63 = vsel %vm346_vm1, %v10416_v6, 0.0  ;;  %v4281_v19 = vrot.slane %v4280_v24, 2 }
 0x722   :  { %v4257_v12 = vadd.f32 %v4256_v18, %v4255_v2  ;;  %v4298_v48 = vadd.f32 %v4297_v15, %v4296_v1  ;;  %v4304_v10 = vsel %vm1210_vm0, %v10390_v7, 0.0  ;;  %v4265_v54 = vrot.slane %v4264_v40, 1 }
 0x723   :  { %v4274_v47 = vrot.slane %v4273_v35, 1  ;;  %v4290_v31 = vrot.slane %v4289_v20, 2  ;;  %v4305_v22 = vadd.f32 %v4304_v10, %v4303_v63  ;;  %v4282_v56 = vadd.f32 %v4281_v19, %v4280_v24 }
 0x724   :  { %v4299_v11 = vrot.slane %v4298_v48, 2  ;;  %v4312_v3 = vsel %vm346_vm1, %v10463_v42, 0.0  ;;  %v4313_v46 = vsel %vm1210_vm0, %v10441_v5, 0.0  ;;  %v4266_v51 = vadd.f32 %v4265_v54, %v4264_v40 }
 0x725   :  { %v4275_v6 = vadd.f32 %v4274_v47, %v4273_v35  ;;  %v4291_v37 = vadd.f32 %v4290_v31, %v4289_v20  ;;  %v4306_v34 = vrot.slane %v4305_v22, 4  ;;  %v4283_v2 = vrot.slane %v4282_v56, 1 }
 0x726   :  { %v4300_v32 = vadd.f32 %v4299_v11, %v4298_v48  ;;  %v4314_v1 = vadd.f32 %v4313_v46, %v4312_v3  ;;  %v10696_v7 = vadd.f32 %v10506_v43, %v4257_v12  ;;  %v10699_v23 = vadd.f32 %v10512_v39, %v4266_v51 }
 0x727   :  { %v4292_v30 = vrot.slane %v4291_v37, 1  ;;  %v4307_v28 = vadd.f32 %v4306_v34, %v4305_v22  ;;  %v10702_v42 = vadd.f32 %v10515_v49, %v4275_v6  ;;  %v4284_v14 = vadd.f32 %v4283_v2, %v4282_v56 }
 0x728   :  { %13704 = vst [vmem:[#allocation40_spill] sm:$0xff] %v10696_v7  ;;  %13705 = vst [vmem:[#allocation39_spill] sm:$0xff] %v10699_v23  ;;  %v4301_v5 = vrot.slane %v4300_v32, 1  ;;  %v4315_v26 = vrot.slane %v4314_v1, 4  ;;  %v3680_v18 = vmul.f32 %v10259_v17, %v13630_v13  ;;  %v4787_v40 = vrot.slane %v10699_v23, 7 }
 0x729   :  { %13706 = vst [vmem:[#allocation54_spill] sm:$0xff] %v10702_v42  ;;  %v4293_v24 = vadd.f32 %v4292_v30, %v4291_v37  ;;  %v4308_v15 = vrot.slane %v4307_v28, 2  ;;  %v4789_v35 = vrot.slane %v10702_v42, 6  ;;  %v10709_v12 = vadd.f32 %v10518_v38, %v4284_v14  ;;  %v13732_v42 = vld [vmem:[#allocation22_spill] sm:$0xff] }
 0x72a   :  { %v4302_v20 = vadd.f32 %v4301_v5, %v4300_v32  ;;  %v4316_v63 = vadd.f32 %v4315_v26, %v4314_v1  ;;  %v3682_v19 = vmul.f32 %v10259_v17, %v13631_v8  ;;  %v4788_v54 = vsel %vm432_vm2, %v4787_v40, %v10696_v7 }
 0x72b   :  { %13707 = vst [vmem:[#allocation104_spill] sm:$0xff] %v10709_v12  ;;  %v4309_v48 = vadd.f32 %v4308_v15, %v4307_v28  ;;  %v10714_v10 = vadd.f32 %v10521_v50, %v4293_v24  ;;  %v3684_v47 = vmul.f32 %v10259_v17, %v13632_v60  ;;  %v4790_v56 = vsel %vm434_vm3, %v4789_v35, %v4788_v54  ;;  %v13710_v28 = vld [vmem:[#allocation61_spill] sm:$0xff]  ;;  %v13711_v15 = vld [vmem:[#allocation55_spill] sm:$0xff]  ;;  %v13713_v54 = vld [vmem:[#allocation56_spill] sm:$0xff] }
 0x72c   :  { %v4317_v31 = vrot.slane %v4316_v63, 2  ;;  %v10721_v22 = vadd.f32 %v10524_v62, %v4302_v20  ;;  %v4791_v11 = vrot.slane %v10709_v12, 5  ;;  %v3686_v51 = vmul.f32 %v10259_v17, %v13633_v59 }
 0x72d   :  { %13708 = vst [vmem:[#allocation105_spill] sm:$0xff] %v10714_v10  ;;  %v4310_v3 = vrot.slane %v4309_v48, 1  ;;  %v4793_v46 = vrot.slane %v10714_v10, 4  ;;  %v3688_v6 = vmul.f32 %v10259_v17, %v13634_v0  ;;  %v3980_v32 = vsel %vm1210_vm0, %v3680_v18, 0.0 }
 0x72e   :  { %13709 = vst [vmem:[#allocation106_spill] sm:$0xff] %v10721_v22  ;;  %v4318_v37 = vadd.f32 %v4317_v31, %v4316_v63  ;;  %v4792_v34 = vsel %vm436_vm4, %v4791_v11, %v4790_v56  ;;  %v4795_v2 = vrot.slane %v10721_v22, 3  ;;  %v3981_v14 = vadd.f32 %v3980_v32, %v13710_v28  ;;  %v13714_v11 = vld [vmem:[#allocation62_spill] sm:$0xff] }
 0x72f   :  { %v4311_v1 = vadd.f32 %v4310_v3, %v4309_v48  ;;  %v4794_v30 = vsel %vm438_vm5, %v4793_v46, %v4792_v34  ;;  %v3989_v5 = vsel %vm1210_vm0, %v3682_v19, 0.0  ;;  %v3998_v35 = vsel %vm1210_vm0, %v3684_v47, 0.0  ;;  %v13715_v32 = vld [vmem:[#allocation58_spill] sm:$0xff] }
 0x730   :  { %v4319_v26 = vrot.slane %v4318_v37, 1  ;;  %v4796_v24 = vsel %vm440_vm6, %v4795_v2, %v4794_v30  ;;  %v3990_v40 = vadd.f32 %v3989_v5, %v13711_v15  ;;  %v3982_v63 = vrot.slane %v3981_v14, 4  ;;  %v13717_v5 = vld [vmem:[#allocation38_spill] sm:$0xff]  ;;  %v13718_v15 = vld [vmem:[#allocation51_spill] sm:$0xff] }
 0x731   :  { %v10740_v20 = vadd.f32 %v10527_v44, %v4311_v1  ;;  %v3999_v18 = vadd.f32 %v3998_v35, %v13713_v54  ;;  %v4007_v48 = vsel %vm1210_vm0, %v3686_v51, 0.0  ;;  %v4016_v19 = vsel %vm1210_vm0, %v3688_v6, 0.0 }
 0x732   :  { %v4320_v31 = vadd.f32 %v4319_v26, %v4318_v37  ;;  %v3991_v56 = vrot.slane %v3990_v40, 4  ;;  %v4008_v3 = vadd.f32 %v4007_v48, %v13714_v11  ;;  %v3983_v34 = vadd.f32 %v3982_v63, %v3981_v14 }
 0x733   :  { %13712 = vst [vmem:[#allocation61_spill] sm:$0xff] %v10740_v20  ;;  %v4797_v46 = vrot.slane %v10740_v20, 2  ;;  %v4000_v2 = vrot.slane %v3999_v18, 4  ;;  %v4017_v47 = vadd.f32 %v4016_v19, %v13715_v32  ;;  %v4026_v51 = vadd.f32 %v13718_v15, %v13717_v5 }
 0x734   :  { %v10749_v1 = vadd.f32 %v10532_v4, %v4320_v31  ;;  %v3992_v30 = vadd.f32 %v3991_v56, %v3990_v40  ;;  %v4009_v28 = vrot.slane %v4008_v3, 4  ;;  %v3984_v26 = vrot.slane %v3983_v34, 2  ;;  %v13719_v31 = vld [vmem:[#allocation49_spill] sm:$0xff] }
 0x735   :  { %v4798_v37 = vsel %vm442_vm7, %v4797_v46, %v4796_v24  ;;  %v4001_v35 = vadd.f32 %v4000_v2, %v3999_v18  ;;  %v4018_v54 = vrot.slane %v4017_v47, 4  ;;  %v4027_v63 = vrot.slane %v4026_v51, 4 }
 0x736   :  { %13716 = vst [vmem:[#allocation55_spill] sm:$0xff] %v10749_v1  ;;  %v4799_v6 = vrot.slane %v10749_v1, 1  ;;  %v3993_v48 = vrot.slane %v3992_v30, 2  ;;  %v4010_v14 = vadd.f32 %v4009_v28, %v4008_v3  ;;  %v3985_v11 = vadd.f32 %v3984_v26, %v3983_v34  ;;  %v13720_v34 = vld [vmem:[#allocation29_spill] sm:$0xff] }
 0x737   :  { %v4002_v19 = vrot.slane %v4001_v35, 2  ;;  %v4019_v32 = vadd.f32 %v4018_v54, %v4017_v47  ;;  %v4033_v40 = vsel %vm346_vm1, %v13719_v31, 0.0  ;;  %v4028_v15 = vadd.f32 %v4027_v63, %v4026_v51  ;;  %v13721_v51 = vld [vmem:[#allocation79_spill] sm:$0xff] }
 0x738   :  { %v4800_v56 = vsel %vm444_vm8, %v4799_v6, %v4798_v37  ;;  %v3994_v7 = vadd.f32 %v3993_v48, %v3992_v30  ;;  %v4011_v5 = vrot.slane %v4010_v14, 2  ;;  %v3986_v18 = vrot.slane %v3985_v11, 1 }
 0x739   :  { %v4881_v24 = vsel %vm346_vm1, %v4800_v56, 0.0  ;;  %v4003_v46 = vadd.f32 %v4002_v19, %v4001_v35  ;;  %v4020_v2 = vrot.slane %v4019_v32, 2  ;;  %v4029_v28 = vrot.slane %v4028_v15, 2  ;;  %v13722_v56 = vld [vmem:[#allocation73_spill] sm:$0xff] }
 0x73a   :  { %4882 = vadd.xlane.f32.xlu1 %v4881_v24  ;;  %v3995_v1 = vrot.slane %v3994_v7, 1  ;;  %v4012_v3 = vadd.f32 %v4011_v5, %v4010_v14  ;;  %v4034_v47 = vsel %vm1210_vm0, %v13720_v34, 0.0  ;;  %v3987_v26 = vadd.f32 %v3986_v18, %v3985_v11 }
 0x73b   :  { %v4004_v54 = vrot.slane %v4003_v46, 1  ;;  %v4021_v31 = vadd.f32 %v4020_v2, %v4019_v32  ;;  %v4035_v20 = vadd.f32 %v4034_v47, %v4033_v40  ;;  %v4030_v6 = vadd.f32 %v4029_v28, %v4028_v15  ;;  %v13727_v2 = vld [vmem:[#allocation21_spill] sm:$0xff] }
 0x73c   :  { %v3996_v37 = vadd.f32 %v3995_v1, %v3994_v7  ;;  %v4013_v30 = vrot.slane %v4012_v3, 1  ;;  %v4042_v48 = vsel %vm346_vm1, %v13721_v51, 0.0  ;;  %v4043_v14 = vsel %vm1210_vm0, %v13722_v56, 0.0 }
 0x73d   :  { %v4005_v63 = vadd.f32 %v4004_v54, %v4003_v46  ;;  %v4022_v35 = vrot.slane %v4021_v31, 1  ;;  %v4036_v19 = vrot.slane %v4035_v20, 4  ;;  %v4031_v24 = vrot.slane %v4030_v6, 1 }
 0x73e   :  { %v4014_v5 = vadd.f32 %v4013_v30, %v4012_v3  ;;  %v4044_v22 = vadd.f32 %v4043_v14, %v4042_v48  ;;  %v10766_v11 = vadd.f32 %v10506_v43, %v3987_v26  ;;  %v10769_v7 = vadd.f32 %v10512_v39, %v3996_v37 }
 0x73f   :  { %v4023_v32 = vadd.f32 %v4022_v35, %v4021_v31  ;;  %v4037_v40 = vadd.f32 %v4036_v19, %v4035_v20  ;;  %v10772_v1 = vadd.f32 %v10515_v49, %v4005_v63  ;;  %v4032_v15 = vadd.f32 %v4031_v24, %v4030_v6 }
 0x740   :  { %13723 = vst [vmem:[#allocation56_spill] sm:$0xff] %v10766_v11  ;;  %13724 = vst [vmem:[#allocation62_spill] sm:$0xff] %v10769_v7  ;;  %v4045_v18 = vrot.slane %v4044_v22, 4  ;;  %v10775_v46 = vadd.f32 %v10518_v38, %v4014_v5  ;;  %v3780_v3 = vmul.f32 %v13727_v2, %v13630_v13  ;;  %v4739_v20 = vrot.slane %v10769_v7, 7 }
 0x741   :  { %13725 = vst [vmem:[#allocation58_spill] sm:$0xff] %v10772_v1  ;;  %v4038_v28 = vrot.slane %v4037_v40, 2  ;;  %v10780_v34 = vadd.f32 %v10521_v50, %v4023_v32  ;;  %v4741_v47 = vrot.slane %v10772_v1, 6  ;;  %v10785_v54 = vadd.f32 %v10524_v62, %v4032_v15  ;;  %v13730_v15 = vld [vmem:[#allocation46_spill] sm:$0xff] }
 0x742   :  { %13726 = vst [vmem:[#allocation38_spill] sm:$0xff] %v10775_v46  ;;  %v4046_v26 = vadd.f32 %v4045_v18, %v4044_v22  ;;  %v4743_v31 = vrot.slane %v10775_v46, 5  ;;  %v3782_v37 = vmul.f32 %v13727_v2, %v13631_v8  ;;  %v4740_v6 = vsel %vm432_vm2, %v4739_v20, %v10766_v11 }
 0x743   :  { %13728 = vst [vmem:[#allocation51_spill] sm:$0xff] %v10780_v34  ;;  %13729 = vst [vmem:[#allocation49_spill] sm:$0xff] %v10785_v54  ;;  %v4039_v30 = vadd.f32 %v4038_v28, %v4037_v40  ;;  %v4745_v51 = vrot.slane %v10780_v34, 4  ;;  %v3784_v48 = vmul.f32 %v13727_v2, %v13632_v60  ;;  %v4742_v22 = vsel %vm434_vm3, %v4741_v47, %v4740_v6  ;;  %v13731_v6 = vld [vmem:[#allocation45_spill] sm:$0xff] }
 0x744   :  { %v4047_v63 = vrot.slane %v4046_v26, 2  ;;  %v4747_v35 = vrot.slane %v10785_v54, 3  ;;  %v3786_v19 = vmul.f32 %v13727_v2, %v13633_v59  ;;  %v4744_v14 = vsel %vm436_vm4, %v4743_v31, %v4742_v22 }
 0x745   :  { %v4040_v56 = vrot.slane %v4039_v30, 1  ;;  %v3788_v5 = vmul.f32 %v13727_v2, %v13634_v0  ;;  %v4430_v24 = vsel %vm1210_vm0, %v3780_v3, 0.0  ;;  %v4746_v40 = vsel %vm438_vm5, %v4745_v51, %v4744_v14 }
 0x746   :  { %v4048_v32 = vadd.f32 %v4047_v63, %v4046_v26  ;;  %v4431_v18 = vadd.f32 %v4430_v24, %v13730_v15  ;;  %v4439_v28 = vsel %vm1210_vm0, %v3782_v37, 0.0  ;;  %v4748_v47 = vsel %vm440_vm6, %v4747_v35, %v4746_v40  ;;  %v13734_v63 = vld [vmem:[#allocation13_spill] sm:$0xff]  ;;  %v13735_v37 = vld [vmem:[#allocation12_spill] sm:$0xff] }
 0x747   :  { %v4041_v20 = vadd.f32 %v4040_v56, %v4039_v30  ;;  %v4440_v10 = vadd.f32 %v4439_v28, %v13731_v6  ;;  %v4448_v12 = vsel %vm1210_vm0, %v3784_v48, 0.0  ;;  %v4457_v3 = vsel %vm1210_vm0, %v3786_v19, 0.0  ;;  %v13737_v6 = vld [vmem:[#allocation25_spill] sm:$0xff] }
 0x748   :  { %v4049_v31 = vrot.slane %v4048_v32, 1  ;;  %v4432_v22 = vrot.slane %v4431_v18, 4  ;;  %v4449_v23 = vadd.f32 %v4448_v12, %v13732_v42  ;;  %v4458_v14 = vadd.f32 %v4457_v3, %v13734_v63  ;;  %v13738_v3 = vld [vmem:[#allocation74_spill] sm:$0xff] }
 0x749   :  { %v10812_v26 = vadd.f32 %v10527_v44, %v4041_v20  ;;  %v4441_v51 = vrot.slane %v4440_v10, 4  ;;  %v4465_v30 = vsel %vm346_vm1, %v13735_v37, 0.0  ;;  %v4466_v48 = vsel %vm1210_vm0, %v3788_v5, 0.0 }
 0x74a   :  { %v4050_v35 = vadd.f32 %v4049_v31, %v4048_v32  ;;  %v4433_v56 = vadd.f32 %v4432_v22, %v4431_v18  ;;  %v4450_v24 = vrot.slane %v4449_v23, 4  ;;  %v4459_v42 = vrot.slane %v4458_v14, 4 }
 0x74b   :  { %13733 = vst [vmem:[#allocation29_spill] sm:$0xff] %v10812_v26  ;;  %v4749_v40 = vrot.slane %v10812_v26, 2  ;;  %v4442_v15 = vadd.f32 %v4441_v51, %v4440_v10  ;;  %v4467_v12 = vadd.f32 %v4466_v48, %v4465_v30  ;;  %v4476_v63 = vadd.f32 %v13738_v3, %v13737_v6 }
 0x74c   :  { %v10820_v19 = vadd.f32 %v10532_v4, %v4050_v35  ;;  %v4434_v28 = vrot.slane %v4433_v56, 2  ;;  %v4451_v20 = vadd.f32 %v4450_v24, %v4449_v23  ;;  %v4460_v18 = vadd.f32 %v4459_v42, %v4458_v14  ;;  %v13739_v35 = vld [vmem:[#allocation72_spill] sm:$0xff] }
 0x74d   :  { %v4750_v37 = vsel %vm442_vm7, %v4749_v40, %v4748_v47  ;;  %v4443_v32 = vrot.slane %v4442_v15, 2  ;;  %v4468_v31 = vrot.slane %v4467_v12, 4  ;;  %v4477_v10 = vrot.slane %v4476_v63, 4 }
 0x74e   :  { %13736 = vst [vmem:[#allocation79_spill] sm:$0xff] %v10820_v19  ;;  %v4751_v5 = vrot.slane %v10820_v19, 1  ;;  %v4435_v22 = vadd.f32 %v4434_v28, %v4433_v56  ;;  %v4452_v26 = vrot.slane %v4451_v20, 2  ;;  %v4461_v30 = vrot.slane %v4460_v18, 2 }
 0x74f   :  { %v4444_v51 = vadd.f32 %v4443_v32, %v4442_v15  ;;  %v4469_v48 = vadd.f32 %v4468_v31, %v4467_v12  ;;  %v4483_v54 = vsel %vm346_vm1, %v13739_v35, 0.0  ;;  %v4478_v3 = vadd.f32 %v4477_v10, %v4476_v63  ;;  %v13740_v15 = vld [vmem:[#allocation60_spill] sm:$0xff]  ;;  %v13742_v63 = vld [vmem:[#allocation78_spill] sm:$0xff] }
 0x750   :  { %v4752_v23 = vsel %vm444_vm8, %v4751_v5, %v4750_v37  ;;  %v4436_v24 = vrot.slane %v4435_v22, 1  ;;  %v4453_v6 = vadd.f32 %v4452_v26, %v4451_v20  ;;  %v4462_v40 = vadd.f32 %v4461_v30, %v4460_v18  ;;  %v13741_v26 = vld [vmem:[#allocation83_spill] sm:$0xff] }
 0x751   :  { %v4863_v47 = vsel %vm346_vm1, %v4752_v23, 0.0  ;;  %v4445_v14 = vrot.slane %v4444_v51, 1  ;;  %v4470_v42 = vrot.slane %v4469_v48, 2  ;;  %v4479_v19 = vrot.slane %v4478_v3, 2 }
 0x752   :  { %4864 = vadd.xlane.f32.xlu0 %v4863_v47  ;;  %v4437_v56 = vadd.f32 %v4436_v24, %v4435_v22  ;;  %v4454_v28 = vrot.slane %v4453_v6, 1  ;;  %v4484_v12 = vsel %vm1210_vm0, %v13740_v15, 0.0  ;;  %v4463_v31 = vrot.slane %v4462_v40, 1 }
 0x753   :  { %v4446_v32 = vadd.f32 %v4445_v14, %v4444_v51  ;;  %v4471_v35 = vadd.f32 %v4470_v42, %v4469_v48  ;;  %v4485_v11 = vadd.f32 %v4484_v12, %v4483_v54  ;;  %v4480_v5 = vadd.f32 %v4479_v19, %v4478_v3 }
 0x754   :  { %v4455_v37 = vadd.f32 %v4454_v28, %v4453_v6  ;;  %v4492_v20 = vsel %vm346_vm1, %v13741_v26, 0.0  ;;  %v4493_v18 = vsel %vm1210_vm0, %v13742_v63, 0.0  ;;  %v4464_v10 = vadd.f32 %v4463_v31, %v4462_v40 }
 0x755   :  { %v4472_v30 = vrot.slane %v4471_v35, 1  ;;  %v4486_v22 = vrot.slane %v4485_v11, 4  ;;  %v4494_v23 = vadd.f32 %v4493_v18, %v4492_v20  ;;  %v4481_v24 = vrot.slane %v4480_v5, 1 }
 0x756   :  { %v10837_v47 = vadd.f32 %v10506_v43, %v4437_v56  ;;  %v10840_v51 = vadd.f32 %v10512_v39, %v4446_v32  ;;  %v10843_v54 = vadd.f32 %v10515_v49, %v4455_v37  ;;  %v10846_v3 = vadd.f32 %v10518_v38, %v4464_v10  ;;  %v13747_v56 = vld [vmem:[#allocation48_spill] sm:$0xff] }
 0x757   :  { %v4473_v19 = vadd.f32 %v4472_v30, %v4471_v35  ;;  %v4487_v48 = vadd.f32 %v4486_v22, %v4485_v11  ;;  %v4495_v6 = vrot.slane %v4494_v23, 4  ;;  %v4482_v14 = vadd.f32 %v4481_v24, %v4480_v5 }
 0x758   :  { %13743 = vst [vmem:[#allocation73_spill] sm:$0xff] %v10837_v47  ;;  %13744 = vst [vmem:[#allocation21_spill] sm:$0xff] %v10840_v51  ;;  %v4819_v40 = vrot.slane %v10840_v51, 7  ;;  %v4821_v42 = vrot.slane %v10843_v54, 6  ;;  %v3700_v28 = vmul.f32 %v13747_v56, %v13630_v13  ;;  %v4823_v31 = vrot.slane %v10846_v3, 5 }
 0x759   :  { %13745 = vst [vmem:[#allocation46_spill] sm:$0xff] %v10843_v54  ;;  %13746 = vst [vmem:[#allocation45_spill] sm:$0xff] %v10846_v3  ;;  %v4488_v15 = vrot.slane %v4487_v48, 2  ;;  %v4496_v12 = vadd.f32 %v4495_v6, %v4494_v23  ;;  %v10853_v32 = vadd.f32 %v10521_v50, %v4473_v19  ;;  %v10857_v11 = vadd.f32 %v10524_v62, %v4482_v14  ;;  %v13752_v3 = vld [vmem:[#allocation19_spill] sm:$0xff] }
 0x75a   :  { %v4820_v35 = vsel %vm432_vm2, %v4819_v40, %v10837_v47  ;;  %v3702_v37 = vmul.f32 %v13747_v56, %v13631_v8  ;;  %v3704_v5 = vmul.f32 %v13747_v56, %v13632_v60  ;;  %v3706_v22 = vmul.f32 %v13747_v56, %v13633_v59  ;;  %v13750_v40 = vld [vmem:[#allocation64_spill] sm:$0xff] }
 0x75b   :  { %13748 = vst [vmem:[#allocation22_spill] sm:$0xff] %v10853_v32  ;;  %13749 = vst [vmem:[#allocation13_spill] sm:$0xff] %v10857_v11  ;;  %v4489_v26 = vadd.f32 %v4488_v15, %v4487_v48  ;;  %v4497_v20 = vrot.slane %v4496_v12, 2  ;;  %v4822_v63 = vsel %vm434_vm3, %v4821_v42, %v4820_v35  ;;  %v4825_v18 = vrot.slane %v10853_v32, 4 }
 0x75c   :  { %v4824_v10 = vsel %vm436_vm4, %v4823_v31, %v4822_v63  ;;  %v4827_v30 = vrot.slane %v10857_v11, 3  ;;  %v3708_v23 = vmul.f32 %v13747_v56, %v13634_v0  ;;  %v4070_v48 = vsel %vm1210_vm0, %v3700_v28, 0.0  ;;  %v13751_v11 = vld [vmem:[#allocation17_spill] sm:$0xff] }
 0x75d   :  { %v4490_v24 = vrot.slane %v4489_v26, 1  ;;  %v4498_v19 = vadd.f32 %v4497_v20, %v4496_v12  ;;  %v4826_v6 = vsel %vm438_vm5, %v4825_v18, %v4824_v10  ;;  %v4071_v42 = vadd.f32 %v4070_v48, %v13750_v40  ;;  %v13753_v28 = vld [vmem:[#allocation37_spill] sm:$0xff]  ;;  %v13754_v18 = vld [vmem:[#allocation34_spill] sm:$0xff] }
 0x75e   :  { %v4828_v14 = vsel %vm440_vm6, %v4827_v30, %v4826_v6  ;;  %v4079_v15 = vsel %vm1210_vm0, %v3702_v37, 0.0  ;;  %v4088_v31 = vsel %vm1210_vm0, %v3704_v5, 0.0  ;;  %v4097_v12 = vsel %vm1210_vm0, %v3706_v22, 0.0 }
 0x75f   :  { %v4491_v35 = vadd.f32 %v4490_v24, %v4489_v26  ;;  %v4499_v63 = vrot.slane %v4498_v19, 1  ;;  %v4080_v32 = vadd.f32 %v4079_v15, %v13751_v11  ;;  %v4089_v54 = vadd.f32 %v4088_v31, %v13752_v3  ;;  %v13756_v24 = vld [vmem:[#allocation18_spill] sm:$0xff]  ;;  %v13757_v11 = vld [vmem:[#allocation65_spill] sm:$0xff] }
 0x760   :  { %v4072_v51 = vrot.slane %v4071_v42, 4  ;;  %v4106_v20 = vsel %vm1210_vm0, %v3708_v23, 0.0  ;;  %v4116_v10 = vadd.f32 %v13754_v18, %v13753_v28  ;;  %v4098_v48 = vadd.f32 %v4097_v12, %v13756_v24 }
 0x761   :  { %v4500_v30 = vadd.f32 %v4499_v63, %v4498_v19  ;;  %v10886_v6 = vadd.f32 %v10527_v44, %v4491_v35  ;;  %v4081_v37 = vrot.slane %v4080_v32, 4  ;;  %v4090_v5 = vrot.slane %v4089_v54, 4 }
 0x762   :  { %v4073_v26 = vadd.f32 %v4072_v51, %v4071_v42  ;;  %v4107_v40 = vadd.f32 %v4106_v20, %v13757_v11  ;;  %v4117_v3 = vrot.slane %v4116_v10, 4  ;;  %v4099_v19 = vrot.slane %v4098_v48, 4 }
 0x763   :  { %13755 = vst [vmem:[#allocation12_spill] sm:$0xff] %v10886_v6  ;;  %v10891_v15 = vadd.f32 %v10532_v4, %v4500_v30  ;;  %v4829_v22 = vrot.slane %v10886_v6, 2  ;;  %v4082_v23 = vadd.f32 %v4081_v37, %v4080_v32  ;;  %v4091_v31 = vadd.f32 %v4090_v5, %v4089_v54  ;;  %v13759_v32 = vld [vmem:[#allocation53_spill] sm:$0xff] }
 0x764   :  { %v4074_v28 = vrot.slane %v4073_v26, 2  ;;  %v4108_v63 = vrot.slane %v4107_v40, 4  ;;  %v4118_v35 = vadd.f32 %v4117_v3, %v4116_v10  ;;  %v4100_v20 = vadd.f32 %v4099_v19, %v4098_v48 }
 0x765   :  { %13758 = vst [vmem:[#allocation25_spill] sm:$0xff] %v10891_v15  ;;  %v4830_v18 = vsel %vm442_vm7, %v4829_v22, %v4828_v14  ;;  %v4831_v51 = vrot.slane %v10891_v15, 1  ;;  %v4083_v42 = vrot.slane %v4082_v23, 2  ;;  %v4092_v12 = vrot.slane %v4091_v31, 2 }
 0x766   :  { %v4075_v24 = vadd.f32 %v4074_v28, %v4073_v26  ;;  %v4109_v11 = vadd.f32 %v4108_v63, %v4107_v40  ;;  %v4119_v47 = vrot.slane %v4118_v35, 2  ;;  %v4123_v54 = vsel %vm346_vm1, %v13759_v32, 0.0  ;;  %v13760_v26 = vld [vmem:[#allocation31_spill] sm:$0xff] }
 0x767   :  { %v4832_v30 = vsel %vm444_vm8, %v4831_v51, %v4830_v18  ;;  %v4084_v34 = vadd.f32 %v4083_v42, %v4082_v23  ;;  %v4093_v6 = vadd.f32 %v4092_v12, %v4091_v31  ;;  %v4101_v5 = vrot.slane %v4100_v20, 2  ;;  %v13761_v51 = vld [vmem:[#allocation80_spill] sm:$0xff] }
 0x768   :  { %v4893_v37 = vsel %vm346_vm1, %v4832_v30, 0.0  ;;  %v4076_v10 = vrot.slane %v4075_v24, 1  ;;  %v4110_v14 = vrot.slane %v4109_v11, 2  ;;  %v4120_v15 = vadd.f32 %v4119_v47, %v4118_v35 }
 0x769   :  { %4894 = vadd.xlane.f32.xlu1 %v4893_v37  ;;  %v4085_v3 = vrot.slane %v4084_v34, 1  ;;  %v4094_v22 = vrot.slane %v4093_v6, 1  ;;  %v4124_v48 = vsel %vm1210_vm0, %v13760_v26, 0.0  ;;  %v4102_v28 = vadd.f32 %v4101_v5, %v4100_v20  ;;  %v13762_v37 = vld [vmem:[#allocation75_spill] sm:$0xff] }
 0x76a   :  { %v4077_v40 = vadd.f32 %v4076_v10, %v4075_v24  ;;  %v4111_v19 = vadd.f32 %v4110_v14, %v4109_v11  ;;  %v4125_v23 = vadd.f32 %v4124_v48, %v4123_v54  ;;  %v4121_v18 = vrot.slane %v4120_v15, 1 }
 0x76b   :  { %v4086_v31 = vadd.f32 %v4085_v3, %v4084_v34  ;;  %v4095_v63 = vadd.f32 %v4094_v22, %v4093_v6  ;;  %v4132_v42 = vsel %vm346_vm1, %v13761_v51, 0.0  ;;  %v4103_v12 = vrot.slane %v4102_v28, 1 }
 0x76c   :  { %v4112_v30 = vrot.slane %v4111_v19, 1  ;;  %v4126_v32 = vrot.slane %v4125_v23, 4  ;;  %v4133_v46 = vsel %vm1210_vm0, %v13762_v37, 0.0  ;;  %v4122_v47 = vadd.f32 %v4121_v18, %v4120_v15 }
 0x76d   :  { %v4134_v35 = vadd.f32 %v4133_v46, %v4132_v42  ;;  %v10907_v26 = vadd.f32 %v10506_v43, %v4077_v40  ;;  %v10910_v24 = vadd.f32 %v10512_v39, %v4086_v31  ;;  %v4104_v34 = vadd.f32 %v4103_v12, %v4102_v28  ;;  %v13766_v46 = vld [vmem:[#allocation47_spill] sm:$0xff] }
 0x76e   :  { %v4113_v6 = vadd.f32 %v4112_v30, %v4111_v19  ;;  %v4127_v20 = vadd.f32 %v4126_v32, %v4125_v23  ;;  %v10913_v11 = vadd.f32 %v10515_v49, %v4095_v63  ;;  %v10916_v10 = vadd.f32 %v10524_v62, %v4122_v47 }
 0x76f   :  { %13763 = vst [vmem:[#allocation74_spill] sm:$0xff] %v10907_v26  ;;  %v4135_v54 = vrot.slane %v4134_v35, 4  ;;  %v4755_v5 = vrot.slane %v10910_v24, 7  ;;  %v3720_v15 = vmul.f32 %v13766_v46, %v13630_v13  ;;  %v10922_v3 = vadd.f32 %v10518_v38, %v4104_v34 }
 0x770   :  { %13764 = vst [vmem:[#allocation72_spill] sm:$0xff] %v10913_v11  ;;  %13765 = vst [vmem:[#allocation60_spill] sm:$0xff] %v10916_v10  ;;  %v4128_v14 = vrot.slane %v4127_v20, 2  ;;  %v10925_v22 = vadd.f32 %v10521_v50, %v4113_v6  ;;  %v4757_v48 = vrot.slane %v10913_v11, 6  ;;  %v4763_v19 = vrot.slane %v10916_v10, 3 }
 0x771   :  { %13767 = vst [vmem:[#allocation83_spill] sm:$0xff] %v10922_v3  ;;  %v4136_v40 = vadd.f32 %v4135_v54, %v4134_v35  ;;  %v4756_v28 = vsel %vm432_vm2, %v4755_v5, %v10907_v26  ;;  %v3722_v23 = vmul.f32 %v13766_v46, %v13631_v8  ;;  %v4759_v18 = vrot.slane %v10922_v3, 5  ;;  %v13769_v54 = vld [vmem:[#allocation66_spill] sm:$0xff] }
 0x772   :  { %13768 = vst [vmem:[#allocation78_spill] sm:$0xff] %v10925_v22  ;;  %v4129_v31 = vadd.f32 %v4128_v14, %v4127_v20  ;;  %v4758_v63 = vsel %vm434_vm3, %v4757_v48, %v4756_v28  ;;  %v4761_v51 = vrot.slane %v10925_v22, 4  ;;  %v3724_v12 = vmul.f32 %v13766_v46, %v13632_v60  ;;  %v13770_v14 = vld [vmem:[#allocation67_spill] sm:$0xff] }
 0x773   :  { %v4137_v42 = vrot.slane %v4136_v40, 2  ;;  %v3726_v30 = vmul.f32 %v13766_v46, %v13633_v59  ;;  %v3728_v32 = vmul.f32 %v13766_v46, %v13634_v0  ;;  %v4760_v47 = vsel %vm436_vm4, %v4759_v18, %v4758_v63 }
 0x774   :  { %v4130_v37 = vrot.slane %v4129_v31, 1  ;;  %v4160_v35 = vsel %vm1210_vm0, %v3720_v15, 0.0  ;;  %v4169_v34 = vsel %vm1210_vm0, %v3722_v23, 0.0  ;;  %v4762_v20 = vsel %vm438_vm5, %v4761_v51, %v4760_v47  ;;  %v13771_v15 = vld [vmem:[#allocation68_spill] sm:$0xff]  ;;  %v13773_v23 = vld [vmem:[#allocation69_spill] sm:$0xff]  ;;  %v13774_v47 = vld [vmem:[#allocation27_spill] sm:$0xff] }
 0x775   :  { %v4138_v6 = vadd.f32 %v4137_v42, %v4136_v40  ;;  %v4161_v5 = vadd.f32 %v4160_v35, %v13769_v54  ;;  %v4170_v48 = vadd.f32 %v4169_v34, %v13770_v14  ;;  %v4764_v1 = vsel %vm440_vm6, %v4763_v19, %v4762_v20  ;;  %v13776_v54 = vld [vmem:[#allocation70_spill] sm:$0xff] }
 0x776   :  { %v4131_v28 = vadd.f32 %v4130_v37, %v4129_v31  ;;  %v4178_v7 = vsel %vm1210_vm0, %v3724_v12, 0.0  ;;  %v4187_v10 = vsel %vm1210_vm0, %v3726_v30, 0.0  ;;  %v4196_v42 = vsel %vm1210_vm0, %v3728_v32, 0.0  ;;  %v13775_v31 = vld [vmem:[#allocation33_spill] sm:$0xff] }
 0x777   :  { %v4139_v26 = vrot.slane %v4138_v6, 1  ;;  %v4162_v63 = vrot.slane %v4161_v5, 4  ;;  %v4171_v18 = vrot.slane %v4170_v48, 4  ;;  %v4179_v22 = vadd.f32 %v4178_v7, %v13771_v15 }
 0x778   :  { %v10953_v40 = vadd.f32 %v10527_v44, %v4131_v28  ;;  %v4188_v51 = vadd.f32 %v4187_v10, %v13773_v23  ;;  %v4206_v37 = vadd.f32 %v13775_v31, %v13774_v47  ;;  %v4197_v14 = vadd.f32 %v4196_v42, %v13776_v54  ;;  %v13778_v54 = vld [vmem:[#allocation57_spill] sm:$0xff] }
 0x779   :  { %v4140_v19 = vadd.f32 %v4139_v26, %v4138_v6  ;;  %v4163_v35 = vadd.f32 %v4162_v63, %v4161_v5  ;;  %v4172_v12 = vadd.f32 %v4171_v18, %v4170_v48  ;;  %v4180_v34 = vrot.slane %v4179_v22, 4 }
 0x77a   :  { %13772 = vst [vmem:[#allocation48_spill] sm:$0xff] %v10953_v40  ;;  %v4765_v30 = vrot.slane %v10953_v40, 2  ;;  %v4189_v20 = vrot.slane %v4188_v51, 4  ;;  %v4207_v7 = vrot.slane %v4206_v37, 4  ;;  %v4198_v47 = vrot.slane %v4197_v14, 4 }
 0x77b   :  { %v10962_v28 = vadd.f32 %v10532_v4, %v4140_v19  ;;  %v4164_v15 = vrot.slane %v4163_v35, 2  ;;  %v4173_v10 = vrot.slane %v4172_v12, 2  ;;  %v4181_v23 = vadd.f32 %v4180_v34, %v4179_v22 }
 0x77c   :  { %v4766_v32 = vsel %vm442_vm7, %v4765_v30, %v4764_v1  ;;  %v4190_v3 = vadd.f32 %v4189_v20, %v4188_v51  ;;  %v4208_v26 = vadd.f32 %v4207_v7, %v4206_v37  ;;  %v4199_v31 = vadd.f32 %v4198_v47, %v4197_v14  ;;  %v13779_v7 = vld [vmem:[#allocation42_spill] sm:$0xff] }
 0x77d   :  { %13777 = vst [vmem:[#allocation64_spill] sm:$0xff] %v10962_v28  ;;  %v4767_v6 = vrot.slane %v10962_v28, 1  ;;  %v4165_v5 = vadd.f32 %v4164_v15, %v4163_v35  ;;  %v4174_v48 = vadd.f32 %v4173_v10, %v4172_v12  ;;  %v4182_v63 = vrot.slane %v4181_v23, 2 }
 0x77e   :  { %v4191_v18 = vrot.slane %v4190_v3, 2  ;;  %v4209_v42 = vrot.slane %v4208_v26, 2  ;;  %v4213_v19 = vsel %vm346_vm1, %v13778_v54, 0.0  ;;  %v4200_v37 = vrot.slane %v4199_v31, 2 }
 0x77f   :  { %v4768_v40 = vsel %vm444_vm8, %v4767_v6, %v4766_v32  ;;  %v4166_v11 = vrot.slane %v4165_v5, 1  ;;  %v4175_v22 = vrot.slane %v4174_v48, 1  ;;  %v4183_v34 = vadd.f32 %v4182_v63, %v4181_v23  ;;  %v13780_v6 = vld [vmem:[#allocation81_spill] sm:$0xff]  ;;  %v13781_v63 = vld [vmem:[#allocation76_spill] sm:$0xff] }
 0x780   :  { %v4869_v1 = vsel %vm346_vm1, %v4768_v40, 0.0  ;;  %v4192_v51 = vadd.f32 %v4191_v18, %v4190_v3  ;;  %v4210_v30 = vadd.f32 %v4209_v42, %v4208_v26  ;;  %v4214_v14 = vsel %vm1210_vm0, %v13779_v7, 0.0 }
 0x781   :  { %4870 = vadd.xlane.f32.xlu0 %v4869_v1  ;;  %v4167_v35 = vadd.f32 %v4166_v11, %v4165_v5  ;;  %v4176_v12 = vadd.f32 %v4175_v22, %v4174_v48  ;;  %v4184_v20 = vrot.slane %v4183_v34, 1  ;;  %v4201_v10 = vadd.f32 %v4200_v37, %v4199_v31  ;;  %v10979_v11 = vpop.permute.xlu0 %3466  ;;  %v13785_v22 = vld [vmem:[#allocation92_spill] sm:$0xff] }
 0x782   :  { %v4193_v15 = vrot.slane %v4192_v51, 1  ;;  %v4211_v47 = vrot.slane %v4210_v30, 1  ;;  %v4215_v54 = vadd.f32 %v4214_v14, %v4213_v19  ;;  %v4222_v23 = vsel %vm346_vm1, %v13780_v6, 0.0  ;;  %v13789_v14 = vld [vmem:[#allocation15_spill] sm:$0xff] }
 0x783   :  { %v4185_v32 = vadd.f32 %v4184_v20, %v4183_v34  ;;  %v4223_v3 = vsel %vm1210_vm0, %v13781_v63, 0.0  ;;  %v10977_v40 = vadd.f32 %v10506_v43, %v4167_v35  ;;  %v4202_v5 = vrot.slane %v4201_v10, 1  ;;  %v13786_v34 = vld [vmem:[#allocation50_spill] sm:$0xff] }
 0x784   :  { %v4194_v26 = vadd.f32 %v4193_v15, %v4192_v51  ;;  %v4212_v48 = vadd.f32 %v4211_v47, %v4210_v30  ;;  %v4216_v18 = vrot.slane %v4215_v54, 4  ;;  %v4224_v42 = vadd.f32 %v4223_v3, %v4222_v23 }
 0x785   :  { %13782 = vst [vmem:[#allocation17_spill] sm:$0xff] %v10977_v40  ;;  %v10982_v31 = vadd.f32 %v10512_v39, %v4176_v12  ;;  %v10985_v19 = vadd.f32 %v10515_v49, %v4185_v32  ;;  %v3675_v1 = vmul.f32 %v13786_v34, %v13785_v22  ;;  %v4203_v37 = vadd.f32 %v4202_v5, %v4201_v10 }
 0x786   :  { %v4217_v20 = vadd.f32 %v4216_v18, %v4215_v54  ;;  %v10990_v35 = vadd.f32 %v10518_v38, %v4194_v26  ;;  %v10993_v51 = vadd.f32 %v10524_v62, %v4212_v48  ;;  %v4225_v30 = vrot.slane %v4224_v42, 4 }
 0x787   :  { %13783 = vst [vmem:[#allocation19_spill] sm:$0xff] %v10982_v31  ;;  %13784 = vst [vmem:[#allocation37_spill] sm:$0xff] %v10985_v19  ;;  %v4771_v7 = vrot.slane %v10982_v31, 7  ;;  %v4773_v12 = vrot.slane %v10985_v19, 6  ;;  %v3676_v15 = vmul.f32 %v13789_v14, %v10979_v11  ;;  %v11000_v32 = vadd.f32 %v10521_v50, %v4203_v37  ;;  %v13791_v14 = vld [vmem:[#allocation85_spill] sm:$0xff]  ;;  %v13796_v19 = vld [vmem:[#allocation24_spill] sm:$0xff] }
 0x788   :  { %13787 = vst [vmem:[#allocation34_spill] sm:$0xff] %v10990_v35  ;;  %13788 = vst [vmem:[#allocation18_spill] sm:$0xff] %v10993_v51  ;;  %v4218_v47 = vrot.slane %v4217_v20, 2  ;;  %v4775_v10 = vrot.slane %v10990_v35, 5  ;;  %v4779_v54 = vrot.slane %v10993_v51, 3  ;;  %v4226_v6 = vadd.f32 %v4225_v30, %v4224_v42  ;;  %v13792_v42 = vld [vmem:[#allocation94_spill] sm:$0xff] }
 0x789   :  { %13790 = vst [vmem:[#allocation65_spill] sm:$0xff] %v11000_v32  ;;  %v4772_v23 = vsel %vm432_vm2, %v4771_v7, %v10977_v40  ;;  %v3961_v63 = vsel %vm346_vm1, %v3675_v1, 0.0  ;;  %v3962_v3 = vsel %vm1210_vm0, %v3676_v15, 0.0  ;;  %v4777_v48 = vrot.slane %v11000_v32, 4 }
 0x78a   :  { %v4219_v26 = vadd.f32 %v4218_v47, %v4217_v20  ;;  %v4774_v5 = vsel %vm434_vm3, %v4773_v12, %v4772_v23  ;;  %v3963_v18 = vadd.f32 %v3962_v3, %v3961_v63  ;;  %v4227_v34 = vrot.slane %v4226_v6, 2  ;;  %v13793_v47 = vld [vmem:[#allocation28_spill] sm:$0xff]  ;;  %v13794_v23 = vld [vmem:[#allocation43_spill] sm:$0xff] }
 0x78b   :  { %v4776_v37 = vsel %vm436_vm4, %v4775_v10, %v4774_v5  ;;  %v3970_v51 = vsel %vm346_vm1, %v13791_v14, 0.0  ;;  %v3971_v30 = vsel %vm1210_vm0, %v13792_v42, 0.0  ;;  %v3759_v63 = vmul.f32 %v13794_v23, %v13793_v47  ;;  %v13795_v3 = vld [vmem:[#allocation36_spill] sm:$0xff] }
 0x78c   :  { %v4220_v7 = vrot.slane %v4219_v26, 1  ;;  %v4778_v1 = vsel %vm438_vm5, %v4777_v48, %v4776_v37  ;;  %v3964_v35 = vrot.slane %v3963_v18, 4  ;;  %v3972_v15 = vadd.f32 %v3971_v30, %v3970_v51  ;;  %v13797_v51 = vld [vmem:[#allocation26_spill] sm:$0xff]  ;;  %v13800_v30 = vld [vmem:[#allocation32_spill] sm:$0xff] }
 0x78d   :  { %v4228_v20 = vadd.f32 %v4227_v34, %v4226_v6  ;;  %v4780_v12 = vsel %vm440_vm6, %v4779_v54, %v4778_v1  ;;  %v3760_v10 = vmul.f32 %v13795_v3, %v13630_v13  ;;  %v3761_v42 = vmul.f32 %v13794_v23, %v13796_v19 }
 0x78e   :  { %v4221_v5 = vadd.f32 %v4220_v7, %v4219_v26  ;;  %v3965_v32 = vadd.f32 %v3964_v35, %v3963_v18  ;;  %v3973_v14 = vrot.slane %v3972_v15, 4  ;;  %v3762_v48 = vmul.f32 %v13795_v3, %v13631_v8  ;;  %v13799_v35 = vld [vmem:[#allocation30_spill] sm:$0xff] }
 0x78f   :  { %v4229_v31 = vrot.slane %v4228_v20, 1  ;;  %v3763_v6 = vmul.f32 %v13794_v23, %v13797_v51  ;;  %v3764_v54 = vmul.f32 %v13795_v3, %v13632_v60  ;;  %v3765_v18 = vmul.f32 %v13794_v23, %v13799_v35 }
 0x790   :  { %v11030_v34 = vadd.f32 %v10527_v44, %v4221_v5  ;;  %v3966_v13 = vrot.slane %v3965_v32, 2  ;;  %v3974_v26 = vadd.f32 %v3973_v14, %v3972_v15  ;;  %v3766_v19 = vmul.f32 %v13795_v3, %v13633_v59 }
 0x791   :  { %v4230_v37 = vadd.f32 %v4229_v31, %v4228_v20  ;;  %v3767_v8 = vmul.f32 %v13794_v23, %v13800_v30  ;;  %v3768_v7 = vmul.f32 %v13795_v3, %v13634_v0  ;;  %v4339_v5 = vsel %vm346_vm1, %v3759_v63, 0.0 }
 0x792   :  { %13798 = vst [vmem:[#allocation53_spill] sm:$0xff] %v11030_v34  ;;  %v4781_v60 = vrot.slane %v11030_v34, 2  ;;  %v3967_v1 = vadd.f32 %v3966_v13, %v3965_v32  ;;  %v3975_v47 = vrot.slane %v3974_v26, 2  ;;  %v4340_v31 = vsel %vm1210_vm0, %v3760_v10, 0.0 }
 0x793   :  { %v11043_v15 = vadd.f32 %v10532_v4, %v4230_v37  ;;  %v4348_v20 = vsel %vm346_vm1, %v3761_v42, 0.0  ;;  %v4349_v59 = vsel %vm1210_vm0, %v3762_v48, 0.0  ;;  %v4341_v0 = vadd.f32 %v4340_v31, %v4339_v5 }
 0x794   :  { %v4782_v14 = vsel %vm442_vm7, %v4781_v60, %v4780_v12  ;;  %v3968_v51 = vrot.slane %v3967_v1, 1  ;;  %v3976_v35 = vadd.f32 %v3975_v47, %v3974_v26  ;;  %v4350_v32 = vadd.f32 %v4349_v59, %v4348_v20 }
 0x795   :  { %13801 = vst [vmem:[#allocation31_spill] sm:$0xff] %v11043_v15  ;;  %v4783_v30 = vrot.slane %v11043_v15, 1  ;;  %v4357_v13 = vsel %vm346_vm1, %v3763_v6, 0.0  ;;  %v4358_v63 = vsel %vm1210_vm0, %v3764_v54, 0.0  ;;  %v4342_v40 = vrot.slane %v4341_v0, 4 }
 0x796   :  { %v3969_v37 = vadd.f32 %v3968_v51, %v3967_v1  ;;  %v3977_v34 = vrot.slane %v3976_v35, 1  ;;  %v4359_v10 = vadd.f32 %v4358_v63, %v4357_v13  ;;  %v4351_v28 = vrot.slane %v4350_v32, 4 }
 0x797   :  { %v4784_v42 = vsel %vm444_vm8, %v4783_v30, %v4782_v14  ;;  %v4366_v48 = vsel %vm346_vm1, %v3765_v18, 0.0  ;;  %v4367_v12 = vsel %vm1210_vm0, %v3766_v19, 0.0  ;;  %v4343_v6 = vadd.f32 %v4342_v40, %v4341_v0  ;;  %v13803_v19 = vld [vmem:[#allocation23_spill] sm:$0xff] }
 0x798   :  { %v4875_v26 = vsel %vm346_vm1, %v4784_v42, 0.0  ;;  %v3978_v60 = vadd.f32 %v3977_v34, %v3976_v35  ;;  %v11057_v47 = vadd.f32 %v10562_v16, %v3969_v37  ;;  %v4352_v54 = vadd.f32 %v4351_v28, %v4350_v32  ;;  %v13804_v14 = vld [vmem:[#allocation35_spill] sm:$0xff] }
 0x799   :  { %4876 = vadd.xlane.f32.xlu0 %v4875_v26  ;;  %v4360_v1 = vrot.slane %v4359_v10, 4  ;;  %v4368_v5 = vadd.f32 %v4367_v12, %v4366_v48  ;;  %v4375_v31 = vsel %vm346_vm1, %v3767_v8, 0.0  ;;  %v4344_v59 = vrot.slane %v4343_v6, 2  ;;  %v13805_v32 = vld [vmem:[#allocation71_spill] sm:$0xff] }
 0x79a   :  { %v11061_v20 = vadd.f32 %v10577_v61, %v3978_v60  ;;  %v4376_v18 = vsel %vm1210_vm0, %v3768_v7, 0.0  ;;  %v4386_v51 = vadd.f32 %v13804_v14, %v13803_v19  ;;  %v4353_v34 = vrot.slane %v4352_v54, 2  ;;  %v13806_v60 = vld [vmem:[#allocation41_spill] sm:$0xff] }
 0x79b   :  { %v4361_v35 = vadd.f32 %v4360_v1, %v4359_v10  ;;  %v4369_v30 = vrot.slane %v4368_v5, 4  ;;  %v4377_v13 = vadd.f32 %v4376_v18, %v4375_v31  ;;  %v4345_v28 = vadd.f32 %v4344_v59, %v4343_v6 }
 0x79c   :  { %13802 = vst [vmem:[#allocation80_spill] sm:$0xff] %v11061_v20  ;;  %v4737_v40 = vrot.slane %v11061_v20, 7  ;;  %v4387_v0 = vrot.slane %v4386_v51, 4  ;;  %v4393_v8 = vsel %vm346_vm1, %v13805_v32, 0.0  ;;  %v4354_v63 = vadd.f32 %v4353_v34, %v4352_v54  ;;  %v13807_v32 = vld [vmem:[#allocation82_spill] sm:$0xff] }
 0x79d   :  { %v4362_v37 = vrot.slane %v4361_v35, 2  ;;  %v4370_v42 = vadd.f32 %v4369_v30, %v4368_v5  ;;  %v4378_v48 = vrot.slane %v4377_v13, 4  ;;  %v4346_v12 = vrot.slane %v4345_v28, 1 }
 0x79e   :  { %v4738_v7 = vsel %vm432_vm2, %v4737_v40, %v11057_v47  ;;  %v4388_v26 = vadd.f32 %v4387_v0, %v4386_v51  ;;  %v4394_v10 = vsel %vm1210_vm0, %v13806_v60, 0.0  ;;  %v4355_v31 = vrot.slane %v4354_v63, 1  ;;  %v13808_v60 = vld [vmem:[#allocation77_spill] sm:$0xff] }
 0x79f   :  { %v4860_v1 = vsel %vm1210_vm0, %v4738_v7, 0.0  ;;  %v4363_v6 = vadd.f32 %v4362_v37, %v4361_v35  ;;  %v4371_v59 = vrot.slane %v4370_v42, 2  ;;  %v4347_v18 = vadd.f32 %v4346_v12, %v4345_v28 }
 0x7a0   :  { %4861 = vadd.xlane.f32.xlu1 %v4860_v1  ;;  %v4379_v19 = vadd.f32 %v4378_v48, %v4377_v13  ;;  %v4389_v54 = vrot.slane %v4388_v26, 2  ;;  %v4395_v14 = vadd.f32 %v4394_v10, %v4393_v8  ;;  %v4356_v5 = vadd.f32 %v4355_v31, %v4354_v63  ;;  %v13809_v10 = vld [vmem:[#allocation63_spill] sm:$0xff] }
 0x7a1   :  { %v4364_v34 = vrot.slane %v4363_v6, 1  ;;  %v4372_v30 = vadd.f32 %v4371_v59, %v4370_v42  ;;  %v4402_v40 = vsel %vm346_vm1, %v13807_v32, 0.0  ;;  %v4403_v7 = vsel %vm1210_vm0, %v13808_v60, 0.0 }
 0x7a2   :  { %v4380_v51 = vrot.slane %v4379_v19, 2  ;;  %v4390_v0 = vadd.f32 %v4389_v54, %v4388_v26  ;;  %v4396_v15 = vrot.slane %v4395_v14, 4  ;;  %v4404_v37 = vadd.f32 %v4403_v7, %v4402_v40  ;;  %v13810_v7 = vld [vmem:[#allocation87_spill] sm:$0xff] }
 0x7a3   :  { %v4365_v20 = vadd.f32 %v4364_v34, %v4363_v6  ;;  %v4373_v35 = vrot.slane %v4372_v30, 1  ;;  %v11079_v28 = vadd.f32 %v10506_v43, %v4347_v18  ;;  %v11082_v42 = vadd.f32 %v10512_v39, %v4356_v5 }
 0x7a4   :  { %v4381_v13 = vadd.f32 %v4380_v51, %v4379_v19  ;;  %v4391_v8 = vrot.slane %v4390_v0, 1  ;;  %v4397_v63 = vadd.f32 %v4396_v15, %v4395_v14  ;;  %v4405_v12 = vrot.slane %v4404_v37, 4 }
 0x7a5   :  { %v4374_v48 = vadd.f32 %v4373_v35, %v4372_v30  ;;  %v11085_v26 = vadd.f32 %v10515_v49, %v4365_v20  ;;  %v3715_v1 = vmul.f32 %v13809_v10, %v13785_v22  ;;  %v4803_v43 = vrot.slane %v11082_v42, 7 }
 0x7a6   :  { %v4382_v31 = vrot.slane %v4381_v13, 1  ;;  %v4392_v6 = vadd.f32 %v4391_v8, %v4390_v0  ;;  %v4398_v59 = vrot.slane %v4397_v63, 2  ;;  %v4406_v18 = vadd.f32 %v4405_v12, %v4404_v37  ;;  %v13811_v8 = vld [vmem:[#allocation96_spill] sm:$0xff] }
 0x7a7   :  { %v11091_v19 = vadd.f32 %v10518_v38, %v4374_v48  ;;  %v4805_v39 = vrot.slane %v11085_v26, 6  ;;  %v3716_v15 = vmul.f32 %v13747_v56, %v10979_v11  ;;  %v4804_v14 = vsel %vm432_vm2, %v4803_v43, %v11079_v28 }
 0x7a8   :  { %v4383_v54 = vadd.f32 %v4382_v31, %v4381_v13  ;;  %v4399_v49 = vadd.f32 %v4398_v59, %v4397_v63  ;;  %v11097_v20 = vadd.f32 %v10524_v62, %v4392_v6  ;;  %v4407_v5 = vrot.slane %v4406_v18, 2  ;;  %v13813_v31 = vld [vmem:[#allocation14_spill] sm:$0xff] }
 0x7a9   :  { %v4806_v34 = vsel %vm434_vm3, %v4805_v39, %v4804_v14  ;;  %v4807_v30 = vrot.slane %v11091_v19, 5  ;;  %v4141_v38 = vsel %vm346_vm1, %v3715_v1, 0.0  ;;  %v4142_v51 = vsel %vm1210_vm0, %v3716_v15, 0.0  ;;  %v13814_v39 = vld [vmem:[#allocation84_spill] sm:$0xff] }
 0x7aa   :  { %v4400_v32 = vrot.slane %v4399_v49, 1  ;;  %v11105_v40 = vadd.f32 %v10521_v50, %v4383_v54  ;;  %v4811_v56 = vrot.slane %v11097_v20, 3  ;;  %v4408_v62 = vadd.f32 %v4407_v5, %v4406_v18  ;;  %v13812_v50 = vld [vmem:[#allocation16_spill] sm:$0xff] }
 0x7ab   :  { %v4808_v0 = vsel %vm436_vm4, %v4807_v30, %v4806_v34  ;;  %v4143_v60 = vadd.f32 %v4142_v51, %v4141_v38  ;;  %v4150_v35 = vsel %vm346_vm1, %v13810_v7, 0.0  ;;  %v4151_v63 = vsel %vm1210_vm0, %v13811_v8, 0.0  ;;  %v13815_v38 = vld [vmem:[#allocation93_spill] sm:$0xff] }
 0x7ac   :  { %v4401_v37 = vadd.f32 %v4400_v32, %v4399_v49  ;;  %v4809_v13 = vrot.slane %v11105_v40, 4  ;;  %v3655_v48 = vmul.f32 %v13812_v50, %v13785_v22  ;;  %v4409_v12 = vrot.slane %v4408_v62, 1  ;;  %v13816_v32 = vld [vmem:[#allocation44_spill] sm:$0xff] }
 0x7ad   :  { %v4144_v10 = vrot.slane %v4143_v60, 4  ;;  %v4152_v1 = vadd.f32 %v4151_v63, %v4150_v35  ;;  %v3656_v6 = vmul.f32 %v13813_v31, %v10979_v11  ;;  %v3880_v15 = vsel %vm346_vm1, %v13814_v39, 0.0  ;;  %v13818_v31 = vld [vmem:[#allocation98_spill] sm:$0xff] }
 0x7ae   :  { %v11120_v59 = vadd.f32 %v10527_v44, %v4401_v37  ;;  %v4810_v43 = vsel %vm438_vm5, %v4809_v13, %v4808_v0  ;;  %v3871_v18 = vsel %vm346_vm1, %v3655_v48, 0.0  ;;  %v4410_v54 = vadd.f32 %v4409_v12, %v4408_v62 }
 0x7af   :  { %v4812_v49 = vsel %vm440_vm6, %v4811_v56, %v4810_v43  ;;  %v4145_v14 = vadd.f32 %v4144_v10, %v4143_v60  ;;  %v4153_v5 = vrot.slane %v4152_v1, 4  ;;  %v3872_v30 = vsel %vm1210_vm0, %v3656_v6, 0.0  ;;  %v13817_v10 = vld [vmem:[#allocation89_spill] sm:$0xff] }
 0x7b0   :  { %v4813_v34 = vrot.slane %v11120_v59, 2  ;;  %v3881_v44 = vsel %vm1210_vm0, %v13815_v38, 0.0  ;;  %v3755_v51 = vmul.f32 %v13816_v32, %v13785_v22  ;;  %v11134_v0 = vadd.f32 %v10532_v4, %v4410_v54  ;;  %v13819_v38 = vld [vmem:[#allocation52_spill] sm:$0xff] }
 0x7b1   :  { %v4146_v7 = vrot.slane %v4145_v14, 2  ;;  %v4154_v35 = vadd.f32 %v4153_v5, %v4152_v1  ;;  %v3873_v62 = vadd.f32 %v3872_v30, %v3871_v18  ;;  %v3882_v60 = vadd.f32 %v3881_v44, %v3880_v15 }
 0x7b2   :  { %v4814_v56 = vsel %vm442_vm7, %v4813_v34, %v4812_v49  ;;  %v3756_v37 = vmul.f32 %v10308_v55, %v10979_v11  ;;  %v4321_v13 = vsel %vm346_vm1, %v3755_v51, 0.0  ;;  %v4815_v8 = vrot.slane %v11134_v0, 1 }
 0x7b3   :  { %v4147_v63 = vadd.f32 %v4146_v7, %v4145_v14  ;;  %v4155_v50 = vrot.slane %v4154_v35, 2  ;;  %v3874_v48 = vrot.slane %v3873_v62, 4  ;;  %v3883_v12 = vrot.slane %v3882_v60, 4 }
 0x7b4   :  { %v4322_v4 = vsel %vm1210_vm0, %v3756_v37, 0.0  ;;  %v4330_v1 = vsel %vm346_vm1, %v13817_v10, 0.0  ;;  %v4331_v6 = vsel %vm1210_vm0, %v13818_v31, 0.0  ;;  %v4816_v43 = vsel %vm444_vm8, %v4815_v8, %v4814_v56  ;;  %v13820_v10 = vld [vmem:[#allocation86_spill] sm:$0xff] }
 0x7b5   :  { %v4148_v18 = vrot.slane %v4147_v63, 1  ;;  %v4156_v55 = vadd.f32 %v4155_v50, %v4154_v35  ;;  %v3875_v39 = vadd.f32 %v3874_v48, %v3873_v62  ;;  %v4887_v15 = vsel %vm346_vm1, %v4816_v43, 0.0  ;;  %v13821_v43 = vld [vmem:[#allocation95_spill] sm:$0xff] }
 0x7b6   :  { %v3884_v54 = vadd.f32 %v3883_v12, %v3882_v60  ;;  %v4323_v49 = vadd.f32 %v4322_v4, %v4321_v13  ;;  %v4332_v14 = vadd.f32 %v4331_v6, %v4330_v1  ;;  %4888 = vadd.xlane.f32.xlu0 %v4887_v15  ;;  %v3695_v44 = vmul.f32 %v13819_v38, %v13785_v22 }
 0x7b7   :  { %v4149_v5 = vadd.f32 %v4148_v18, %v4147_v63  ;;  %v4157_v34 = vrot.slane %v4156_v55, 1  ;;  %v3876_v30 = vrot.slane %v3875_v39, 2  ;;  %v3696_v56 = vmul.f32 %v10259_v17, %v10979_v11 }
 0x7b8   :  { %v3885_v32 = vrot.slane %v3884_v54, 2  ;;  %v4324_v51 = vrot.slane %v4323_v49, 4  ;;  %v4333_v7 = vrot.slane %v4332_v14, 4  ;;  %v4051_v37 = vsel %vm346_vm1, %v3695_v44, 0.0 }
 0x7b9   :  { %v4158_v35 = vadd.f32 %v4157_v34, %v4156_v55  ;;  %v11153_v62 = vadd.f32 %v10562_v16, %v4149_v5  ;;  %v3877_v60 = vadd.f32 %v3876_v30, %v3875_v39  ;;  %v4052_v50 = vsel %vm1210_vm0, %v3696_v56, 0.0  ;;  %v13822_v34 = vld [vmem:[#allocation20_spill] sm:$0xff] }
 0x7ba   :  { %v3886_v13 = vadd.f32 %v3885_v32, %v3884_v54  ;;  %v4325_v8 = vadd.f32 %v4324_v51, %v4323_v49  ;;  %v4334_v63 = vadd.f32 %v4333_v7, %v4332_v14  ;;  %v4053_v4 = vadd.f32 %v4052_v50, %v4051_v37 }
 0x7bb   :  { %v11158_v48 = vadd.f32 %v10577_v61, %v4158_v35  ;;  %v3878_v12 = vrot.slane %v3877_v60, 1  ;;  %v4060_v17 = vsel %vm346_vm1, %v13820_v10, 0.0  ;;  %v4061_v18 = vsel %vm1210_vm0, %v13821_v43, 0.0  ;;  %v13823_v10 = vld [vmem:[#allocation91_spill] sm:$0xff]  ;;  %v13824_v43 = vld [vmem:[#allocation100_spill] sm:$0xff] }
 0x7bc   :  { %v3887_v1 = vrot.slane %v3886_v13, 1  ;;  %v4326_v31 = vrot.slane %v4325_v8, 2  ;;  %v4335_v6 = vrot.slane %v4334_v63, 2  ;;  %v4054_v15 = vrot.slane %v4053_v4, 4 }
 0x7bd   :  { %v4769_v55 = vrot.slane %v11158_v48, 7  ;;  %v3879_v39 = vadd.f32 %v3878_v12, %v3877_v60  ;;  %v4062_v54 = vadd.f32 %v4061_v18, %v4060_v17  ;;  %v3795_v30 = vmul.f32 %v13822_v34, %v13785_v22 }
 0x7be   :  { %v3888_v49 = vadd.f32 %v3887_v1, %v3886_v13  ;;  %v4327_v14 = vadd.f32 %v4326_v31, %v4325_v8  ;;  %v4336_v5 = vadd.f32 %v4335_v6, %v4334_v63  ;;  %v4055_v32 = vadd.f32 %v4054_v15, %v4053_v4 }
 0x7bf   :  { %v4770_v38 = vsel %vm432_vm2, %v4769_v55, %v11153_v62  ;;  %v11170_v44 = vadd.f32 %v10562_v16, %v3879_v39  ;;  %v4063_v51 = vrot.slane %v4062_v54, 4  ;;  %v3796_v8 = vmul.f32 %v13727_v2, %v10979_v11 }
 0x7c0   :  { %v4872_v7 = vsel %vm1210_vm0, %v4770_v38, 0.0  ;;  %v11174_v56 = vadd.f32 %v10577_v61, %v3888_v49  ;;  %v4328_v35 = vrot.slane %v4327_v14, 1  ;;  %v4337_v60 = vrot.slane %v4336_v5, 1  ;;  %v13825_v38 = vld [vmem:[#allocation59_spill] sm:$0xff] }
 0x7c1   :  { %4873 = vadd.xlane.f32.xlu1 %v4872_v7  ;;  %v4056_v37 = vrot.slane %v4055_v32, 2  ;;  %v4064_v13 = vadd.f32 %v4063_v51, %v4062_v54  ;;  %v4501_v63 = vsel %vm346_vm1, %v3795_v30, 0.0  ;;  %v4510_v17 = vsel %vm346_vm1, %v13823_v10, 0.0 }
 0x7c2   :  { %v4721_v50 = vrot.slane %v11174_v56, 7  ;;  %v4329_v12 = vadd.f32 %v4328_v35, %v4327_v14  ;;  %v4338_v4 = vadd.f32 %v4337_v60, %v4336_v5  ;;  %v4502_v6 = vsel %vm1210_vm0, %v3796_v8, 0.0 }
 0x7c3   :  { %v4057_v1 = vadd.f32 %v4056_v37, %v4055_v32  ;;  %v4065_v31 = vrot.slane %v4064_v13, 2  ;;  %v4511_v18 = vsel %vm1210_vm0, %v13824_v43, 0.0  ;;  %v4503_v15 = vadd.f32 %v4502_v6, %v4501_v63  ;;  %v13826_v37 = vld [vmem:[#allocation88_spill] sm:$0xff]  ;;  %v13827_v6 = vld [vmem:[#allocation97_spill] sm:$0xff] }
 0x7c4   :  { %v4722_v55 = vsel %vm432_vm2, %v4721_v50, %v11170_v44  ;;  %v11188_v2 = vadd.f32 %v10562_v16, %v4329_v12  ;;  %v11191_v39 = vadd.f32 %v10577_v61, %v4338_v4  ;;  %v4512_v5 = vadd.f32 %v4511_v18, %v4510_v17 }
 0x7c5   :  { %v4854_v54 = vsel %vm1210_vm0, %v4722_v55, 0.0  ;;  %v4058_v49 = vrot.slane %v4057_v1, 1  ;;  %v4066_v14 = vadd.f32 %v4065_v31, %v4064_v13  ;;  %v4504_v30 = vrot.slane %v4503_v15, 4 }
 0x7c6   :  { %4855 = vadd.xlane.f32.xlu0 %v4854_v54  ;;  %v4801_v34 = vrot.slane %v11191_v39, 7  ;;  %v3735_v32 = vmul.f32 %v13825_v38, %v13785_v22  ;;  %v3736_v51 = vmul.f32 %v13766_v46, %v10979_v11  ;;  %v4513_v60 = vrot.slane %v4512_v5, 4 }
 0x7c7   :  { %v4059_v7 = vadd.f32 %v4058_v49, %v4057_v1  ;;  %v4067_v35 = vrot.slane %v4066_v14, 1  ;;  %v4240_v8 = vsel %vm346_vm1, %v13826_v37, 0.0  ;;  %v4505_v63 = vadd.f32 %v4504_v30, %v4503_v15  ;;  %v13828_v30 = vld [vmem:[#allocation90_spill] sm:$0xff]  ;;  %v13829_v37 = vld [vmem:[#allocation99_spill] sm:$0xff] }
 0x7c8   :  { %v4802_v13 = vsel %vm432_vm2, %v4801_v34, %v11188_v2  ;;  %v4231_v50 = vsel %vm346_vm1, %v3735_v32, 0.0  ;;  %v4232_v12 = vsel %vm1210_vm0, %v3736_v51, 0.0  ;;  %v4514_v46 = vadd.f32 %v4513_v60, %v4512_v5 }
 0x7c9   :  { %v4884_v4 = vsel %vm1210_vm0, %v4802_v13, 0.0  ;;  %v4068_v10 = vadd.f32 %v4067_v35, %v4066_v14  ;;  %v11207_v17 = vadd.f32 %v10562_v16, %v4059_v7  ;;  %v4506_v1 = vrot.slane %v4505_v63, 2 }
 0x7ca   :  { %4885 = vadd.xlane.f32.xlu1 %v4884_v4  ;;  %v4233_v31 = vadd.f32 %v4232_v12, %v4231_v50  ;;  %v4241_v43 = vsel %vm1210_vm0, %v13827_v6, 0.0  ;;  %v3775_v18 = vmul.f32 %v13794_v23, %v13785_v22  ;;  %v4515_v15 = vrot.slane %v4514_v46, 2 }
 0x7cb   :  { %v11214_v55 = vadd.f32 %v10577_v61, %v4068_v10  ;;  %v4242_v54 = vadd.f32 %v4241_v43, %v4240_v8  ;;  %v3776_v49 = vmul.f32 %v13795_v3, %v10979_v11  ;;  %v4507_v14 = vadd.f32 %v4506_v1, %v4505_v63 }
 0x7cc   :  { %v4234_v34 = vrot.slane %v4233_v31, 4  ;;  %v4411_v5 = vsel %vm346_vm1, %v3775_v18, 0.0  ;;  %v4420_v38 = vsel %vm346_vm1, %v13828_v30, 0.0  ;;  %v4516_v51 = vadd.f32 %v4515_v15, %v4514_v46 }
 0x7cd   :  { %v4753_v32 = vrot.slane %v11214_v55, 7  ;;  %v4243_v7 = vrot.slane %v4242_v54, 4  ;;  %v4412_v22 = vsel %vm1210_vm0, %v3776_v49, 0.0  ;;  %v4508_v23 = vrot.slane %v4507_v14, 1 }
 0x7ce   :  { %v4235_v35 = vadd.f32 %v4234_v34, %v4233_v31  ;;  %v4413_v60 = vadd.f32 %v4412_v22, %v4411_v5  ;;  %v4421_v8 = vsel %vm1210_vm0, %v13829_v37, 0.0  ;;  %v4517_v3 = vrot.slane %v4516_v51, 1 }
 0x7cf   :  { %v4754_v11 = vsel %vm432_vm2, %v4753_v32, %v11207_v17  ;;  %v4244_v13 = vadd.f32 %v4243_v7, %v4242_v54  ;;  %v4422_v63 = vadd.f32 %v4421_v8, %v4420_v38  ;;  %v4509_v12 = vadd.f32 %v4508_v23, %v4507_v14 }
 0x7d0   :  { %v4866_v50 = vsel %vm1210_vm0, %v4754_v11, 0.0  ;;  %v4236_v4 = vrot.slane %v4235_v35, 2  ;;  %v4414_v10 = vrot.slane %v4413_v60, 4  ;;  %v4518_v46 = vadd.f32 %v4517_v3, %v4516_v51 }
 0x7d1   :  { %4867 = vadd.xlane.f32.xlu0 %v4866_v50  ;;  %v4245_v1 = vrot.slane %v4244_v13, 2  ;;  %v4423_v6 = vrot.slane %v4422_v63, 4  ;;  %v11229_v18 = vadd.f32 %v10562_v16, %v4509_v12 }
 0x7d2   :  { %v4237_v31 = vadd.f32 %v4236_v4, %v4235_v35  ;;  %v4415_v43 = vadd.f32 %v4414_v10, %v4413_v60  ;;  %v11232_v15 = vadd.f32 %v10577_v61, %v4518_v46 }
 0x7d3   :  { %v4246_v49 = vadd.f32 %v4245_v1, %v4244_v13  ;;  %v4424_v54 = vadd.f32 %v4423_v6, %v4422_v63 }
 0x7d4   :  { %v4238_v34 = vrot.slane %v4237_v31, 1  ;;  %v4416_v5 = vrot.slane %v4415_v43, 2  ;;  %v4833_v14 = vrot.slane %v11232_v15, 7 }
 0x7d5   :  { %v4247_v30 = vrot.slane %v4246_v49, 1  ;;  %v4425_v38 = vrot.slane %v4424_v54, 2 }
 0x7d6   :  { %v4239_v32 = vadd.f32 %v4238_v34, %v4237_v31  ;;  %v4417_v51 = vadd.f32 %v4416_v5, %v4415_v43  ;;  %v4834_v7 = vsel %vm432_vm2, %v4833_v14, %v11229_v18  ;;  %v4853_v31 = vpop.xlane.xlu0 %4852 }
 0x7d7   :  { %v4248_v22 = vadd.f32 %v4247_v30, %v4246_v49  ;;  %v4426_v23 = vadd.f32 %v4425_v38, %v4424_v54  ;;  %v4896_v35 = vsel %vm1210_vm0, %v4834_v7, 0.0  ;;  %v4859_v49 = vpop.xlane.xlu1 %4858  ;;  %v4899_v34 = vmul.f32 0.0625, %v4853_v31 }
 0x7d8   :  { %v4418_v60 = vrot.slane %v4417_v51, 1  ;;  %4897 = vadd.xlane.f32.xlu1 %v4896_v35  ;;  %v11239_v37 = vadd.f32 %v10562_v16, %v4239_v32 }
 0x7d9   :  { %v11242_v8 = vadd.f32 %v10577_v61, %v4248_v22  ;;  %v4427_v11 = vrot.slane %v4426_v23, 1 }
 0x7da   :  { %v4419_v3 = vadd.f32 %v4418_v60, %v4417_v51 }
 0x7db   :  { %v4785_v13 = vrot.slane %v11242_v8, 7  ;;  %v4428_v63 = vadd.f32 %v4427_v11, %v4426_v23  ;;  %v4883_v7 = vpop.xlane.xlu1 %4882 }
 0x7dc   :  { %v11248_v12 = vadd.f32 %v10562_v16, %v4419_v3  ;;  %v4901_v16 = vmul.f32 0.0625, %v4859_v49  ;;  %v4909_v23 = vmul.f32 0.0625, %v4883_v7  ;;  %v13834_v7 = vld [vmem:[#allocation103_spill] sm:$0xff] }
 0x7dd   :  { %v4786_v50 = vsel %vm432_vm2, %v4785_v13, %v11239_v37  ;;  %v11251_v4 = vadd.f32 %v10577_v61, %v4428_v63 }
 0x7de   :  { %v4878_v10 = vsel %vm1210_vm0, %v4786_v50, 0.0  ;;  %v4915_v14 = vadd.f32 %v4901_v16, %v4899_v34 }
 0x7df   :  { %4879 = vadd.xlane.f32.xlu0 %v4878_v10  ;;  %v4817_v46 = vrot.slane %v11251_v4, 7  ;;  %v4865_v43 = vpop.xlane.xlu0 %4864 }
 0x7e0   :  { %v4903_v5 = vmul.f32 0.0625, %v4865_v43 }
 0x7e1   :  { %v4818_v1 = vsel %vm432_vm2, %v4817_v46, %v11248_v12 }
 0x7e2   :  { %v4890_v6 = vsel %vm1210_vm0, %v4818_v1, 0.0  ;;  %v4916_v38 = vadd.f32 %v4915_v14, %v4903_v5 }
 0x7e3   :  { %4891 = vadd.xlane.f32.xlu0 %v4890_v6 }
 0x7f6   :  { %v4895_v60 = vpop.xlane.xlu1 %4894 }
 0x7f7   :  { %v4913_v13 = vmul.f32 0.0625, %v4895_v60 }
 0x80e   :  { %v4871_v54 = vpop.xlane.xlu0 %4870 }
 0x80f   :  { %v4905_v30 = vmul.f32 0.0625, %v4871_v54 }
 0x811   :  { %v4917_v51 = vadd.f32 %v4916_v38, %v4905_v30  ;;  %v13830_v30 = vld [vmem:[#allocation101_spill] sm:$0xff] }
 0x826   :  { %v4877_v61 = vpop.xlane.xlu0 %4876 }
 0x827   :  { %v4907_v32 = vmul.f32 0.0625, %v4877_v61 }
 0x829   :  { %v4918_v22 = vadd.f32 %v4917_v51, %v4907_v32  ;;  %v13832_v32 = vld [vmem:[#allocation102_spill] sm:$0xff] }
 0x82b   :  { %v4919_v35 = vadd.f32 %v4918_v22, %v4909_v23 }
 0x82d   :  { %v4862_v50 = vpop.xlane.xlu1 %4861 }
 0x82e   :  { %v4902_v1 = vmul.f32 0.0625, %v4862_v50 }
 0x843   :  { %v4889_v11 = vpop.xlane.xlu0 %4888 }
 0x844   :  { %v4911_v3 = vmul.f32 0.0625, %v4889_v11 }
 0x846   :  { %v4920_v63 = vadd.f32 %v4919_v35, %v4911_v3 }
 0x848   :  { %v4921_v10 = vadd.f32 %v4920_v63, %v4913_v13 }
 0x84a   :  { %v11258_v46 = vmul.f32 0.125, %v4921_v10 }
 0x84c   :  { %v11261_v6 = vrot.slane %v11258_v46, 1  ;;  %v11264_v31 = vrot.slane %v11258_v46, 2  ;;  %v11267_v43 = vrot.slane %v11258_v46, 3  ;;  %v11270_v49 = vrot.slane %v11258_v46, 4 }
 0x84d   :  { %v11273_v16 = vrot.slane %v11258_v46, 5  ;;  %v11276_v34 = vrot.slane %v11258_v46, 6  ;;  %v11279_v5 = vrot.slane %v11258_v46, 7  ;;  %v11283_v61 = vsub.f32 %v10536_v58, %v11258_v46 }
 0x84e   :  { %v4874_v54 = vpop.xlane.xlu1 %4873  ;;  %v11287_v38 = vsub.f32 %v13830_v30, %v11261_v6  ;;  %v11291_v51 = vsub.f32 %v13832_v32, %v11264_v31  ;;  %v11295_v22 = vsub.f32 %v13834_v7, %v11267_v43  ;;  %v11299_v23 = vsub.f32 %v10583_v53, %v11270_v49 }
 0x84f   :  { %v4906_v14 = vmul.f32 0.0625, %v4874_v54  ;;  %v11303_v58 = vsub.f32 %v10590_v29, %v11273_v16  ;;  %v11307_v35 = vsub.f32 %v10596_v33, %v11276_v34  ;;  %v11311_v60 = vsub.f32 %v10601_v9, %v11279_v5 }
 0x850   :  { %13831 = vst [vmem:[#allocation75_spill] sm:$0xff] %v11287_v38  ;;  %13833 = vst [vmem:[#allocation47_spill] sm:$0xff] %v11291_v51  ;;  %v5050_v11 = vmul.f32 %v11287_v38, %v11287_v38  ;;  %v5051_v3 = vmul.f32 %v11291_v51, %v11291_v51  ;;  %v4923_v53 = vsel %vm1280_vm11, %v4902_v1, 0.0  ;;  %v5052_v29 = vmul.f32 %v11295_v22, %v11295_v22 }
 0x851   :  { %13835 = vst [vmem:[#allocation66_spill] sm:$0xff] %v11295_v22  ;;  %13836 = vst [vmem:[#allocation67_spill] sm:$0xff] %v11299_v23  ;;  %v5053_v13 = vmul.f32 %v11299_v23, %v11299_v23  ;;  %v5054_v33 = vmul.f32 %v11303_v58, %v11303_v58  ;;  %v11325_v9 = vsel %vm1280_vm11, %v4906_v14, 0.0  ;;  %v5049_v50 = vmul.f32 %v11283_v61, %v11283_v61 }
 0x852   :  { %13837 = vst [vmem:[#allocation68_spill] sm:$0xff] %v11303_v58  ;;  %13838 = vst [vmem:[#allocation69_spill] sm:$0xff] %v11307_v35  ;;  %v5215_v10 = vrot.slane %v5050_v11, 7  ;;  %v5217_v54 = vrot.slane %v5051_v3, 6  ;;  %v5055_v1 = vmul.f32 %v11307_v35, %v11307_v35  ;;  %v5056_v32 = vmul.f32 %v11311_v60, %v11311_v60 }
 0x853   :  { %13839 = vst [vmem:[#allocation27_spill] sm:$0xff] %v11311_v60  ;;  %v4856_v63 = vpop.xlane.xlu0 %4855  ;;  %v11335_v7 = vsub.f32 %v10626_v27, %v11258_v46  ;;  %v5219_v23 = vrot.slane %v5052_v29, 5  ;;  %v5221_v58 = vrot.slane %v5053_v13, 4  ;;  %v11340_v51 = vsub.f32 %v10629_v25, %v11261_v6 }
 0x854   :  { %v4900_v30 = vmul.f32 0.0625, %v4856_v63  ;;  %v5216_v14 = vsel %vm432_vm2, %v5215_v10, %v5049_v50  ;;  %v5223_v3 = vrot.slane %v5054_v33, 3  ;;  %v11345_v63 = vsub.f32 %v10635_v36, %v11264_v31 }
 0x855   :  { %13840 = vst [vmem:[#allocation33_spill] sm:$0xff] %v11340_v51  ;;  %v5218_v11 = vsel %vm434_vm3, %v5217_v54, %v5216_v14  ;;  %v11349_v35 = vsub.f32 %v10647_v21, %v11267_v43  ;;  %v11355_v13 = vsub.f32 %v10654_v57, %v11270_v49  ;;  %v11359_v25 = vsub.f32 %v10659_v52, %v11273_v16 }
 0x856   :  { %13841 = vst [vmem:[#allocation70_spill] sm:$0xff] %v11345_v63  ;;  %v4922_v27 = vsel %vm1280_vm11, %v4900_v30, 0.0  ;;  %v5220_v29 = vsel %vm436_vm4, %v5219_v23, %v5218_v11  ;;  %v5225_v50 = vrot.slane %v5055_v1, 2  ;;  %v11364_v21 = vsub.f32 %v10669_v45, %v11276_v34 }
 0x857   :  { %13842 = vst [vmem:[#allocation57_spill] sm:$0xff] %v11349_v35  ;;  %13843 = vst [vmem:[#allocation42_spill] sm:$0xff] %v11355_v13  ;;  %v4886_v33 = vpop.xlane.xlu1 %4885  ;;  %v5222_v36 = vsel %vm438_vm5, %v5221_v58, %v5220_v29  ;;  %v11368_v10 = vsub.f32 %v10674_v41, %v11279_v5  ;;  %v5227_v57 = vrot.slane %v5056_v32, 1  ;;  %v5040_v54 = vmul.f32 %v11340_v51, %v11340_v51 }
 0x858   :  { %13844 = vst [vmem:[#allocation81_spill] sm:$0xff] %v11359_v25  ;;  %13845 = vst [vmem:[#allocation76_spill] sm:$0xff] %v11364_v21  ;;  %v5224_v23 = vsel %vm440_vm6, %v5223_v3, %v5222_v36  ;;  %v5041_v52 = vmul.f32 %v11345_v63, %v11345_v63  ;;  %v4924_v30 = vadd.f32 %v4923_v53, %v4922_v27  ;;  %v4910_v41 = vmul.f32 0.0625, %v4886_v33 }
 0x859   :  { %13846 = vst [vmem:[#allocation92_spill] sm:$0xff] %v11368_v10  ;;  %v5226_v58 = vsel %vm442_vm7, %v5225_v50, %v5224_v23  ;;  %v5042_v45 = vmul.f32 %v11349_v35, %v11349_v35  ;;  %v5043_v1 = vmul.f32 %v11355_v13, %v11355_v13  ;;  %v5044_v14 = vmul.f32 %v11359_v25, %v11359_v25 }
 0x85a   :  { %v5045_v32 = vmul.f32 %v11364_v21, %v11364_v21  ;;  %v5046_v11 = vmul.f32 %v11368_v10, %v11368_v10  ;;  %v5228_v53 = vsel %vm444_vm8, %v5227_v57, %v5226_v58  ;;  %v5039_v3 = vmul.f32 %v11335_v7, %v11335_v7  ;;  %v13848_v10 = vld [vmem:[#allocation72_spill] sm:$0xff] }
 0x85b   :  { %v5199_v27 = vrot.slane %v5040_v54, 7  ;;  %v5201_v29 = vrot.slane %v5041_v52, 6  ;;  %v5203_v36 = vrot.slane %v5042_v45, 5  ;;  %v5205_v50 = vrot.slane %v5043_v1, 4  ;;  %v13850_v52 = vld [vmem:[#allocation83_spill] sm:$0xff]  ;;  %v13852_v1 = vld [vmem:[#allocation78_spill] sm:$0xff] }
 0x85c   :  { %v5207_v23 = vrot.slane %v5044_v14, 3  ;;  %v5209_v33 = vrot.slane %v5045_v32, 2  ;;  %v5211_v25 = vrot.slane %v5046_v11, 1  ;;  %v11392_v21 = vsub.f32 %v10910_v24, %v11261_v6  ;;  %v13854_v24 = vld [vmem:[#allocation74_spill] sm:$0xff] }
 0x85d   :  { %v5200_v13 = vsel %vm432_vm2, %v5199_v27, %v5039_v3  ;;  %v11396_v57 = vsub.f32 %v13848_v10, %v11264_v31  ;;  %v11401_v45 = vsub.f32 %v13850_v52, %v11267_v43  ;;  %v11405_v14 = vsub.f32 %v13852_v1, %v11270_v49  ;;  %v13856_v10 = vld [vmem:[#allocation60_spill] sm:$0xff] }
 0x85e   :  { %v4868_v60 = vpop.xlane.xlu0 %4867  ;;  %13847 = vst [vmem:[#allocation50_spill] sm:$0xff] %v11392_v21  ;;  %v5202_v54 = vsel %vm434_vm3, %v5201_v29, %v5200_v13  ;;  %v11410_v11 = vsub.f32 %v13854_v24, %v11258_v46  ;;  %v11414_v3 = vsub.f32 %v13856_v10, %v11273_v16  ;;  %v13860_v52 = vld [vmem:[#allocation64_spill] sm:$0xff] }
 0x85f   :  { %13849 = vst [vmem:[#allocation15_spill] sm:$0xff] %v11396_v57  ;;  %v4904_v58 = vmul.f32 0.0625, %v4868_v60  ;;  %13851 = vst [vmem:[#allocation85_spill] sm:$0xff] %v11401_v45  ;;  %v5204_v32 = vsel %vm436_vm4, %v5203_v36, %v5202_v54  ;;  %v13858_v60 = vld [vmem:[#allocation48_spill] sm:$0xff]  ;;  %v11424_v1 = vsub.f32 %v13860_v52, %v11279_v5  ;;  %v5070_v36 = vmul.f32 %v11392_v21, %v11392_v21 }
 0x860   :  { %13853 = vst [vmem:[#allocation94_spill] sm:$0xff] %v11405_v14  ;;  %13855 = vst [vmem:[#allocation28_spill] sm:$0xff] %v11410_v11  ;;  %v11418_v13 = vsub.f32 %v13858_v60, %v11276_v34  ;;  %v5206_v29 = vsel %vm438_vm5, %v5205_v50, %v5204_v32  ;;  %v5071_v10 = vmul.f32 %v11396_v57, %v11396_v57 }
 0x861   :  { %13857 = vst [vmem:[#allocation43_spill] sm:$0xff] %v11414_v3  ;;  %v4925_v27 = vsel %vm1280_vm11, %v4904_v58, 0.0  ;;  %13861 = vst [vmem:[#allocation24_spill] sm:$0xff] %v11424_v1  ;;  %v5208_v24 = vsel %vm440_vm6, %v5207_v23, %v5206_v29  ;;  %v5072_v60 = vmul.f32 %v11401_v45, %v11401_v45  ;;  %v5073_v50 = vmul.f32 %v11405_v14, %v11405_v14 }
 0x862   :  { %13859 = vst [vmem:[#allocation36_spill] sm:$0xff] %v11418_v13  ;;  %v4926_v54 = vadd.f32 %v4925_v27, %v4924_v30  ;;  %v5210_v58 = vsel %vm442_vm7, %v5209_v33, %v5208_v24  ;;  %v5074_v32 = vmul.f32 %v11414_v3, %v11414_v3  ;;  %v5075_v52 = vmul.f32 %v11418_v13, %v11418_v13 }
 0x863   :  { %v4931_v30 = vsel %vm1280_vm11, %v4910_v41, 0.0  ;;  %v11442_v23 = vsel %vm346_vm1, %v5228_v53, 0.0  ;;  %v5069_v27 = vmul.f32 %v11410_v11, %v11410_v11  ;;  %v5247_v29 = vrot.slane %v5070_v36, 7  ;;  %v13862_v36 = vld [vmem:[#allocation62_spill] sm:$0xff] }
 0x864   :  { %v4928_v33 = vadd.f32 %v11325_v9, %v4926_v54  ;;  %v5212_v24 = vsel %vm444_vm8, %v5211_v25, %v5210_v58  ;;  %v5076_v14 = vmul.f32 %v11424_v1, %v11424_v1  ;;  %v5249_v3 = vrot.slane %v5071_v10, 6  ;;  %v13864_v25 = vld [vmem:[#allocation58_spill] sm:$0xff] }
 0x865   :  { %v4898_v57 = vpop.xlane.xlu1 %4897  ;;  %v5248_v13 = vsel %vm432_vm2, %v5247_v29, %v5069_v27  ;;  %v5251_v63 = vrot.slane %v5072_v60, 5  ;;  %v5253_v41 = vrot.slane %v5073_v50, 4  ;;  %v5255_v45 = vrot.slane %v5074_v32, 3  ;;  %v13866_v10 = vld [vmem:[#allocation38_spill] sm:$0xff]  ;;  %v13868_v60 = vld [vmem:[#allocation51_spill] sm:$0xff]  ;;  %v13874_v32 = vld [vmem:[#allocation29_spill] sm:$0xff] }
 0x866   :  { %v4914_v53 = vmul.f32 0.0625, %v4898_v57  ;;  %v5250_v22 = vsel %vm434_vm3, %v5249_v3, %v5248_v13  ;;  %v5257_v35 = vrot.slane %v5075_v52, 2  ;;  %v11454_v21 = vsub.f32 %v13862_v36, %v11261_v6  ;;  %v13870_v13 = vld [vmem:[#allocation56_spill] sm:$0xff]  ;;  %v13876_v36 = vld [vmem:[#allocation79_spill] sm:$0xff] }
 0x867   :  { %v5252_v9 = vsel %vm436_vm4, %v5251_v63, %v5250_v22  ;;  %v11459_v54 = vsub.f32 %v13864_v25, %v11264_v31  ;;  %v11463_v58 = vsub.f32 %v13866_v10, %v11267_v43  ;;  %v11467_v57 = vsub.f32 %v13868_v60, %v11270_v49  ;;  %v13872_v22 = vld [vmem:[#allocation49_spill] sm:$0xff] }
 0x868   :  { %13863 = vst [vmem:[#allocation26_spill] sm:$0xff] %v11454_v21  ;;  %v5254_v3 = vsel %vm438_vm5, %v5253_v41, %v5252_v9  ;;  %v11472_v50 = vsub.f32 %v13870_v13, %v11258_v46  ;;  %v11476_v63 = vsub.f32 %v13872_v22, %v11273_v16  ;;  %v11480_v52 = vsub.f32 %v13874_v32, %v11276_v34 }
 0x869   :  { %13865 = vst [vmem:[#allocation30_spill] sm:$0xff] %v11459_v54  ;;  %13867 = vst [vmem:[#allocation32_spill] sm:$0xff] %v11463_v58  ;;  %v11483_v27 = vsel %vm346_vm1, %v5212_v24, 0.0  ;;  %v5256_v29 = vsel %vm440_vm6, %v5255_v45, %v5254_v3  ;;  %v11488_v41 = vsub.f32 %v13876_v36, %v11279_v5  ;;  %v5060_v9 = vmul.f32 %v11454_v21, %v11454_v21 }
 0x86a   :  { %13869 = vst [vmem:[#allocation23_spill] sm:$0xff] %v11467_v57  ;;  %13871 = vst [vmem:[#allocation35_spill] sm:$0xff] %v11472_v50  ;;  %v5258_v25 = vsel %vm442_vm7, %v5257_v35, %v5256_v29  ;;  %v5061_v10 = vmul.f32 %v11459_v54, %v11459_v54  ;;  %v5062_v60 = vmul.f32 %v11463_v58, %v11463_v58  ;;  %v4935_v45 = vsel %vm1280_vm11, %v4914_v53, 0.0 }
 0x86b   :  { %13873 = vst [vmem:[#allocation71_spill] sm:$0xff] %v11476_v63  ;;  %13875 = vst [vmem:[#allocation41_spill] sm:$0xff] %v11480_v52  ;;  %v5063_v24 = vmul.f32 %v11467_v57, %v11467_v57  ;;  %v5259_v13 = vrot.slane %v5076_v14, 1  ;;  %v5064_v22 = vmul.f32 %v11476_v63, %v11476_v63  ;;  %v5065_v32 = vmul.f32 %v11480_v52, %v11480_v52 }
 0x86c   :  { %13877 = vst [vmem:[#allocation82_spill] sm:$0xff] %v11488_v41  ;;  %v4880_v3 = vpop.xlane.xlu0 %4879  ;;  %v5059_v29 = vmul.f32 %v11472_v50, %v11472_v50  ;;  %v5231_v36 = vrot.slane %v5060_v9, 7  ;;  %v5233_v1 = vrot.slane %v5061_v10, 6  ;;  %v5066_v57 = vmul.f32 %v11488_v41, %v11488_v41  ;;  %v13878_v9 = vld [vmem:[#allocation39_spill] sm:$0xff] }
 0x86d   :  { %v4908_v35 = vmul.f32 0.0625, %v4880_v3  ;;  %v5260_v54 = vsel %vm444_vm8, %v5259_v13, %v5258_v25  ;;  %v5235_v53 = vrot.slane %v5062_v60, 5  ;;  %v5237_v58 = vrot.slane %v5063_v24, 4  ;;  %v13880_v25 = vld [vmem:[#allocation54_spill] sm:$0xff] }
 0x86e   :  { %v5232_v63 = vsel %vm432_vm2, %v5231_v36, %v5059_v29  ;;  %v5239_v21 = vrot.slane %v5064_v22, 3  ;;  %v5241_v38 = vrot.slane %v5065_v32, 2  ;;  %v11514_v10 = vsub.f32 %v13878_v9, %v11261_v6  ;;  %v13886_v32 = vld [vmem:[#allocation106_spill] sm:$0xff]  ;;  %v13890_v9 = vld [vmem:[#allocation40_spill] sm:$0xff] }
 0x86f   :  { %v4929_v14 = vsel %vm1280_vm11, %v4908_v35, 0.0  ;;  %v5234_v51 = vsel %vm434_vm3, %v5233_v1, %v5232_v63  ;;  %v11518_v13 = vsub.f32 %v13880_v25, %v11264_v31  ;;  %v13882_v35 = vld [vmem:[#allocation104_spill] sm:$0xff]  ;;  %v11532_v36 = vsub.f32 %v13886_v32, %v11273_v16 }
 0x870   :  { %v4930_v52 = vadd.f32 %v4929_v14, %v4928_v33  ;;  %v4892_v3 = vpop.xlane.xlu0 %4891  ;;  %13879 = vst [vmem:[#allocation77_spill] sm:$0xff] %v11514_v10  ;;  %v5236_v24 = vsel %vm436_vm4, %v5235_v53, %v5234_v51  ;;  %v11523_v29 = vsub.f32 %v13882_v35, %v11267_v43  ;;  %v13884_v33 = vld [vmem:[#allocation105_spill] sm:$0xff]  ;;  %v11542_v25 = vsub.f32 %v13890_v9, %v11258_v46 }
 0x871   :  { %13881 = vst [vmem:[#allocation63_spill] sm:$0xff] %v11518_v13  ;;  %v4912_v60 = vmul.f32 0.0625, %v4892_v3  ;;  %v11527_v22 = vsub.f32 %v13884_v33, %v11270_v49  ;;  %v5238_v63 = vsel %vm438_vm5, %v5237_v58, %v5236_v24  ;;  %13887 = vst [vmem:[#allocation16_spill] sm:$0xff] %v11532_v36  ;;  %v13888_v14 = vld [vmem:[#allocation61_spill] sm:$0xff]  ;;  %v5090_v35 = vmul.f32 %v11514_v10, %v11514_v10 }
 0x872   :  { %13883 = vst [vmem:[#allocation87_spill] sm:$0xff] %v11523_v29  ;;  %v4932_v1 = vadd.f32 %v4931_v30, %v4930_v52  ;;  %v11536_v3 = vsub.f32 %v13888_v14, %v11276_v34  ;;  %v5240_v53 = vsel %vm440_vm6, %v5239_v21, %v5238_v63  ;;  %13891 = vst [vmem:[#allocation84_spill] sm:$0xff] %v11542_v25  ;;  %v13892_v30 = vld [vmem:[#allocation55_spill] sm:$0xff]  ;;  %v11568_v32 = vsel %vm346_vm1, %v5260_v54, 0.0 }
 0x873   :  { %13885 = vst [vmem:[#allocation96_spill] sm:$0xff] %v11527_v22  ;;  %v4933_v51 = vsel %vm1280_vm11, %v4912_v60, 0.0  ;;  %v11546_v52 = vsub.f32 %v13892_v30, %v11279_v5  ;;  %v5242_v24 = vsel %vm442_vm7, %v5241_v38, %v5240_v53  ;;  %v11553_v33 = vmul.f32 %v11518_v13, %v11518_v13 }
 0x874   :  { %13889 = vst [vmem:[#allocation14_spill] sm:$0xff] %v11536_v3  ;;  %v4934_v58 = vadd.f32 %v4933_v51, %v4932_v1  ;;  %v5243_v60 = vrot.slane %v5066_v57, 1  ;;  %v11557_v21 = vmul.f32 %v11523_v29, %v11523_v29  ;;  %v11561_v63 = vmul.f32 %v11527_v22, %v11527_v22 }
 0x875   :  { %13893 = vst [vmem:[#allocation93_spill] sm:$0xff] %v11546_v52  ;;  %v11565_v1 = vmul.f32 %v11532_v36, %v11532_v36  ;;  %v11572_v14 = vmul.f32 %v11536_v3, %v11536_v3  ;;  %v11576_v57 = vmul.f32 %v11546_v52, %v11546_v52  ;;  %v5089_v53 = vmul.f32 %v11542_v25, %v11542_v25  ;;  %v13897_v52 = vld [vmem:[#allocation37_spill] sm:$0xff]  ;;  %v13899_v3 = vld [vmem:[#allocation80_spill] sm:$0xff] }
 0x876   :  { %v4936_v38 = vadd.f32 %v4935_v45, %v4934_v58  ;;  %v11579_v51 = vsel %vm444_vm8, %v5243_v60, %v5242_v24  ;;  %v5279_v9 = vrot.slane %v5090_v35, 7  ;;  %v5281_v45 = vrot.slane %v11553_v33, 6  ;;  %v13894_v60 = vld [vmem:[#allocation17_spill] sm:$0xff]  ;;  %v13896_v24 = vld [vmem:[#allocation19_spill] sm:$0xff] }
 0x877   :  { %v11592_v22 = vsub.f32 %v13894_v60, %v11258_v46  ;;  %v11611_v60 = vsub.f32 %v13896_v24, %v11261_v6 }
 0x878   :  { %v4938_v30 = vmul.f32 0.125, %v4936_v38  ;;  %v5280_v41 = vsel %vm432_vm2, %v5279_v9, %v5089_v53 }
 0x87a   :  { %v4948_v35 = vrot.slane %v4938_v30, 1  ;;  %v11595_v33 = vsub.f32 %v11057_v47, %v4938_v30  ;;  %v11598_v38 = vsub.f32 %v11170_v44, %v4938_v30  ;;  %v11601_v58 = vsub.f32 %v11153_v62, %v4938_v30 }
 0x87b   :  { %v11604_v53 = vsub.f32 %v11207_v17, %v4938_v30  ;;  %v11607_v9 = vsub.f32 %v11188_v2, %v4938_v30  ;;  %v11615_v47 = vsub.f32 %v13897_v52, %v11264_v31  ;;  %v11624_v17 = vsub.f32 %v11239_v37, %v4938_v30 }
 0x87c   :  { %v11618_v44 = vsub.f32 %v13899_v3, %v4948_v35  ;;  %v11621_v62 = vsub.f32 %v11174_v56, %v4948_v35  ;;  %v11627_v2 = vsub.f32 %v11229_v18, %v4938_v30  ;;  %v5057_v24 = vmul.f32 %v11595_v33, %v11595_v33 }
 0x87d   :  { %13895 = vst [vmem:[#allocation44_spill] sm:$0xff] %v11607_v9  ;;  %13898 = vst [vmem:[#allocation89_spill] sm:$0xff] %v11615_v47  ;;  %v5047_v54 = vmul.f32 %v11598_v38, %v11598_v38  ;;  %v11634_v52 = vsub.f32 %v11158_v48, %v4948_v35  ;;  %v11637_v3 = vsub.f32 %v11214_v55, %v4948_v35 }
 0x87e   :  { %13900 = vst [vmem:[#allocation98_spill] sm:$0xff] %v11618_v44  ;;  %13901 = vst [vmem:[#allocation52_spill] sm:$0xff] %v11621_v62  ;;  %v5058_v56 = vmul.f32 %v11618_v44, %v11618_v44  ;;  %v5048_v37 = vmul.f32 %v11621_v62, %v11621_v62  ;;  %v5077_v18 = vmul.f32 %v11601_v58, %v11601_v58 }
 0x87f   :  { %13902 = vst [vmem:[#allocation86_spill] sm:$0xff] %v11624_v17  ;;  %13903 = vst [vmem:[#allocation95_spill] sm:$0xff] %v11627_v2  ;;  %v11646_v36 = vsub.f32 %v11191_v39, %v4948_v35  ;;  %v5078_v13 = vmul.f32 %v11634_v52, %v11634_v52  ;;  %v5067_v48 = vmul.f32 %v11604_v53, %v11604_v53 }
 0x880   :  { %13904 = vst [vmem:[#allocation20_spill] sm:$0xff] %v11634_v52  ;;  %13905 = vst [vmem:[#allocation91_spill] sm:$0xff] %v11637_v3  ;;  %v5068_v55 = vmul.f32 %v11637_v3, %v11637_v3  ;;  %v11655_v44 = vsub.f32 %v11242_v8, %v4948_v35  ;;  %v5229_v29 = vrot.slane %v5058_v56, 7  ;;  %v5213_v62 = vrot.slane %v5048_v37, 7 }
 0x881   :  { %13906 = vst [vmem:[#allocation100_spill] sm:$0xff] %v11646_v36  ;;  %v5098_v10 = vmul.f32 %v11646_v36, %v11646_v36  ;;  %v11660_v39 = vsub.f32 %v11232_v15, %v4948_v35  ;;  %v5261_v25 = vrot.slane %v5078_v13, 7  ;;  %v5097_v52 = vmul.f32 %v11607_v9, %v11607_v9 }
 0x882   :  { %13907 = vst [vmem:[#allocation59_spill] sm:$0xff] %v11655_v44  ;;  %v5245_v11 = vrot.slane %v5068_v55, 7  ;;  %v5088_v50 = vmul.f32 %v11655_v44, %v11655_v44  ;;  %v5230_v3 = vsel %vm432_vm2, %v5229_v29, %v5057_v24  ;;  %v5214_v8 = vsel %vm432_vm2, %v5213_v62, %v5047_v54 }
 0x883   :  { %13908 = vst [vmem:[#allocation88_spill] sm:$0xff] %v11660_v39  ;;  %v5293_v56 = vrot.slane %v5098_v10, 7  ;;  %v5118_v37 = vmul.f32 %v11660_v39, %v11660_v39  ;;  %v5352_v36 = vsel %vm1210_vm0, %v5230_v3, 0.0  ;;  %v5346_v15 = vsel %vm1210_vm0, %v5214_v8, 0.0 }
 0x884   :  { %v5262_v13 = vsel %vm432_vm2, %v5261_v25, %v5077_v18  ;;  %v5246_v55 = vsel %vm432_vm2, %v5245_v11, %v5067_v48  ;;  %5353 = vadd.xlane.f32.xlu1 %v5352_v36  ;;  %5347 = vadd.xlane.f32.xlu0 %v5346_v15  ;;  %v5087_v29 = vmul.f32 %v11624_v17, %v11624_v17  ;;  %v5277_v54 = vrot.slane %v5088_v50, 7  ;;  %v13911_v50 = vld [vmem:[#allocation34_spill] sm:$0xff] }
 0x885   :  { %v5294_v9 = vsel %vm432_vm2, %v5293_v56, %v5097_v52  ;;  %v5117_v10 = vmul.f32 %v11627_v2, %v11627_v2  ;;  %v5364_v62 = vsel %vm1210_vm0, %v5262_v13, 0.0  ;;  %v5325_v24 = vrot.slane %v5118_v37, 7  ;;  %v13915_v56 = vld [vmem:[#allocation18_spill] sm:$0xff]  ;;  %v13917_v37 = vld [vmem:[#allocation53_spill] sm:$0xff] }
 0x886   :  { %v11681_v3 = vsub.f32 %v11248_v12, %v4938_v30  ;;  %v11684_v25 = vsub.f32 %v11251_v4, %v4948_v35  ;;  %v5358_v11 = vsel %vm1210_vm0, %v5246_v55, 0.0  ;;  %v5278_v36 = vsel %vm432_vm2, %v5277_v54, %v5087_v29  ;;  %v13912_v4 = vld [vmem:[#allocation65_spill] sm:$0xff] }
 0x887   :  { %v5282_v52 = vsel %vm434_vm3, %v5281_v45, %v5280_v41  ;;  %v11691_v18 = vsub.f32 %v13911_v50, %v11267_v43  ;;  %v5376_v48 = vsel %vm1210_vm0, %v5294_v9, 0.0  ;;  %v5326_v8 = vsel %vm432_vm2, %v5325_v24, %v5117_v10 }
 0x888   :  { %13909 = vst [vmem:[#allocation97_spill] sm:$0xff] %v11681_v3  ;;  %13910 = vst [vmem:[#allocation90_spill] sm:$0xff] %v11684_v25  ;;  %v5108_v12 = vmul.f32 %v11684_v25, %v11684_v25  ;;  %v11699_v30 = vsub.f32 %v13912_v4, %v11270_v49  ;;  %5365 = vadd.xlane.f32.xlu1 %v5364_v62  ;;  %5359 = vadd.xlane.f32.xlu0 %v5358_v11  ;;  %v5370_v35 = vsel %vm1210_vm0, %v5278_v36, 0.0 }
 0x889   :  { %v13914_v41 = vrot.slane %v11557_v21, 5  ;;  %v11707_v9 = vsub.f32 %v13915_v56, %v11273_v16  ;;  %v11711_v15 = vsub.f32 %v13917_v37, %v11276_v34  ;;  %v5107_v13 = vmul.f32 %v11681_v3, %v11681_v3  ;;  %v13920_v21 = vld [vmem:[#allocation31_spill] sm:$0xff] }
 0x88a   :  { %13913 = vst [vmem:[#allocation99_spill] sm:$0xff] %v11699_v30  ;;  %v5309_v55 = vrot.slane %v5108_v12, 7  ;;  %v13919_v29 = vrot.slane %v11561_v63, 4  ;;  %v11720_v10 = vsub.f32 %v13920_v21, %v11279_v5  ;;  %v13922_v62 = vrot.slane %v11565_v1, 3 }
 0x88b   :  { %v5284_v45 = vsel %vm436_vm4, %v13914_v41, %v5282_v52  ;;  %13916 = vst [vmem:[#allocation101_spill] sm:$0xff] %v11707_v9  ;;  %13918 = vst [vmem:[#allocation102_spill] sm:$0xff] %v11711_v15  ;;  %v5080_v11 = vmul.f32 %v11611_v60, %v11611_v60  ;;  %v5081_v36 = vmul.f32 %v11615_v47, %v11615_v47  ;;  %v13923_v50 = vrot.slane %v11572_v14, 2 }
 0x88c   :  { %v5286_v54 = vsel %vm438_vm5, %v13919_v29, %v5284_v45  ;;  %13921 = vst [vmem:[#allocation103_spill] sm:$0xff] %v11720_v10  ;;  %v5082_v52 = vmul.f32 %v11691_v18, %v11691_v18  ;;  %v5310_v63 = vsel %vm432_vm2, %v5309_v55, %v5107_v13  ;;  %v5083_v1 = vmul.f32 %v11699_v30, %v11699_v30 }
 0x88d   :  { %v5288_v24 = vsel %vm440_vm6, %v13922_v62, %v5286_v54  ;;  %v5084_v4 = vmul.f32 %v11707_v9, %v11707_v9  ;;  %5377 = vadd.xlane.f32.xlu1 %v5376_v48  ;;  %5371 = vadd.xlane.f32.xlu0 %v5370_v35  ;;  %v5388_v41 = vsel %vm1210_vm0, %v5326_v8, 0.0  ;;  %v5355_v45 = vsel %vm346_vm1, %v11579_v51, 0.0  ;;  %v13925_v62 = vld [vmem:[#allocation73_spill] sm:$0xff] }
 0x88e   :  { %v5290_v12 = vsel %vm442_vm7, %v13923_v50, %v5288_v24  ;;  %v5079_v56 = vmul.f32 %v11592_v22, %v11592_v22  ;;  %v5085_v14 = vmul.f32 %v11711_v15, %v11711_v15  ;;  %v5382_v37 = vsel %vm1210_vm0, %v5310_v63, 0.0  ;;  %v13926_v63 = vld [vmem:[#allocation21_spill] sm:$0xff] }
 0x88f   :  { %v13924_v13 = vrot.slane %v11576_v57, 1  ;;  %v5263_v29 = vrot.slane %v5080_v11, 7  ;;  %v5265_v48 = vrot.slane %v5081_v36, 6  ;;  %v5086_v8 = vmul.f32 %v11720_v10, %v11720_v10  ;;  %v13927_v57 = vld [vmem:[#allocation46_spill] sm:$0xff] }
 0x890   :  { %v5267_v35 = vrot.slane %v5082_v52, 5  ;;  %v5269_v54 = vrot.slane %v5083_v1, 4  ;;  %v5271_v51 = vrot.slane %v5084_v4, 3  ;;  %v11755_v24 = vsub.f32 %v13925_v62, %v11258_v46  ;;  %v13930_v4 = vld [vmem:[#allocation22_spill] sm:$0xff] }
 0x891   :  { %v5292_v55 = vsel %vm444_vm8, %v13924_v13, %v5290_v12  ;;  %v5264_v21 = vsel %vm432_vm2, %v5263_v29, %v5079_v56  ;;  %v11759_v50 = vsub.f32 %v13926_v63, %v11261_v6  ;;  %v11763_v11 = vsub.f32 %v13927_v57, %v11264_v31  ;;  %5389 = vadd.xlane.f32.xlu1 %v5388_v41  ;;  %v13929_v12 = vld [vmem:[#allocation45_spill] sm:$0xff]  ;;  %v13934_v41 = vld [vmem:[#allocation12_spill] sm:$0xff]  ;;  %v13982_v10 = vld [vmem:[#allocation50_spill] sm:$0xff] }
 0x892   :  { %5383 = vadd.xlane.f32.xlu0 %v5382_v37  ;;  %v5266_v36 = vsel %vm434_vm3, %v5265_v48, %v5264_v21  ;;  %v5273_v52 = vrot.slane %v5085_v14, 2  ;;  %v11768_v1 = vsub.f32 %v13929_v12, %v11267_v43  ;;  %v11772_v56 = vsub.f32 %v13930_v4, %v11270_v49  ;;  %v13932_v29 = vld [vmem:[#allocation13_spill] sm:$0xff] }
 0x893   :  { %13928 = vst [vmem:[#allocation72_spill] sm:$0xff] %v11763_v11  ;;  %v5268_v13 = vsel %vm436_vm4, %v5267_v35, %v5266_v36  ;;  %v11777_v62 = vsub.f32 %v13932_v29, %v11273_v16  ;;  %v11781_v37 = vsub.f32 %v13934_v41, %v11276_v34  ;;  %v13936_v14 = vld [vmem:[#allocation25_spill] sm:$0xff]  ;;  %v5275_v63 = vrot.slane %v5086_v8, 1 }
 0x894   :  { %13931 = vst [vmem:[#allocation83_spill] sm:$0xff] %v11772_v56  ;;  %v11785_v48 = vsub.f32 %v13936_v14, %v11279_v5  ;;  %v5270_v21 = vsel %vm438_vm5, %v5269_v54, %v5268_v13  ;;  %v5110_v57 = vmul.f32 %v11759_v50, %v11759_v50  ;;  %v5111_v35 = vmul.f32 %v11763_v11, %v11763_v11 }
 0x895   :  { %13933 = vst [vmem:[#allocation78_spill] sm:$0xff] %v11777_v62  ;;  %13935 = vst [vmem:[#allocation74_spill] sm:$0xff] %v11781_v37  ;;  %v5272_v36 = vsel %vm440_vm6, %v5271_v51, %v5270_v21  ;;  %v5112_v12 = vmul.f32 %v11768_v1, %v11768_v1  ;;  %v5113_v4 = vmul.f32 %v11772_v56, %v11772_v56  ;;  %5350 = vadd.xlane.f32.xlu1 %v11442_v23  ;;  %v13983_v56 = vld [vmem:[#allocation77_spill] sm:$0xff] }
 0x896   :  { %13937 = vst [vmem:[#allocation60_spill] sm:$0xff] %v11785_v48  ;;  %v5114_v29 = vmul.f32 %v11777_v62, %v11777_v62  ;;  %5344 = vadd.xlane.f32.xlu0 %v11483_v27  ;;  %v5274_v8 = vsel %vm442_vm7, %v5273_v52, %v5272_v36  ;;  %v5109_v54 = vmul.f32 %v11755_v24, %v11755_v24  ;;  %v5311_v13 = vrot.slane %v5110_v57, 7 }
 0x897   :  { %v5115_v51 = vmul.f32 %v11781_v37, %v11781_v37  ;;  %v5373_v41 = vsel %vm346_vm1, %v5292_v55, 0.0  ;;  %v5276_v14 = vsel %vm444_vm8, %v5275_v63, %v5274_v8  ;;  %v5116_v21 = vmul.f32 %v11785_v48, %v11785_v48  ;;  %v13981_v48 = vld [vmem:[#allocation26_spill] sm:$0xff] }
 0x898   :  { %v5313_v2 = vrot.slane %v5111_v35, 6  ;;  %v5367_v23 = vsel %vm346_vm1, %v5276_v14, 0.0  ;;  %v5312_v27 = vsel %vm432_vm2, %v5311_v13, %v5109_v54  ;;  %v5315_v52 = vrot.slane %v5112_v12, 5 }
 0x899   :  { %v5317_v36 = vrot.slane %v5113_v4, 4  ;;  %v5319_v17 = vrot.slane %v5114_v29, 3  ;;  %v11815_v57 = vsub.f32 %v11079_v28, %v11258_v46  ;;  %v11819_v55 = vsub.f32 %v11082_v42, %v11261_v6  ;;  %5362 = vadd.xlane.f32.xlu1 %v11568_v32 }
 0x89a   :  { %v5314_v3 = vsel %vm434_vm3, %v5313_v2, %v5312_v27  ;;  %5356 = vadd.xlane.f32.xlu0 %v5355_v45  ;;  %v5321_v35 = vrot.slane %v5115_v51, 2  ;;  %v11825_v12 = vsub.f32 %v11085_v26, %v11264_v31  ;;  %v11829_v2 = vsub.f32 %v11091_v19, %v11267_v43 }
 0x89b   :  { %v5316_v63 = vsel %vm436_vm4, %v5315_v52, %v5314_v3  ;;  %v11834_v42 = vsub.f32 %v11105_v40, %v11270_v49  ;;  %v11838_v46 = vsub.f32 %v11097_v20, %v11273_v16  ;;  %v11842_v6 = vsub.f32 %v11120_v59, %v11276_v34 }
 0x89c   :  { %13938 = vst [vmem:[#allocation48_spill] sm:$0xff] %v11825_v12  ;;  %v5318_v28 = vsel %vm438_vm5, %v5317_v36, %v5316_v63  ;;  %v5323_v31 = vrot.slane %v5116_v21, 1  ;;  %v11847_v19 = vsub.f32 %v11134_v0, %v11279_v5  ;;  %v5100_v43 = vmul.f32 %v11819_v55, %v11819_v55  ;;  %v5643_v63 = vld [vmem:[%s13163_s11] sm:$0xff] }
 0x89d   :  { %13939 = vst [vmem:[#allocation64_spill] sm:$0xff] %v11834_v42  ;;  %13940 = vst [vmem:[#allocation62_spill] sm:$0xff] %v11838_v46  ;;  %v5320_v26 = vsel %vm440_vm6, %v5319_v17, %v5318_v28  ;;  %v5101_v20 = vmul.f32 %v11825_v12, %v11825_v12  ;;  %v5102_v49 = vmul.f32 %v11829_v2, %v11829_v2  ;;  %5374 = vadd.xlane.f32.xlu1 %v5373_v41  ;;  %v5644_v28 = vld [vmem:[%s13163_s11 + $0x8] sm:$0x3] }
 0x89e   :  { %13941 = vst [vmem:[#allocation58_spill] sm:$0xff] %v11842_v6  ;;  %13942 = vst [vmem:[#allocation38_spill] sm:$0xff] %v11847_v19  ;;  %v5322_v40 = vsel %vm442_vm7, %v5321_v35, %v5320_v26  ;;  %v5103_v59 = vmul.f32 %v11834_v42, %v11834_v42  ;;  %5368 = vadd.xlane.f32.xlu0 %v5367_v23  ;;  %v5099_v0 = vmul.f32 %v11815_v57, %v11815_v57  ;;  %v5536_v35 = vld [vmem:[%s13162_s10 + $0x8] sm:$0x3]  ;;  %v5535_v26 = vld [vmem:[%s13162_s10] sm:$0xff] }
 0x89f   :  { %v5324_v16 = vsel %vm444_vm8, %v5323_v31, %v5322_v40  ;;  %v5104_v34 = vmul.f32 %v11838_v46, %v11838_v46  ;;  %v5295_v5 = vrot.slane %v5100_v43, 7  ;;  %v5105_v32 = vmul.f32 %v11842_v6, %v11842_v6  ;;  %v6311_v31 = vld [vmem:[%s13164_s12] sm:$0xff]  ;;  %v6312_v43 = vld [vmem:[%s13164_s12 + $0x8] sm:$0xff]  ;;  %v7315_v40 = vld [vmem:[%s13164_s12 + $0x10] sm:$0xff] }
 0x8a0   :  { %v5297_v17 = vrot.slane %v5101_v20, 6  ;;  %v5106_v3 = vmul.f32 %v11847_v19, %v11847_v19  ;;  %v5299_v4 = vrot.slane %v5102_v49, 5  ;;  %v5385_v29 = vsel %vm346_vm1, %v5324_v16, 0.0 }
 0x8a1   :  { %v5296_v45 = vsel %vm432_vm2, %v5295_v5, %v5099_v0  ;;  %v5301_v54 = vrot.slane %v5103_v59, 4  ;;  %5386 = vadd.xlane.f32.xlu1 %v5385_v29  ;;  %v5303_v13 = vrot.slane %v5104_v34, 3  ;;  %v5305_v14 = vrot.slane %v5105_v32, 2  ;;  %v7316_v59 = vld [vmem:[%s13164_s12 + $0x18] sm:$0xff] }
 0x8a2   :  { %v5298_v8 = vsel %vm434_vm3, %v5297_v17, %v5296_v45  ;;  %v5307_v23 = vrot.slane %v5106_v3, 1  ;;  %v13386_v20 = vmov 0.0|0.0   ;;  %v7448_v49 = vpack.c.bf16 %v6312_v43, %v6311_v31 }
 0x8a3   :  { %v5300_v51 = vsel %vm436_vm4, %v5299_v4, %v5298_v8  ;;  %7447 = vmatprep.subr.bf16.mxu1 %v13386_v20  ;;  %7444 = vmatprep.subr.bf16.mxu0 %v13386_v20  ;;  %v7445_v16 = vpack.c.bf16 %v7316_v59, %v7315_v40  ;;  %v13388_v0 = vmov 0.0  }
 0x8a4   :  { %v5302_v41 = vsel %vm438_vm5, %v5301_v54, %v5300_v51  ;;  %7385 = vmatprep.mubr.msk.f32.mxu1 %vm7882_vm12, %v13388_v0  ;;  %7378 = vmatprep.mubr.msk.f32.mxu0 %vm7882_vm12, %v13388_v0 }
 0x8a5   :  { %v5304_v21 = vsel %vm440_vm6, %v5303_v13, %v5302_v41  ;;  %7449 = vmatpush3.bf16.msra.mxu1 %v7448_v49  ;;  %7446 = vmatpush3.bf16.msra.mxu0 %v7445_v16 }
 0x8a6   :  { %v5306_v27 = vsel %vm442_vm7, %v5305_v14, %v5304_v21  ;;  %7453 = vmatprep.subr.bf16.mxu1 %v13386_v20  ;;  %7450 = vmatprep.subr.bf16.mxu0 %v13386_v20 }
 0x8a7   :  { %v5308_v52 = vsel %vm444_vm8, %v5307_v23, %v5306_v27 }
 0x8a8   :  { %v5379_v36 = vsel %vm346_vm1, %v5308_v52, 0.0 }
 0x8a9   :  { %5380 = vadd.xlane.f32.xlu0 %v5379_v36 }
 0x8b2   :  { %5647 = vperm.xlu1 %7489, %v5643_v63  }
 0x8b6   :  { %5543 = vperm.xlu1 %7489, %v5536_v35  }
 0x8ba   :  { %5651 = vperm.xlu1 %7489, %v5644_v28  }
 0x8bf   :  { %5539 = vperm.xlu0 %7490, %v5535_v26  }
 0x911   :  { %v5354_v34 = vpop.xlane.xlu1 %5353  ;;  %v5348_v5 = vpop.xlane.xlu0 %5347 }
 0x912   :  { %v5394_v32 = vmul.f32 0.0625, %v5354_v34  ;;  %v5392_v17 = vmul.f32 0.0625, %v5348_v5 }
 0x914   :  { %v5415_v3 = vsel %vm1280_vm11, %v5394_v32, 0.0  ;;  %v5414_v45 = vsel %vm1280_vm11, %v5392_v17, 0.0 }
 0x915   :  { %v5416_v4 = vadd.f32 %v5415_v3, %v5414_v45  ;;  %v5366_v29 = vpop.xlane.xlu1 %5365  ;;  %v5360_v8 = vpop.xlane.xlu0 %5359 }
 0x916   :  { %v5398_v54 = vmul.f32 0.0625, %v5366_v29  ;;  %v5396_v51 = vmul.f32 0.0625, %v5360_v8 }
 0x918   :  { %v5417_v13 = vsel %vm1280_vm11, %v5396_v51, 0.0  ;;  %v5419_v23 = vsel %vm1280_vm11, %v5398_v54, 0.0 }
 0x919   :  { %v5418_v41 = vadd.f32 %v5417_v13, %v5416_v4 }
 0x91a   :  { %v5378_v14 = vpop.xlane.xlu1 %5377  ;;  %v5372_v21 = vpop.xlane.xlu0 %5371 }
 0x91b   :  { %v5402_v27 = vmul.f32 0.0625, %v5378_v14  ;;  %v5400_v52 = vmul.f32 0.0625, %v5372_v21  ;;  %v5420_v36 = vadd.f32 %v5419_v23, %v5418_v41 }
 0x91d   :  { %v5421_v63 = vsel %vm1280_vm11, %v5400_v52, 0.0  ;;  %v5423_v31 = vsel %vm1280_vm11, %v5402_v27, 0.0 }
 0x91e   :  { %v5422_v35 = vadd.f32 %v5421_v63, %v5420_v36  ;;  %v5390_v28 = vpop.xlane.xlu1 %5389 }
 0x91f   :  { %v5384_v26 = vpop.xlane.xlu0 %5383  ;;  %v5406_v43 = vmul.f32 0.0625, %v5390_v28 }
 0x920   :  { %v5404_v40 = vmul.f32 0.0625, %v5384_v26  ;;  %v5424_v49 = vadd.f32 %v5423_v31, %v5422_v35 }
 0x921   :  { %v5427_v32 = vsel %vm1280_vm11, %v5406_v43, 0.0 }
 0x922   :  { %v5425_v59 = vsel %vm1280_vm11, %v5404_v40, 0.0  ;;  %v5351_v34 = vpop.xlane.xlu1 %5350 }
 0x923   :  { %v5426_v16 = vadd.f32 %v5425_v59, %v5424_v49  ;;  %v5345_v5 = vpop.xlane.xlu0 %5344  ;;  %v5393_v17 = vmul.f32 0.0625, %v5351_v34 }
 0x924   :  { %v5391_v3 = vmul.f32 0.0625, %v5345_v5 }
 0x925   :  { %v5428_v45 = vadd.f32 %v5427_v32, %v5426_v16 }
 0x926   :  { %v5363_v29 = vpop.xlane.xlu1 %5362  ;;  %v5407_v54 = vadd.f32 %v5393_v17, %v5391_v3 }
 0x927   :  { %v5430_v4 = vmul.f32 0.125, %v5428_v45  ;;  %v5357_v8 = vpop.xlane.xlu0 %5356  ;;  %v5397_v41 = vmul.f32 0.0625, %v5363_v29 }
 0x928   :  { %v5395_v51 = vmul.f32 0.0625, %v5357_v8 }
 0x929   :  { %v5432_v13 = vadd.f32 1e-05, %v5430_v4 }
 0x92a   :  { %v5408_v14 = vadd.f32 %v5407_v54, %v5395_v51  ;;  %v5375_v21 = vpop.xlane.xlu1 %5374 }
 0x92b   :  { %7611 = vrsqrt.f32 %v5432_v13  ;;  %v5369_v23 = vpop.xlane.xlu0 %5368  ;;  %v5401_v35 = vmul.f32 0.0625, %v5375_v21 }
 0x92c   :  { %v5409_v27 = vadd.f32 %v5408_v14, %v5397_v41  ;;  %v5399_v52 = vmul.f32 0.0625, %v5369_v23 }
 0x92e   :  { %v5387_v36 = vpop.xlane.xlu1 %5386  ;;  %v5410_v63 = vadd.f32 %v5409_v27, %v5399_v52  ;;  %v11955_v52 = vld [vmem:[%s13164_s12 + $0x30] sm:$0xff] }
 0x92f   :  { %v5405_v5 = vmul.f32 0.0625, %v5387_v36 }
 0x930   :  { %v5411_v26 = vadd.f32 %v5410_v63, %v5401_v35  ;;  %v11967_v63 = vld [vmem:[%s13164_s12 + $0x20] sm:$0xff]  ;;  %v11972_v35 = vld [vmem:[%s13164_s12 + $0x28] sm:$0xff] }
 0x931   :  { %13950 = vst [vmem:[#allocation104_spill] sm:$0xff] %v11967_v63 }
 0x932   :  { %v11916_v28 = vpop.permute.xlu1 %5647 }
 0x933   :  { %13943 = vst [vmem:[#allocation51_spill] sm:$0xff] %v11916_v28 }
 0x935   :  { %v11918_v31 = vpop.eup %7611 }
 0x936   :  { %13944 = vst [vmem:[#allocation56_spill] sm:$0xff] %v11918_v31  ;;  %v5381_v43 = vpop.xlane.xlu0 %5380  ;;  %v5463_v49 = vmul.f32 %v11918_v31, %v11598_v38  ;;  %v5473_v59 = vmul.f32 %v11918_v31, %v11595_v33  ;;  %v11924_v16 = vpop.permute.xlu1 %5543  ;;  %v5483_v34 = vmul.f32 %v11918_v31, %v11604_v53  ;;  %v5493_v13 = vmul.f32 %v11918_v31, %v11601_v58  ;;  %v11962_v58 = vld [vmem:[%s13164_s12 + $0x38] sm:$0xff] }
 0x937   :  { %v5403_v40 = vmul.f32 0.0625, %v5381_v43  ;;  %13945 = vst [vmem:[#allocation49_spill] sm:$0xff] %v11924_v16  ;;  %v11981_v43 = vld [vmem:[%s13164_s12 + $0x50] sm:$0xff] }
 0x938   :  { %v5571_v3 = vmul.f32 %v11924_v16, %v5463_v49  ;;  %v5581_v45 = vmul.f32 %v11924_v16, %v5473_v59  ;;  %v5591_v29 = vmul.f32 %v11924_v16, %v5483_v34  ;;  %v5601_v23 = vmul.f32 %v11924_v16, %v5493_v13  ;;  %13952 = vst [vmem:[#allocation106_spill] sm:$0xff] %v11981_v43  ;;  %v13961_v34 = vld [vmem:[#allocation28_spill] sm:$0xff] }
 0x939   :  { %v5412_v32 = vadd.f32 %v5411_v26, %v5403_v40  ;;  %v11986_v40 = vld [vmem:[%s13164_s12 + $0x58] sm:$0xff]  ;;  %v11992_v59 = vrot.slane %v11916_v28, 1  ;;  %v12025_v13 = vrot.slane %v11916_v28, 4 }
 0x93a   :  { %v11930_v4 = vpop.permute.xlu1 %5651  ;;  %13953 = vst [vmem:[#allocation61_spill] sm:$0xff] %v11986_v40 }
 0x93b   :  { %v5413_v17 = vadd.f32 %v5412_v32, %v5405_v5  ;;  %13946 = vst [vmem:[#allocation29_spill] sm:$0xff] %v11930_v4  ;;  %v11934_v8 = vadd.f32 %v11930_v4, %v5571_v3  ;;  %v11937_v33 = vadd.f32 %v11930_v4, %v5581_v45  ;;  %v11940_v53 = vadd.f32 %v11930_v4, %v5591_v29 }
 0x93c   :  { %v11975_v26 = vadd.f32 %v11930_v4, %v5601_v23  ;;  %v11998_v5 = vrot.slane %v11916_v28, 3  ;;  %v12001_v32 = vrot.slane %v11916_v28, 2  ;;  %v12009_v45 = vrot.slane %v11924_v16, 1  ;;  %13959 = vst [vmem:[#allocation80_spill] sm:$0xff] %v12025_v13  ;;  %v13960_v23 = vld [vmem:[#allocation35_spill] sm:$0xff] }
 0x93d   :  { %v5429_v38 = vmul.f32 0.125, %v5413_v17  ;;  %13947 = vst [vmem:[#allocation79_spill] sm:$0xff] %v11934_v8  ;;  %13948 = vst [vmem:[#allocation39_spill] sm:$0xff] %v11937_v33  ;;  %v5759_v51 = vand.u32 2147483647, %v11934_v8  ;;  %v12004_v17 = vrot.slane %v11916_v28, 5 }
 0x93e   :  { %13949 = vst [vmem:[#allocation54_spill] sm:$0xff] %v11940_v53  ;;  %v5769_v41 = vand.u32 2147483647, %v11937_v33  ;;  %v5779_v14 = vand.u32 2147483647, %v11940_v53  ;;  %13951 = vst [vmem:[#allocation105_spill] sm:$0xff] %v11975_v26  ;;  %v12035_v0 = vpop.permute.xlu0 %5539 }
 0x93f   :  { %v5431_v54 = vadd.f32 1e-05, %v5429_v38  ;;  %v11947_v21 = vadd.f32 1.0, %v5759_v51  ;;  %13954 = vst [vmem:[#allocation40_spill] sm:$0xff] %v12001_v32  ;;  %13955 = vst [vmem:[#allocation55_spill] sm:$0xff] %v12004_v17  ;;  %v12022_v51 = vld [vmem:[%s13164_s12 + $0x48] sm:$0xff] }
 0x940   :  { %v11950_v27 = vadd.f32 1.0, %v5769_v41  ;;  %v11957_v36 = vadd.f32 1.0, %v5779_v14  ;;  %13956 = vst [vmem:[#allocation17_spill] sm:$0xff] %v12009_v45  ;;  %v5789_v29 = vand.u32 2147483647, %v11975_v26  ;;  %13958 = vst [vmem:[#allocation37_spill] sm:$0xff] %v12022_v51 }
 0x941   :  { %7613 = vrsqrt.f32 %v5431_v54  ;;  %v12017_v54 = vld [vmem:[%s13164_s12 + $0x40] sm:$0xff]  ;;  %13962 = vst [vmem:[#allocation34_spill] sm:$0xff] %v12035_v0 }
 0x942   :  { %7615 = vrcp.f32 %v11947_v21  ;;  %13957 = vst [vmem:[#allocation19_spill] sm:$0xff] %v12017_v54  ;;  %v13963_v26 = vld [vmem:[#allocation84_spill] sm:$0xff]  ;;  %v12056_v45 = vadd.f32 1.0, %v5789_v29 }
 0x943   :  { %7617 = vrcp.f32 %v11950_v27 }
 0x944   :  { %7619 = vrcp.f32 %v11957_v36  ;;  %13965 = vst [vmem:[#allocation18_spill] sm:$0xff] %v12056_v45 }
 0x945   :  { %7621 = vrcp.f32 %v12056_v45 }
 0x94b   :  { %v12006_v3 = vpop.eup %7613 }
 0x94c   :  { %v5455_v41 = vmul.f32 %v12006_v3, %v11335_v7  ;;  %v5465_v14 = vmul.f32 %v12006_v3, %v11283_v61  ;;  %v5475_v38 = vmul.f32 %v12006_v3, %v13960_v23  ;;  %v5485_v20 = vmul.f32 %v12006_v3, %v13961_v34 }
 0x94d   :  { %v5495_v49 = vmul.f32 %v12006_v3, %v11592_v22  ;;  %v5505_v8 = vmul.f32 %v12006_v3, %v13963_v26  ;;  %v5515_v7 = vmul.f32 %v12006_v3, %v11815_v57  ;;  %v5525_v61 = vmul.f32 %v12006_v3, %v11755_v24 }
 0x94e   :  { %v5563_v53 = vmul.f32 %v12035_v0, %v5455_v41  ;;  %v5573_v23 = vmul.f32 %v12035_v0, %v5465_v14  ;;  %v5583_v34 = vmul.f32 %v12035_v0, %v5475_v38  ;;  %v12051_v22 = vrot.slane %v11930_v4, 1 }
 0x94f   :  { %v5593_v26 = vmul.f32 %v12035_v0, %v5485_v20  ;;  %v5603_v16 = vmul.f32 %v12035_v0, %v5495_v49  ;;  %v5613_v57 = vmul.f32 %v12035_v0, %v5505_v8  ;;  %v5623_v24 = vmul.f32 %v12035_v0, %v5515_v7  ;;  %v12075_v49 = vpop.eup %7615 }
 0x950   :  { %13964 = vst [vmem:[#allocation65_spill] sm:$0xff] %v12051_v22  ;;  %v5633_v41 = vmul.f32 %v12035_v0, %v5525_v61  ;;  %v12061_v38 = vrot.slane %v12035_v0, 1  ;;  %v12064_v14 = vadd.f32 %v11916_v28, %v5563_v53  ;;  %v12067_v33 = vadd.f32 %v11916_v28, %v5573_v23  ;;  %13966 = vst [vmem:[#allocation53_spill] sm:$0xff] %v12075_v49  ;;  %v12089_v23 = vpop.eup %7617 }
 0x951   :  { %v12070_v20 = vadd.f32 %v11916_v28, %v5583_v34  ;;  %v12073_v8 = vrot.slane %v12035_v0, 3  ;;  %v12078_v29 = vadd.f32 %v11916_v28, %v5593_v26  ;;  %v12081_v7 = vadd.f32 %v11916_v28, %v5603_v16  ;;  %13969 = vst [vmem:[#allocation21_spill] sm:$0xff] %v12089_v23  ;;  %v12103_v22 = vpop.eup %7619 }
 0x952   :  { %v12084_v53 = vrot.slane %v12035_v0, 2  ;;  %v12087_v61 = vrot.slane %v12035_v0, 5  ;;  %v12092_v34 = vadd.f32 %v11916_v28, %v5613_v57  ;;  %v12095_v4 = vadd.f32 %v11916_v28, %v5623_v24  ;;  %13971 = vst [vmem:[#allocation45_spill] sm:$0xff] %v12103_v22 }
 0x953   :  { %v12098_v26 = vadd.f32 %v11916_v28, %v5633_v41  ;;  %v12101_v16 = vrot.slane %v12035_v0, 4  ;;  %v5751_v39 = vand.u32 2147483647, %v12064_v14  ;;  %v5761_v25 = vand.u32 2147483647, %v12067_v33 }
 0x954   :  { %13967 = vst [vmem:[#allocation31_spill] sm:$0xff] %v12084_v53  ;;  %13968 = vst [vmem:[#allocation73_spill] sm:$0xff] %v12087_v61  ;;  %v12109_v57 = vrot.slane %v12035_v0, 7  ;;  %v12113_v24 = vmul.f32 %v12075_v49, %v11947_v21  ;;  %v5771_v41 = vand.u32 2147483647, %v12070_v20  ;;  %v12120_v45 = vmul.f32 %v12089_v23, %v11950_v27  ;;  %v12139_v27 = vld [vmem:[%s13164_s12 + $0x78] sm:$0xff] }
 0x955   :  { %13970 = vst [vmem:[#allocation46_spill] sm:$0xff] %v12101_v16  ;;  %v5781_v44 = vand.u32 2147483647, %v12078_v29  ;;  %v5791_v31 = vand.u32 2147483647, %v12081_v7  ;;  %v12127_v21 = vmul.f32 %v12103_v22, %v11957_v36  ;;  %v5831_v49 = vadd.f32 1.0, %v5751_v39 }
 0x956   :  { %13972 = vst [vmem:[#allocation22_spill] sm:$0xff] %v12109_v57  ;;  %13973 = vst [vmem:[#allocation13_spill] sm:$0xff] %v12113_v24  ;;  %v5801_v37 = vand.u32 2147483647, %v12092_v34  ;;  %v5811_v6 = vand.u32 2147483647, %v12095_v4 }
 0x957   :  { %13974 = vst [vmem:[#allocation12_spill] sm:$0xff] %v12120_v45  ;;  %v5821_v0 = vand.u32 2147483647, %v12098_v26  ;;  %13975 = vst [vmem:[#allocation25_spill] sm:$0xff] %v12127_v21  ;;  %v5841_v24 = vadd.f32 1.0, %v5761_v25  ;;  %v12129_v15 = vadd.f32 1.0, %v5771_v41  ;;  %7623 = vrcp.f32 %v5831_v49 }
 0x958   :  { %v12134_v57 = vld [vmem:[%s13164_s12 + $0x70] sm:$0xff]  ;;  %13977 = vst [vmem:[#allocation28_spill] sm:$0xff] %v12139_v27  ;;  %v12141_v23 = vadd.f32 1.0, %v5781_v44  ;;  %v12143_v45 = vadd.f32 1.0, %v5791_v31  ;;  %v12145_v36 = vadd.f32 1.0, %v5801_v37  ;;  %v12147_v39 = vadd.f32 1.0, %v5811_v6  ;;  %v12175_v27 = vpop.eup %7621 }
 0x959   :  { %13976 = vst [vmem:[#allocation35_spill] sm:$0xff] %v12134_v57  ;;  %v12149_v25 = vadd.f32 1.0, %v5821_v0  ;;  %v5437_v41 = vrot.slane %v12006_v3, 1  ;;  %v12153_v22 = vrot.slane %v12006_v3, 3  ;;  %7625 = vrcp.f32 %v5841_v24  ;;  %v13979_v6 = vld [vmem:[#allocation33_spill] sm:$0xff]  ;;  %v13980_v31 = vld [vmem:[#allocation75_spill] sm:$0xff] }
 0x95a   :  { %v12156_v21 = vrot.slane %v12006_v3, 2  ;;  %v12159_v44 = vrot.slane %v12006_v3, 5  ;;  %7627 = vrcp.f32 %v12129_v15  ;;  %13984 = vst [vmem:[#allocation33_spill] sm:$0xff] %v12175_v27 }
 0x95b   :  { %v5456_v0 = vmul.f32 %v5437_v41, %v13979_v6  ;;  %v5466_v28 = vmul.f32 %v5437_v41, %v13980_v31  ;;  %v5476_v19 = vmul.f32 %v5437_v41, %v13981_v48  ;;  %7629 = vrcp.f32 %v12141_v23 }
 0x95c   :  { %13978 = vst [vmem:[#allocation84_spill] sm:$0xff] %v12159_v44  ;;  %v5486_v13 = vmul.f32 %v5437_v41, %v13982_v10  ;;  %v5496_v16 = vmul.f32 %v5437_v41, %v11611_v60  ;;  %v5506_v42 = vmul.f32 %v5437_v41, %v13983_v56  ;;  %7631 = vrcp.f32 %v12143_v45 }
 0x95d   :  { %v5516_v37 = vmul.f32 %v5437_v41, %v11819_v55  ;;  %v5526_v57 = vmul.f32 %v5437_v41, %v11759_v50  ;;  %v5564_v6 = vmul.f32 %v12061_v38, %v5456_v0  ;;  %7633 = vrcp.f32 %v12145_v36 }
 0x95e   :  { %v5574_v48 = vmul.f32 %v12061_v38, %v5466_v28  ;;  %v5584_v10 = vmul.f32 %v12061_v38, %v5476_v19  ;;  %v5594_v60 = vmul.f32 %v12061_v38, %v5486_v13  ;;  %7635 = vrcp.f32 %v12147_v39 }
 0x95f   :  { %v5604_v56 = vmul.f32 %v12061_v38, %v5496_v16  ;;  %v5614_v55 = vmul.f32 %v12061_v38, %v5506_v42  ;;  %v5624_v50 = vmul.f32 %v12061_v38, %v5516_v37  ;;  %7637 = vrcp.f32 %v12149_v25 }
 0x960   :  { %v5634_v41 = vmul.f32 %v12061_v38, %v5526_v57  ;;  %v12188_v0 = vadd.f32 %v11992_v59, %v5564_v6  ;;  %v12191_v28 = vadd.f32 %v11992_v59, %v5574_v48  ;;  %v12194_v19 = vadd.f32 %v11992_v59, %v5584_v10 }
 0x961   :  { %v12197_v13 = vadd.f32 %v11992_v59, %v5594_v60  ;;  %v12200_v42 = vadd.f32 %v11992_v59, %v5604_v56  ;;  %v12203_v16 = vadd.f32 %v11992_v59, %v5614_v55  ;;  %v12206_v38 = vadd.f32 %v11992_v59, %v5624_v50  ;;  %v7624_v6 = vpop.eup %7623  ;;  %v13985_v56 = vld [vmem:[#allocation57_spill] sm:$0xff] }
 0x962   :  { %v12209_v57 = vadd.f32 %v11992_v59, %v5634_v41  ;;  %v5752_v37 = vand.u32 2147483647, %v12188_v0  ;;  %v5762_v31 = vand.u32 2147483647, %v12191_v28  ;;  %v5772_v48 = vand.u32 2147483647, %v12194_v19 }
 0x963   :  { %v5782_v10 = vand.u32 2147483647, %v12197_v13  ;;  %v5792_v60 = vand.u32 2147483647, %v12200_v42  ;;  %v12218_v55 = vmul.f32 %v12153_v22, %v13985_v56  ;;  %v7626_v50 = vpop.eup %7625  ;;  %v5991_v27 = vmul.f32 %v7624_v6, %v5831_v49 }
 0x964   :  { %v5802_v59 = vand.u32 2147483647, %v12203_v16  ;;  %v5812_v41 = vand.u32 2147483647, %v12206_v38  ;;  %v5822_v30 = vand.u32 2147483647, %v12209_v57  ;;  %v7628_v54 = vpop.eup %7627  ;;  %v6001_v51 = vmul.f32 %v7626_v50, %v5841_v24 }
 0x965   :  { %v12223_v17 = vadd.f32 1.0, %v5752_v37  ;;  %v12225_v61 = vadd.f32 1.0, %v5762_v31  ;;  %v12227_v43 = vadd.f32 1.0, %v5772_v48  ;;  %v7630_v40 = vpop.eup %7629  ;;  %v6011_v56 = vmul.f32 %v7628_v54, %v12129_v15 }
 0x966   :  { %v6071_v62 = vsub.f32 2.0, %v5991_v27  ;;  %v12230_v46 = vadd.f32 1.0, %v5782_v10  ;;  %v12232_v49 = vadd.f32 1.0, %v5792_v60  ;;  %v7632_v9 = vpop.eup %7631  ;;  %v6021_v44 = vmul.f32 %v7630_v40, %v12141_v23 }
 0x967   :  { %v6081_v32 = vsub.f32 2.0, %v6001_v51  ;;  %v12235_v53 = vadd.f32 1.0, %v5802_v59  ;;  %v12237_v24 = vadd.f32 1.0, %v5812_v41  ;;  %v7634_v37 = vpop.eup %7633  ;;  %v6031_v31 = vmul.f32 %v7632_v9, %v12143_v45 }
 0x968   :  { %v6091_v48 = vsub.f32 2.0, %v6011_v56  ;;  %v6151_v11 = vmul.f32 %v7624_v6, %v6071_v62  ;;  %v12240_v12 = vadd.f32 1.0, %v5822_v30  ;;  %v7636_v15 = vpop.eup %7635  ;;  %v6041_v27 = vmul.f32 %v7634_v37, %v12145_v36 }
 0x969   :  { %v6101_v10 = vsub.f32 2.0, %v6021_v44  ;;  %v6161_v60 = vmul.f32 %v7626_v50, %v6081_v32  ;;  %7639 = vrcp.f32 %v12223_v17  ;;  %v7638_v23 = vpop.eup %7637  ;;  %v6051_v51 = vmul.f32 %v7636_v15, %v12147_v39 }
 0x96a   :  { %v6111_v59 = vsub.f32 2.0, %v6031_v31  ;;  %v6171_v41 = vmul.f32 %v7628_v54, %v6091_v48  ;;  %v6231_v47 = vmul.f32 %v6151_v11, %v12064_v14  ;;  %v6061_v45 = vmul.f32 %v7638_v23, %v12149_v25 }
 0x96b   :  { %v6121_v56 = vsub.f32 2.0, %v6041_v27  ;;  %v6181_v62 = vmul.f32 %v7630_v40, %v6101_v10  ;;  %v6241_v30 = vmul.f32 %v6161_v60, %v12067_v33  ;;  %v6131_v6 = vsub.f32 2.0, %v6051_v51 }
 0x96c   :  { %v6191_v63 = vmul.f32 %v7632_v9, %v6111_v59  ;;  %v6251_v36 = vmul.f32 %v6171_v41, %v12070_v20  ;;  %7641 = vrcp.f32 %v12225_v61  ;;  %v6141_v32 = vsub.f32 2.0, %v6061_v45  ;;  %v13988_v59 = vld [vmem:[#allocation85_spill] sm:$0xff] }
 0x96d   :  { %v6201_v44 = vmul.f32 %v7634_v37, %v6121_v56  ;;  %v6261_v39 = vmul.f32 %v6181_v62, %v12078_v29  ;;  %v6418_v50 = vrot.slane %v6241_v30, 7  ;;  %v6211_v54 = vmul.f32 %v7636_v15, %v6131_v6  ;;  %v13989_v62 = vld [vmem:[#allocation87_spill] sm:$0xff] }
 0x96e   :  { %v6271_v11 = vmul.f32 %v6191_v63, %v12081_v7  ;;  %v6420_v14 = vrot.slane %v6251_v36, 6  ;;  %7643 = vrcp.f32 %v12227_v43  ;;  %v6221_v40 = vmul.f32 %v7638_v23, %v6141_v32 }
 0x96f   :  { %v6281_v33 = vmul.f32 %v6201_v44, %v12092_v34  ;;  %v6419_v9 = vsel %vm432_vm2, %v6418_v50, %v6231_v47  ;;  %v6422_v25 = vrot.slane %v6261_v39, 5  ;;  %v6291_v20 = vmul.f32 %v6211_v54, %v12095_v4  ;;  %v13986_v47 = vld [vmem:[#allocation66_spill] sm:$0xff] }
 0x970   :  { %v6421_v31 = vsel %vm434_vm3, %v6420_v14, %v6419_v9  ;;  %v6424_v37 = vrot.slane %v6271_v11, 4  ;;  %7645 = vrcp.f32 %v12230_v46  ;;  %v6301_v29 = vmul.f32 %v6221_v40, %v12098_v26  ;;  %v13987_v26 = vld [vmem:[#allocation32_spill] sm:$0xff] }
 0x971   :  { %v6423_v63 = vsel %vm436_vm4, %v6422_v25, %v6421_v31  ;;  %v6426_v7 = vrot.slane %v6281_v33, 3  ;;  %7647 = vrcp.f32 %v12232_v49  ;;  %v6428_v34 = vrot.slane %v6291_v20, 2 }
 0x972   :  { %v6425_v48 = vsel %vm438_vm5, %v6424_v37, %v6423_v63  ;;  %7649 = vrcp.f32 %v12235_v53  ;;  %v5468_v4 = vmul.f32 %v12153_v22, %v13986_v47  ;;  %v6430_v10 = vrot.slane %v6301_v29, 1 }
 0x973   :  { %v7640_v15 = vpop.eup %7639  ;;  %v6427_v27 = vsel %vm440_vm6, %v6426_v7, %v6425_v48  ;;  %7651 = vrcp.f32 %v12237_v24  ;;  %v5478_v60 = vmul.f32 %v12153_v22, %v13987_v26  ;;  %v5488_v41 = vmul.f32 %v12153_v22, %v13988_v59 }
 0x974   :  { %v6429_v23 = vsel %vm442_vm7, %v6428_v34, %v6427_v27  ;;  %7653 = vrcp.f32 %v12240_v12  ;;  %v5992_v51 = vmul.f32 %v7640_v15, %v12223_v17  ;;  %v5498_v56 = vmul.f32 %v12153_v22, %v11691_v18 }
 0x975   :  { %v6431_v45 = vsel %vm444_vm8, %v6430_v10, %v6429_v23  ;;  %v5508_v30 = vmul.f32 %v12153_v22, %v13989_v62  ;;  %v5518_v6 = vmul.f32 %v12153_v22, %v11829_v2  ;;  %v5528_v17 = vmul.f32 %v12153_v22, %v11768_v1 }
 0x976   :  { %v7642_v36 = vpop.eup %7641  ;;  %7386 = vmatmul.mubr.msk.f32.vlgmr.msra.gmra.mrb[0].mxu1 %vm346_vm1, %v6431_v45  ;;  %v6072_v32 = vsub.f32 2.0, %v5992_v51  ;;  %v5566_v44 = vmul.f32 %v12073_v8, %v12218_v55  ;;  %v5576_v39 = vmul.f32 %v12073_v8, %v5468_v4  ;;  %v13990_v18 = vpack.c.bf16 %v11962_v58, %v11955_v52 }
 0x977   :  { %v6002_v50 = vmul.f32 %v7642_v36, %v12225_v61  ;;  %v13991_v54 = vmov 0.0   ;;  %v5586_v2 = vmul.f32 %v12073_v8, %v5478_v60  ;;  %v5596_v11 = vmul.f32 %v12073_v8, %v5488_v41 }
 0x978   :  { %7455 = vmatpush3.bf16.msra.mxu1 %v13990_v18  ;;  %7399 = vmatprep.mubr.msk.f32.mxu1 %vm7882_vm12, %v13991_v54  ;;  %v12296_v1 = vrot.slane %v12006_v3, 4  ;;  %v7644_v22 = vpop.eup %7643  ;;  %v6152_v55 = vmul.f32 %v7640_v15, %v6072_v32  ;;  %v5606_v14 = vmul.f32 %v12073_v8, %v5498_v56  ;;  %v5616_v40 = vmul.f32 %v12073_v8, %v5508_v30 }
 0x979   :  { %v5626_v52 = vmul.f32 %v12073_v8, %v5518_v6  ;;  %v13992_v58 = vmov 0.0|0.0   ;;  %v6012_v61 = vmul.f32 %v7644_v22, %v12227_v43  ;;  %v6082_v33 = vsub.f32 2.0, %v6002_v50 }
 0x97a   :  { %7459 = vmatprep.subr.bf16.mxu1 %v13992_v58  ;;  %v5636_v9 = vmul.f32 %v12073_v8, %v5528_v17  ;;  %v12305_v25 = vadd.f32 %v11998_v5, %v5566_v44  ;;  %v7646_v20 = vpop.eup %7645  ;;  %v6232_v31 = vmul.f32 %v6152_v55, %v12188_v0  ;;  %v12309_v37 = vadd.f32 %v11998_v5, %v5576_v39 }
 0x97b   :  { %v12312_v29 = vadd.f32 %v11998_v5, %v5586_v2  ;;  %v12315_v63 = vadd.f32 %v11998_v5, %v5596_v11  ;;  %v7648_v7 = vpop.eup %7647  ;;  %v6022_v43 = vmul.f32 %v7646_v20, %v12230_v46  ;;  %v6092_v48 = vsub.f32 2.0, %v6012_v61 }
 0x97c   :  { %v6162_v8 = vmul.f32 %v7642_v36, %v6082_v33  ;;  %v12319_v34 = vadd.f32 %v11998_v5, %v5606_v14  ;;  %v7650_v47 = vpop.eup %7649  ;;  %v6032_v0 = vmul.f32 %v7648_v7, %v12232_v49  ;;  %v12323_v4 = vadd.f32 %v11998_v5, %v5616_v40 }
 0x97d   :  { %v12326_v15 = vadd.f32 %v11998_v5, %v5626_v52  ;;  %v12329_v27 = vadd.f32 %v11998_v5, %v5636_v9  ;;  %v7652_v10 = vpop.eup %7651  ;;  %v6042_v46 = vmul.f32 %v7650_v47, %v12235_v53  ;;  %v6102_v26 = vsub.f32 2.0, %v6022_v43 }
 0x97e   :  { %v6172_v60 = vmul.f32 %v7644_v22, %v6092_v48  ;;  %v6242_v23 = vmul.f32 %v6162_v8, %v12191_v28  ;;  %v7654_v51 = vpop.eup %7653  ;;  %v6052_v59 = vmul.f32 %v7652_v10, %v12237_v24  ;;  %v6112_v49 = vsub.f32 2.0, %v6032_v0 }
 0x97f   :  { %v5754_v41 = vand.u32 2147483647, %v12305_v25  ;;  %v5764_v45 = vand.u32 2147483647, %v12309_v37  ;;  %v6062_v56 = vmul.f32 %v7654_v51, %v12240_v12  ;;  %v6122_v62 = vsub.f32 2.0, %v6042_v46 }
 0x980   :  { %v6182_v5 = vmul.f32 %v7646_v20, %v6102_v26  ;;  %v6252_v30 = vmul.f32 %v6172_v60, %v12194_v19  ;;  %v6132_v6 = vsub.f32 2.0, %v6052_v59  ;;  %v6192_v53 = vmul.f32 %v7648_v7, %v6112_v49  ;;  %v13993_v60 = vld [vmem:[#allocation70_spill] sm:$0xff] }
 0x981   :  { %v6324_v36 = vrot.slane %v6242_v23, 7  ;;  %v5774_v32 = vand.u32 2147483647, %v12312_v29  ;;  %v6142_v28 = vsub.f32 2.0, %v6062_v56  ;;  %v6202_v17 = vmul.f32 %v7650_v47, %v6122_v62  ;;  %v13995_v49 = vld [vmem:[#allocation30_spill] sm:$0xff]  ;;  %v13998_v62 = vld [vmem:[#allocation15_spill] sm:$0xff] }
 0x982   :  { %v6262_v24 = vmul.f32 %v6182_v5, %v12197_v13  ;;  %v6326_v44 = vrot.slane %v6252_v30, 6  ;;  %v6212_v39 = vmul.f32 %v7652_v10, %v6132_v6  ;;  %v6272_v18 = vmul.f32 %v6192_v53, %v12200_v42  ;;  %v13999_v30 = vld [vmem:[#allocation89_spill] sm:$0xff]  ;;  %v14000_v53 = vld [vmem:[#allocation63_spill] sm:$0xff] }
 0x983   :  { %v6325_v50 = vsel %vm432_vm2, %v6324_v36, %v6232_v31  ;;  %v5784_v12 = vand.u32 2147483647, %v12315_v63  ;;  %v6222_v2 = vmul.f32 %v7654_v51, %v6142_v28  ;;  %v6282_v19 = vmul.f32 %v6202_v17, %v12203_v16  ;;  %v13994_v51 = vld [vmem:[#allocation47_spill] sm:$0xff]  ;;  %v14002_v28 = vld [vmem:[#allocation72_spill] sm:$0xff] }
 0x984   :  { %v6327_v11 = vsel %vm434_vm3, %v6326_v44, %v6325_v50  ;;  %v6328_v22 = vrot.slane %v6262_v24, 5  ;;  %v6292_v55 = vmul.f32 %v6212_v39, %v12206_v38  ;;  %v6330_v14 = vrot.slane %v6272_v18, 4  ;;  %v14003_v24 = vld [vmem:[#allocation31_spill] sm:$0xff] }
 0x985   :  { %v5794_v40 = vand.u32 2147483647, %v12319_v34  ;;  %v5804_v13 = vand.u32 2147483647, %v12323_v4  ;;  %v6302_v52 = vmul.f32 %v6222_v2, %v12209_v57  ;;  %v6332_v61 = vrot.slane %v6282_v19, 3 }
 0x986   :  { %v6329_v42 = vsel %vm436_vm4, %v6328_v22, %v6327_v11  ;;  %v5814_v33 = vand.u32 2147483647, %v12326_v15  ;;  %v6334_v16 = vrot.slane %v6292_v55, 2  ;;  %v5824_v20 = vand.u32 2147483647, %v12329_v27  ;;  %v14004_v11 = vld [vmem:[#allocation40_spill] sm:$0xff] }
 0x987   :  { %v6331_v9 = vsel %vm438_vm5, %v6330_v14, %v6329_v42  ;;  %v5834_v31 = vadd.f32 1.0, %v5754_v41  ;;  %v6336_v7 = vrot.slane %v6302_v52, 1  ;;  %v5844_v43 = vadd.f32 1.0, %v5764_v45  ;;  %v13996_v45 = vld [vmem:[#allocation104_spill] sm:$0xff] }
 0x988   :  { %v6333_v38 = vsel %vm440_vm6, %v6332_v61, %v6331_v9  ;;  %v12354_v48 = vadd.f32 1.0, %v5774_v32  ;;  %v12357_v57 = vadd.f32 1.0, %v5784_v12  ;;  %v12359_v47 = vadd.f32 1.0, %v5794_v40 }
 0x989   :  { %v6335_v8 = vsel %vm442_vm7, %v6334_v16, %v6333_v38  ;;  %v12361_v0 = vadd.f32 1.0, %v5804_v13  ;;  %v12364_v46 = vadd.f32 1.0, %v5814_v33  ;;  %v12366_v26 = vadd.f32 1.0, %v5824_v20  ;;  %v14005_v38 = vld [vmem:[#allocation81_spill] sm:$0xff] }
 0x98a   :  { %v6337_v10 = vsel %vm444_vm8, %v6336_v7, %v6335_v8  ;;  %7655 = vrcp.f32 %v5834_v31  ;;  %v5457_v23 = vmul.f32 %v12156_v21, %v13993_v60  ;;  %v5467_v59 = vmul.f32 %v12156_v21, %v13994_v51  ;;  %v14006_v7 = vld [vmem:[#allocation84_spill] sm:$0xff] }
 0x98b   :  { %7379 = vmatmul.mubr.msk.f32.vlgmr.msra.gmra.mrb[0].mxu0 %vm346_vm1, %v6337_v10  ;;  %7657 = vrcp.f32 %v5844_v43  ;;  %v5477_v41 = vmul.f32 %v12156_v21, %v13995_v49  ;;  %v13997_v56 = vpack.c.bf16 %v11972_v35, %v13996_v45  ;;  %v5487_v5 = vmul.f32 %v12156_v21, %v13998_v62  ;;  %v14001_v35 = vld [vmem:[#allocation48_spill] sm:$0xff] }
 0x98c   :  { %7659 = vrcp.f32 %v12354_v48  ;;  %7392 = vmatprep.mubr.msk.f32.mxu0 %vm7882_vm12, %v13991_v54  ;;  %v5497_v6 = vmul.f32 %v12156_v21, %v13999_v30  ;;  %v5507_v36 = vmul.f32 %v12156_v21, %v14000_v53  ;;  %v5517_v32 = vmul.f32 %v12156_v21, %v14001_v35 }
 0x98d   :  { %7452 = vmatpush3.bf16.msra.mxu0 %v13997_v56  ;;  %7661 = vrcp.f32 %v12357_v57  ;;  %v5527_v17 = vmul.f32 %v12156_v21, %v14002_v28  ;;  %v5565_v44 = vmul.f32 %v14003_v24, %v5457_v23  ;;  %v5575_v39 = vmul.f32 %v14003_v24, %v5467_v59  ;;  %v14007_v59 = vld [vmem:[#allocation68_spill] sm:$0xff] }
 0x98e   :  { %7456 = vmatprep.subr.bf16.mxu0 %v13992_v58  ;;  %7663 = vrcp.f32 %v12359_v47  ;;  %v5585_v18 = vmul.f32 %v14003_v24, %v5477_v41  ;;  %v5595_v50 = vmul.f32 %v14003_v24, %v5487_v5  ;;  %v5605_v12 = vmul.f32 %v14003_v24, %v5497_v6 }
 0x98f   :  { %7665 = vrcp.f32 %v12361_v0  ;;  %v5615_v2 = vmul.f32 %v14003_v24, %v5507_v36  ;;  %v5625_v19 = vmul.f32 %v14003_v24, %v5517_v32  ;;  %v5635_v21 = vmul.f32 %v14003_v24, %v5527_v17 }
 0x990   :  { %7667 = vrcp.f32 %v12364_v46  ;;  %v12405_v22 = vadd.f32 %v14004_v11, %v5565_v44  ;;  %v12408_v55 = vadd.f32 %v14004_v11, %v5575_v39  ;;  %v12412_v14 = vadd.f32 %v14004_v11, %v5585_v18 }
 0x991   :  { %7669 = vrcp.f32 %v12366_v26  ;;  %v12415_v40 = vadd.f32 %v14004_v11, %v5595_v50  ;;  %v12418_v13 = vadd.f32 %v14004_v11, %v5605_v12  ;;  %v12421_v52 = vadd.f32 %v14004_v11, %v5615_v2 }
 0x992   :  { %v12424_v42 = vadd.f32 %v14004_v11, %v5625_v19  ;;  %v12427_v61 = vadd.f32 %v14004_v11, %v5635_v21  ;;  %v5753_v33 = vand.u32 2147483647, %v12405_v22  ;;  %v5763_v9 = vand.u32 2147483647, %v12408_v55 }
 0x993   :  { %v5773_v16 = vand.u32 2147483647, %v12412_v14  ;;  %v5783_v20 = vand.u32 2147483647, %v12415_v40  ;;  %v12435_v8 = vmul.f32 %v14006_v7, %v14005_v38  ;;  %v5793_v60 = vand.u32 2147483647, %v12418_v13 }
 0x994   :  { %v7656_v10 = vpop.eup %7655  ;;  %v5803_v23 = vand.u32 2147483647, %v12421_v52  ;;  %v5813_v51 = vand.u32 2147483647, %v12424_v42  ;;  %v12442_v49 = vmul.f32 %v14006_v7, %v14007_v59  ;;  %v5823_v56 = vand.u32 2147483647, %v12427_v61 }
 0x995   :  { %v7658_v41 = vpop.eup %7657  ;;  %v5994_v45 = vmul.f32 %v7656_v10, %v5834_v31  ;;  %v12445_v62 = vadd.f32 1.0, %v5753_v33  ;;  %v12447_v5 = vadd.f32 1.0, %v5763_v9  ;;  %v12449_v53 = vadd.f32 1.0, %v5773_v16 }
 0x996   :  { %v7660_v30 = vpop.eup %7659  ;;  %v6004_v6 = vmul.f32 %v7658_v41, %v5844_v43  ;;  %v12451_v36 = vadd.f32 1.0, %v5783_v20  ;;  %v12453_v35 = vadd.f32 1.0, %v5793_v60  ;;  %v12456_v24 = vadd.f32 1.0, %v5803_v23 }
 0x997   :  { %v7662_v32 = vpop.eup %7661  ;;  %v6014_v28 = vmul.f32 %v7660_v30, %v12354_v48  ;;  %v6074_v17 = vsub.f32 2.0, %v5994_v45  ;;  %v12458_v31 = vadd.f32 1.0, %v5813_v51  ;;  %v12461_v50 = vadd.f32 1.0, %v5823_v56 }
 0x998   :  { %v7664_v44 = vpop.eup %7663  ;;  %v6024_v39 = vmul.f32 %v7662_v32, %v12357_v57  ;;  %v6084_v18 = vsub.f32 2.0, %v6004_v6  ;;  %7671 = vrcp.f32 %v12445_v62 }
 0x999   :  { %v7666_v43 = vpop.eup %7665  ;;  %v6034_v12 = vmul.f32 %v7664_v44, %v12359_v47  ;;  %v6094_v2 = vsub.f32 2.0, %v6014_v28  ;;  %v6154_v19 = vmul.f32 %v7656_v10, %v6074_v17  ;;  %7673 = vrcp.f32 %v12447_v5 }
 0x99a   :  { %v7668_v48 = vpop.eup %7667  ;;  %v6044_v21 = vmul.f32 %v7666_v43, %v12361_v0  ;;  %v6104_v11 = vsub.f32 2.0, %v6024_v39  ;;  %v6164_v33 = vmul.f32 %v7658_v41, %v6084_v18  ;;  %7675 = vrcp.f32 %v12449_v53 }
 0x99b   :  { %v7670_v57 = vpop.eup %7669  ;;  %v6054_v9 = vmul.f32 %v7668_v48, %v12364_v46  ;;  %v6114_v16 = vsub.f32 2.0, %v6034_v12  ;;  %v6174_v20 = vmul.f32 %v7660_v30, %v6094_v2  ;;  %v6234_v38 = vmul.f32 %v6154_v19, %v12305_v25 }
 0x99c   :  { %v6064_v47 = vmul.f32 %v7670_v57, %v12366_v26  ;;  %v6124_v60 = vsub.f32 2.0, %v6044_v21  ;;  %v6184_v10 = vmul.f32 %v7662_v32, %v6104_v11  ;;  %v6244_v23 = vmul.f32 %v6164_v33, %v12309_v37 }
 0x99d   :  { %v6134_v51 = vsub.f32 2.0, %v6054_v9  ;;  %v6194_v59 = vmul.f32 %v7664_v44, %v6114_v16  ;;  %v6254_v0 = vmul.f32 %v6174_v20, %v12312_v29  ;;  %7677 = vrcp.f32 %v12451_v36  ;;  %v14009_v16 = vld [vmem:[#allocation43_spill] sm:$0xff] }
 0x99e   :  { %v6144_v41 = vsub.f32 2.0, %v6064_v47  ;;  %v6204_v45 = vmul.f32 %v7666_v43, %v6124_v60  ;;  %v6264_v46 = vmul.f32 %v6184_v10, %v12315_v63  ;;  %v6613_v56 = vrot.slane %v6244_v23, 7  ;;  %v14010_v47 = vld [vmem:[#allocation101_spill] sm:$0xff]  ;;  %v14011_v10 = vld [vmem:[#allocation16_spill] sm:$0xff] }
 0x99f   :  { %v6214_v30 = vmul.f32 %v7668_v48, %v6134_v51  ;;  %v6274_v25 = vmul.f32 %v6194_v59, %v12319_v34  ;;  %v6615_v6 = vrot.slane %v6254_v0, 6  ;;  %7679 = vrcp.f32 %v12453_v35  ;;  %v14012_v0 = vld [vmem:[#allocation62_spill] sm:$0xff] }
 0x9a0   :  { %v6224_v26 = vmul.f32 %v7670_v57, %v6144_v41  ;;  %v6284_v37 = vmul.f32 %v6204_v45, %v12323_v4  ;;  %v6614_v32 = vsel %vm432_vm2, %v6613_v56, %v6234_v38  ;;  %v6617_v28 = vrot.slane %v6264_v46, 5  ;;  %v14013_v41 = vld [vmem:[#allocation78_spill] sm:$0xff]  ;;  %v14014_v46 = vld [vmem:[#allocation61_spill] sm:$0xff] }
 0x9a1   :  { %v6294_v29 = vmul.f32 %v6214_v30, %v12326_v15  ;;  %v6616_v17 = vsel %vm434_vm3, %v6615_v6, %v6614_v32  ;;  %v6619_v44 = vrot.slane %v6274_v25, 4  ;;  %7681 = vrcp.f32 %v12456_v24  ;;  %v14015_v56 = vld [vmem:[#allocation106_spill] sm:$0xff] }
 0x9a2   :  { %v7672_v63 = vpop.eup %7671  ;;  %v6304_v39 = vmul.f32 %v6224_v26, %v12329_v27  ;;  %v6618_v34 = vsel %vm436_vm4, %v6617_v28, %v6616_v17  ;;  %v6621_v18 = vrot.slane %v6284_v37, 3  ;;  %7683 = vrcp.f32 %v12458_v31  ;;  %v14008_v27 = vld [vmem:[#allocation71_spill] sm:$0xff]  ;;  %v14017_v26 = vld [vmem:[#allocation73_spill] sm:$0xff] }
 0x9a3   :  { %v7674_v43 = vpop.eup %7673  ;;  %v6620_v4 = vsel %vm438_vm5, %v6619_v44, %v6618_v34  ;;  %v6623_v12 = vrot.slane %v6294_v29, 2  ;;  %7685 = vrcp.f32 %v12461_v50  ;;  %v5993_v15 = vmul.f32 %v7672_v63, %v12445_v62 }
 0x9a4   :  { %v7676_v2 = vpop.eup %7675  ;;  %v6622_v19 = vsel %vm440_vm6, %v6621_v18, %v6620_v4  ;;  %v6625_v48 = vrot.slane %v6304_v39, 1  ;;  %v6003_v21 = vmul.f32 %v7674_v43, %v12447_v5  ;;  %v5480_v11 = vmul.f32 %v14006_v7, %v14008_v27  ;;  %v14018_v27 = vld [vmem:[#allocation55_spill] sm:$0xff] }
 0x9a5   :  { %v6624_v33 = vsel %vm442_vm7, %v6623_v12, %v6622_v19  ;;  %v6013_v57 = vmul.f32 %v7676_v2, %v12449_v53  ;;  %v6073_v9 = vsub.f32 2.0, %v5993_v15  ;;  %v5490_v20 = vmul.f32 %v14006_v7, %v14009_v16 }
 0x9a6   :  { %v6626_v38 = vsel %vm444_vm8, %v6625_v48, %v6624_v33  ;;  %v6083_v62 = vsub.f32 2.0, %v6003_v21  ;;  %v5500_v60 = vmul.f32 %v14006_v7, %v14010_v47  ;;  %v5510_v5 = vmul.f32 %v14006_v7, %v14011_v10 }
 0x9a7   :  { %v7678_v23 = vpop.eup %7677  ;;  %7400 = vmatmul.mubr.msk.f32.vlgmr.msra.gmra.mrb[2].mxu1 %vm346_vm1, %v6626_v38  ;;  %v6093_v51 = vsub.f32 2.0, %v6013_v57  ;;  %v6153_v59 = vmul.f32 %v7672_v63, %v6073_v9  ;;  %v5520_v53 = vmul.f32 %v14006_v7, %v14012_v0  ;;  %v5530_v45 = vmul.f32 %v14006_v7, %v14013_v41 }
 0x9a8   :  { %v14016_v30 = vpack.c.bf16 %v14014_v46, %v14015_v56  ;;  %v6023_v25 = vmul.f32 %v7678_v23, %v12451_v36  ;;  %v6163_v6 = vmul.f32 %v7674_v43, %v6083_v62  ;;  %7413 = vmatprep.mubr.msk.f32.mxu1 %vm7882_vm12, %v13991_v54  ;;  %v5568_v37 = vmul.f32 %v14017_v26, %v12435_v8 }
 0x9a9   :  { %v12515_v32 = vrot.slane %v12006_v3, 7  ;;  %v7680_v28 = vpop.eup %7679  ;;  %v6173_v29 = vmul.f32 %v7676_v2, %v6093_v51  ;;  %v6233_v7 = vmul.f32 %v6153_v59, %v12405_v22  ;;  %v5578_v17 = vmul.f32 %v14017_v26, %v12442_v49 }
 0x9aa   :  { %7461 = vmatpush3.bf16.msra.mxu1 %v14016_v30  ;;  %v5588_v44 = vmul.f32 %v14017_v26, %v5480_v11  ;;  %v6033_v36 = vmul.f32 %v7680_v28, %v12453_v35  ;;  %v6103_v63 = vsub.f32 2.0, %v6023_v25  ;;  %v6243_v39 = vmul.f32 %v6163_v6, %v12408_v55 }
 0x9ab   :  { %7465 = vmatprep.subr.bf16.mxu1 %v13992_v58  ;;  %v5598_v8 = vmul.f32 %v14017_v26, %v5490_v20  ;;  %v7682_v34 = vpop.eup %7681  ;;  %v6253_v18 = vmul.f32 %v6173_v29, %v12412_v14  ;;  %v5608_v43 = vmul.f32 %v14017_v26, %v5500_v60  ;;  %v5618_v22 = vmul.f32 %v14017_v26, %v5510_v5 }
 0x9ac   :  { %v5628_v49 = vmul.f32 %v14017_v26, %v5520_v53  ;;  %v7684_v4 = vpop.eup %7683  ;;  %v6043_v12 = vmul.f32 %v7682_v34, %v12456_v24  ;;  %v6113_v15 = vsub.f32 2.0, %v6033_v36  ;;  %v6183_v2 = vmul.f32 %v7678_v23, %v6103_v63 }
 0x9ad   :  { %v6515_v35 = vrot.slane %v6243_v39, 7  ;;  %v7686_v19 = vpop.eup %7685  ;;  %v6053_v55 = vmul.f32 %v7684_v4, %v12458_v31  ;;  %v6517_v48 = vrot.slane %v6253_v18, 6  ;;  %v5638_v21 = vmul.f32 %v14017_v26, %v5530_v45  ;;  %v14019_v26 = vld [vmem:[#allocation42_spill] sm:$0xff] }
 0x9ae   :  { %v12533_v14 = vadd.f32 %v14018_v27, %v5568_v37  ;;  %v6063_v11 = vmul.f32 %v7686_v19, %v12461_v50  ;;  %v6123_v33 = vsub.f32 2.0, %v6043_v12  ;;  %v6193_v57 = vmul.f32 %v7680_v28, %v6113_v15  ;;  %v14020_v12 = vld [vmem:[#allocation37_spill] sm:$0xff]  ;;  %v14021_v15 = vld [vmem:[#allocation19_spill] sm:$0xff] }
 0x9af   :  { %v6263_v9 = vmul.f32 %v6183_v2, %v12415_v40  ;;  %v6133_v16 = vsub.f32 2.0, %v6053_v55  ;;  %v6516_v24 = vsel %vm432_vm2, %v6515_v35, %v6233_v7  ;;  %v12539_v20 = vadd.f32 %v14018_v27, %v5578_v17 }
 0x9b0   :  { %v12542_v31 = vadd.f32 %v14018_v27, %v5588_v44  ;;  %v6143_v38 = vsub.f32 2.0, %v6063_v11  ;;  %v6203_v62 = vmul.f32 %v7682_v34, %v6123_v33  ;;  %v6273_v47 = vmul.f32 %v6193_v57, %v12418_v13  ;;  %v14026_v33 = vld [vmem:[#allocation99_spill] sm:$0xff] }
 0x9b1   :  { %v6518_v60 = vsel %vm434_vm3, %v6517_v48, %v6516_v24  ;;  %v6213_v50 = vmul.f32 %v7684_v4, %v6133_v16  ;;  %v6519_v10 = vrot.slane %v6263_v9, 5  ;;  %v12547_v5 = vadd.f32 %v14018_v27, %v5598_v8  ;;  %v14024_v48 = vld [vmem:[#allocation23_spill] sm:$0xff]  ;;  %v14027_v9 = vld [vmem:[#allocation96_spill] sm:$0xff] }
 0x9b2   :  { %v12550_v40 = vadd.f32 %v14018_v27, %v5608_v43  ;;  %v6223_v23 = vmul.f32 %v7686_v19, %v6143_v38  ;;  %v6283_v51 = vmul.f32 %v6203_v62, %v12421_v52  ;;  %v6521_v59 = vrot.slane %v6273_v47, 4  ;;  %v14023_v19 = vld [vmem:[#allocation67_spill] sm:$0xff]  ;;  %v14028_v24 = vld [vmem:[#allocation64_spill] sm:$0xff] }
 0x9b3   :  { %v12554_v0 = vadd.f32 %v14018_v27, %v5618_v22  ;;  %v6293_v53 = vmul.f32 %v6213_v50, %v12424_v42  ;;  %v6520_v13 = vsel %vm436_vm4, %v6519_v10, %v6518_v60  ;;  %v12559_v41 = vadd.f32 %v14018_v27, %v5628_v49  ;;  %v14029_v62 = vld [vmem:[#allocation83_spill] sm:$0xff]  ;;  %v14030_v60 = vld [vmem:[#allocation46_spill] sm:$0xff] }
 0x9b4   :  { %v12562_v45 = vadd.f32 %v14018_v27, %v5638_v21  ;;  %v6303_v46 = vmul.f32 %v6223_v23, %v12427_v61  ;;  %v6522_v56 = vsel %vm438_vm5, %v6521_v59, %v6520_v13  ;;  %v6523_v30 = vrot.slane %v6283_v51, 3  ;;  %v14025_v27 = vld [vmem:[#allocation94_spill] sm:$0xff] }
 0x9b5   :  { %v5756_v52 = vand.u32 2147483647, %v12533_v14  ;;  %v6525_v25 = vrot.slane %v6293_v53, 2  ;;  %v5766_v6 = vand.u32 2147483647, %v12539_v20  ;;  %v5459_v37 = vmul.f32 %v12296_v1, %v14019_v26 }
 0x9b6   :  { %v5776_v42 = vand.u32 2147483647, %v12542_v31  ;;  %v6524_v28 = vsel %vm440_vm6, %v6523_v30, %v6522_v56  ;;  %v6527_v29 = vrot.slane %v6303_v46, 1  ;;  %v5786_v7 = vand.u32 2147483647, %v12547_v5  ;;  %v14031_v46 = vld [vmem:[#allocation80_spill] sm:$0xff] }
 0x9b7   :  { %v5796_v61 = vand.u32 2147483647, %v12550_v40  ;;  %v6526_v17 = vsel %vm442_vm7, %v6525_v25, %v6524_v28  ;;  %v5806_v44 = vand.u32 2147483647, %v12554_v0  ;;  %v5816_v36 = vand.u32 2147483647, %v12559_v41 }
 0x9b8   :  { %v5826_v63 = vand.u32 2147483647, %v12562_v45  ;;  %v6528_v39 = vsel %vm444_vm8, %v6527_v29, %v6526_v17  ;;  %v5836_v8 = vadd.f32 1.0, %v5756_v52  ;;  %v12579_v34 = vadd.f32 1.0, %v5766_v6  ;;  %v12636_v52 = vld [vmem:[%s13164_s12 + $0x60] sm:$0xff]  ;;  %v12641_v25 = vld [vmem:[%s13164_s12 + $0x68] sm:$0xff] }
 0x9b9   :  { %v12581_v18 = vadd.f32 1.0, %v5776_v42  ;;  %7393 = vmatmul.mubr.msk.f32.vlgmr.msra.gmra.mrb[2].mxu0 %vm346_vm1, %v6528_v39  ;;  %v12584_v43 = vadd.f32 1.0, %v5786_v7  ;;  %v12586_v22 = vadd.f32 1.0, %v5796_v61  ;;  %v12588_v49 = vadd.f32 1.0, %v5806_v44 }
 0x9ba   :  { %v12590_v4 = vadd.f32 1.0, %v5816_v36  ;;  %v14022_v2 = vpack.c.bf16 %v14020_v12, %v14021_v15  ;;  %v12595_v35 = vadd.f32 1.0, %v5826_v63  ;;  %7687 = vrcp.f32 %v5836_v8  ;;  %7406 = vmatprep.mubr.msk.f32.mxu0 %vm7882_vm12, %v13991_v54  ;;  %v14032_v12 = vld [vmem:[#allocation92_spill] sm:$0xff] }
 0x9bb   :  { %v5469_v55 = vmul.f32 %v12296_v1, %v14023_v19  ;;  %v5479_v21 = vmul.f32 %v12296_v1, %v14024_v48  ;;  %7689 = vrcp.f32 %v12579_v34  ;;  %v5489_v11 = vmul.f32 %v12296_v1, %v14025_v27 }
 0x9bc   :  { %7458 = vmatpush3.bf16.msra.mxu0 %v14022_v2  ;;  %v5499_v57 = vmul.f32 %v12296_v1, %v14026_v33  ;;  %v5509_v16 = vmul.f32 %v12296_v1, %v14027_v9  ;;  %7691 = vrcp.f32 %v12581_v18  ;;  %v5519_v38 = vmul.f32 %v12296_v1, %v14028_v24 }
 0x9bd   :  { %7462 = vmatprep.subr.bf16.mxu0 %v13992_v58  ;;  %v5529_v47 = vmul.f32 %v12296_v1, %v14029_v62  ;;  %v5567_v50 = vmul.f32 %v14030_v60, %v5459_v37  ;;  %7693 = vrcp.f32 %v12584_v43  ;;  %v5577_v10 = vmul.f32 %v14030_v60, %v5469_v55 }
 0x9be   :  { %v5587_v23 = vmul.f32 %v14030_v60, %v5479_v21  ;;  %v5597_v51 = vmul.f32 %v14030_v60, %v5489_v11  ;;  %7695 = vrcp.f32 %v12586_v22  ;;  %v5607_v59 = vmul.f32 %v14030_v60, %v5499_v57 }
 0x9bf   :  { %v5617_v53 = vmul.f32 %v14030_v60, %v5509_v16  ;;  %v5627_v13 = vmul.f32 %v14030_v60, %v5519_v38  ;;  %7697 = vrcp.f32 %v12588_v49  ;;  %v5637_v1 = vmul.f32 %v14030_v60, %v5529_v47 }
 0x9c0   :  { %v12628_v56 = vadd.f32 %v14031_v46, %v5567_v50  ;;  %v12631_v30 = vadd.f32 %v14031_v46, %v5577_v10  ;;  %7699 = vrcp.f32 %v12590_v4  ;;  %v12645_v6 = vadd.f32 %v14031_v46, %v5587_v23 }
 0x9c1   :  { %v12648_v42 = vadd.f32 %v14031_v46, %v5597_v51  ;;  %v12651_v26 = vadd.f32 %v14031_v46, %v5607_v59  ;;  %7701 = vrcp.f32 %v12595_v35  ;;  %v12655_v37 = vadd.f32 %v14031_v46, %v5617_v53  ;;  %v14034_v53 = vld [vmem:[#allocation82_spill] sm:$0xff] }
 0x9c2   :  { %v12658_v28 = vadd.f32 %v14031_v46, %v5627_v13  ;;  %v12661_v29 = vadd.f32 %v14031_v46, %v5637_v1  ;;  %v5755_v7 = vand.u32 2147483647, %v12628_v56  ;;  %v5765_v61 = vand.u32 2147483647, %v12631_v30 }
 0x9c3   :  { %v5775_v17 = vand.u32 2147483647, %v12645_v6  ;;  %v7463_v44 = vpack.c.bf16 %v12641_v25, %v12636_v52  ;;  %v5785_v36 = vand.u32 2147483647, %v12648_v42  ;;  %v5795_v63 = vand.u32 2147483647, %v12651_v26 }
 0x9c4   :  { %v5805_v39 = vand.u32 2147483647, %v12655_v37  ;;  %v12673_v15 = vmul.f32 %v12515_v32, %v14032_v12  ;;  %v7688_v2 = vpop.eup %7687  ;;  %v5815_v19 = vand.u32 2147483647, %v12658_v28  ;;  %v5825_v55 = vand.u32 2147483647, %v12661_v29 }
 0x9c5   :  { %v12677_v48 = vadd.f32 1.0, %v5755_v7  ;;  %v12679_v21 = vadd.f32 1.0, %v5765_v61  ;;  %v7690_v27 = vpop.eup %7689  ;;  %v5996_v11 = vmul.f32 %v7688_v2, %v5836_v8  ;;  %v12681_v33 = vadd.f32 1.0, %v5775_v17  ;;  %v14033_v8 = vld [vmem:[#allocation27_spill] sm:$0xff]  ;;  %v14045_v25 = vld [vmem:[#allocation76_spill] sm:$0xff] }
 0x9c6   :  { %v12683_v57 = vadd.f32 1.0, %v5785_v36  ;;  %v12685_v9 = vadd.f32 1.0, %v5795_v63  ;;  %v7692_v16 = vpop.eup %7691  ;;  %v6006_v24 = vmul.f32 %v7690_v27, %v12579_v34  ;;  %v12688_v38 = vadd.f32 1.0, %v5805_v39  ;;  %v12835_v52 = vld [vmem:[%s13164_s12 + $0x98] sm:$0xff] }
 0x9c7   :  { %v12690_v62 = vadd.f32 1.0, %v5815_v19  ;;  %v12692_v47 = vadd.f32 1.0, %v5825_v55  ;;  %v7694_v60 = vpop.eup %7693  ;;  %v6016_v50 = vmul.f32 %v7692_v16, %v12581_v18  ;;  %v6076_v10 = vsub.f32 2.0, %v5996_v11 }
 0x9c8   :  { %7703 = vrcp.f32 %v12677_v48  ;;  %v12698_v23 = vmul.f32 %v12515_v32, %v14033_v8  ;;  %v7696_v51 = vpop.eup %7695  ;;  %v6026_v59 = vmul.f32 %v7694_v60, %v12584_v43  ;;  %v6086_v34 = vsub.f32 2.0, %v6006_v24 }
 0x9c9   :  { %7705 = vrcp.f32 %v12679_v21  ;;  %v12704_v13 = vmul.f32 %v12515_v32, %v14034_v53  ;;  %v7698_v1 = vpop.eup %7697  ;;  %v6036_v18 = vmul.f32 %v7696_v51, %v12586_v22  ;;  %v6096_v46 = vsub.f32 2.0, %v6016_v50 }
 0x9ca   :  { %v6156_v7 = vmul.f32 %v7688_v2, %v6076_v10  ;;  %7707 = vrcp.f32 %v12681_v33  ;;  %v7700_v61 = vpop.eup %7699  ;;  %v6046_v17 = vmul.f32 %v7698_v1, %v12588_v49  ;;  %v6106_v36 = vsub.f32 2.0, %v6026_v59 }
 0x9cb   :  { %v6166_v63 = vmul.f32 %v7690_v27, %v6086_v34  ;;  %7709 = vrcp.f32 %v12683_v57  ;;  %v7702_v43 = vpop.eup %7701  ;;  %v6056_v39 = vmul.f32 %v7700_v61, %v12590_v4  ;;  %v6116_v12 = vsub.f32 2.0, %v6036_v18 }
 0x9cc   :  { %v6176_v19 = vmul.f32 %v7692_v16, %v6096_v46  ;;  %v6236_v55 = vmul.f32 %v6156_v7, %v12533_v14  ;;  %v6066_v22 = vmul.f32 %v7702_v43, %v12595_v35  ;;  %v6126_v11 = vsub.f32 2.0, %v6046_v17 }
 0x9cd   :  { %v6186_v2 = vmul.f32 %v7694_v60, %v6106_v36  ;;  %v6246_v24 = vmul.f32 %v6166_v63, %v12539_v20  ;;  %v6136_v50 = vsub.f32 2.0, %v6056_v39  ;;  %v6196_v10 = vmul.f32 %v7696_v51, %v6116_v12 }
 0x9ce   :  { %v6256_v49 = vmul.f32 %v6176_v19, %v12542_v31  ;;  %7711 = vrcp.f32 %v12685_v9  ;;  %v6146_v27 = vsub.f32 2.0, %v6066_v22  ;;  %v6206_v8 = vmul.f32 %v7698_v1, %v6126_v11 }
 0x9cf   :  { %v6266_v4 = vmul.f32 %v6186_v2, %v12547_v5  ;;  %v6809_v59 = vrot.slane %v6246_v24, 7  ;;  %v6216_v16 = vmul.f32 %v7700_v61, %v6136_v50  ;;  %v6276_v14 = vmul.f32 %v6196_v10, %v12550_v40  ;;  %v14036_v50 = vld [vmem:[#allocation103_spill] sm:$0xff]  ;;  %v14037_v10 = vld [vmem:[#allocation93_spill] sm:$0xff] }
 0x9d0   :  { %v6811_v34 = vrot.slane %v6256_v49, 6  ;;  %7713 = vrcp.f32 %v12688_v38  ;;  %v6226_v35 = vmul.f32 %v7702_v43, %v6146_v27  ;;  %v6286_v20 = vmul.f32 %v6206_v8, %v12554_v0 }
 0x9d1   :  { %v6810_v60 = vsel %vm432_vm2, %v6809_v59, %v6236_v55  ;;  %v6813_v51 = vrot.slane %v6266_v4, 5  ;;  %v6296_v53 = vmul.f32 %v6216_v16, %v12559_v41  ;;  %v6815_v18 = vrot.slane %v6276_v14, 4  ;;  %v14038_v59 = vld [vmem:[#allocation38_spill] sm:$0xff]  ;;  %v14039_v16 = vld [vmem:[#allocation28_spill] sm:$0xff]  ;;  %v14040_v14 = vld [vmem:[#allocation35_spill] sm:$0xff] }
 0x9d2   :  { %v7704_v31 = vpop.eup %7703  ;;  %v6812_v1 = vsel %vm434_vm3, %v6811_v34, %v6810_v60  ;;  %7715 = vrcp.f32 %v12690_v62  ;;  %v6306_v40 = vmul.f32 %v6226_v35, %v12562_v45  ;;  %v6817_v7 = vrot.slane %v6286_v20, 3  ;;  %v14035_v45 = vld [vmem:[#allocation24_spill] sm:$0xff] }
 0x9d3   :  { %v7706_v5 = vpop.eup %7705  ;;  %v6814_v46 = vsel %vm436_vm4, %v6813_v51, %v6812_v1  ;;  %7717 = vrcp.f32 %v12692_v47  ;;  %v6819_v17 = vrot.slane %v6296_v53, 2  ;;  %v5995_v36 = vmul.f32 %v7704_v31, %v12677_v48  ;;  %v14042_v60 = vld [vmem:[#allocation60_spill] sm:$0xff]  ;;  %v14043_v53 = vld [vmem:[#allocation51_spill] sm:$0xff] }
 0x9d4   :  { %v7708_v0 = vpop.eup %7707  ;;  %v6816_v61 = vsel %vm438_vm5, %v6815_v18, %v6814_v46  ;;  %v6005_v41 = vmul.f32 %v7706_v5, %v12679_v21  ;;  %v6821_v39 = vrot.slane %v6306_v40, 1  ;;  %v5492_v19 = vmul.f32 %v12515_v32, %v14035_v45  ;;  %v14044_v46 = vld [vmem:[#allocation22_spill] sm:$0xff] }
 0x9d5   :  { %v7710_v63 = vpop.eup %7709  ;;  %v6818_v43 = vsel %vm440_vm6, %v6817_v7, %v6816_v61  ;;  %v6015_v12 = vmul.f32 %v7708_v0, %v12681_v33  ;;  %v6075_v11 = vsub.f32 2.0, %v5995_v36  ;;  %v5502_v21 = vmul.f32 %v12515_v32, %v14036_v50 }
 0x9d6   :  { %v6820_v55 = vsel %vm442_vm7, %v6819_v17, %v6818_v43  ;;  %v6025_v22 = vmul.f32 %v7710_v63, %v12683_v57  ;;  %v6085_v2 = vsub.f32 2.0, %v6005_v41  ;;  %v5512_v49 = vmul.f32 %v12515_v32, %v14037_v10 }
 0x9d7   :  { %v6822_v24 = vsel %vm444_vm8, %v6821_v39, %v6820_v55  ;;  %v6095_v48 = vsub.f32 2.0, %v6015_v12  ;;  %v6155_v8 = vmul.f32 %v7704_v31, %v6075_v11  ;;  %v5522_v57 = vmul.f32 %v12515_v32, %v14038_v59 }
 0x9d8   :  { %v7712_v27 = vpop.eup %7711  ;;  %7414 = vmatmul.mubr.msk.f32.vlgmr.msra.gmra.mrb[4].mxu1 %vm346_vm1, %v6822_v24  ;;  %v6105_v33 = vsub.f32 2.0, %v6025_v22  ;;  %v6165_v4 = vmul.f32 %v7706_v5, %v6085_v2  ;;  %v14041_v34 = vpack.c.bf16 %v14039_v16, %v14040_v14  ;;  %v5532_v51 = vmul.f32 %v12515_v32, %v14042_v60 }
 0x9d9   :  { %v6035_v35 = vmul.f32 %v7712_v27, %v12685_v9  ;;  %v6175_v20 = vmul.f32 %v7708_v0, %v6095_v48  ;;  %7427 = vmatprep.mubr.msk.f32.mxu1 %vm7882_vm12, %v13991_v54  ;;  %v5659_v1 = vrot.slane %v14043_v53, 7  ;;  %v6235_v5 = vmul.f32 %v6155_v8, %v12628_v56 }
 0x9da   :  { %7467 = vmatpush3.bf16.msra.mxu1 %v14041_v34  ;;  %v7714_v31 = vpop.eup %7713  ;;  %v6185_v18 = vmul.f32 %v7710_v63, %v6105_v33  ;;  %v6245_v40 = vmul.f32 %v6165_v4, %v12631_v30  ;;  %v5570_v7 = vmul.f32 %v14044_v46, %v12673_v15  ;;  %v5580_v32 = vmul.f32 %v14044_v46, %v12698_v23 }
 0x9db   :  { %7471 = vmatprep.subr.bf16.mxu1 %v13992_v58  ;;  %v6045_v9 = vmul.f32 %v7714_v31, %v12688_v38  ;;  %v6115_v0 = vsub.f32 2.0, %v6035_v35  ;;  %v6255_v61 = vmul.f32 %v6175_v20, %v12645_v6  ;;  %v5590_v56 = vmul.f32 %v14044_v46, %v12704_v13 }
 0x9dc   :  { %v7716_v17 = vpop.eup %7715  ;;  %v6265_v36 = vmul.f32 %v6185_v18, %v12648_v42  ;;  %v6711_v41 = vrot.slane %v6245_v40, 7  ;;  %v5600_v30 = vmul.f32 %v14044_v46, %v5492_v19  ;;  %v5610_v45 = vmul.f32 %v14044_v46, %v5502_v21 }
 0x9dd   :  { %v7718_v15 = vpop.eup %7717  ;;  %v6055_v63 = vmul.f32 %v7716_v17, %v12690_v62  ;;  %v6125_v43 = vsub.f32 2.0, %v6045_v9  ;;  %v6195_v38 = vmul.f32 %v7712_v27, %v6115_v0  ;;  %v6713_v39 = vrot.slane %v6255_v61, 6 }
 0x9de   :  { %v6065_v6 = vmul.f32 %v7718_v15, %v12692_v47  ;;  %v6712_v12 = vsel %vm432_vm2, %v6711_v41, %v6235_v5  ;;  %v6715_v23 = vrot.slane %v6265_v36, 5  ;;  %v5620_v62 = vmul.f32 %v14044_v46, %v5512_v49 }
 0x9df   :  { %v6135_v42 = vsub.f32 2.0, %v6055_v63  ;;  %v6205_v55 = vmul.f32 %v7714_v31, %v6125_v43  ;;  %v6275_v22 = vmul.f32 %v6195_v38, %v12651_v26  ;;  %v6714_v13 = vsel %vm434_vm3, %v6713_v39, %v6712_v12  ;;  %v14047_v63 = vld [vmem:[#allocation41_spill] sm:$0xff]  ;;  %v14048_v38 = vld [vmem:[#allocation36_spill] sm:$0xff]  ;;  %v14049_v39 = vld [vmem:[#allocation102_spill] sm:$0xff] }
 0x9e0   :  { %v6145_v19 = vsub.f32 2.0, %v6065_v6  ;;  %v6716_v11 = vsel %vm436_vm4, %v6715_v23, %v6714_v13  ;;  %v5630_v2 = vmul.f32 %v14044_v46, %v5522_v57  ;;  %v5640_v50 = vmul.f32 %v14044_v46, %v5532_v51  ;;  %v14050_v12 = vld [vmem:[#allocation14_spill] sm:$0xff] }
 0x9e1   :  { %v6215_v24 = vmul.f32 %v7716_v17, %v6135_v42  ;;  %v6285_v47 = vmul.f32 %v6205_v55, %v12655_v37  ;;  %v6717_v48 = vrot.slane %v6275_v22, 4  ;;  %v12777_v10 = vadd.f32 %v5659_v1, %v5570_v7  ;;  %v14052_v55 = vld [vmem:[#allocation74_spill] sm:$0xff] }
 0x9e2   :  { %v6225_v21 = vmul.f32 %v7718_v15, %v6145_v19  ;;  %v12779_v27 = vadd.f32 %v5659_v1, %v5580_v32  ;;  %v12781_v26 = vadd.f32 %v5659_v1, %v5590_v56  ;;  %v12785_v4 = vadd.f32 %v5659_v1, %v5600_v30  ;;  %v12830_v56 = vld [vmem:[%s13164_s12 + $0x90] sm:$0xff]  ;;  %v14046_v30 = vld [vmem:[#allocation69_spill] sm:$0xff] }
 0x9e3   :  { %v6295_v33 = vmul.f32 %v6215_v24, %v12658_v28  ;;  %v6718_v8 = vsel %vm438_vm5, %v6717_v48, %v6716_v11  ;;  %v6719_v49 = vrot.slane %v6285_v47, 3  ;;  %v12788_v37 = vadd.f32 %v5659_v1, %v5610_v45  ;;  %v14051_v45 = vld [vmem:[#allocation58_spill] sm:$0xff] }
 0x9e4   :  { %v6305_v59 = vmul.f32 %v6225_v21, %v12661_v29  ;;  %v12790_v57 = vadd.f32 %v5659_v1, %v5620_v62  ;;  %v12792_v16 = vadd.f32 %v5659_v1, %v5630_v2  ;;  %v12795_v35 = vadd.f32 %v5659_v1, %v5640_v50  ;;  %v14053_v13 = vld [vmem:[#allocation34_spill] sm:$0xff]  ;;  %v14054_v2 = vld [vmem:[#allocation56_spill] sm:$0xff] }
 0x9e5   :  { %v6720_v14 = vsel %vm440_vm6, %v6719_v49, %v6718_v8  ;;  %v6721_v34 = vrot.slane %v6295_v33, 2  ;;  %v5758_v28 = vand.u32 2147483647, %v12777_v10  ;;  %v5768_v60 = vand.u32 2147483647, %v12779_v27 }
 0x9e6   :  { %v6723_v20 = vrot.slane %v6305_v59, 1  ;;  %v5778_v51 = vand.u32 2147483647, %v12781_v26  ;;  %v5442_v29 = vrot.slane %v12006_v3, 6  ;;  %v5788_v18 = vand.u32 2147483647, %v12785_v4 }
 0x9e7   :  { %v6722_v31 = vsel %vm442_vm7, %v6721_v34, %v6720_v14  ;;  %v5798_v5 = vand.u32 2147483647, %v12788_v37  ;;  %v5808_v40 = vand.u32 2147483647, %v12790_v57  ;;  %v5818_v46 = vand.u32 2147483647, %v12792_v16 }
 0x9e8   :  { %v6724_v1 = vsel %vm444_vm8, %v6723_v20, %v6722_v31  ;;  %v5828_v7 = vand.u32 2147483647, %v12795_v35  ;;  %v5838_v9 = vadd.f32 1.0, %v5758_v28  ;;  %v5848_v0 = vadd.f32 1.0, %v5768_v60 }
 0x9e9   :  { %7407 = vmatmul.mubr.msk.f32.vlgmr.msra.gmra.mrb[4].mxu0 %vm346_vm1, %v6724_v1  ;;  %v12809_v61 = vadd.f32 1.0, %v5778_v51  ;;  %v12811_v3 = vadd.f32 1.0, %v5788_v18  ;;  %v12813_v32 = vadd.f32 1.0, %v5798_v5  ;;  %v12818_v17 = vadd.f32 1.0, %v5808_v40 }
 0x9ea   :  { %7464 = vmatpush3.bf16.msra.mxu0 %v7463_v44  ;;  %v12820_v36 = vadd.f32 1.0, %v5818_v46  ;;  %v12822_v41 = vadd.f32 1.0, %v5828_v7  ;;  %7719 = vrcp.f32 %v5838_v9  ;;  %7420 = vmatprep.mubr.msk.f32.mxu0 %vm7882_vm12, %v13991_v54  ;;  %v5461_v44 = vmul.f32 %v5442_v29, %v14045_v25  ;;  %v14055_v46 = vld [vmem:[#allocation52_spill] sm:$0xff] }
 0x9eb   :  { %7721 = vrcp.f32 %v5848_v0  ;;  %7468 = vmatprep.subr.bf16.mxu0 %v13992_v58  ;;  %v5471_v15 = vmul.f32 %v5442_v29, %v14046_v30  ;;  %v5481_v43 = vmul.f32 %v5442_v29, %v14047_v63  ;;  %v5491_v58 = vmul.f32 %v5442_v29, %v14048_v38 }
 0x9ec   :  { %7723 = vrcp.f32 %v12809_v61  ;;  %v5501_v6 = vmul.f32 %v5442_v29, %v14049_v39  ;;  %v5511_v23 = vmul.f32 %v5442_v29, %v14050_v12  ;;  %v5521_v42 = vmul.f32 %v5442_v29, %v14051_v45 }
 0x9ed   :  { %7725 = vrcp.f32 %v12811_v3  ;;  %v5531_v22 = vmul.f32 %v5442_v29, %v14052_v55  ;;  %v5550_v19 = vrot.slane %v14053_v13, 6  ;;  %v7472_v11 = vpack.c.bf16 %v12835_v52, %v12830_v56 }
 0x9ee   :  { %7727 = vrcp.f32 %v12813_v32  ;;  %v5658_v62 = vrot.slane %v14043_v53, 6  ;;  %v12853_v24 = vrot.slane %v14054_v2, 1 }
 0x9ef   :  { %7729 = vrcp.f32 %v12818_v17  ;;  %v5569_v47 = vmul.f32 %v5550_v19, %v5461_v44  ;;  %v5579_v48 = vmul.f32 %v5550_v19, %v5471_v15  ;;  %v5589_v50 = vmul.f32 %v5550_v19, %v5481_v43 }
 0x9f0   :  { %7731 = vrcp.f32 %v12820_v36  ;;  %v5599_v21 = vmul.f32 %v5550_v19, %v5491_v58  ;;  %v5609_v33 = vmul.f32 %v5550_v19, %v5501_v6  ;;  %v5619_v8 = vmul.f32 %v5550_v19, %v5511_v23 }
 0x9f1   :  { %7733 = vrcp.f32 %v12822_v41  ;;  %v5629_v49 = vmul.f32 %v5550_v19, %v5521_v42  ;;  %v5639_v59 = vmul.f32 %v5550_v19, %v5531_v22  ;;  %v12858_v14 = vadd.f32 %v5658_v62, %v5569_v47 }
 0x9f2   :  { %v12860_v53 = vadd.f32 %v5658_v62, %v5579_v48  ;;  %v12862_v34 = vadd.f32 %v5658_v62, %v5589_v50  ;;  %v12864_v28 = vadd.f32 %v5658_v62, %v5599_v21  ;;  %v12866_v20 = vadd.f32 %v5658_v62, %v5609_v33 }
 0x9f3   :  { %v12868_v60 = vadd.f32 %v5658_v62, %v5619_v8  ;;  %v12870_v51 = vadd.f32 %v5658_v62, %v5629_v49  ;;  %v12872_v29 = vadd.f32 %v5658_v62, %v5639_v59  ;;  %v5757_v31 = vand.u32 2147483647, %v12858_v14 }
 0x9f4   :  { %v7720_v18 = vpop.eup %7719  ;;  %v5767_v5 = vand.u32 2147483647, %v12860_v53  ;;  %v5777_v40 = vand.u32 2147483647, %v12862_v34  ;;  %v5787_v1 = vand.u32 2147483647, %v12864_v28  ;;  %v12880_v7 = vmul.f32 %v12853_v24, %v14055_v46 }
 0x9f5   :  { %v7722_v25 = vpop.eup %7721  ;;  %v5998_v44 = vmul.f32 %v7720_v18, %v5838_v9  ;;  %v5797_v30 = vand.u32 2147483647, %v12866_v20  ;;  %v5807_v15 = vand.u32 2147483647, %v12868_v60  ;;  %v5817_v63 = vand.u32 2147483647, %v12870_v51 }
 0x9f6   :  { %v7724_v43 = vpop.eup %7723  ;;  %v6008_v38 = vmul.f32 %v7722_v25, %v5848_v0  ;;  %v5827_v58 = vand.u32 2147483647, %v12872_v29  ;;  %v12886_v39 = vadd.f32 1.0, %v5757_v31  ;;  %v12888_v6 = vadd.f32 1.0, %v5767_v5 }
 0x9f7   :  { %v7726_v12 = vpop.eup %7725  ;;  %v6018_v23 = vmul.f32 %v7724_v43, %v12809_v61  ;;  %v6078_v45 = vsub.f32 2.0, %v5998_v44  ;;  %v12891_v42 = vadd.f32 1.0, %v5777_v40  ;;  %v12893_v9 = vadd.f32 1.0, %v5787_v1 }
 0x9f8   :  { %v7728_v55 = vpop.eup %7727  ;;  %v6028_v22 = vmul.f32 %v7726_v12, %v12811_v3  ;;  %v6088_v13 = vsub.f32 2.0, %v6008_v38  ;;  %v12896_v19 = vadd.f32 1.0, %v5797_v30  ;;  %v12898_v0 = vadd.f32 1.0, %v5807_v15 }
 0x9f9   :  { %v7730_v62 = vpop.eup %7729  ;;  %v6038_v47 = vmul.f32 %v7728_v55, %v12813_v32  ;;  %v6098_v48 = vsub.f32 2.0, %v6018_v23  ;;  %v6158_v50 = vmul.f32 %v7720_v18, %v6078_v45  ;;  %v12901_v21 = vadd.f32 1.0, %v5817_v63 }
 0x9fa   :  { %v7732_v61 = vpop.eup %7731  ;;  %v6048_v33 = vmul.f32 %v7730_v62, %v12818_v17  ;;  %v6108_v8 = vsub.f32 2.0, %v6028_v22  ;;  %v6168_v49 = vmul.f32 %v7722_v25, %v6088_v13  ;;  %v12904_v59 = vadd.f32 1.0, %v5827_v58 }
 0x9fb   :  { %v7734_v3 = vpop.eup %7733  ;;  %v6058_v31 = vmul.f32 %v7732_v61, %v12820_v36  ;;  %v6118_v5 = vsub.f32 2.0, %v6038_v47  ;;  %v6178_v40 = vmul.f32 %v7724_v43, %v6098_v48  ;;  %v6238_v1 = vmul.f32 %v6158_v50, %v12777_v10  ;;  %v12937_v50 = vld [vmem:[%s13164_s12 + $0x88] sm:$0xff] }
 0x9fc   :  { %v6068_v32 = vmul.f32 %v7734_v3, %v12822_v41  ;;  %v6128_v46 = vsub.f32 2.0, %v6048_v33  ;;  %v6188_v18 = vmul.f32 %v7726_v12, %v6108_v8  ;;  %v6248_v44 = vmul.f32 %v6168_v49, %v12779_v27  ;;  %v14058_v49 = vld [vmem:[#allocation20_spill] sm:$0xff] }
 0x9fd   :  { %v6138_v30 = vsub.f32 2.0, %v6058_v31  ;;  %v6198_v15 = vmul.f32 %v7728_v55, %v6118_v5  ;;  %v6258_v17 = vmul.f32 %v6178_v40, %v12781_v26  ;;  %7735 = vrcp.f32 %v12886_v39  ;;  %v14059_v31 = vld [vmem:[#allocation59_spill] sm:$0xff] }
 0x9fe   :  { %v6148_v25 = vsub.f32 2.0, %v6068_v32  ;;  %v6208_v63 = vmul.f32 %v7730_v62, %v6128_v46  ;;  %v6268_v36 = vmul.f32 %v6188_v18, %v12785_v4  ;;  %v7005_v38 = vrot.slane %v6248_v44, 7  ;;  %v14056_v62 = vld [vmem:[#allocation98_spill] sm:$0xff] }
 0x9ff   :  { %v6218_v43 = vmul.f32 %v7732_v61, %v6138_v30  ;;  %v6278_v10 = vmul.f32 %v6198_v15, %v12788_v37  ;;  %v7007_v58 = vrot.slane %v6258_v17, 6  ;;  %7737 = vrcp.f32 %v12888_v6  ;;  %v14057_v61 = vld [vmem:[#allocation91_spill] sm:$0xff]  ;;  %v14061_v46 = vld [vmem:[#allocation90_spill] sm:$0xff]  ;;  %v14062_v30 = vld [vmem:[#allocation12_spill] sm:$0xff] }
 0xa00   :  { %v6228_v41 = vmul.f32 %v7734_v3, %v6148_v25  ;;  %v6288_v27 = vmul.f32 %v6208_v63, %v12790_v57  ;;  %v7006_v12 = vsel %vm432_vm2, %v7005_v38, %v6238_v1  ;;  %v7009_v23 = vrot.slane %v6268_v36, 5  ;;  %v14060_v1 = vld [vmem:[#allocation100_spill] sm:$0xff]  ;;  %v14064_v36 = vld [vmem:[#allocation17_spill] sm:$0xff] }
 0xa01   :  { %v6298_v26 = vmul.f32 %v6218_v43, %v12792_v16  ;;  %v7008_v45 = vsel %vm434_vm3, %v7007_v58, %v7006_v12  ;;  %v7011_v55 = vrot.slane %v6278_v10, 4  ;;  %7739 = vrcp.f32 %v12891_v42  ;;  %v14063_v25 = vld [vmem:[#allocation88_spill] sm:$0xff]  ;;  %v14065_v43 = vld [vmem:[#allocation25_spill] sm:$0xff] }
 0xa02   :  { %v6308_v4 = vmul.f32 %v6228_v41, %v12795_v35  ;;  %v7010_v37 = vsel %vm436_vm4, %v7009_v23, %v7008_v45  ;;  %v7013_v22 = vrot.slane %v6288_v27, 3  ;;  %7741 = vrcp.f32 %v12893_v9  ;;  %v12932_v35 = vld [vmem:[%s13164_s12 + $0x80] sm:$0xff] }
 0xa03   :  { %v7012_v13 = vsel %vm438_vm5, %v7011_v55, %v7010_v37  ;;  %v7015_v57 = vrot.slane %v6298_v26, 2  ;;  %7743 = vrcp.f32 %v12896_v19  ;;  %v5474_v16 = vmul.f32 %v12853_v24, %v14056_v62  ;;  %v14066_v26 = vld [vmem:[#allocation65_spill] sm:$0xff] }
 0xa04   :  { %v7014_v47 = vsel %vm440_vm6, %v7013_v22, %v7012_v13  ;;  %v7017_v48 = vrot.slane %v6308_v4, 1  ;;  %7745 = vrcp.f32 %v12898_v0  ;;  %v5484_v33 = vmul.f32 %v12853_v24, %v14057_v61 }
 0xa05   :  { %v7016_v8 = vsel %vm442_vm7, %v7015_v57, %v7014_v47  ;;  %7747 = vrcp.f32 %v12901_v21  ;;  %v5494_v3 = vmul.f32 %v12853_v24, %v14058_v49  ;;  %v5504_v5 = vmul.f32 %v12853_v24, %v14059_v31 }
 0xa06   :  { %v7018_v40 = vsel %vm444_vm8, %v7017_v48, %v7016_v8  ;;  %7749 = vrcp.f32 %v12904_v59  ;;  %v5514_v32 = vmul.f32 %v12853_v24, %v14060_v1  ;;  %v5524_v18 = vmul.f32 %v12853_v24, %v14061_v46 }
 0xa07   :  { %v7736_v44 = vpop.eup %7735  ;;  %v6089_v15 = vsub.f32 2.0, %v14062_v30  ;;  %7428 = vmatmul.mubr.msk.f32.vlgmr.msra.gmra.mrb[6].mxu1 %vm346_vm1, %v7018_v40  ;;  %v7469_v17 = vpack.c.bf16 %v12937_v50, %v12932_v35  ;;  %v5534_v63 = vmul.f32 %v12853_v24, %v14063_v25  ;;  %v5572_v38 = vmul.f32 %v14064_v36, %v12880_v7  ;;  %v14073_v50 = vld [vmem:[#allocation29_spill] sm:$0xff] }
 0xa08   :  { %v6099_v10 = vsub.f32 2.0, %v14065_v43  ;;  %7473 = vmatpush3.bf16.msra.mxu1 %v7472_v11  ;;  %v5997_v58 = vmul.f32 %v7736_v44, %v12886_v39  ;;  %7441 = vmatprep.mubr.msk.f32.mxu1 %vm7882_vm12, %v13991_v54  ;;  %v5582_v41 = vmul.f32 %v14064_v36, %v5474_v16  ;;  %v5592_v27 = vmul.f32 %v14064_v36, %v5484_v33  ;;  %v14078_v43 = vld [vmem:[#allocation33_spill] sm:$0xff] }
 0xa09   :  { %v7738_v12 = vpop.eup %7737  ;;  %v5602_v24 = vmul.f32 %v14064_v36, %v5494_v3  ;;  %v5612_v7 = vmul.f32 %v14064_v36, %v5504_v5  ;;  %v5622_v23 = vmul.f32 %v14064_v36, %v5514_v32  ;;  %v12974_v45 = vadd.f32 %v14066_v26, %v5572_v38 }
 0xa0a   :  { %v6007_v56 = vmul.f32 %v7738_v12, %v12888_v6  ;;  %v6077_v52 = vsub.f32 2.0, %v5997_v58  ;;  %v5632_v11 = vmul.f32 %v14064_v36, %v5524_v18  ;;  %v12979_v39 = vadd.f32 %v14066_v26, %v5582_v41 }
 0xa0b   :  { %v7740_v55 = vpop.eup %7739  ;;  %v5642_v4 = vmul.f32 %v14064_v36, %v5534_v63  ;;  %v12983_v37 = vadd.f32 %v14066_v26, %v5592_v27  ;;  %v12986_v22 = vadd.f32 %v14066_v26, %v5602_v24  ;;  %v12989_v13 = vadd.f32 %v14066_v26, %v5612_v7 }
 0xa0c   :  { %v7742_v57 = vpop.eup %7741  ;;  %v6017_v6 = vmul.f32 %v7740_v55, %v12891_v42  ;;  %v6087_v62 = vsub.f32 2.0, %v6007_v56  ;;  %v6157_v16 = vmul.f32 %v7736_v44, %v6077_v52  ;;  %v12993_v47 = vadd.f32 %v14066_v26, %v5622_v23 }
 0xa0d   :  { %v7744_v48 = vpop.eup %7743  ;;  %v6027_v61 = vmul.f32 %v7742_v57, %v12893_v9  ;;  %v12997_v33 = vadd.f32 %v14066_v26, %v5632_v11  ;;  %v13000_v8 = vadd.f32 %v14066_v26, %v5642_v4  ;;  %v5760_v49 = vand.u32 2147483647, %v12974_v45 }
 0xa0e   :  { %v7746_v3 = vpop.eup %7745  ;;  %v6037_v31 = vmul.f32 %v7744_v48, %v12896_v19  ;;  %v6097_v42 = vsub.f32 2.0, %v6017_v6  ;;  %v6167_v5 = vmul.f32 %v7738_v12, %v6087_v62  ;;  %v5770_v40 = vand.u32 2147483647, %v12979_v39 }
 0xa0f   :  { %v7748_v1 = vpop.eup %7747  ;;  %v6047_v32 = vmul.f32 %v7746_v3, %v12898_v0  ;;  %v6107_v46 = vsub.f32 2.0, %v6027_v61  ;;  %v6237_v9 = vmul.f32 %v6157_v16, %v12858_v14  ;;  %v5780_v18 = vand.u32 2147483647, %v12983_v37 }
 0xa10   :  { %v7750_v44 = vpop.eup %7749  ;;  %v6057_v25 = vmul.f32 %v7748_v1, %v12901_v21  ;;  %v6117_v63 = vsub.f32 2.0, %v6037_v31  ;;  %v6177_v36 = vmul.f32 %v7740_v55, %v6097_v42  ;;  %v6247_v38 = vmul.f32 %v6167_v5, %v12860_v53 }
 0xa11   :  { %v6067_v19 = vmul.f32 %v7750_v44, %v12904_v59  ;;  %v6127_v58 = vsub.f32 2.0, %v6047_v32  ;;  %v6187_v41 = vmul.f32 %v7742_v57, %v6107_v46  ;;  %v5790_v27 = vand.u32 2147483647, %v12986_v22 }
 0xa12   :  { %v6137_v12 = vsub.f32 2.0, %v6057_v25  ;;  %v6197_v0 = vmul.f32 %v7744_v48, %v6117_v63  ;;  %v6257_v24 = vmul.f32 %v6177_v36, %v12862_v34  ;;  %v6907_v14 = vrot.slane %v6247_v38, 7  ;;  %v14068_v25 = vld [vmem:[#allocation44_spill] sm:$0xff]  ;;  %v14069_v36 = vld [vmem:[#allocation97_spill] sm:$0xff] }
 0xa13   :  { %v6147_v7 = vsub.f32 2.0, %v6067_v19  ;;  %v6207_v23 = vmul.f32 %v7746_v3, %v6127_v58  ;;  %v6267_v26 = vmul.f32 %v6187_v41, %v12864_v28  ;;  %v5800_v21 = vand.u32 2147483647, %v12989_v13  ;;  %v14070_v19 = vld [vmem:[#allocation95_spill] sm:$0xff] }
 0xa14   :  { %v6217_v56 = vmul.f32 %v7748_v1, %v6137_v12  ;;  %v6277_v53 = vmul.f32 %v6197_v0, %v12866_v20  ;;  %v6908_v59 = vsel %vm432_vm2, %v6907_v14, %v6237_v9  ;;  %v6909_v52 = vrot.slane %v6257_v24, 6  ;;  %v14067_v9 = vld [vmem:[#allocation86_spill] sm:$0xff]  ;;  %v14072_v24 = vld [vmem:[#allocation21_spill] sm:$0xff] }
 0xa15   :  { %v6227_v11 = vmul.f32 %v7750_v44, %v6147_v7  ;;  %v6287_v55 = vmul.f32 %v6207_v23, %v12868_v60  ;;  %v6911_v4 = vrot.slane %v6267_v26, 5  ;;  %v5810_v57 = vand.u32 2147483647, %v12993_v47  ;;  %v14074_v7 = vld [vmem:[#allocation13_spill] sm:$0xff] }
 0xa16   :  { %v6297_v34 = vmul.f32 %v6217_v56, %v12870_v51  ;;  %v6910_v6 = vsel %vm434_vm3, %v6909_v52, %v6908_v59  ;;  %v6913_v62 = vrot.slane %v6277_v53, 4  ;;  %v5840_v28 = vadd.f32 1.0, %v5760_v49  ;;  %v14075_v26 = vld [vmem:[#allocation45_spill] sm:$0xff]  ;;  %v14076_v59 = vld [vmem:[#allocation39_spill] sm:$0xff] }
 0xa17   :  { %v6307_v16 = vmul.f32 %v6227_v11, %v12872_v29  ;;  %v6912_v48 = vsel %vm436_vm4, %v6911_v4, %v6910_v6  ;;  %v6915_v20 = vrot.slane %v6287_v55, 3  ;;  %v5850_v61 = vadd.f32 1.0, %v5770_v40 }
 0xa18   :  { %v6914_v3 = vsel %vm438_vm5, %v6913_v62, %v6912_v48  ;;  %v6917_v31 = vrot.slane %v6297_v34, 2  ;;  %v5820_v60 = vand.u32 2147483647, %v12997_v33  ;;  %v5860_v42 = vadd.f32 1.0, %v5780_v18  ;;  %v14077_v34 = vld [vmem:[#allocation18_spill] sm:$0xff]  ;;  %v14079_v62 = vld [vmem:[#allocation53_spill] sm:$0xff] }
 0xa19   :  { %v6916_v5 = vsel %vm440_vm6, %v6915_v20, %v6914_v3  ;;  %v6919_v1 = vrot.slane %v6307_v16, 1  ;;  %v5830_v51 = vand.u32 2147483647, %v13000_v8  ;;  %v5870_v32 = vadd.f32 1.0, %v5790_v27  ;;  %v14071_v27 = vld [vmem:[#allocation49_spill] sm:$0xff] }
 0xa1a   :  { %v6918_v49 = vsel %vm442_vm7, %v6917_v31, %v6916_v5  ;;  %v5880_v46 = vadd.f32 1.0, %v5800_v21  ;;  %v13028_v29 = vadd.f32 1.0, %v5810_v57  ;;  %7751 = vrcp.f32 %v5840_v28  ;;  %v14080_v31 = vld [vmem:[#allocation54_spill] sm:$0xff] }
 0xa1b   :  { %v6920_v40 = vsel %vm444_vm8, %v6919_v1, %v6918_v49  ;;  %7753 = vrcp.f32 %v5850_v61  ;;  %v5503_v44 = vmul.f32 %v14054_v2, %v14067_v9  ;;  %v5513_v18 = vmul.f32 %v14054_v2, %v14068_v25 }
 0xa1c   :  { %7421 = vmatmul.mubr.msk.f32.vlgmr.msra.gmra.mrb[6].mxu0 %vm346_vm1, %v6920_v40  ;;  %v13036_v63 = vadd.f32 1.0, %v5820_v60  ;;  %7755 = vrcp.f32 %v5860_v42  ;;  %v5523_v38 = vmul.f32 %v14054_v2, %v14069_v36  ;;  %v5533_v58 = vmul.f32 %v14054_v2, %v14070_v19  ;;  %v14081_v36 = vld [vmem:[#allocation79_spill] sm:$0xff] }
 0xa1d   :  { %7470 = vmatpush3.bf16.msra.mxu0 %v7469_v17  ;;  %v13045_v41 = vadd.f32 1.0, %v5830_v51  ;;  %7757 = vrcp.f32 %v5870_v32  ;;  %7434 = vmatprep.mubr.msk.f32.mxu0 %vm7882_vm12, %v13991_v54  ;;  %v5611_v12 = vmul.f32 %v14071_v27, %v5503_v44  ;;  %v5621_v0 = vmul.f32 %v14071_v27, %v5513_v18 }
 0xa1e   :  { %v6169_v14 = vmul.f32 %v14072_v24, %v6089_v15  ;;  %7759 = vrcp.f32 %v5880_v46  ;;  %v5631_v2 = vmul.f32 %v14071_v27, %v5523_v38  ;;  %v5641_v35 = vmul.f32 %v14071_v27, %v5533_v58 }
 0xa1f   :  { %7761 = vrcp.f32 %v13028_v29  ;;  %v13058_v17 = vadd.f32 %v14073_v50, %v5611_v12  ;;  %v13061_v54 = vadd.f32 %v14073_v50, %v5621_v0  ;;  %v6079_v23 = vsub.f32 2.0, %v14074_v7 }
 0xa20   :  { %7763 = vrcp.f32 %v13036_v63  ;;  %v13066_v30 = vadd.f32 %v14073_v50, %v5631_v2  ;;  %v13069_v15 = vadd.f32 %v14073_v50, %v5641_v35  ;;  %v6179_v21 = vmul.f32 %v14075_v26, %v6099_v10 }
 0xa21   :  { %7765 = vrcp.f32 %v13045_v41  ;;  %v5799_v56 = vand.u32 2147483647, %v13058_v17  ;;  %v5809_v53 = vand.u32 2147483647, %v13061_v54  ;;  %v6249_v52 = vmul.f32 %v6169_v14, %v14076_v59 }
 0xa22   :  { %v5819_v11 = vand.u32 2147483647, %v13066_v30  ;;  %v5829_v55 = vand.u32 2147483647, %v13069_v15  ;;  %v6029_v6 = vmul.f32 %v14078_v43, %v14077_v34  ;;  %v6159_v16 = vmul.f32 %v14079_v62, %v6079_v23 }
 0xa23   :  { %v13080_v4 = vadd.f32 1.0, %v5799_v56  ;;  %v13082_v57 = vadd.f32 1.0, %v5809_v53  ;;  %v13092_v60 = vmul.f32 %v6179_v21, %v14080_v31  ;;  %v7103_v51 = vrot.slane %v6249_v52, 7 }
 0xa24   :  { %v7752_v10 = vpop.eup %7751  ;;  %v13087_v48 = vadd.f32 1.0, %v5819_v11  ;;  %v13089_v20 = vadd.f32 1.0, %v5829_v55  ;;  %v6109_v25 = vsub.f32 2.0, %v6029_v6  ;;  %v6239_v38 = vmul.f32 %v6159_v16, %v14081_v36  ;;  %v14082_v16 = vld [vmem:[#allocation105_spill] sm:$0xff] }
 0xa25   :  { %v7754_v3 = vpop.eup %7753  ;;  %v6000_v5 = vmul.f32 %v7752_v10, %v5840_v28  ;;  %7767 = vrcp.f32 %v13080_v4 }
 0xa26   :  { %v7756_v1 = vpop.eup %7755  ;;  %v6010_v49 = vmul.f32 %v7754_v3, %v5850_v61  ;;  %7769 = vrcp.f32 %v13082_v57  ;;  %v7105_v61 = vrot.slane %v13092_v60, 6  ;;  %v7104_v35 = vsel %vm432_vm2, %v7103_v51, %v6239_v38 }
 0xa27   :  { %v7758_v40 = vpop.eup %7757  ;;  %v6020_v9 = vmul.f32 %v7756_v1, %v5860_v42  ;;  %v6080_v44 = vsub.f32 2.0, %v6000_v5  ;;  %7771 = vrcp.f32 %v13087_v48  ;;  %v6189_v26 = vmul.f32 %v14078_v43, %v6109_v25 }
 0xa28   :  { %v7760_v18 = vpop.eup %7759  ;;  %v6030_v19 = vmul.f32 %v7758_v40, %v5870_v32  ;;  %v6090_v58 = vsub.f32 2.0, %v6010_v49  ;;  %7773 = vrcp.f32 %v13089_v20 }
 0xa29   :  { %v7762_v28 = vpop.eup %7761  ;;  %v6040_v27 = vmul.f32 %v7760_v18, %v5880_v46  ;;  %v6100_v12 = vsub.f32 2.0, %v6020_v9  ;;  %v6160_v0 = vmul.f32 %v7752_v10, %v6080_v44 }
 0xa2a   :  { %v7764_v24 = vpop.eup %7763  ;;  %v6050_v42 = vmul.f32 %v7762_v28, %v13028_v29  ;;  %v6110_v14 = vsub.f32 2.0, %v6030_v19  ;;  %v6170_v2 = vmul.f32 %v7754_v3, %v6090_v58  ;;  %v6269_v3 = vmul.f32 %v6189_v26, %v14082_v16 }
 0xa2b   :  { %v7766_v50 = vpop.eup %7765  ;;  %v6060_v7 = vmul.f32 %v7764_v24, %v13036_v63  ;;  %v6120_v32 = vsub.f32 2.0, %v6040_v27  ;;  %v6180_v23 = vmul.f32 %v7756_v1, %v6100_v12  ;;  %v6240_v29 = vmul.f32 %v6160_v0, %v12974_v45 }
 0xa2c   :  { %v6070_v46 = vmul.f32 %v7766_v50, %v13045_v41  ;;  %v6130_v21 = vsub.f32 2.0, %v6050_v42  ;;  %v6190_v56 = vmul.f32 %v7758_v40, %v6110_v14  ;;  %v6250_v53 = vmul.f32 %v6170_v2, %v12979_v39 }
 0xa2d   :  { %v6140_v59 = vsub.f32 2.0, %v6060_v7  ;;  %v6200_v52 = vmul.f32 %v7760_v18, %v6120_v32  ;;  %v6260_v11 = vmul.f32 %v6180_v23, %v12983_v37 }
 0xa2e   :  { %v6150_v55 = vsub.f32 2.0, %v6070_v46  ;;  %v6210_v34 = vmul.f32 %v7762_v28, %v6130_v21  ;;  %v6270_v63 = vmul.f32 %v6190_v56, %v12986_v22  ;;  %v7201_v6 = vrot.slane %v6250_v53, 7 }
 0xa2f   :  { %v7768_v10 = vpop.eup %7767  ;;  %v6220_v62 = vmul.f32 %v7764_v24, %v6140_v59  ;;  %v6280_v43 = vmul.f32 %v6200_v52, %v12989_v13  ;;  %v7203_v41 = vrot.slane %v6260_v11, 6  ;;  %v7106_v24 = vsel %vm434_vm3, %v7105_v61, %v7104_v35 }
 0xa30   :  { %v7770_v31 = vpop.eup %7769  ;;  %v6230_v39 = vmul.f32 %v7766_v50, %v6150_v55  ;;  %v6290_v60 = vmul.f32 %v6210_v34, %v12993_v47  ;;  %v7202_v45 = vsel %vm432_vm2, %v7201_v6, %v6240_v29  ;;  %v7205_v5 = vrot.slane %v6270_v63, 5 }
 0xa31   :  { %v7772_v37 = vpop.eup %7771  ;;  %v6300_v1 = vmul.f32 %v6220_v62, %v12997_v33  ;;  %v7204_v22 = vsel %vm434_vm3, %v7203_v41, %v7202_v45  ;;  %v7207_v51 = vrot.slane %v6280_v43, 4  ;;  %v6039_v49 = vmul.f32 %v7768_v10, %v13080_v4 }
 0xa32   :  { %v7774_v40 = vpop.eup %7773  ;;  %v6310_v13 = vmul.f32 %v6230_v39, %v13000_v8  ;;  %v7206_v9 = vsel %vm436_vm4, %v7205_v5, %v7204_v22  ;;  %v7209_v44 = vrot.slane %v6290_v60, 3  ;;  %v6049_v25 = vmul.f32 %v7770_v31, %v13082_v57 }
 0xa33   :  { %v7208_v47 = vsel %vm438_vm5, %v7207_v51, %v7206_v9  ;;  %v7211_v18 = vrot.slane %v6300_v1, 2  ;;  %v6059_v36 = vmul.f32 %v7772_v37, %v13087_v48  ;;  %v6069_v33 = vmul.f32 %v7774_v40, %v13089_v20 }
 0xa34   :  { %v7210_v38 = vsel %vm440_vm6, %v7209_v44, %v7208_v47  ;;  %v7213_v19 = vrot.slane %v6310_v13, 1  ;;  %v6119_v58 = vsub.f32 2.0, %v6039_v49  ;;  %v6129_v4 = vsub.f32 2.0, %v6049_v25 }
 0xa35   :  { %v7212_v28 = vsel %vm442_vm7, %v7211_v18, %v7210_v38  ;;  %v6139_v8 = vsub.f32 2.0, %v6059_v36  ;;  %v6149_v27 = vsub.f32 2.0, %v6069_v33  ;;  %v7107_v20 = vrot.slane %v6269_v3, 5 }
 0xa36   :  { %v7214_v12 = vsel %vm444_vm8, %v7213_v19, %v7212_v28  ;;  %v6199_v0 = vmul.f32 %v7768_v10, %v6119_v58  ;;  %v6209_v57 = vmul.f32 %v7770_v31, %v6129_v4 }
 0xa37   :  { %7442 = vmatmul.mubr.msk.f32.vlgmr.msra.gmra.mrb[8].mxu1 %vm346_vm1, %v7214_v12  ;;  %v6219_v48 = vmul.f32 %v7772_v37, %v6139_v8  ;;  %v6229_v42 = vmul.f32 %v7774_v40, %v6149_v27  ;;  %v7108_v32 = vsel %vm436_vm4, %v7107_v20, %v7106_v24  ;;  %v7343_v40 = vld [vmem:[%s13165_s13] ss:$0 sm:$0xff] }
 0xa38   :  { %v6279_v14 = vmul.f32 %v6199_v0, %v13058_v17  ;;  %v6289_v2 = vmul.f32 %v6209_v57, %v13061_v54 }
 0xa39   :  { %v6299_v50 = vmul.f32 %v6219_v48, %v13066_v30  ;;  %v6309_v7 = vmul.f32 %v6229_v42, %v13069_v15 }
 0xa3a   :  { %v7109_v23 = vrot.slane %v6279_v14, 4  ;;  %v7111_v26 = vrot.slane %v6289_v2, 3 }
 0xa3b   :  { %v7113_v61 = vrot.slane %v6299_v50, 2  ;;  %v7115_v21 = vrot.slane %v6309_v7, 1 }
 0xa3c   :  { %v7110_v46 = vsel %vm438_vm5, %v7109_v23, %v7108_v32 }
 0xa3d   :  { %v7112_v35 = vsel %vm440_vm6, %v7111_v26, %v7110_v46 }
 0xa3e   :  { %v7114_v56 = vsel %vm442_vm7, %v7113_v61, %v7112_v35 }
 0xa3f   :  { %v7116_v17 = vsel %vm444_vm8, %v7115_v21, %v7114_v56 }
 0xa40   :  { %7435 = vmatmul.mubr.msk.f32.vlgmr.msra.gmra.mrb[8].mxu0 %vm346_vm1, %v7116_v17 }
 0xa49   :  { %v6500_v54 = vpop.f32.mrb[0].mxu1 }
 0xa4a   :  { %v7387_v30 = vpop.f32.mrb[1].mxu1 }
 0xa5e   :  { %v6406_v53 = vpop.f32.mrb[0].mxu0 }
 0xa5f   :  { %v6501_v15 = vadd.f32 %v6500_v54, %v6406_v53  ;;  %v7380_v59 = vpop.f32.mrb[1].mxu0 }
 0xa7a   :  { %v6695_v52 = vpop.f32.mrb[2].mxu1 }
 0xa7b   :  { %v7401_v29 = vpop.f32.mrb[3].mxu1 }
 0xa8c   :  { %v6597_v11 = vpop.f32.mrb[2].mxu0 }
 0xa8d   :  { %v6601_v55 = vadd.f32 %v6597_v11, %v6501_v15  ;;  %v7394_v34 = vpop.f32.mrb[3].mxu0 }
 0xa8f   :  { %v6699_v63 = vadd.f32 %v6695_v52, %v6601_v55 }
 0xaab   :  { %v6891_v6 = vpop.f32.mrb[4].mxu1 }
 0xaac   :  { %v7415_v10 = vpop.f32.mrb[5].mxu1 }
 0xabc   :  { %v6793_v62 = vpop.f32.mrb[4].mxu0 }
 0xabd   :  { %v6797_v43 = vadd.f32 %v6793_v62, %v6699_v63  ;;  %v7408_v41 = vpop.f32.mrb[5].mxu0 }
 0xabf   :  { %v6895_v16 = vadd.f32 %v6891_v6, %v6797_v43 }
 0xada   :  { %v7087_v3 = vpop.f32.mrb[6].mxu1 }
 0xadb   :  { %v7429_v31 = vpop.f32.mrb[7].mxu1 }
 0xaef   :  { %v6989_v39 = vpop.f32.mrb[6].mxu0 }
 0xaf0   :  { %v6993_v60 = vadd.f32 %v6989_v39, %v6895_v16  ;;  %v7422_v45 = vpop.f32.mrb[7].mxu0 }
 0xaf2   :  { %v7091_v5 = vadd.f32 %v7087_v3, %v6993_v60 }
 0xb0a   :  { %v7283_v37 = vpop.f32.mrb[8].mxu1 }
 0xb0b   :  { %v7443_v1 = vpop.f32.mrb[9].mxu1 }
 0xb13   :  { %v7185_v22 = vpop.f32.mrb[8].mxu0 }
 0xb14   :  { %v7189_v51 = vadd.f32 %v7185_v22, %v7091_v5  ;;  %v7436_v49 = vpop.f32.mrb[9].mxu0 }
 0xb16   :  { %v7287_v13 = vadd.f32 %v7283_v37, %v7189_v51 }
 0xb18   :  { %v7295_v9 = vadd.f32 %v7343_v40, %v7287_v13 }
 0xb1a   :  { %7296 = vst [vmem:[#allocation8] sm:$0xff] %v7295_v9 }
 0xb1b   :  { %7853 = shalt.err (!%p7850_p0)
}
 0xb1c   :  { %s7854_s28 = scalar_lea.hbm %s13166_s14, 128 }
 0xb1d   :  { %p7855_p1 = scmp.ne.s32.totalorder %s13166_s14, %s7854_s28  ;;  %p7858_p2 = scmp.lt.u32.totalorder %s7854_s28, %s13166_s14 }
 0xb1f   :  { %p7860_p3 = pnand %p7858_p2, %p7855_p1 }
 0xb21   :  { %7863 = shalt.err (!%p7860_p3)
}
 0xb22   :  { %7306 = dma.vmem_to_hbm [thread:$0]  %s7304_s19, 128, %s13166_s14, [#allocation4]  }
 0xb23   :  { %7868 = dma.done.wait [#allocation4], 128  }
 0xb24   :  { %7869 = vsyncadd [#allocation4], 4294967168 }
 0xb25   :  { %7310 = vsyncpa [#allocation3], 1 }
 0xb26   :  { %7311 = vsyncpa [#allocation6], 1 }
 0xb27   :  { %7312 = vsyncpa [#allocation4], 1 }

</bundles_post_ra>
